<compile_context>
chip_gen: v5e
topology: v5e:2x2
jax: 0.10.0
libtpu: 0.0.40
codegen_flags: <defaults>
</compile_context>

<pallas_src>
import functools

import jax
import jax.numpy as jnp
from jax.experimental import pallas as pl
from jax.experimental.pallas import tpu as pltpu

# --------------------------- config (stand-ins for cfg.*) -------------------
POOLING_SIZE = 7          # cfg.POOLING_SIZE
FEAT_STRIDE = 16          # cfg.FEAT_STRIDE
NUM_CLASSES = 21
NUM_ANCHORS = 9           # 3 scales x 3 ratios
NUM_ROIS = 8              # proposals kept after the (simplified) proposal layer

_LANE = 128
_SUBLANE = 8
_VMEM_LIMIT = 32 * 1024 * 1024   # safe on v5e/v6e (128 MiB) and v7x (64 MiB)


def _round_up(x, m):
    return (x + m - 1) // m * m


# =============================== Pallas kernels ==============================

def _matmul_bias_kernel(x_ref, w_ref, b_ref, o_ref, acc_ref, *, relu):
    """Tiled matmul with K-reduction grid axis; bias+ReLU epilogue at finalize."""
    @pl.when(pl.program_id(2) == 0)
    def _():
        acc_ref[...] = jnp.zeros_like(acc_ref)

    acc_ref[...] += jnp.dot(x_ref[...], w_ref[...],
                            preferred_element_type=jnp.float32)

    @pl.when(pl.program_id(2) == pl.num_programs(2) - 1)
    def _():
        acc = acc_ref[...] + b_ref[...]
        if relu:
            acc = jnp.maximum(acc, 0.0)
        o_ref[...] = acc.astype(o_ref.dtype)


def matmul_bias(x, w, bias, relu=False):
    """o = maybe_relu(x @ w + bias); x:[M,K], w:[K,N], bias:[N].
    bf16 MXU inputs, f32 accumulator, lane-dense (128-padded) output blocks."""
    M, K = x.shape
    K2, N = w.shape
    assert K == K2
    tm = min(512, _round_up(M, _SUBLANE))
    tn = min(256, _round_up(N, _LANE))
    kp128 = _round_up(K, _LANE)
    tk = kp128 if kp128 <= 1024 else 512
    Mp, Kp, Np = _round_up(M, tm), _round_up(K, tk), _round_up(N, tn)

    xp = jnp.pad(x, ((0, Mp - M), (0, Kp - K))).astype(jnp.bfloat16)
    wp = jnp.pad(w, ((0, Kp - K), (0, Np - N))).astype(jnp.bfloat16)
    bp = jnp.pad(bias.reshape(1, N).astype(jnp.float32), ((0, 0), (0, Np - N)))

    out = pl.pallas_call(
        functools.partial(_matmul_bias_kernel, relu=relu),
        out_shape=jax.ShapeDtypeStruct((Mp, Np), jnp.float32),
        grid=(Mp // tm, Np // tn, Kp // tk),
        in_specs=[
            pl.BlockSpec((tm, tk), lambda i, j, k: (i, k)),
            pl.BlockSpec((tk, tn), lambda i, j, k: (k, j)),
            pl.BlockSpec((1, tn), lambda i, j, k: (0, j)),
        ],
        out_specs=pl.BlockSpec((tm, tn), lambda i, j, k: (i, j)),
        scratch_shapes=[pltpu.VMEM((tm, tn), jnp.float32)],
        compiler_params=pltpu.CompilerParams(
            dimension_semantics=("parallel", "parallel", "arbitrary"),
            vmem_limit_bytes=_VMEM_LIMIT),
    )(xp, wp, bp)
    return out[:M, :N]


def _maxpool_kernel(x_ref, o_ref, *, k):
    """Running max over k*k shifted windows of the padded input tile."""
    ho, wo = o_ref.shape[0], o_ref.shape[1]
    out = x_ref[0:ho, 0:wo, :]
    for dy in range(k):
        for dx in range(k):
            if dy == 0 and dx == 0:
                continue
            out = jnp.maximum(out, x_ref[dy:dy + ho, dx:dx + wo, :])
    o_ref[...] = out


def maxpool(x, k=3, stride=2, pad=1):
    """k x k / stride max pool; dense window max in one Pallas kernel, then a
    cheap strided subsample in glue (no [.., k*k, C] stack in HBM)."""
    N, H, W, C = x.shape
    Ho = (H + 2 * pad - k) // stride + 1
    Wo = (W + 2 * pad - k) // stride + 1
    xp = jnp.pad(x.astype(jnp.float32), ((0, 0), (pad, pad), (pad, pad), (0, 0)),
                 constant_values=-jnp.inf)
    Hp, Wp = H + 2 * pad, W + 2 * pad
    Hof, Wof = Hp - k + 1, Wp - k + 1
    out = pl.pallas_call(
        functools.partial(_maxpool_kernel, k=k),
        out_shape=jax.ShapeDtypeStruct((N, Hof, Wof, C), jnp.float32),
        grid=(N,),
        in_specs=[pl.BlockSpec((None, Hp, Wp, C), lambda n: (n, 0, 0, 0))],
        out_specs=pl.BlockSpec((None, Hof, Wof, C), lambda n: (n, 0, 0, 0)),
        compiler_params=pltpu.CompilerParams(
            dimension_semantics=("arbitrary",),
            vmem_limit_bytes=_VMEM_LIMIT),
    )(xp)
    return out[:, ::stride, ::stride, :][:, :Ho, :Wo, :]


def _roi_max_kernel(mask_ref, feat_ref, o_ref):
    """Per-bin masked max over the Hf*Wf feature positions (f32, -inf sentinel)."""
    m = mask_ref[...]                                     # [tb, HW]
    f = feat_ref[...]                                     # [HW, Cp]
    masked = jnp.where(m[:, :, None] > 0.5, f[None, :, :], -jnp.inf)
    o_ref[...] = jnp.max(masked, axis=1)


def _layer4_mean_kernel(x_ref, w_ref, b_ref, o_ref, acc_ref, *, inv_t):
    """Fused relu(1x1-conv + bias) + spatial mean; spatial axis is the grid reduction."""
    t = pl.program_id(2)

    @pl.when(t == 0)
    def _():
        acc_ref[...] = jnp.zeros_like(acc_ref)

    h = jnp.dot(x_ref[...], w_ref[...], preferred_element_type=jnp.float32) + b_ref[...]
    acc_ref[...] += jnp.maximum(h, 0.0)

    @pl.when(t == pl.num_programs(2) - 1)
    def _():
        o_ref[...] = (acc_ref[...] * inv_t).astype(o_ref.dtype)


def _softmax_kernel(x_ref, o_ref):
    x = x_ref[...]
    m = jnp.max(x, axis=-1, keepdims=True)
    e = jnp.exp(x - m)
    o_ref[...] = e / jnp.sum(e, axis=-1, keepdims=True)


def softmax2d(x):
    """Row-wise softmax over the last dim of a small 2-D array (final 21-class head)."""
    M, N = x.shape
    return pl.pallas_call(
        _softmax_kernel,
        out_shape=jax.ShapeDtypeStruct((M, N), jnp.float32),
        grid=(1,),
        in_specs=[pl.BlockSpec((M, N), lambda i: (0, 0))],
        out_specs=pl.BlockSpec((M, N), lambda i: (0, 0)),
        compiler_params=pltpu.CompilerParams(dimension_semantics=("arbitrary",)),
    )(x.astype(jnp.float32))


# ================================ JAX glue ===================================

def im2col(x, k, stride, pad):
    """x:[N,H,W,C] NHWC -> patches [N*Ho*Wo, k*k*C] (plain-JAX gather glue)."""
    # TODO(synk): fuse the k*k patch accumulation into the conv matmul pipeline to
    # avoid materializing im2col patches in HBM at production image sizes.
    N, H, W, C = x.shape
    Ho = (H + 2 * pad - k) // stride + 1
    Wo = (W + 2 * pad - k) // stride + 1
    xp = jnp.pad(x, ((0, 0), (pad, pad), (pad, pad), (0, 0)))
    cols = []
    for dy in range(k):
        for dx in range(k):
            cols.append(xp[:, dy:dy + (Ho - 1) * stride + 1:stride,
                            dx:dx + (Wo - 1) * stride + 1:stride, :])
    patches = jnp.concatenate(cols, axis=-1)
    return patches.reshape(N * Ho * Wo, k * k * C), Ho, Wo


def conv_bias_relu(x, w_flat, bias, k, stride, pad, relu=True):
    """Conv (im2col in bf16 + tiled Pallas matmul). BN scale is pre-folded into w_flat."""
    N = x.shape[0]
    patches, Ho, Wo = im2col(x.astype(jnp.bfloat16), k, stride, pad)
    out = matmul_bias(patches, w_flat, bias, relu=relu)
    return out.reshape(N, Ho, Wo, -1)


def fold_bn(gamma, beta, mean, var, eps=1e-5):
    """Eval-mode BN folding: y = x*scale + shift with scale=gamma/sqrt(var+eps),
    shift = beta - mean*scale. scale is folded into the conv weights offline."""
    scale = gamma / jnp.sqrt(var + eps)
    shift = beta - mean * scale
    return scale, shift


def generate_base_anchors(base_size=16, ratios=(0.5, 1.0, 2.0), scales=(8.0, 16.0, 32.0)):
    base = jnp.array([0.0, 0.0, base_size - 1.0, base_size - 1.0], jnp.float32)
    w = base[2] - base[0] + 1.0
    h = base[3] - base[1] + 1.0
    x_ctr = base[0] + 0.5 * (w - 1.0)
    y_ctr = base[1] + 0.5 * (h - 1.0)
    ratios = jnp.array(ratios, jnp.float32)
    scales = jnp.array(scales, jnp.float32)
    size = w * h
    ws = jnp.round(jnp.sqrt(size / ratios))
    hs = jnp.round(ws * ratios)
    ws = (ws[:, None] * scales[None, :]).reshape(-1)
    hs = (hs[:, None] * scales[None, :]).reshape(-1)
    return jnp.stack([x_ctr - 0.5 * (ws - 1.0), y_ctr - 0.5 * (hs - 1.0),
                      x_ctr + 0.5 * (ws - 1.0), y_ctr + 0.5 * (hs - 1.0)], axis=1)


def make_all_anchors(Hf, Wf):
    base = generate_base_anchors()                           # [A,4]
    shift_x = jnp.arange(Wf, dtype=jnp.float32) * FEAT_STRIDE
    shift_y = jnp.arange(Hf, dtype=jnp.float32) * FEAT_STRIDE
    sx, sy = jnp.meshgrid(shift_x, shift_y)                  # [Hf,Wf]
    shifts = jnp.stack([sx.ravel(), sy.ravel(), sx.ravel(), sy.ravel()], axis=1)
    return (shifts[:, None, :] + base[None, :, :]).reshape(-1, 4)  # [Hf*Wf*A,4]


def bbox_transform_inv(boxes, deltas):
    w = boxes[:, 2] - boxes[:, 0] + 1.0
    h = boxes[:, 3] - boxes[:, 1] + 1.0
    cx = boxes[:, 0] + 0.5 * w
    cy = boxes[:, 1] + 0.5 * h
    dx, dy, dw, dh = deltas[:, 0], deltas[:, 1], deltas[:, 2], deltas[:, 3]
    pcx = dx * w + cx
    pcy = dy * h + cy
    pw = jnp.exp(dw) * w
    ph = jnp.exp(dh) * h
    return jnp.stack([pcx - 0.5 * pw, pcy - 0.5 * ph,
                      pcx + 0.5 * pw, pcy + 0.5 * ph], axis=1)


def clip_boxes(boxes, im_info_row):
    H, W = im_info_row[0], im_info_row[1]
    return jnp.stack([jnp.clip(boxes[:, 0], 0.0, W - 1.0),
                      jnp.clip(boxes[:, 1], 0.0, H - 1.0),
                      jnp.clip(boxes[:, 2], 0.0, W - 1.0),
                      jnp.clip(boxes[:, 3], 0.0, H - 1.0)], axis=1)


def roi_pool(features, rois, ph_n, pw_n, spatial_scale):
    """Classic RoIPool (max). Bin rectangles built in glue; the masked max runs in a
    Pallas kernel tiled over bins on mask[bins,HW] x feat[HW,C] (no C-amplified HBM tensor)."""
    # TODO(synk): for production feature sizes, tile the Hf*Wf reduction (running-max
    # scratch) or gather per-bin rectangles via scalar-prefetched DMA.
    feat = features[0].astype(jnp.float32)                   # [Hf,Wf,C] -inf path stays f32
    Hf, Wf, C = feat.shape
    R = rois.shape[0]
    rsx = jnp.round(rois[:, 1] * spatial_scale)
    rsy = jnp.round(rois[:, 2] * spatial_scale)
    rex = jnp.round(rois[:, 3] * spatial_scale)
    rey = jnp.round(rois[:, 4] * spatial_scale)
    rw = jnp.maximum(rex - rsx + 1.0, 1.0)
    rh = jnp.maximum(rey - rsy + 1.0, 1.0)
    bw = rw / pw_n
    bh = rh / ph_n
    ph = jnp.arange(ph_n, dtype=jnp.float32)
    pw = jnp.arange(pw_n, dtype=jnp.float32)
    hstart = jnp.clip(jnp.floor(ph[None, :] * bh[:, None]) + rsy[:, None], 0, Hf)
    hend = jnp.clip(jnp.ceil((ph[None, :] + 1.0) * bh[:, None]) + rsy[:, None], 0, Hf)
    wstart = jnp.clip(jnp.floor(pw[None, :] * bw[:, None]) + rsx[:, None], 0, Wf)
    wend = jnp.clip(jnp.ceil((pw[None, :] + 1.0) * bw[:, None]) + rsx[:, None], 0, Wf)
    hcoord = jnp.arange(Hf, dtype=jnp.float32)
    wcoord = jnp.arange(Wf, dtype=jnp.float32)
    hmask = (hcoord[None, None, :] >= hstart[:, :, None]) & (hcoord[None, None, :] < hend[:, :, None])
    wmask = (wcoord[None, None, :] >= wstart[:, :, None]) & (wcoord[None, None, :] < wend[:, :, None])
    mask = hmask[:, :, None, :, None] & wmask[:, None, :, None, :]         # [R,ph,pw,Hf,Wf]

    nbins = R * ph_n * pw_n
    HW = Hf * Wf
    mask2d = mask.reshape(nbins, HW).astype(jnp.float32)
    Cp = _round_up(C, _LANE)
    feat2d = jnp.pad(feat.reshape(HW, C), ((0, 0), (0, Cp - C)))
    tb = min(64, _round_up(nbins, _SUBLANE))
    Bp = _round_up(nbins, tb)
    mask2d = jnp.pad(mask2d, ((0, Bp - nbins), (0, 0)))

    pooled = pl.pallas_call(
        _roi_max_kernel,
        out_shape=jax.ShapeDtypeStruct((Bp, Cp), jnp.float32),
        grid=(Bp // tb,),
        in_specs=[pl.BlockSpec((tb, HW), lambda i: (i, 0)),
                  pl.BlockSpec((HW, Cp), lambda i: (0, 0))],
        out_specs=pl.BlockSpec((tb, Cp), lambda i: (i, 0)),
        compiler_params=pltpu.CompilerParams(
            dimension_semantics=("parallel",),
            vmem_limit_bytes=_VMEM_LIMIT),
    )(mask2d, feat2d)

    pooled = pooled[:nbins, :C]
    empty = (hend[:, :, None] <= hstart[:, :, None]) | (wend[:, None, :] <= wstart[:, None, :])
    pooled = jnp.where(empty.reshape(-1, 1), 0.0, pooled)
    return pooled.reshape(R, ph_n, pw_n, C)


def classifier_head_pool(pooled, w, bias):
    """Fused layer4 stand-in (1x1 conv -> ReLU) + out.mean(3).mean(2).
    Spatial bins (PH*PW) form the grid reduction axis; running sum in VMEM scratch."""
    R, PH, PW, C = pooled.shape
    D = w.shape[1]
    T = PH * PW
    tr = min(256, _round_up(R, _SUBLANE))
    Rp = _round_up(R, tr)
    Kp = _round_up(C, _LANE)
    tn = min(256, _round_up(D, _LANE))
    Dp = _round_up(D, tn)

    x3 = jnp.transpose(pooled.reshape(R, T, C), (1, 0, 2))                  # [T,R,C]
    x3 = jnp.pad(x3, ((0, 0), (0, Rp - R), (0, Kp - C))).astype(jnp.bfloat16)
    wp = jnp.pad(w, ((0, Kp - C), (0, Dp - D))).astype(jnp.bfloat16)
    bp = jnp.pad(bias.reshape(1, D).astype(jnp.float32), ((0, 0), (0, Dp - D)))

    out = pl.pallas_call(
        functools.partial(_layer4_mean_kernel, inv_t=1.0 / T),
        out_shape=jax.ShapeDtypeStruct((Rp, Dp), jnp.float32),
        grid=(Rp // tr, Dp // tn, T),
        in_specs=[
            pl.BlockSpec((None, tr, Kp), lambda i, j, t: (t, i, 0)),
            pl.BlockSpec((Kp, tn), lambda i, j, t: (0, j)),
            pl.BlockSpec((1, tn), lambda i, j, t: (0, j)),
        ],
        out_specs=pl.BlockSpec((tr, tn), lambda i, j, t: (i, j)),
        scratch_shapes=[pltpu.VMEM((tr, tn), jnp.float32)],
        compiler_params=pltpu.CompilerParams(
            dimension_semantics=("parallel", "parallel", "arbitrary"),
            vmem_limit_bytes=_VMEM_LIMIT),
    )(x3, wp, bp)
    return out[:R, :D]


# ============================ model (forward pass) ===========================

def init_params(key):
    ks = jax.random.split(key, 12)
    nrm = lambda k, shape, std: jax.random.normal(k, shape, jnp.float32) * std
    zeros = lambda c: jnp.zeros((c,), jnp.float32)

    def conv_with_folded_bn(k, shape, std):
        c_out = shape[1]
        w = nrm(k, shape, std)
        # frozen-BN stand-in: gamma=1, beta=0, running_mean=0, running_var=1
        scale, shift = fold_bn(jnp.ones((c_out,), jnp.float32), zeros(c_out),
                               zeros(c_out), jnp.ones((c_out,), jnp.float32))
        return w * scale[None, :], shift

    p = {}
    # backbone (stride-16 stand-in for resnet conv1..layer3; weights flattened [k*k*Cin, Cout])
    p['conv1_w'], p['conv1_b'] = conv_with_folded_bn(ks[0], (7 * 7 * 3, 16), 0.05)
    p['l1_w'], p['l1_b'] = conv_with_folded_bn(ks[1], (3 * 3 * 16, 32), 0.05)
    p['l2_w'], p['l2_b'] = conv_with_folded_bn(ks[2], (3 * 3 * 32, 64), 0.05)
    p['l3_w'], p['l3_b'] = conv_with_folded_bn(ks[3], (3 * 3 * 64, 64), 0.05)
    # RPN (normal_init std=0.01, bias 0); cls+reg merged into one weight (64 -> 18+36)
    p['rpn_conv_w'], p['rpn_conv_b'] = nrm(ks[4], (3 * 3 * 64, 64), 0.01), zeros(64)
    rpn_cls_w = nrm(ks[5], (64, 2 * NUM_ANCHORS), 0.01)
    rpn_reg_w = nrm(ks[6], (64, 4 * NUM_ANCHORS), 0.01)
    p['rpn_head_w'] = jnp.concatenate([rpn_cls_w, rpn_reg_w], axis=1)
    p['rpn_head_b'] = zeros(6 * NUM_ANCHORS)
    # classifier (resnet layer4 stand-in: 1x1 conv C_feat -> 2048)
    p['layer4_w'], p['layer4_b'] = nrm(ks[7], (64, 2048), 0.05), zeros(2048)
    # heads: Linear(2048, 21) std 0.01 and Linear(2048, 84) std 0.001, merged (2048 -> 105)
    cls_w = nrm(ks[8], (2048, NUM_CLASSES), 0.01)
    reg_w = nrm(ks[9], (2048, NUM_CLASSES * 4), 0.001)
    p['head_w'] = jnp.concatenate([cls_w, reg_w], axis=1)
    p['head_b'] = zeros(NUM_CLASSES * 5)
    return p


def rpn_forward(params, features, gt_boxes, im_info):
    N, Hf, Wf, C = features.shape
    A = NUM_ANCHORS
    rpn_feat = conv_bias_relu(features, params['rpn_conv_w'], params['rpn_conv_b'],
                              k=3, stride=1, pad=1, relu=True)
    flat = rpn_feat.reshape(N * Hf * Wf, rpn_feat.shape[-1])
    heads = matmul_bias(flat, params['rpn_head_w'], params['rpn_head_b'])   # [HW, 54]
    cls = heads[:, :2 * A]
    reg = heads[:, 2 * A:6 * A]
    # PyTorch reshapes rpn_cls to (N,2,A*H,W): channel layout is all-bg then all-fg.
    # fg softmax probability over (bg, fg) == sigmoid(fg - bg) — fused, no 2-wide softmax.
    bg, fg = cls[:, :A], cls[:, A:]
    fg_prob = jax.nn.sigmoid(fg - bg).reshape(-1)            # (h, w, a) order
    deltas = reg.reshape(-1, 4)                              # channels are (a, 4)
    anchors = make_all_anchors(Hf, Wf)
    proposals = clip_boxes(bbox_transform_inv(anchors, deltas), im_info[0])
    # TODO(synk): NMS in the proposal layer has no clean static Pallas form; keep top-K by fg score.
    _, top_idx = jax.lax.top_k(fg_prob, NUM_ROIS)
    rois = jnp.concatenate([jnp.zeros((NUM_ROIS, 1), jnp.float32), proposals[top_idx]], axis=1)
    return rois, jnp.float32(0.0), jnp.float32(0.0)          # eval-mode losses


def faster_rcnn_forward(params, im_data, gt_boxes, im_info):
    """Eval-mode forward of FasterRCNN. im_data is NCHW (PyTorch convention)."""
    x = jnp.transpose(im_data, (0, 2, 3, 1)).astype(jnp.float32)   # -> NHWC
    # backbone: conv1+bn1+relu, maxpool, layer1, layer2, layer3  (overall stride 16)
    x = conv_bias_relu(x, params['conv1_w'], params['conv1_b'], 7, 2, 3)
    x = maxpool(x, 3, 2, 1)
    x = conv_bias_relu(x, params['l1_w'], params['l1_b'], 3, 1, 1)
    x = conv_bias_relu(x, params['l2_w'], params['l2_b'], 3, 2, 1)
    features = conv_bias_relu(x, params['l3_w'], params['l3_b'], 3, 2, 1)

    rois, rpn_cls_loss, rpn_reg_loss = rpn_forward(params, features, gt_boxes, im_info)
    # TODO(synk): training-only proposal_target / cross_entropy / smooth_L1 not implemented (eval path).

    pooled = roi_pool(features, rois, POOLING_SIZE, POOLING_SIZE, 1.0 / FEAT_STRIDE)  # [R,7,7,C]

    # classifier (layer4 stand-in) + ReLU + spatial mean, fused
    out = classifier_head_pool(pooled, params['layer4_w'], params['layer4_b'])        # [R,2048]

    # merged cls+reg heads in one lane-dense matmul
    heads = matmul_bias(out, params['head_w'], params['head_b'])                      # [R,105]
    cls_score = heads[:, :NUM_CLASSES]
    reg = heads[:, NUM_CLASSES:]
    cls_prob = softmax2d(cls_score)

    faster_rcnn_cls_loss = jnp.float32(0.0)
    faster_rcnn_reg_loss = jnp.float32(0.0)
    train_info = {}
    return (rois, cls_prob, reg, faster_rcnn_cls_loss, faster_rcnn_reg_loss,
            rpn_cls_loss, rpn_reg_loss, train_info)


# =================================== main ====================================

if __name__ == "__main__":
    key = jax.random.PRNGKey(0)
    pkey, dkey = jax.random.split(key)
    params = init_params(pkey)

    im_data = jax.random.normal(dkey, (1, 3, 64, 64), jnp.float32)   # NCHW
    gt_boxes = jnp.array([[[5.0, 5.0, 30.0, 40.0, 1.0],
                           [10.0, 12.0, 50.0, 60.0, 2.0],
                           [0.0, 0.0, 20.0, 20.0, 3.0],
                           [15.0, 8.0, 48.0, 32.0, 4.0]]], jnp.float32)
    im_info = jnp.array([[64.0, 64.0, 1.0]], jnp.float32)

    fwd = jax.jit(faster_rcnn_forward)
    outs = fwd(params, im_data, gt_boxes, im_info)
    rois, cls_prob, reg = outs[0], outs[1], outs[2]
    jax.block_until_ready(rois)
    jax.block_until_ready(cls_prob)
    jax.block_until_ready(reg)
    assert rois.shape == (NUM_ROIS, 5)
    assert cls_prob.shape == (NUM_ROIS, NUM_CLASSES)
    assert reg.shape == (NUM_ROIS, NUM_CLASSES * 4)
    print("KERNEL_OK")
</pallas_src>

<mosaic_0001>
module attributes {stable_mosaic.version = 11 : i64} {
  func.func @_matmul_bias_kernel(%arg0: i32, %arg1: i32, %arg2: i32, %arg3: memref<512x256xbf16, #tpu.memory_space<vmem>>, %arg4: memref<256x128xbf16, #tpu.memory_space<vmem>>, %arg5: memref<1x128xf32, #tpu.memory_space<vmem>>, %arg6: memref<512x128xf32, #tpu.memory_space<vmem>>, %arg7: memref<512x128xf32, #tpu.memory_space<vmem>>) attributes {dimension_semantics = [#tpu.dimension_semantics<parallel>, #tpu.dimension_semantics<parallel>, #tpu.dimension_semantics<arbitrary>], iteration_bounds = array<i64: 2, 1, 1>, scalar_prefetch = 0 : i64, scratch_operands = 1 : i64, tpu.core_type = #tpu.core_type<tc>, window_params = [{transform_indices = @transform_0, window_bounds = array<i64: 512, 256>}, {transform_indices = @transform_1, window_bounds = array<i64: 256, 128>}, {transform_indices = @transform_2, window_bounds = array<i64: 1, 128>}, {transform_indices = @transform_3, window_bounds = array<i64: 512, 128>}]} {
    %c0_i32 = arith.constant 0 : i32
    %0 = arith.cmpi eq, %arg2, %c0_i32 : i32
    %1 = arith.extui %0 : i1 to i32
    %c0_i32_0 = arith.constant 0 : i32
    %2 = arith.cmpi ne, %1, %c0_i32_0 : i32
    scf.if %2 {
      %cst_10 = arith.constant 0.000000e+00 : f32
      %12 = vector.broadcast %cst_10 : f32 to vector<512x128xf32>
      %c0_11 = arith.constant 0 : index
      %c0_12 = arith.constant 0 : index
      %13 = vector.load %arg7[%c0_11, %c0_12] : memref<512x128xf32, #tpu.memory_space<vmem>>, vector<512x128xf32>
      tpu.vector_store %arg7[%c0_11, %c0_12], %12 {strides = array<i32>} : memref<512x128xf32, #tpu.memory_space<vmem>>, vector<512x128xf32>,
    } else {
    }
    %c0 = arith.constant 0 : index
    %c0_1 = arith.constant 0 : index
    %3 = vector.load %arg7[%c0, %c0_1] : memref<512x128xf32, #tpu.memory_space<vmem>>, vector<512x128xf32>
    %c0_2 = arith.constant 0 : index
    %c0_3 = arith.constant 0 : index
    %4 = vector.load %arg3[%c0_2, %c0_3] : memref<512x256xbf16, #tpu.memory_space<vmem>>, vector<512x256xbf16>
    %c0_4 = arith.constant 0 : index
    %c0_5 = arith.constant 0 : index
    %5 = vector.load %arg4[%c0_4, %c0_5] : memref<256x128xbf16, #tpu.memory_space<vmem>>, vector<256x128xbf16>
    %cst = arith.constant dense<0.000000e+00> : vector<512x128xf32>
    %6 = tpu.matmul %4, %5, %cst {dimension_numbers = #tpu.dot_dimension_numbers<[1], [0], [0], [1], [0, 0, 1, 1], [], []>} : vector<512x256xbf16>, vector<256x128xbf16>, vector<512x128xf32> -> vector<512x128xf32>
    %7 = arith.addf %3, %6 : vector<512x128xf32>
    %c0_6 = arith.constant 0 : index
    %c0_7 = arith.constant 0 : index
    %8 = vector.load %arg7[%c0_6, %c0_7] : memref<512x128xf32, #tpu.memory_space<vmem>>, vector<512x128xf32>
    tpu.vector_store %arg7[%c0_6, %c0_7], %7 {strides = array<i32>} : memref<512x128xf32, #tpu.memory_space<vmem>>, vector<512x128xf32>,
    %c0_i32_8 = arith.constant 0 : i32
    %9 = arith.cmpi eq, %arg2, %c0_i32_8 : i32
    %10 = arith.extui %9 : i1 to i32
    %c0_i32_9 = arith.constant 0 : i32
    %11 = arith.cmpi ne, %10, %c0_i32_9 : i32
    scf.if %11 {
      %c0_10 = arith.constant 0 : index
      %c0_11 = arith.constant 0 : index
      %12 = vector.load %arg7[%c0_10, %c0_11] : memref<512x128xf32, #tpu.memory_space<vmem>>, vector<512x128xf32>
      %c0_12 = arith.constant 0 : index
      %c0_13 = arith.constant 0 : index
      %13 = vector.load %arg5[%c0_12, %c0_13] : memref<1x128xf32, #tpu.memory_space<vmem>>, vector<1x128xf32>
      %14 = vector.broadcast %13 : vector<1x128xf32> to vector<512x128xf32>
      %15 = arith.addf %12, %14 : vector<512x128xf32>
      %cst_14 = arith.constant 0.000000e+00 : f32
      %16 = vector.broadcast %cst_14 : f32 to vector<512x128xf32>
      %17 = arith.maximumf %15, %16 : vector<512x128xf32>
      %c0_15 = arith.constant 0 : index
      %c0_16 = arith.constant 0 : index
      %18 = vector.load %arg6[%c0_15, %c0_16] : memref<512x128xf32, #tpu.memory_space<vmem>>, vector<512x128xf32>
      tpu.vector_store %arg6[%c0_15, %c0_16], %17 {strides = array<i32>} : memref<512x128xf32, #tpu.memory_space<vmem>>, vector<512x128xf32>,
    } else {
    }
    return
  }
  func.func @transform_0(%arg0: i32, %arg1: i32, %arg2: i32) -> (i32, i32) {
    %c0_i32 = arith.constant 0 : i32
    return %arg0, %arg2 : i32, i32
  }
  func.func @transform_1(%arg0: i32, %arg1: i32, %arg2: i32) -> (i32, i32) {
    %c0_i32 = arith.constant 0 : i32
    return %arg2, %arg1 : i32, i32
  }
  func.func @transform_2(%arg0: i32, %arg1: i32, %arg2: i32) -> (i32, i32) {
    %c0_i32 = arith.constant 0 : i32
    %c0_i32_0 = arith.constant 0 : i32
    return %c0_i32, %arg1 : i32, i32
  }
  func.func @transform_3(%arg0: i32, %arg1: i32, %arg2: i32) -> (i32, i32) {
    %c0_i32 = arith.constant 0 : i32
    return %arg0, %arg1 : i32, i32
  }
}

module attributes {stable_mosaic.version = 11 : i64} {
  func.func @_maxpool_kernel(%arg0: i32, %arg1: memref<1x34x34x16xf32, #tpu.memory_space<vmem>>, %arg2: memref<1x32x32x16xf32, #tpu.memory_space<vmem>>) attributes {dimension_semantics = [#tpu.dimension_semantics<arbitrary>], iteration_bounds = array<i64: 1>, scalar_prefetch = 0 : i64, scratch_operands = 0 : i64, tpu.core_type = #tpu.core_type<tc>, window_params = [{transform_indices = @transform_0, window_bounds = array<i64: 1, 34, 34, 16>}, {transform_indices = @transform_1, window_bounds = array<i64: 1, 32, 32, 16>}]} {
    %c0 = arith.constant 0 : index
    %c0_0 = arith.constant 0 : index
    %c0_1 = arith.constant 0 : index
    %c0_2 = arith.constant 0 : index
    %0 = vector.load %arg1[%c0, %c0_0, %c0_1, %c0_2] : memref<1x34x34x16xf32, #tpu.memory_space<vmem>>, vector<1x32x32x16xf32>
    %1 = vector.shape_cast %0 : vector<1x32x32x16xf32> to vector<32x32x16xf32>
    %c0_3 = arith.constant 0 : index
    %c0_4 = arith.constant 0 : index
    %c1 = arith.constant 1 : index
    %c0_5 = arith.constant 0 : index
    %2 = vector.load %arg1[%c0_3, %c0_4, %c1, %c0_5] : memref<1x34x34x16xf32, #tpu.memory_space<vmem>>, vector<1x32x32x16xf32>
    %3 = vector.shape_cast %2 : vector<1x32x32x16xf32> to vector<32x32x16xf32>
    %4 = arith.maximumf %1, %3 : vector<32x32x16xf32>
    %c0_6 = arith.constant 0 : index
    %c0_7 = arith.constant 0 : index
    %c2 = arith.constant 2 : index
    %c0_8 = arith.constant 0 : index
    %5 = vector.load %arg1[%c0_6, %c0_7, %c2, %c0_8] : memref<1x34x34x16xf32, #tpu.memory_space<vmem>>, vector<1x32x32x16xf32>
    %6 = vector.shape_cast %5 : vector<1x32x32x16xf32> to vector<32x32x16xf32>
    %7 = arith.maximumf %4, %6 : vector<32x32x16xf32>
    %c0_9 = arith.constant 0 : index
    %c1_10 = arith.constant 1 : index
    %c0_11 = arith.constant 0 : index
    %c0_12 = arith.constant 0 : index
    %8 = vector.load %arg1[%c0_9, %c1_10, %c0_11, %c0_12] : memref<1x34x34x16xf32, #tpu.memory_space<vmem>>, vector<1x32x32x16xf32>
    %9 = vector.shape_cast %8 : vector<1x32x32x16xf32> to vector<32x32x16xf32>
    %10 = arith.maximumf %7, %9 : vector<32x32x16xf32>
    %c0_13 = arith.constant 0 : index
    %c1_14 = arith.constant 1 : index
    %c1_15 = arith.constant 1 : index
    %c0_16 = arith.constant 0 : index
    %11 = vector.load %arg1[%c0_13, %c1_14, %c1_15, %c0_16] : memref<1x34x34x16xf32, #tpu.memory_space<vmem>>, vector<1x32x32x16xf32>
    %12 = vector.shape_cast %11 : vector<1x32x32x16xf32> to vector<32x32x16xf32>
    %13 = arith.maximumf %10, %12 : vector<32x32x16xf32>
    %c0_17 = arith.constant 0 : index
    %c1_18 = arith.constant 1 : index
    %c2_19 = arith.constant 2 : index
    %c0_20 = arith.constant 0 : index
    %14 = vector.load %arg1[%c0_17, %c1_18, %c2_19, %c0_20] : memref<1x34x34x16xf32, #tpu.memory_space<vmem>>, vector<1x32x32x16xf32>
    %15 = vector.shape_cast %14 : vector<1x32x32x16xf32> to vector<32x32x16xf32>
    %16 = arith.maximumf %13, %15 : vector<32x32x16xf32>
    %c0_21 = arith.constant 0 : index
    %c2_22 = arith.constant 2 : index
    %c0_23 = arith.constant 0 : index
    %c0_24 = arith.constant 0 : index
    %17 = vector.load %arg1[%c0_21, %c2_22, %c0_23, %c0_24] : memref<1x34x34x16xf32, #tpu.memory_space<vmem>>, vector<1x32x32x16xf32>
    %18 = vector.shape_cast %17 : vector<1x32x32x16xf32> to vector<32x32x16xf32>
    %19 = arith.maximumf %16, %18 : vector<32x32x16xf32>
    %c0_25 = arith.constant 0 : index
    %c2_26 = arith.constant 2 : index
    %c1_27 = arith.constant 1 : index
    %c0_28 = arith.constant 0 : index
    %20 = vector.load %arg1[%c0_25, %c2_26, %c1_27, %c0_28] : memref<1x34x34x16xf32, #tpu.memory_space<vmem>>, vector<1x32x32x16xf32>
    %21 = vector.shape_cast %20 : vector<1x32x32x16xf32> to vector<32x32x16xf32>
    %22 = arith.maximumf %19, %21 : vector<32x32x16xf32>
    %c0_29 = arith.constant 0 : index
    %c2_30 = arith.constant 2 : index
    %c2_31 = arith.constant 2 : index
    %c0_32 = arith.constant 0 : index
    %23 = vector.load %arg1[%c0_29, %c2_30, %c2_31, %c0_32] : memref<1x34x34x16xf32, #tpu.memory_space<vmem>>, vector<1x32x32x16xf32>
    %24 = vector.shape_cast %23 : vector<1x32x32x16xf32> to vector<32x32x16xf32>
    %25 = arith.maximumf %22, %24 : vector<32x32x16xf32>
    %c0_33 = arith.constant 0 : index
    %c0_34 = arith.constant 0 : index
    %c0_35 = arith.constant 0 : index
    %c0_36 = arith.constant 0 : index
    %26 = vector.load %arg2[%c0_33, %c0_34, %c0_35, %c0_36] : memref<1x32x32x16xf32, #tpu.memory_space<vmem>>, vector<1x32x32x16xf32>
    %27 = vector.shape_cast %26 : vector<1x32x32x16xf32> to vector<32x32x16xf32>
    %28 = vector.shape_cast %25 : vector<32x32x16xf32> to vector<1x32x32x16xf32>
    tpu.vector_store %arg2[%c0_33, %c0_34, %c0_35, %c0_36], %28 {strides = array<i32>} : memref<1x32x32x16xf32, #tpu.memory_space<vmem>>, vector<1x32x32x16xf32>,
    return
  }
  func.func @transform_0(%arg0: i32) -> (i32, i32, i32, i32) {
    %c0_i32 = arith.constant 0 : i32
    %c0_i32_0 = arith.constant 0 : i32
    %c0_i32_1 = arith.constant 0 : i32
    %c0_i32_2 = arith.constant 0 : i32
    return %arg0, %c0_i32, %c0_i32_0, %c0_i32_1 : i32, i32, i32, i32
  }
  func.func @transform_1(%arg0: i32) -> (i32, i32, i32, i32) {
    %c0_i32 = arith.constant 0 : i32
    %c0_i32_0 = arith.constant 0 : i32
    %c0_i32_1 = arith.constant 0 : i32
    %c0_i32_2 = arith.constant 0 : i32
    return %arg0, %c0_i32, %c0_i32_0, %c0_i32_1 : i32, i32, i32, i32
  }
}

module attributes {stable_mosaic.version = 11 : i64} {
  func.func @_matmul_bias_kernel(%arg0: i32, %arg1: i32, %arg2: i32, %arg3: memref<256x256xbf16, #tpu.memory_space<vmem>>, %arg4: memref<256x128xbf16, #tpu.memory_space<vmem>>, %arg5: memref<1x128xf32, #tpu.memory_space<vmem>>, %arg6: memref<256x128xf32, #tpu.memory_space<vmem>>, %arg7: memref<256x128xf32, #tpu.memory_space<vmem>>) attributes {dimension_semantics = [#tpu.dimension_semantics<parallel>, #tpu.dimension_semantics<parallel>, #tpu.dimension_semantics<arbitrary>], iteration_bounds = array<i64: 1, 1, 1>, scalar_prefetch = 0 : i64, scratch_operands = 1 : i64, tpu.core_type = #tpu.core_type<tc>, window_params = [{transform_indices = @transform_0, window_bounds = array<i64: 256, 256>}, {transform_indices = @transform_1, window_bounds = array<i64: 256, 128>}, {transform_indices = @transform_2, window_bounds = array<i64: 1, 128>}, {transform_indices = @transform_3, window_bounds = array<i64: 256, 128>}]} {
    %c0_i32 = arith.constant 0 : i32
    %0 = arith.cmpi eq, %arg2, %c0_i32 : i32
    %1 = arith.extui %0 : i1 to i32
    %c0_i32_0 = arith.constant 0 : i32
    %2 = arith.cmpi ne, %1, %c0_i32_0 : i32
    scf.if %2 {
      %cst_10 = arith.constant 0.000000e+00 : f32
      %12 = vector.broadcast %cst_10 : f32 to vector<256x128xf32>
      %c0_11 = arith.constant 0 : index
      %c0_12 = arith.constant 0 : index
      %13 = vector.load %arg7[%c0_11, %c0_12] : memref<256x128xf32, #tpu.memory_space<vmem>>, vector<256x128xf32>
      tpu.vector_store %arg7[%c0_11, %c0_12], %12 {strides = array<i32>} : memref<256x128xf32, #tpu.memory_space<vmem>>, vector<256x128xf32>,
    } else {
    }
    %c0 = arith.constant 0 : index
    %c0_1 = arith.constant 0 : index
    %3 = vector.load %arg7[%c0, %c0_1] : memref<256x128xf32, #tpu.memory_space<vmem>>, vector<256x128xf32>
    %c0_2 = arith.constant 0 : index
    %c0_3 = arith.constant 0 : index
    %4 = vector.load %arg3[%c0_2, %c0_3] : memref<256x256xbf16, #tpu.memory_space<vmem>>, vector<256x256xbf16>
    %c0_4 = arith.constant 0 : index
    %c0_5 = arith.constant 0 : index
    %5 = vector.load %arg4[%c0_4, %c0_5] : memref<256x128xbf16, #tpu.memory_space<vmem>>, vector<256x128xbf16>
    %cst = arith.constant dense<0.000000e+00> : vector<256x128xf32>
    %6 = tpu.matmul %4, %5, %cst {dimension_numbers = #tpu.dot_dimension_numbers<[1], [0], [0], [1], [0, 0, 1, 1], [], []>} : vector<256x256xbf16>, vector<256x128xbf16>, vector<256x128xf32> -> vector<256x128xf32>
    %7 = arith.addf %3, %6 : vector<256x128xf32>
    %c0_6 = arith.constant 0 : index
    %c0_7 = arith.constant 0 : index
    %8 = vector.load %arg7[%c0_6, %c0_7] : memref<256x128xf32, #tpu.memory_space<vmem>>, vector<256x128xf32>
    tpu.vector_store %arg7[%c0_6, %c0_7], %7 {strides = array<i32>} : memref<256x128xf32, #tpu.memory_space<vmem>>, vector<256x128xf32>,
    %c0_i32_8 = arith.constant 0 : i32
    %9 = arith.cmpi eq, %arg2, %c0_i32_8 : i32
    %10 = arith.extui %9 : i1 to i32
    %c0_i32_9 = arith.constant 0 : i32
    %11 = arith.cmpi ne, %10, %c0_i32_9 : i32
    scf.if %11 {
      %c0_10 = arith.constant 0 : index
      %c0_11 = arith.constant 0 : index
      %12 = vector.load %arg7[%c0_10, %c0_11] : memref<256x128xf32, #tpu.memory_space<vmem>>, vector<256x128xf32>
      %c0_12 = arith.constant 0 : index
      %c0_13 = arith.constant 0 : index
      %13 = vector.load %arg5[%c0_12, %c0_13] : memref<1x128xf32, #tpu.memory_space<vmem>>, vector<1x128xf32>
      %14 = vector.broadcast %13 : vector<1x128xf32> to vector<256x128xf32>
      %15 = arith.addf %12, %14 : vector<256x128xf32>
      %cst_14 = arith.constant 0.000000e+00 : f32
      %16 = vector.broadcast %cst_14 : f32 to vector<256x128xf32>
      %17 = arith.maximumf %15, %16 : vector<256x128xf32>
      %c0_15 = arith.constant 0 : index
      %c0_16 = arith.constant 0 : index
      %18 = vector.load %arg6[%c0_15, %c0_16] : memref<256x128xf32, #tpu.memory_space<vmem>>, vector<256x128xf32>
      tpu.vector_store %arg6[%c0_15, %c0_16], %17 {strides = array<i32>} : memref<256x128xf32, #tpu.memory_space<vmem>>, vector<256x128xf32>,
    } else {
    }
    return
  }
  func.func @transform_0(%arg0: i32, %arg1: i32, %arg2: i32) -> (i32, i32) {
    %c0_i32 = arith.constant 0 : i32
    return %arg0, %arg2 : i32, i32
  }
  func.func @transform_1(%arg0: i32, %arg1: i32, %arg2: i32) -> (i32, i32) {
    %c0_i32 = arith.constant 0 : i32
    return %arg2, %arg1 : i32, i32
  }
  func.func @transform_2(%arg0: i32, %arg1: i32, %arg2: i32) -> (i32, i32) {
    %c0_i32 = arith.constant 0 : i32
    %c0_i32_0 = arith.constant 0 : i32
    return %c0_i32, %arg1 : i32, i32
  }
  func.func @transform_3(%arg0: i32, %arg1: i32, %arg2: i32) -> (i32, i32) {
    %c0_i32 = arith.constant 0 : i32
    return %arg0, %arg1 : i32, i32
  }
}

module attributes {stable_mosaic.version = 11 : i64} {
  func.func @_matmul_bias_kernel(%arg0: i32, %arg1: i32, %arg2: i32, %arg3: memref<64x384xbf16, #tpu.memory_space<vmem>>, %arg4: memref<384x128xbf16, #tpu.memory_space<vmem>>, %arg5: memref<1x128xf32, #tpu.memory_space<vmem>>, %arg6: memref<64x128xf32, #tpu.memory_space<vmem>>, %arg7: memref<64x128xf32, #tpu.memory_space<vmem>>) attributes {dimension_semantics = [#tpu.dimension_semantics<parallel>, #tpu.dimension_semantics<parallel>, #tpu.dimension_semantics<arbitrary>], iteration_bounds = array<i64: 1, 1, 1>, scalar_prefetch = 0 : i64, scratch_operands = 1 : i64, tpu.core_type = #tpu.core_type<tc>, window_params = [{transform_indices = @transform_0, window_bounds = array<i64: 64, 384>}, {transform_indices = @transform_1, window_bounds = array<i64: 384, 128>}, {transform_indices = @transform_2, window_bounds = array<i64: 1, 128>}, {transform_indices = @transform_3, window_bounds = array<i64: 64, 128>}]} {
    %c0_i32 = arith.constant 0 : i32
    %0 = arith.cmpi eq, %arg2, %c0_i32 : i32
    %1 = arith.extui %0 : i1 to i32
    %c0_i32_0 = arith.constant 0 : i32
    %2 = arith.cmpi ne, %1, %c0_i32_0 : i32
    scf.if %2 {
      %cst_10 = arith.constant 0.000000e+00 : f32
      %12 = vector.broadcast %cst_10 : f32 to vector<64x128xf32>
      %c0_11 = arith.constant 0 : index
      %c0_12 = arith.constant 0 : index
      %13 = vector.load %arg7[%c0_11, %c0_12] : memref<64x128xf32, #tpu.memory_space<vmem>>, vector<64x128xf32>
      tpu.vector_store %arg7[%c0_11, %c0_12], %12 {strides = array<i32>} : memref<64x128xf32, #tpu.memory_space<vmem>>, vector<64x128xf32>,
    } else {
    }
    %c0 = arith.constant 0 : index
    %c0_1 = arith.constant 0 : index
    %3 = vector.load %arg7[%c0, %c0_1] : memref<64x128xf32, #tpu.memory_space<vmem>>, vector<64x128xf32>
    %c0_2 = arith.constant 0 : index
    %c0_3 = arith.constant 0 : index
    %4 = vector.load %arg3[%c0_2, %c0_3] : memref<64x384xbf16, #tpu.memory_space<vmem>>, vector<64x384xbf16>
    %c0_4 = arith.constant 0 : index
    %c0_5 = arith.constant 0 : index
    %5 = vector.load %arg4[%c0_4, %c0_5] : memref<384x128xbf16, #tpu.memory_space<vmem>>, vector<384x128xbf16>
    %cst = arith.constant dense<0.000000e+00> : vector<64x128xf32>
    %6 = tpu.matmul %4, %5, %cst {dimension_numbers = #tpu.dot_dimension_numbers<[1], [0], [0], [1], [0, 0, 1, 1], [], []>} : vector<64x384xbf16>, vector<384x128xbf16>, vector<64x128xf32> -> vector<64x128xf32>
    %7 = arith.addf %3, %6 : vector<64x128xf32>
    %c0_6 = arith.constant 0 : index
    %c0_7 = arith.constant 0 : index
    %8 = vector.load %arg7[%c0_6, %c0_7] : memref<64x128xf32, #tpu.memory_space<vmem>>, vector<64x128xf32>
    tpu.vector_store %arg7[%c0_6, %c0_7], %7 {strides = array<i32>} : memref<64x128xf32, #tpu.memory_space<vmem>>, vector<64x128xf32>,
    %c0_i32_8 = arith.constant 0 : i32
    %9 = arith.cmpi eq, %arg2, %c0_i32_8 : i32
    %10 = arith.extui %9 : i1 to i32
    %c0_i32_9 = arith.constant 0 : i32
    %11 = arith.cmpi ne, %10, %c0_i32_9 : i32
    scf.if %11 {
      %c0_10 = arith.constant 0 : index
      %c0_11 = arith.constant 0 : index
      %12 = vector.load %arg7[%c0_10, %c0_11] : memref<64x128xf32, #tpu.memory_space<vmem>>, vector<64x128xf32>
      %c0_12 = arith.constant 0 : index
      %c0_13 = arith.constant 0 : index
      %13 = vector.load %arg5[%c0_12, %c0_13] : memref<1x128xf32, #tpu.memory_space<vmem>>, vector<1x128xf32>
      %14 = vector.broadcast %13 : vector<1x128xf32> to vector<64x128xf32>
      %15 = arith.addf %12, %14 : vector<64x128xf32>
      %cst_14 = arith.constant 0.000000e+00 : f32
      %16 = vector.broadcast %cst_14 : f32 to vector<64x128xf32>
      %17 = arith.maximumf %15, %16 : vector<64x128xf32>
      %c0_15 = arith.constant 0 : index
      %c0_16 = arith.constant 0 : index
      %18 = vector.load %arg6[%c0_15, %c0_16] : memref<64x128xf32, #tpu.memory_space<vmem>>, vector<64x128xf32>
      tpu.vector_store %arg6[%c0_15, %c0_16], %17 {strides = array<i32>} : memref<64x128xf32, #tpu.memory_space<vmem>>, vector<64x128xf32>,
    } else {
    }
    return
  }
  func.func @transform_0(%arg0: i32, %arg1: i32, %arg2: i32) -> (i32, i32) {
    %c0_i32 = arith.constant 0 : i32
    return %arg0, %arg2 : i32, i32
  }
  func.func @transform_1(%arg0: i32, %arg1: i32, %arg2: i32) -> (i32, i32) {
    %c0_i32 = arith.constant 0 : i32
    return %arg2, %arg1 : i32, i32
  }
  func.func @transform_2(%arg0: i32, %arg1: i32, %arg2: i32) -> (i32, i32) {
    %c0_i32 = arith.constant 0 : i32
    %c0_i32_0 = arith.constant 0 : i32
    return %c0_i32, %arg1 : i32, i32
  }
  func.func @transform_3(%arg0: i32, %arg1: i32, %arg2: i32) -> (i32, i32) {
    %c0_i32 = arith.constant 0 : i32
    return %arg0, %arg1 : i32, i32
  }
}

module attributes {stable_mosaic.version = 11 : i64} {
  func.func @_matmul_bias_kernel(%arg0: i32, %arg1: i32, %arg2: i32, %arg3: memref<16x640xbf16, #tpu.memory_space<vmem>>, %arg4: memref<640x128xbf16, #tpu.memory_space<vmem>>, %arg5: memref<1x128xf32, #tpu.memory_space<vmem>>, %arg6: memref<16x128xf32, #tpu.memory_space<vmem>>, %arg7: memref<16x128xf32, #tpu.memory_space<vmem>>) attributes {dimension_semantics = [#tpu.dimension_semantics<parallel>, #tpu.dimension_semantics<parallel>, #tpu.dimension_semantics<arbitrary>], iteration_bounds = array<i64: 1, 1, 1>, scalar_prefetch = 0 : i64, scratch_operands = 1 : i64, tpu.core_type = #tpu.core_type<tc>, window_params = [{transform_indices = @transform_0, window_bounds = array<i64: 16, 640>}, {transform_indices = @transform_1, window_bounds = array<i64: 640, 128>}, {transform_indices = @transform_2, window_bounds = array<i64: 1, 128>}, {transform_indices = @transform_3, window_bounds = array<i64: 16, 128>}]} {
    %c0_i32 = arith.constant 0 : i32
    %0 = arith.cmpi eq, %arg2, %c0_i32 : i32
    %1 = arith.extui %0 : i1 to i32
    %c0_i32_0 = arith.constant 0 : i32
    %2 = arith.cmpi ne, %1, %c0_i32_0 : i32
    scf.if %2 {
      %cst_10 = arith.constant 0.000000e+00 : f32
      %12 = vector.broadcast %cst_10 : f32 to vector<16x128xf32>
      %c0_11 = arith.constant 0 : index
      %c0_12 = arith.constant 0 : index
      %13 = vector.load %arg7[%c0_11, %c0_12] : memref<16x128xf32, #tpu.memory_space<vmem>>, vector<16x128xf32>
      tpu.vector_store %arg7[%c0_11, %c0_12], %12 {strides = array<i32>} : memref<16x128xf32, #tpu.memory_space<vmem>>, vector<16x128xf32>,
    } else {
    }
    %c0 = arith.constant 0 : index
    %c0_1 = arith.constant 0 : index
    %3 = vector.load %arg7[%c0, %c0_1] : memref<16x128xf32, #tpu.memory_space<vmem>>, vector<16x128xf32>
    %c0_2 = arith.constant 0 : index
    %c0_3 = arith.constant 0 : index
    %4 = vector.load %arg3[%c0_2, %c0_3] : memref<16x640xbf16, #tpu.memory_space<vmem>>, vector<16x640xbf16>
    %c0_4 = arith.constant 0 : index
    %c0_5 = arith.constant 0 : index
    %5 = vector.load %arg4[%c0_4, %c0_5] : memref<640x128xbf16, #tpu.memory_space<vmem>>, vector<640x128xbf16>
    %cst = arith.constant dense<0.000000e+00> : vector<16x128xf32>
    %6 = tpu.matmul %4, %5, %cst {dimension_numbers = #tpu.dot_dimension_numbers<[1], [0], [0], [1], [0, 0, 1, 1], [], []>} : vector<16x640xbf16>, vector<640x128xbf16>, vector<16x128xf32> -> vector<16x128xf32>
    %7 = arith.addf %3, %6 : vector<16x128xf32>
    %c0_6 = arith.constant 0 : index
    %c0_7 = arith.constant 0 : index
    %8 = vector.load %arg7[%c0_6, %c0_7] : memref<16x128xf32, #tpu.memory_space<vmem>>, vector<16x128xf32>
    tpu.vector_store %arg7[%c0_6, %c0_7], %7 {strides = array<i32>} : memref<16x128xf32, #tpu.memory_space<vmem>>, vector<16x128xf32>,
    %c0_i32_8 = arith.constant 0 : i32
    %9 = arith.cmpi eq, %arg2, %c0_i32_8 : i32
    %10 = arith.extui %9 : i1 to i32
    %c0_i32_9 = arith.constant 0 : i32
    %11 = arith.cmpi ne, %10, %c0_i32_9 : i32
    scf.if %11 {
      %c0_10 = arith.constant 0 : index
      %c0_11 = arith.constant 0 : index
      %12 = vector.load %arg7[%c0_10, %c0_11] : memref<16x128xf32, #tpu.memory_space<vmem>>, vector<16x128xf32>
      %c0_12 = arith.constant 0 : index
      %c0_13 = arith.constant 0 : index
      %13 = vector.load %arg5[%c0_12, %c0_13] : memref<1x128xf32, #tpu.memory_space<vmem>>, vector<1x128xf32>
      %14 = vector.broadcast %13 : vector<1x128xf32> to vector<16x128xf32>
      %15 = arith.addf %12, %14 : vector<16x128xf32>
      %cst_14 = arith.constant 0.000000e+00 : f32
      %16 = vector.broadcast %cst_14 : f32 to vector<16x128xf32>
      %17 = arith.maximumf %15, %16 : vector<16x128xf32>
      %c0_15 = arith.constant 0 : index
      %c0_16 = arith.constant 0 : index
      %18 = vector.load %arg6[%c0_15, %c0_16] : memref<16x128xf32, #tpu.memory_space<vmem>>, vector<16x128xf32>
      tpu.vector_store %arg6[%c0_15, %c0_16], %17 {strides = array<i32>} : memref<16x128xf32, #tpu.memory_space<vmem>>, vector<16x128xf32>,
    } else {
    }
    return
  }
  func.func @transform_0(%arg0: i32, %arg1: i32, %arg2: i32) -> (i32, i32) {
    %c0_i32 = arith.constant 0 : i32
    return %arg0, %arg2 : i32, i32
  }
  func.func @transform_1(%arg0: i32, %arg1: i32, %arg2: i32) -> (i32, i32) {
    %c0_i32 = arith.constant 0 : i32
    return %arg2, %arg1 : i32, i32
  }
  func.func @transform_2(%arg0: i32, %arg1: i32, %arg2: i32) -> (i32, i32) {
    %c0_i32 = arith.constant 0 : i32
    %c0_i32_0 = arith.constant 0 : i32
    return %c0_i32, %arg1 : i32, i32
  }
  func.func @transform_3(%arg0: i32, %arg1: i32, %arg2: i32) -> (i32, i32) {
    %c0_i32 = arith.constant 0 : i32
    return %arg0, %arg1 : i32, i32
  }
}

module attributes {stable_mosaic.version = 11 : i64} {
  func.func @_matmul_bias_kernel(%arg0: i32, %arg1: i32, %arg2: i32, %arg3: memref<16x128xbf16, #tpu.memory_space<vmem>>, %arg4: memref<128x128xbf16, #tpu.memory_space<vmem>>, %arg5: memref<1x128xf32, #tpu.memory_space<vmem>>, %arg6: memref<16x128xf32, #tpu.memory_space<vmem>>, %arg7: memref<16x128xf32, #tpu.memory_space<vmem>>) attributes {dimension_semantics = [#tpu.dimension_semantics<parallel>, #tpu.dimension_semantics<parallel>, #tpu.dimension_semantics<arbitrary>], iteration_bounds = array<i64: 1, 1, 1>, scalar_prefetch = 0 : i64, scratch_operands = 1 : i64, tpu.core_type = #tpu.core_type<tc>, window_params = [{transform_indices = @transform_0, window_bounds = array<i64: 16, 128>}, {transform_indices = @transform_1, window_bounds = array<i64: 128, 128>}, {transform_indices = @transform_2, window_bounds = array<i64: 1, 128>}, {transform_indices = @transform_3, window_bounds = array<i64: 16, 128>}]} {
    %c0_i32 = arith.constant 0 : i32
    %0 = arith.cmpi eq, %arg2, %c0_i32 : i32
    %1 = arith.extui %0 : i1 to i32
    %c0_i32_0 = arith.constant 0 : i32
    %2 = arith.cmpi ne, %1, %c0_i32_0 : i32
    scf.if %2 {
      %cst_10 = arith.constant 0.000000e+00 : f32
      %12 = vector.broadcast %cst_10 : f32 to vector<16x128xf32>
      %c0_11 = arith.constant 0 : index
      %c0_12 = arith.constant 0 : index
      %13 = vector.load %arg7[%c0_11, %c0_12] : memref<16x128xf32, #tpu.memory_space<vmem>>, vector<16x128xf32>
      tpu.vector_store %arg7[%c0_11, %c0_12], %12 {strides = array<i32>} : memref<16x128xf32, #tpu.memory_space<vmem>>, vector<16x128xf32>,
    } else {
    }
    %c0 = arith.constant 0 : index
    %c0_1 = arith.constant 0 : index
    %3 = vector.load %arg7[%c0, %c0_1] : memref<16x128xf32, #tpu.memory_space<vmem>>, vector<16x128xf32>
    %c0_2 = arith.constant 0 : index
    %c0_3 = arith.constant 0 : index
    %4 = vector.load %arg3[%c0_2, %c0_3] : memref<16x128xbf16, #tpu.memory_space<vmem>>, vector<16x128xbf16>
    %c0_4 = arith.constant 0 : index
    %c0_5 = arith.constant 0 : index
    %5 = vector.load %arg4[%c0_4, %c0_5] : memref<128x128xbf16, #tpu.memory_space<vmem>>, vector<128x128xbf16>
    %cst = arith.constant dense<0.000000e+00> : vector<16x128xf32>
    %6 = tpu.matmul %4, %5, %cst {dimension_numbers = #tpu.dot_dimension_numbers<[1], [0], [0], [1], [0, 0, 1, 1], [], []>} : vector<16x128xbf16>, vector<128x128xbf16>, vector<16x128xf32> -> vector<16x128xf32>
    %7 = arith.addf %3, %6 : vector<16x128xf32>
    %c0_6 = arith.constant 0 : index
    %c0_7 = arith.constant 0 : index
    %8 = vector.load %arg7[%c0_6, %c0_7] : memref<16x128xf32, #tpu.memory_space<vmem>>, vector<16x128xf32>
    tpu.vector_store %arg7[%c0_6, %c0_7], %7 {strides = array<i32>} : memref<16x128xf32, #tpu.memory_space<vmem>>, vector<16x128xf32>,
    %c0_i32_8 = arith.constant 0 : i32
    %9 = arith.cmpi eq, %arg2, %c0_i32_8 : i32
    %10 = arith.extui %9 : i1 to i32
    %c0_i32_9 = arith.constant 0 : i32
    %11 = arith.cmpi ne, %10, %c0_i32_9 : i32
    scf.if %11 {
      %c0_10 = arith.constant 0 : index
      %c0_11 = arith.constant 0 : index
      %12 = vector.load %arg7[%c0_10, %c0_11] : memref<16x128xf32, #tpu.memory_space<vmem>>, vector<16x128xf32>
      %c0_12 = arith.constant 0 : index
      %c0_13 = arith.constant 0 : index
      %13 = vector.load %arg5[%c0_12, %c0_13] : memref<1x128xf32, #tpu.memory_space<vmem>>, vector<1x128xf32>
      %14 = vector.broadcast %13 : vector<1x128xf32> to vector<16x128xf32>
      %15 = arith.addf %12, %14 : vector<16x128xf32>
      %c0_14 = arith.constant 0 : index
      %c0_15 = arith.constant 0 : index
      %16 = vector.load %arg6[%c0_14, %c0_15] : memref<16x128xf32, #tpu.memory_space<vmem>>, vector<16x128xf32>
      tpu.vector_store %arg6[%c0_14, %c0_15], %15 {strides = array<i32>} : memref<16x128xf32, #tpu.memory_space<vmem>>, vector<16x128xf32>,
    } else {
    }
    return
  }
  func.func @transform_0(%arg0: i32, %arg1: i32, %arg2: i32) -> (i32, i32) {
    %c0_i32 = arith.constant 0 : i32
    return %arg0, %arg2 : i32, i32
  }
  func.func @transform_1(%arg0: i32, %arg1: i32, %arg2: i32) -> (i32, i32) {
    %c0_i32 = arith.constant 0 : i32
    return %arg2, %arg1 : i32, i32
  }
  func.func @transform_2(%arg0: i32, %arg1: i32, %arg2: i32) -> (i32, i32) {
    %c0_i32 = arith.constant 0 : i32
    %c0_i32_0 = arith.constant 0 : i32
    return %c0_i32, %arg1 : i32, i32
  }
  func.func @transform_3(%arg0: i32, %arg1: i32, %arg2: i32) -> (i32, i32) {
    %c0_i32 = arith.constant 0 : i32
    return %arg0, %arg1 : i32, i32
  }
}

module attributes {stable_mosaic.version = 11 : i64} {
  func.func @_roi_max_kernel(%arg0: i32, %arg1: memref<64x16xf32, #tpu.memory_space<vmem>>, %arg2: memref<16x128xf32, #tpu.memory_space<vmem>>, %arg3: memref<64x128xf32, #tpu.memory_space<vmem>>) attributes {dimension_semantics = [#tpu.dimension_semantics<parallel>], iteration_bounds = array<i64: 7>, scalar_prefetch = 0 : i64, scratch_operands = 0 : i64, tpu.core_type = #tpu.core_type<tc>, window_params = [{transform_indices = @transform_0, window_bounds = array<i64: 64, 16>}, {pipeline_mode = #tpu.pipeline_mode<synchronous>, transform_indices = @transform_1, window_bounds = array<i64: 16, 128>}, {transform_indices = @transform_2, window_bounds = array<i64: 64, 128>}]} {
    %c0 = arith.constant 0 : index
    %c0_0 = arith.constant 0 : index
    %0 = vector.load %arg1[%c0, %c0_0] : memref<64x16xf32, #tpu.memory_space<vmem>>, vector<64x16xf32>
    %c0_1 = arith.constant 0 : index
    %c0_2 = arith.constant 0 : index
    %1 = vector.load %arg2[%c0_1, %c0_2] : memref<16x128xf32, #tpu.memory_space<vmem>>, vector<16x128xf32>
    %2 = vector.shape_cast %0 : vector<64x16xf32> to vector<64x16x1xf32>
    %cst = arith.constant 5.000000e-01 : f32
    %3 = vector.broadcast %cst : f32 to vector<64x16x1xf32>
    %4 = arith.cmpf ogt, %2, %3 : vector<64x16x1xf32>
    %5 = vector.shape_cast %1 : vector<16x128xf32> to vector<1x16x128xf32>
    %cst_3 = arith.constant 0xFF800000 : f32
    %6 = vector.shape_cast %4 : vector<64x16x1xi1> to vector<64x16x1xi1>
    %7 = vector.broadcast %6 : vector<64x16x1xi1> to vector<64x16x128xi1>
    %8 = vector.shape_cast %5 : vector<1x16x128xf32> to vector<1x16x128xf32>
    %9 = vector.broadcast %8 : vector<1x16x128xf32> to vector<64x16x128xf32>
    %10 = vector.broadcast %cst_3 : f32 to vector<64x16x128xf32>
    %11 = arith.select %7, %9, %10 : vector<64x16x128xi1>, vector<64x16x128xf32>
    %cst_4 = arith.constant dense<0xFF800000> : vector<64x128xf32>
    %12 = vector.multi_reduction <maximumf>, %11, %cst_4 [1] : vector<64x16x128xf32> to vector<64x128xf32>
    %c0_5 = arith.constant 0 : index
    %c0_6 = arith.constant 0 : index
    %13 = vector.load %arg3[%c0_5, %c0_6] : memref<64x128xf32, #tpu.memory_space<vmem>>, vector<64x128xf32>
    tpu.vector_store %arg3[%c0_5, %c0_6], %12 {strides = array<i32>} : memref<64x128xf32, #tpu.memory_space<vmem>>, vector<64x128xf32>,
    return
  }
  func.func @transform_0(%arg0: i32) -> (i32, i32) {
    %c0_i32 = arith.constant 0 : i32
    %c0_i32_0 = arith.constant 0 : i32
    return %arg0, %c0_i32 : i32, i32
  }
  func.func @transform_1(%arg0: i32) -> (i32, i32) {
    %c0_i32 = arith.constant 0 : i32
    %c0_i32_0 = arith.constant 0 : i32
    %c0_i32_1 = arith.constant 0 : i32
    return %c0_i32, %c0_i32_0 : i32, i32
  }
  func.func @transform_2(%arg0: i32) -> (i32, i32) {
    %c0_i32 = arith.constant 0 : i32
    %c0_i32_0 = arith.constant 0 : i32
    return %arg0, %c0_i32 : i32, i32
  }
}

module attributes {stable_mosaic.version = 11 : i64} {
  func.func @_layer4_mean_kernel(%arg0: i32, %arg1: i32, %arg2: i32, %arg3: memref<1x8x128xbf16, #tpu.memory_space<vmem>>, %arg4: memref<128x256xbf16, #tpu.memory_space<vmem>>, %arg5: memref<1x256xf32, #tpu.memory_space<vmem>>, %arg6: memref<8x256xf32, #tpu.memory_space<vmem>>, %arg7: memref<8x256xf32, #tpu.memory_space<vmem>>) attributes {dimension_semantics = [#tpu.dimension_semantics<parallel>, #tpu.dimension_semantics<parallel>, #tpu.dimension_semantics<arbitrary>], iteration_bounds = array<i64: 1, 8, 49>, scalar_prefetch = 0 : i64, scratch_operands = 1 : i64, tpu.core_type = #tpu.core_type<tc>, window_params = [{transform_indices = @transform_0, window_bounds = array<i64: 1, 8, 128>}, {transform_indices = @transform_1, window_bounds = array<i64: 128, 256>}, {transform_indices = @transform_2, window_bounds = array<i64: 1, 256>}, {transform_indices = @transform_3, window_bounds = array<i64: 8, 256>}]} {
    %c0_i32 = arith.constant 0 : i32
    %0 = arith.cmpi eq, %arg2, %c0_i32 : i32
    %1 = arith.extui %0 : i1 to i32
    %c0_i32_0 = arith.constant 0 : i32
    %2 = arith.cmpi ne, %1, %c0_i32_0 : i32
    scf.if %2 {
      %cst_13 = arith.constant 0.000000e+00 : f32
      %18 = vector.broadcast %cst_13 : f32 to vector<8x256xf32>
      %c0_14 = arith.constant 0 : index
      %c0_15 = arith.constant 0 : index
      %19 = vector.load %arg7[%c0_14, %c0_15] : memref<8x256xf32, #tpu.memory_space<vmem>>, vector<8x256xf32>
      tpu.vector_store %arg7[%c0_14, %c0_15], %18 {strides = array<i32>} : memref<8x256xf32, #tpu.memory_space<vmem>>, vector<8x256xf32>,
    } else {
    }
    %c0 = arith.constant 0 : index
    %c0_1 = arith.constant 0 : index
    %c0_2 = arith.constant 0 : index
    %3 = vector.load %arg3[%c0, %c0_1, %c0_2] : memref<1x8x128xbf16, #tpu.memory_space<vmem>>, vector<1x8x128xbf16>
    %4 = vector.shape_cast %3 : vector<1x8x128xbf16> to vector<8x128xbf16>
    %c0_3 = arith.constant 0 : index
    %c0_4 = arith.constant 0 : index
    %5 = vector.load %arg4[%c0_3, %c0_4] : memref<128x256xbf16, #tpu.memory_space<vmem>>, vector<128x256xbf16>
    %cst = arith.constant dense<0.000000e+00> : vector<8x256xf32>
    %6 = tpu.matmul %4, %5, %cst {dimension_numbers = #tpu.dot_dimension_numbers<[1], [0], [0], [1], [0, 0, 1, 1], [], []>} : vector<8x128xbf16>, vector<128x256xbf16>, vector<8x256xf32> -> vector<8x256xf32>
    %c0_5 = arith.constant 0 : index
    %c0_6 = arith.constant 0 : index
    %7 = vector.load %arg5[%c0_5, %c0_6] : memref<1x256xf32, #tpu.memory_space<vmem>>, vector<1x256xf32>
    %8 = vector.broadcast %7 : vector<1x256xf32> to vector<8x256xf32>
    %9 = arith.addf %6, %8 : vector<8x256xf32>
    %c0_7 = arith.constant 0 : index
    %c0_8 = arith.constant 0 : index
    %10 = vector.load %arg7[%c0_7, %c0_8] : memref<8x256xf32, #tpu.memory_space<vmem>>, vector<8x256xf32>
    %cst_9 = arith.constant 0.000000e+00 : f32
    %11 = vector.broadcast %cst_9 : f32 to vector<8x256xf32>
    %12 = arith.maximumf %9, %11 : vector<8x256xf32>
    %13 = arith.addf %10, %12 : vector<8x256xf32>
    %c0_10 = arith.constant 0 : index
    %c0_11 = arith.constant 0 : index
    %14 = vector.load %arg7[%c0_10, %c0_11] : memref<8x256xf32, #tpu.memory_space<vmem>>, vector<8x256xf32>
    tpu.vector_store %arg7[%c0_10, %c0_11], %13 {strides = array<i32>} : memref<8x256xf32, #tpu.memory_space<vmem>>, vector<8x256xf32>,
    %c48_i32 = arith.constant 48 : i32
    %15 = arith.cmpi eq, %arg2, %c48_i32 : i32
    %16 = arith.extui %15 : i1 to i32
    %c0_i32_12 = arith.constant 0 : i32
    %17 = arith.cmpi ne, %16, %c0_i32_12 : i32
    scf.if %17 {
      %c0_13 = arith.constant 0 : index
      %c0_14 = arith.constant 0 : index
      %18 = vector.load %arg7[%c0_13, %c0_14] : memref<8x256xf32, #tpu.memory_space<vmem>>, vector<8x256xf32>
      %cst_15 = arith.constant 0.0204081628 : f32
      %19 = vector.broadcast %cst_15 : f32 to vector<8x256xf32>
      %20 = arith.mulf %18, %19 : vector<8x256xf32>
      %c0_16 = arith.constant 0 : index
      %c0_17 = arith.constant 0 : index
      %21 = vector.load %arg6[%c0_16, %c0_17] : memref<8x256xf32, #tpu.memory_space<vmem>>, vector<8x256xf32>
      tpu.vector_store %arg6[%c0_16, %c0_17], %20 {strides = array<i32>} : memref<8x256xf32, #tpu.memory_space<vmem>>, vector<8x256xf32>,
    } else {
    }
    return
  }
  func.func @transform_0(%arg0: i32, %arg1: i32, %arg2: i32) -> (i32, i32, i32) {
    %c0_i32 = arith.constant 0 : i32
    %c0_i32_0 = arith.constant 0 : i32
    return %arg2, %arg0, %c0_i32 : i32, i32, i32
  }
  func.func @transform_1(%arg0: i32, %arg1: i32, %arg2: i32) -> (i32, i32) {
    %c0_i32 = arith.constant 0 : i32
    %c0_i32_0 = arith.constant 0 : i32
    return %c0_i32, %arg1 : i32, i32
  }
  func.func @transform_2(%arg0: i32, %arg1: i32, %arg2: i32) -> (i32, i32) {
    %c0_i32 = arith.constant 0 : i32
    %c0_i32_0 = arith.constant 0 : i32
    return %c0_i32, %arg1 : i32, i32
  }
  func.func @transform_3(%arg0: i32, %arg1: i32, %arg2: i32) -> (i32, i32) {
    %c0_i32 = arith.constant 0 : i32
    return %arg0, %arg1 : i32, i32
  }
}

module attributes {stable_mosaic.version = 11 : i64} {
  func.func @_matmul_bias_kernel(%arg0: i32, %arg1: i32, %arg2: i32, %arg3: memref<8x512xbf16, #tpu.memory_space<vmem>>, %arg4: memref<512x128xbf16, #tpu.memory_space<vmem>>, %arg5: memref<1x128xf32, #tpu.memory_space<vmem>>, %arg6: memref<8x128xf32, #tpu.memory_space<vmem>>, %arg7: memref<8x128xf32, #tpu.memory_space<vmem>>) attributes {dimension_semantics = [#tpu.dimension_semantics<parallel>, #tpu.dimension_semantics<parallel>, #tpu.dimension_semantics<arbitrary>], iteration_bounds = array<i64: 1, 1, 4>, scalar_prefetch = 0 : i64, scratch_operands = 1 : i64, tpu.core_type = #tpu.core_type<tc>, window_params = [{transform_indices = @transform_0, window_bounds = array<i64: 8, 512>}, {transform_indices = @transform_1, window_bounds = array<i64: 512, 128>}, {transform_indices = @transform_2, window_bounds = array<i64: 1, 128>}, {transform_indices = @transform_3, window_bounds = array<i64: 8, 128>}]} {
    %c0_i32 = arith.constant 0 : i32
    %0 = arith.cmpi eq, %arg2, %c0_i32 : i32
    %1 = arith.extui %0 : i1 to i32
    %c0_i32_0 = arith.constant 0 : i32
    %2 = arith.cmpi ne, %1, %c0_i32_0 : i32
    scf.if %2 {
      %cst_9 = arith.constant 0.000000e+00 : f32
      %12 = vector.broadcast %cst_9 : f32 to vector<8x128xf32>
      %c0_10 = arith.constant 0 : index
      %c0_11 = arith.constant 0 : index
      %13 = vector.load %arg7[%c0_10, %c0_11] : memref<8x128xf32, #tpu.memory_space<vmem>>, vector<8x128xf32>
      tpu.vector_store %arg7[%c0_10, %c0_11], %12 {strides = array<i32>} : memref<8x128xf32, #tpu.memory_space<vmem>>, vector<8x128xf32>,
    } else {
    }
    %c0 = arith.constant 0 : index
    %c0_1 = arith.constant 0 : index
    %3 = vector.load %arg7[%c0, %c0_1] : memref<8x128xf32, #tpu.memory_space<vmem>>, vector<8x128xf32>
    %c0_2 = arith.constant 0 : index
    %c0_3 = arith.constant 0 : index
    %4 = vector.load %arg3[%c0_2, %c0_3] : memref<8x512xbf16, #tpu.memory_space<vmem>>, vector<8x512xbf16>
    %c0_4 = arith.constant 0 : index
    %c0_5 = arith.constant 0 : index
    %5 = vector.load %arg4[%c0_4, %c0_5] : memref<512x128xbf16, #tpu.memory_space<vmem>>, vector<512x128xbf16>
    %cst = arith.constant dense<0.000000e+00> : vector<8x128xf32>
    %6 = tpu.matmul %4, %5, %cst {dimension_numbers = #tpu.dot_dimension_numbers<[1], [0], [0], [1], [0, 0, 1, 1], [], []>} : vector<8x512xbf16>, vector<512x128xbf16>, vector<8x128xf32> -> vector<8x128xf32>
    %7 = arith.addf %3, %6 : vector<8x128xf32>
    %c0_6 = arith.constant 0 : index
    %c0_7 = arith.constant 0 : index
    %8 = vector.load %arg7[%c0_6, %c0_7] : memref<8x128xf32, #tpu.memory_space<vmem>>, vector<8x128xf32>
    tpu.vector_store %arg7[%c0_6, %c0_7], %7 {strides = array<i32>} : memref<8x128xf32, #tpu.memory_space<vmem>>, vector<8x128xf32>,
    %c3_i32 = arith.constant 3 : i32
    %9 = arith.cmpi eq, %arg2, %c3_i32 : i32
    %10 = arith.extui %9 : i1 to i32
    %c0_i32_8 = arith.constant 0 : i32
    %11 = arith.cmpi ne, %10, %c0_i32_8 : i32
    scf.if %11 {
      %c0_9 = arith.constant 0 : index
      %c0_10 = arith.constant 0 : index
      %12 = vector.load %arg7[%c0_9, %c0_10] : memref<8x128xf32, #tpu.memory_space<vmem>>, vector<8x128xf32>
      %c0_11 = arith.constant 0 : index
      %c0_12 = arith.constant 0 : index
      %13 = vector.load %arg5[%c0_11, %c0_12] : memref<1x128xf32, #tpu.memory_space<vmem>>, vector<1x128xf32>
      %14 = vector.broadcast %13 : vector<1x128xf32> to vector<8x128xf32>
      %15 = arith.addf %12, %14 : vector<8x128xf32>
      %c0_13 = arith.constant 0 : index
      %c0_14 = arith.constant 0 : index
      %16 = vector.load %arg6[%c0_13, %c0_14] : memref<8x128xf32, #tpu.memory_space<vmem>>, vector<8x128xf32>
      tpu.vector_store %arg6[%c0_13, %c0_14], %15 {strides = array<i32>} : memref<8x128xf32, #tpu.memory_space<vmem>>, vector<8x128xf32>,
    } else {
    }
    return
  }
  func.func @transform_0(%arg0: i32, %arg1: i32, %arg2: i32) -> (i32, i32) {
    %c0_i32 = arith.constant 0 : i32
    return %arg0, %arg2 : i32, i32
  }
  func.func @transform_1(%arg0: i32, %arg1: i32, %arg2: i32) -> (i32, i32) {
    %c0_i32 = arith.constant 0 : i32
    return %arg2, %arg1 : i32, i32
  }
  func.func @transform_2(%arg0: i32, %arg1: i32, %arg2: i32) -> (i32, i32) {
    %c0_i32 = arith.constant 0 : i32
    %c0_i32_0 = arith.constant 0 : i32
    return %c0_i32, %arg1 : i32, i32
  }
  func.func @transform_3(%arg0: i32, %arg1: i32, %arg2: i32) -> (i32, i32) {
    %c0_i32 = arith.constant 0 : i32
    return %arg0, %arg1 : i32, i32
  }
}

module attributes {stable_mosaic.version = 11 : i64} {
  func.func @_softmax_kernel(%arg0: i32, %arg1: memref<8x21xf32, #tpu.memory_space<vmem>>, %arg2: memref<8x21xf32, #tpu.memory_space<vmem>>) attributes {dimension_semantics = [#tpu.dimension_semantics<arbitrary>], iteration_bounds = array<i64: 1>, scalar_prefetch = 0 : i64, scratch_operands = 0 : i64, tpu.core_type = #tpu.core_type<tc>, window_params = [{pipeline_mode = #tpu.pipeline_mode<synchronous>, transform_indices = @transform_0, window_bounds = array<i64: 8, 21>}, {pipeline_mode = #tpu.pipeline_mode<synchronous>, transform_indices = @transform_1, window_bounds = array<i64: 8, 21>}]} {
    %c0 = arith.constant 0 : index
    %c0_0 = arith.constant 0 : index
    %0 = vector.load %arg1[%c0, %c0_0] : memref<8x21xf32, #tpu.memory_space<vmem>>, vector<8x21xf32>
    %cst = arith.constant dense<0xFF800000> : vector<8xf32>
    %1 = vector.multi_reduction <maximumf>, %0, %cst [1] : vector<8x21xf32> to vector<8xf32>
    %2 = vector.shape_cast %1 : vector<8xf32> to vector<8x1xf32>
    %3 = vector.broadcast %2 : vector<8x1xf32> to vector<8x21xf32>
    %4 = arith.subf %0, %3 : vector<8x21xf32>
    %5 = math.exp %4 : vector<8x21xf32>
    %cst_1 = arith.constant dense<0.000000e+00> : vector<8xf32>
    %6 = vector.multi_reduction <add>, %5, %cst_1 [1] : vector<8x21xf32> to vector<8xf32>
    %7 = vector.shape_cast %6 : vector<8xf32> to vector<8x1xf32>
    %8 = vector.broadcast %7 : vector<8x1xf32> to vector<8x21xf32>
    %9 = arith.divf %5, %8 : vector<8x21xf32>
    %c0_2 = arith.constant 0 : index
    %c0_3 = arith.constant 0 : index
    %10 = vector.load %arg2[%c0_2, %c0_3] : memref<8x21xf32, #tpu.memory_space<vmem>>, vector<8x21xf32>
    tpu.vector_store %arg2[%c0_2, %c0_3], %9 {strides = array<i32>} : memref<8x21xf32, #tpu.memory_space<vmem>>, vector<8x21xf32>,
    return
  }
  func.func @transform_0(%arg0: i32) -> (i32, i32) {
    %c0_i32 = arith.constant 0 : i32
    %c0_i32_0 = arith.constant 0 : i32
    %c0_i32_1 = arith.constant 0 : i32
    return %c0_i32, %c0_i32_0 : i32, i32
  }
  func.func @transform_1(%arg0: i32) -> (i32, i32) {
    %c0_i32 = arith.constant 0 : i32
    %c0_i32_0 = arith.constant 0 : i32
    %c0_i32_1 = arith.constant 0 : i32
    return %c0_i32, %c0_i32_0 : i32, i32
  }
}

</mosaic_0001>

<bundles_post_ra>
// kernel: faster_rcnn_forward.11
= control target key start
LH: loop header
LB: loop body
LE: loop exit
PB: predicated region body
PF: predicated region fallthrough
CT: control target
= control target key end

     0   :  { %s2254_s12 = smov 0   ;;  %s2256_s13 = smov 0   ;;  %s2610_s0 = inlined_call_operand.vmem [shape: bf16[1024,256], index: 0, kind: input, shape index: {}]   ;;  %s2611_s1 = inlined_call_operand.vmem [shape: bf16[256,128], index: 1, kind: input, shape index: {}]   ;;  %s2612_s2 = inlined_call_operand.vmem [shape: f32[1,128], index: 2, kind: input, shape index: {}]   ;;  %s2613_s3 = inlined_call_operand.vmem [shape: f32[1024,128], index: 3, kind: output, shape index: {}]  }
   0x1   :  { %s2258_s14 = smov 0  }
   0x2 LB: > { %s32_s15 = sadd.s32 1, %s2228_s13  ;;  %p1760_p0 = scmp.ge.s32.totalorder %s2232_s14, 1  ;;  %s2232_s14 = sphi %s2258_s14, %s13_s14   ;;  %s2228_s13 = sphi %s2256_s13, %s2615_s13   ;;  %s2224_s12 = sphi %s2254_s12, %s2614_s12  }
   0x3   : > { %p34_p1 = scmp.ge.s32.totalorder %s32_s15, 2  ;;  %p191_p2 = scmp.lt.s32.totalorder %s2232_s14, 3 }
   0x5   : > { %s2617_s15 = smov (%p34_p1, %s32_s15), 0  ;;  %p192_p3 = pnand %p1760_p0, %p191_p2 }
   0x6   : > { %s1761_s28 = sshll.u32 (!%p192_p3), %s2224_s12, 6 }
   0x7   : > { %195 = sbr.rel (%p192_p3) target bundleno = 432 (0x1b0), region = 32  ;;  %p236_p4 = scmp.lt.s32.totalorder (!%p192_p3), %s1761_s28, 127 }
   0xc   : > { %v2160_v0 = vld [vmem:[%s2611_s1 + $0x38] sm:$0xff]  ;;  %v2159_v2 = vld [vmem:[%s2611_s1 + $0x30] sm:$0xff]  ;;  %v2158_v4 = vld [vmem:[%s2611_s1 + $0x28] sm:$0xff]  ;;  %s2619_s28 = smov (!%p236_p4, %s1761_s28), 127 }
   0xd   : > { %v2168_v1 = vld [vmem:[%s2611_s1 + $0x78] sm:$0xff]  ;;  %911 = vmatpush.bf16.msra.mxu0 %v2160_v0  ;;  %2169 = vmatpush.bf16.msra.mxu2 %v2160_v0  ;;  %v2167_v3 = vld [vmem:[%s2611_s1 + $0x70] sm:$0xff]  ;;  %v2166_v5 = vld [vmem:[%s2611_s1 + $0x68] sm:$0xff]  ;;  %s2088_s17 = sshll.u32 %s2619_s28, 3 }
   0xe   : > { %1080 = vmatpush.bf16.msra.mxu1 %v2168_v1  ;;  %2177 = vmatpush.bf16.msra.mxu3 %v2168_v1  ;;  %v2157_v6 = vld [vmem:[%s2611_s1 + $0x20] sm:$0xff]  ;;  %v2156_v8 = vld [vmem:[%s2611_s1 + $0x18] sm:$0xff]  ;;  %v2155_v10 = vld [vmem:[%s2611_s1 + $0x10] sm:$0xff]  ;;  %s2322_s22 = scalar_lea.vmem %s2610_s0, %s2088_s17  ;;  %s2416_s7 = scalar_lea.vmem %s2613_s3, %s2088_s17 }
   0xf   : > { %v2165_v7 = vld [vmem:[%s2611_s1 + $0x60] sm:$0xff]  ;;  %v2164_v9 = vld [vmem:[%s2611_s1 + $0x58] sm:$0xff]  ;;  %v2163_v11 = vld [vmem:[%s2611_s1 + $0x50] sm:$0xff] }
  0x10   : > { %v2154_v12 = vld [vmem:[%s2611_s1 + $0x8] sm:$0xff]  ;;  %v2153_v14 = vld [vmem:[%s2611_s1] sm:$0xff]  ;;  %v1776_v28 = vld [vmem:[%s2322_s22 + $0x10] sm:$0xf] }
  0x11   : > { %912 = vmatpush.bf16.msra.mxu0 %v2159_v2  ;;  %2170 = vmatpush.bf16.msra.mxu2 %v2159_v2  ;;  %v2162_v13 = vld [vmem:[%s2611_s1 + $0x48] sm:$0xff]  ;;  %v2161_v15 = vld [vmem:[%s2611_s1 + $0x40] sm:$0xff]  ;;  %v2092_v29 = vld [vmem:[%s2322_s22 + $0x14] sm:$0xf0] }
  0x12   : > { %1081 = vmatpush.bf16.msra.mxu1 %v2167_v3  ;;  %2178 = vmatpush.bf16.msra.mxu3 %v2167_v3  ;;  %v1768_v16 = vld [vmem:[%s2322_s22] sm:$0xf]  ;;  %v2090_v17 = vld [vmem:[%s2322_s22 + $0x4] sm:$0xf0]  ;;  %v2089_v20 = vld [vmem:[%s2322_s22 + $0x4] sm:$0xf]  ;;  %v1777_v36 = vor.u32 %v2092_v29, %v1776_v28 }
  0x13   : > { %v1896_v18 = vld [vmem:[%s2322_s22 + $0x100] sm:$0xf]  ;;  %v2122_v19 = vld [vmem:[%s2322_s22 + $0x104] sm:$0xf0]  ;;  %v1770_v21 = vld [vmem:[%s2322_s22 + $0x8] sm:$0xf0]  ;;  %v1769_v24 = vor.u32 %v2090_v17, %v1768_v16 }
  0x14   : > { %v2121_v22 = vld [vmem:[%s2322_s22 + $0x104] sm:$0xf]  ;;  %v1898_v23 = vld [vmem:[%s2322_s22 + $0x108] sm:$0xf0]  ;;  %v1897_v25 = vor.u32 %v2122_v19, %v1896_v18  ;;  %v1773_v26 = vor.u32 %v2089_v20, %v1770_v21  ;;  %v1904_v30 = vld [vmem:[%s2322_s22 + $0x110] sm:$0xf] }
  0x15   : > { %913 = vmatpush.bf16.msra.mxu0 %v2158_v4  ;;  %2171 = vmatpush.bf16.msra.mxu2 %v2158_v4  ;;  %v1901_v27 = vor.u32 %v2121_v22, %v1898_v23  ;;  %v2124_v31 = vld [vmem:[%s2322_s22 + $0x114] sm:$0xf0]  ;;  %v2091_v32 = vld [vmem:[%s2322_s22 + $0x14] sm:$0xf]  ;;  %v1778_v33 = vld [vmem:[%s2322_s22 + $0x18] sm:$0xf0] }
  0x16   : > { %1082 = vmatpush.bf16.msra.mxu1 %v2166_v5  ;;  %2179 = vmatpush.bf16.msra.mxu3 %v2166_v5  ;;  %v2123_v34 = vld [vmem:[%s2322_s22 + $0x114] sm:$0xf]  ;;  %v1906_v35 = vld [vmem:[%s2322_s22 + $0x118] sm:$0xf0]  ;;  %v1905_v37 = vor.u32 %v2124_v31, %v1904_v30  ;;  %v1781_v38 = vor.u32 %v2091_v32, %v1778_v33  ;;  %v1784_v40 = vld [vmem:[%s2322_s22 + $0x20] sm:$0xf] }
  0x17   : > { %v1909_v39 = vor.u32 %v2123_v34, %v1906_v35  ;;  %v2094_v41 = vld [vmem:[%s2322_s22 + $0x24] sm:$0xf0]  ;;  %v1912_v42 = vld [vmem:[%s2322_s22 + $0x120] sm:$0xf]  ;;  %v2093_v44 = vld [vmem:[%s2322_s22 + $0x24] sm:$0xf] }
  0x18   : > { %v2126_v43 = vld [vmem:[%s2322_s22 + $0x124] sm:$0xf0]  ;;  %v1786_v45 = vld [vmem:[%s2322_s22 + $0x28] sm:$0xf0]  ;;  %v2125_v46 = vld [vmem:[%s2322_s22 + $0x124] sm:$0xf]  ;;  %v1785_v48 = vor.u32 %v2094_v41, %v1784_v40 }
  0x19   : > { %914 = vmatpush.bf16.msra.mxu0 %v2157_v6  ;;  %2172 = vmatpush.bf16.msra.mxu2 %v2157_v6  ;;  %v1914_v47 = vld [vmem:[%s2322_s22 + $0x128] sm:$0xf0]  ;;  %v1913_v49 = vor.u32 %v2126_v43, %v1912_v42  ;;  %v1789_v50 = vor.u32 %v2093_v44, %v1786_v45  ;;  %v1792_v52 = vld [vmem:[%s2322_s22 + $0x30] sm:$0xf]  ;;  %v2096_v53 = vld [vmem:[%s2322_s22 + $0x34] sm:$0xf0] }
  0x1a   : > { %1083 = vmatpush.bf16.msra.mxu1 %v2165_v7  ;;  %2180 = vmatpush.bf16.msra.mxu3 %v2165_v7  ;;  %v1917_v51 = vor.u32 %v2125_v46, %v1914_v47  ;;  %v1920_v54 = vld [vmem:[%s2322_s22 + $0x130] sm:$0xf]  ;;  %v2128_v55 = vld [vmem:[%s2322_s22 + $0x134] sm:$0xf0]  ;;  %v2095_v56 = vld [vmem:[%s2322_s22 + $0x34] sm:$0xf]  ;;  %v1793_v60 = vor.u32 %v2096_v53, %v1792_v52 }
  0x1b   : > { %v1794_v57 = vld [vmem:[%s2322_s22 + $0x38] sm:$0xf0]  ;;  %v2127_v58 = vld [vmem:[%s2322_s22 + $0x134] sm:$0xf]  ;;  %v1921_v61 = vor.u32 %v2128_v55, %v1920_v54  ;;  %v1800_v0 = vld [vmem:[%s2322_s22 + $0x40] sm:$0xf] }
  0x1c   : > { %v1922_v59 = vld [vmem:[%s2322_s22 + $0x138] sm:$0xf0]  ;;  %v1797_v62 = vor.u32 %v2095_v56, %v1794_v57  ;;  %v2098_v1 = vld [vmem:[%s2322_s22 + $0x44] sm:$0xf0]  ;;  %v1928_v2 = vld [vmem:[%s2322_s22 + $0x140] sm:$0xf] }
  0x1d   : > { %915 = vmatpush.bf16.msra.mxu0 %v2156_v8  ;;  %2173 = vmatpush.bf16.msra.mxu2 %v2156_v8  ;;  %v1925_v63 = vor.u32 %v2127_v58, %v1922_v59  ;;  %v2130_v3 = vld [vmem:[%s2322_s22 + $0x144] sm:$0xf0]  ;;  %v2097_v4 = vld [vmem:[%s2322_s22 + $0x44] sm:$0xf]  ;;  %v1802_v5 = vld [vmem:[%s2322_s22 + $0x48] sm:$0xf0]  ;;  %v1801_v8 = vor.u32 %v2098_v1, %v1800_v0 }
  0x1e   : > { %1084 = vmatpush.bf16.msra.mxu1 %v2164_v9  ;;  %2181 = vmatpush.bf16.msra.mxu3 %v2164_v9  ;;  %v2129_v6 = vld [vmem:[%s2322_s22 + $0x144] sm:$0xf]  ;;  %v1930_v7 = vld [vmem:[%s2322_s22 + $0x148] sm:$0xf0]  ;;  %v1929_v9 = vor.u32 %v2130_v3, %v1928_v2  ;;  %v2099_v16 = vld [vmem:[%s2322_s22 + $0x54] sm:$0xf] }
  0x1f   : > { %v1810_v17 = vld [vmem:[%s2322_s22 + $0x58] sm:$0xf0]  ;;  %v2131_v18 = vld [vmem:[%s2322_s22 + $0x154] sm:$0xf]  ;;  %v2101_v28 = vld [vmem:[%s2322_s22 + $0x64] sm:$0xf] }
  0x20   : > { %v1938_v19 = vld [vmem:[%s2322_s22 + $0x158] sm:$0xf0]  ;;  %v1813_v22 = vor.u32 %v2099_v16, %v1810_v17  ;;  %v1818_v29 = vld [vmem:[%s2322_s22 + $0x68] sm:$0xf0]  ;;  %v2133_v30 = vld [vmem:[%s2322_s22 + $0x164] sm:$0xf] }
  0x21   : > { %916 = vmatpush.bf16.msra.mxu0 %v2155_v10  ;;  %2174 = vmatpush.bf16.msra.mxu2 %v2155_v10  ;;  %v1805_v10 = vor.u32 %v2097_v4, %v1802_v5  ;;  %v1941_v23 = vor.u32 %v2131_v18, %v1938_v19  ;;  %v1946_v31 = vld [vmem:[%s2322_s22 + $0x168] sm:$0xf0]  ;;  %v1821_v34 = vor.u32 %v2101_v28, %v1818_v29  ;;  %v2103_v40 = vld [vmem:[%s2322_s22 + $0x74] sm:$0xf]  ;;  %v1826_v41 = vld [vmem:[%s2322_s22 + $0x78] sm:$0xf0] }
  0x22   : > { %1085 = vmatpush.bf16.msra.mxu1 %v2163_v11  ;;  %2182 = vmatpush.bf16.msra.mxu3 %v2163_v11  ;;  %v1933_v11 = vor.u32 %v2129_v6, %v1930_v7  ;;  %v1949_v35 = vor.u32 %v2133_v30, %v1946_v31  ;;  %v2135_v42 = vld [vmem:[%s2322_s22 + $0x174] sm:$0xf]  ;;  %v1954_v43 = vld [vmem:[%s2322_s22 + $0x178] sm:$0xf0]  ;;  %v1829_v46 = vor.u32 %v2103_v40, %v1826_v41  ;;  %v2105_v52 = vld [vmem:[%s2322_s22 + $0x84] sm:$0xf] }
  0x23   : > { %v1957_v47 = vor.u32 %v2135_v42, %v1954_v43  ;;  %v1834_v53 = vld [vmem:[%s2322_s22 + $0x88] sm:$0xf0]  ;;  %v2137_v54 = vld [vmem:[%s2322_s22 + $0x184] sm:$0xf]  ;;  %v2408_v59 = vld [vmem:[%s2612_s2] ss:$0 sm:$0xff] }
  0x24   : > { %v1962_v55 = vld [vmem:[%s2322_s22 + $0x188] sm:$0xf0]  ;;  %v1842_v16 = vld [vmem:[%s2322_s22 + $0x98] sm:$0xf0]  ;;  %v2139_v17 = vld [vmem:[%s2322_s22 + $0x194] sm:$0xf] }
  0x25   : > { %917 = vmatpush.bf16.msra.mxu0 %v2154_v12  ;;  %2175 = vmatpush.bf16.msra.mxu2 %v2154_v12  ;;  %v1808_v12 = vld [vmem:[%s2322_s22 + $0x50] sm:$0xf]  ;;  %v1970_v18 = vld [vmem:[%s2322_s22 + $0x198] sm:$0xf0]  ;;  %v1848_v41 = vld [vmem:[%s2322_s22 + $0xa0] sm:$0xf] }
  0x26   : > { %1086 = vmatpush.bf16.msra.mxu1 %v2162_v13  ;;  %2183 = vmatpush.bf16.msra.mxu3 %v2162_v13  ;;  %v2100_v13 = vld [vmem:[%s2322_s22 + $0x54] sm:$0xf0]  ;;  %v2110_v42 = vld [vmem:[%s2322_s22 + $0xa4] sm:$0xf0]  ;;  %v1976_v43 = vld [vmem:[%s2322_s22 + $0x1a0] sm:$0xf] }
  0x27   : > { %v1809_v20 = vor.u32 %v2100_v13, %v1808_v12 }
  0x29   : > { %918 = vmatpush.bf16.msra.mxu0 %v2153_v14  ;;  %2176 = vmatpush.bf16.msra.mxu2 %v2153_v14  ;;  %v1936_v14 = vld [vmem:[%s2322_s22 + $0x150] sm:$0xf] }
  0x2a   : > { %1087 = vmatpush.bf16.msra.mxu1 %v2161_v15  ;;  %2184 = vmatpush.bf16.msra.mxu3 %v2161_v15  ;;  %v2132_v15 = vld [vmem:[%s2322_s22 + $0x154] sm:$0xf0] }
  0x2b   : > { %v1937_v21 = vor.u32 %v2132_v15, %v1936_v14  ;;  %v2140_v14 = vld [vmem:[%s2322_s22 + $0x194] sm:$0xf0]  ;;  %v2107_v15 = vld [vmem:[%s2322_s22 + $0x94] sm:$0xf] }
  0x2c   : > { %919 = vmatmul.bf16.vlgmr.msra.gmra.mxu0 %v1769_v24  ;;  %999 = vmatmul.bf16.vlgmr.msra.gmra.mxu2 %v1897_v25  ;;  %v1816_v24 = vld [vmem:[%s2322_s22 + $0x60] sm:$0xf]  ;;  %v2102_v25 = vld [vmem:[%s2322_s22 + $0x64] sm:$0xf0] }
  0x2d   : > { %1088 = vmatmul.bf16.vlgmr.msra.gmra.mxu1 %v1773_v26  ;;  %1168 = vmatmul.bf16.vlgmr.msra.gmra.mxu3 %v1901_v27  ;;  %v1944_v26 = vld [vmem:[%s2322_s22 + $0x160] sm:$0xf]  ;;  %v2134_v27 = vld [vmem:[%s2322_s22 + $0x164] sm:$0xf0]  ;;  %v1817_v32 = vor.u32 %v2102_v25, %v1816_v24 }
  0x2e   : > { %v1945_v33 = vor.u32 %v2134_v27, %v1944_v26  ;;  %v1845_v26 = vor.u32 %v2107_v15, %v1842_v16  ;;  %v1973_v27 = vor.u32 %v2139_v17, %v1970_v18  ;;  %v2144_v15 = vld [vmem:[%s2322_s22 + $0x1b4] sm:$0xf0]  ;;  %v2111_v16 = vld [vmem:[%s2322_s22 + $0xb4] sm:$0xf]  ;;  %v1858_v17 = vld [vmem:[%s2322_s22 + $0xb8] sm:$0xf0] }
  0x2f   : > { %v2143_v18 = vld [vmem:[%s2322_s22 + $0x1b4] sm:$0xf] }
  0x3c   : > { %924 = vmatmul.bf16.gmra.mxu0 %v1777_v36  ;;  %1004 = vmatmul.bf16.gmra.mxu2 %v1905_v37  ;;  %v1824_v36 = vld [vmem:[%s2322_s22 + $0x70] sm:$0xf]  ;;  %v2104_v37 = vld [vmem:[%s2322_s22 + $0x74] sm:$0xf0] }
  0x3d   : > { %1093 = vmatmul.bf16.gmra.mxu1 %v1781_v38  ;;  %1173 = vmatmul.bf16.gmra.mxu3 %v1909_v39  ;;  %v1952_v38 = vld [vmem:[%s2322_s22 + $0x170] sm:$0xf]  ;;  %v2136_v39 = vld [vmem:[%s2322_s22 + $0x174] sm:$0xf0]  ;;  %v1825_v44 = vor.u32 %v2104_v37, %v1824_v36 }
  0x3e   : > { %v1953_v45 = vor.u32 %v2136_v39, %v1952_v38 }
  0x4c   : > { %929 = vmatmul.bf16.gmra.mxu0 %v1785_v48  ;;  %1009 = vmatmul.bf16.gmra.mxu2 %v1913_v49  ;;  %v1832_v48 = vld [vmem:[%s2322_s22 + $0x80] sm:$0xf]  ;;  %v2106_v49 = vld [vmem:[%s2322_s22 + $0x84] sm:$0xf0] }
  0x4d   : > { %1098 = vmatmul.bf16.gmra.mxu1 %v1789_v50  ;;  %1178 = vmatmul.bf16.gmra.mxu3 %v1917_v51  ;;  %v1960_v50 = vld [vmem:[%s2322_s22 + $0x180] sm:$0xf]  ;;  %v2138_v51 = vld [vmem:[%s2322_s22 + $0x184] sm:$0xf0]  ;;  %v1833_v56 = vor.u32 %v2106_v49, %v1832_v48  ;;  %v1850_v48 = vld [vmem:[%s2322_s22 + $0xa8] sm:$0xf0] }
  0x4e   : > { %v1961_v57 = vor.u32 %v2138_v51, %v1960_v50  ;;  %v2141_v49 = vld [vmem:[%s2322_s22 + $0x1a4] sm:$0xf]  ;;  %v1978_v50 = vld [vmem:[%s2322_s22 + $0x1a8] sm:$0xf0] }
  0x5c   : > { %934 = vmatmul.bf16.gmra.mxu0 %v1793_v60  ;;  %1014 = vmatmul.bf16.gmra.mxu2 %v1921_v61  ;;  %v1837_v60 = vor.u32 %v2105_v52, %v1834_v53  ;;  %v1965_v61 = vor.u32 %v2137_v54, %v1962_v55  ;;  %v1849_v54 = vor.u32 %v2110_v42, %v1848_v41  ;;  %v1864_v42 = vld [vmem:[%s2322_s22 + $0xc0] sm:$0xf] }
  0x5d   : > { %1103 = vmatmul.bf16.gmra.mxu1 %v1797_v62  ;;  %1183 = vmatmul.bf16.gmra.mxu3 %v1925_v63 }
  0x6c   : > { %939 = vmatmul.bf16.gmra.mxu0 %v1801_v8  ;;  %1019 = vmatmul.bf16.gmra.mxu2 %v1929_v9  ;;  %v1840_v9 = vld [vmem:[%s2322_s22 + $0x90] sm:$0xf] }
  0x6d   : > { %1108 = vmatmul.bf16.gmra.mxu1 %v1805_v10  ;;  %1188 = vmatmul.bf16.gmra.mxu3 %v1933_v11  ;;  %v2108_v10 = vld [vmem:[%s2322_s22 + $0x94] sm:$0xf0]  ;;  %v1968_v11 = vld [vmem:[%s2322_s22 + $0x190] sm:$0xf] }
  0x7c   : > { %944 = vmatmul.bf16.gmra.mxu0 %v1809_v20  ;;  %1024 = vmatmul.bf16.gmra.mxu2 %v1937_v21 }
  0x7d   : > { %1113 = vmatmul.bf16.gmra.mxu1 %v1813_v22  ;;  %1193 = vmatmul.bf16.gmra.mxu3 %v1941_v23  ;;  %v1841_v22 = vor.u32 %v2108_v10, %v1840_v9  ;;  %v1969_v23 = vor.u32 %v2140_v14, %v1968_v11  ;;  %v1856_v10 = vld [vmem:[%s2322_s22 + $0xb0] sm:$0xf]  ;;  %v2112_v11 = vld [vmem:[%s2322_s22 + $0xb4] sm:$0xf0] }
  0x8c   : > { %949 = vmatmul.bf16.gmra.mxu0 %v1817_v32  ;;  %1029 = vmatmul.bf16.gmra.mxu2 %v1945_v33 }
  0x8d   : > { %1118 = vmatmul.bf16.gmra.mxu1 %v1821_v34  ;;  %1198 = vmatmul.bf16.gmra.mxu3 %v1949_v35 }
  0x9c   : > { %954 = vmatmul.bf16.gmra.mxu0 %v1825_v44  ;;  %1034 = vmatmul.bf16.gmra.mxu2 %v1953_v45 }
  0x9d   : > { %1123 = vmatmul.bf16.gmra.mxu1 %v1829_v46  ;;  %1203 = vmatmul.bf16.gmra.mxu3 %v1957_v47  ;;  %v2142_v46 = vld [vmem:[%s2322_s22 + $0x1a4] sm:$0xf0]  ;;  %v2109_v47 = vld [vmem:[%s2322_s22 + $0xa4] sm:$0xf] }
  0x9e   : > { %v1977_v55 = vor.u32 %v2142_v46, %v1976_v43  ;;  %v2114_v43 = vld [vmem:[%s2322_s22 + $0xc4] sm:$0xf0] }
  0xa9   : > { %v920_v58 = vpop.f32.mrf.mxu0 }
  0xaa   : > { %v1089_v62 = vpop.f32.mrf.mxu1 }
  0xab   : > { %v1090_v63 = vadd.f32 %v1089_v62, %v920_v58  ;;  %v1853_v58 = vor.u32 %v2109_v47, %v1850_v48  ;;  %v2146_v47 = vld [vmem:[%s2322_s22 + $0x1c4] sm:$0xf0]  ;;  %v2113_v48 = vld [vmem:[%s2322_s22 + $0xc4] sm:$0xf] }
  0xac   : > { %959 = vmatmul.bf16.gmra.mxu0 %v1833_v56  ;;  %1039 = vmatmul.bf16.gmra.mxu2 %v1961_v57 }
  0xad   : > { %v1448_v0 = vadd.f32 %v2408_v59, %v1090_v63  ;;  %1128 = vmatmul.bf16.gmra.mxu1 %v1837_v60  ;;  %1208 = vmatmul.bf16.gmra.mxu3 %v1965_v61  ;;  %v1981_v60 = vor.u32 %v2141_v49, %v1978_v50  ;;  %v1866_v49 = vld [vmem:[%s2322_s22 + $0xc8] sm:$0xf0]  ;;  %v2145_v50 = vld [vmem:[%s2322_s22 + $0x1c4] sm:$0xf] }
  0xaf   : > { %v1512_v1 = vmax.f32 %v1448_v0, 0.0  ;;  %v1000_v2 = vpop.f32.mrf.mxu2 }
  0xb0   : > { %v1169_v3 = vpop.f32.mrf.mxu3 }
  0xb1   : > { %1576 = vst [vmem:[%s2416_s7] sm:$0xff] %v1512_v1  ;;  %v1170_v4 = vadd.f32 %v1169_v3, %v1000_v2  ;;  %v922_v5 = vpop.f32.mrf.mxu0 }
  0xb2   : > { %v1091_v6 = vpop.f32.mrf.mxu1 }
  0xb3   : > { %v1480_v7 = vadd.f32 %v2408_v59, %v1170_v4  ;;  %v1092_v8 = vadd.f32 %v1091_v6, %v922_v5 }
  0xb5   : > { %v1544_v12 = vmax.f32 %v1480_v7, 0.0  ;;  %v1449_v13 = vadd.f32 %v2408_v59, %v1092_v8 }
  0xb7   : > { %1608 = vst [vmem:[%s2416_s7 + $0x100] sm:$0xff] %v1544_v12  ;;  %v1513_v19 = vmax.f32 %v1449_v13, 0.0  ;;  %v1002_v20 = vpop.f32.mrf.mxu2  ;;  %v1984_v12 = vld [vmem:[%s2322_s22 + $0x1b0] sm:$0xf] }
  0xb8   : > { %v1171_v21 = vpop.f32.mrf.mxu3 }
  0xb9   : > { %1577 = vst [vmem:[%s2416_s7 + $0x8] sm:$0xff] %v1513_v19  ;;  %v1172_v24 = vadd.f32 %v1171_v21, %v1002_v20  ;;  %v925_v25 = vpop.f32.mrf.mxu0  ;;  %v1986_v19 = vld [vmem:[%s2322_s22 + $0x1b8] sm:$0xf0] }
  0xba   : > { %v1094_v28 = vpop.f32.mrf.mxu1 }
  0xbb   : > { %v1481_v29 = vadd.f32 %v2408_v59, %v1172_v24  ;;  %v1095_v30 = vadd.f32 %v1094_v28, %v925_v25  ;;  %v1985_v24 = vor.u32 %v2144_v15, %v1984_v12  ;;  %v1989_v28 = vor.u32 %v2143_v18, %v1986_v19  ;;  %v2116_v12 = vld [vmem:[%s2322_s22 + $0xd4] sm:$0xf0]  ;;  %v1874_v18 = vld [vmem:[%s2322_s22 + $0xd8] sm:$0xf0]  ;;  %v2147_v19 = vld [vmem:[%s2322_s22 + $0x1d4] sm:$0xf] }
  0xbc   : > { %964 = vmatmul.bf16.gmra.mxu0 %v1841_v22  ;;  %1044 = vmatmul.bf16.gmra.mxu2 %v1969_v23  ;;  %v1857_v23 = vor.u32 %v2112_v11, %v1856_v10  ;;  %v1872_v11 = vld [vmem:[%s2322_s22 + $0xd0] sm:$0xf] }
  0xbd   : > { %v1545_v31 = vmax.f32 %v1481_v29, 0.0  ;;  %v1450_v32 = vadd.f32 %v2408_v59, %v1095_v30  ;;  %1133 = vmatmul.bf16.gmra.mxu1 %v1845_v26  ;;  %1213 = vmatmul.bf16.gmra.mxu3 %v1973_v27  ;;  %v1861_v27 = vor.u32 %v2111_v16, %v1858_v17  ;;  %v2148_v16 = vld [vmem:[%s2322_s22 + $0x1d4] sm:$0xf0]  ;;  %v2115_v17 = vld [vmem:[%s2322_s22 + $0xd4] sm:$0xf] }
  0xbf   : > { %1609 = vst [vmem:[%s2416_s7 + $0x108] sm:$0xff] %v1545_v31  ;;  %v1514_v33 = vmax.f32 %v1450_v32, 0.0  ;;  %v1005_v34 = vpop.f32.mrf.mxu2 }
  0xc0   : > { %v1174_v35 = vpop.f32.mrf.mxu3 }
  0xc1   : > { %1578 = vst [vmem:[%s2416_s7 + $0x10] sm:$0xff] %v1514_v33  ;;  %v1175_v36 = vadd.f32 %v1174_v35, %v1005_v34  ;;  %v927_v37 = vpop.f32.mrf.mxu0 }
  0xc2   : > { %v1096_v38 = vpop.f32.mrf.mxu1 }
  0xc3   : > { %v1482_v39 = vadd.f32 %v2408_v59, %v1175_v36  ;;  %v1097_v40 = vadd.f32 %v1096_v38, %v927_v37 }
  0xc5   : > { %v1546_v44 = vmax.f32 %v1482_v39, 0.0  ;;  %v1451_v45 = vadd.f32 %v2408_v59, %v1097_v40 }
  0xc7   : > { %1610 = vst [vmem:[%s2416_s7 + $0x110] sm:$0xff] %v1546_v44  ;;  %v1515_v51 = vmax.f32 %v1451_v45, 0.0  ;;  %v1007_v52 = vpop.f32.mrf.mxu2  ;;  %v1992_v44 = vld [vmem:[%s2322_s22 + $0x1c0] sm:$0xf] }
  0xc8   : > { %v1176_v53 = vpop.f32.mrf.mxu3 }
  0xc9   : > { %1579 = vst [vmem:[%s2416_s7 + $0x18] sm:$0xff] %v1515_v51  ;;  %v1177_v56 = vadd.f32 %v1176_v53, %v1007_v52  ;;  %v930_v57 = vpop.f32.mrf.mxu0  ;;  %v1994_v51 = vld [vmem:[%s2322_s22 + $0x1c8] sm:$0xf0] }
  0xca   : > { %v1099_v61 = vpop.f32.mrf.mxu1 }
  0xcb   : > { %v1483_v62 = vadd.f32 %v2408_v59, %v1177_v56  ;;  %v1100_v63 = vadd.f32 %v1099_v61, %v930_v57  ;;  %v1993_v56 = vor.u32 %v2146_v47, %v1992_v44  ;;  %v1997_v61 = vor.u32 %v2145_v50, %v1994_v51  ;;  %v2118_v44 = vld [vmem:[%s2322_s22 + $0xe4] sm:$0xf0]  ;;  %v1882_v50 = vld [vmem:[%s2322_s22 + $0xe8] sm:$0xf0]  ;;  %v2149_v51 = vld [vmem:[%s2322_s22 + $0x1e4] sm:$0xf] }
  0xcc   : > { %969 = vmatmul.bf16.gmra.mxu0 %v1849_v54  ;;  %1049 = vmatmul.bf16.gmra.mxu2 %v1977_v55  ;;  %v1865_v55 = vor.u32 %v2114_v43, %v1864_v42  ;;  %v1880_v43 = vld [vmem:[%s2322_s22 + $0xe0] sm:$0xf] }
  0xcd   : > { %v1547_v0 = vmax.f32 %v1483_v62, 0.0  ;;  %v1452_v1 = vadd.f32 %v2408_v59, %v1100_v63  ;;  %1138 = vmatmul.bf16.gmra.mxu1 %v1853_v58  ;;  %1218 = vmatmul.bf16.gmra.mxu3 %v1981_v60  ;;  %v1869_v60 = vor.u32 %v2113_v48, %v1866_v49  ;;  %v2150_v48 = vld [vmem:[%s2322_s22 + $0x1e4] sm:$0xf0]  ;;  %v2117_v49 = vld [vmem:[%s2322_s22 + $0xe4] sm:$0xf] }
  0xcf   : > { %1611 = vst [vmem:[%s2416_s7 + $0x118] sm:$0xff] %v1547_v0  ;;  %v1516_v2 = vmax.f32 %v1452_v1, 0.0  ;;  %v1010_v3 = vpop.f32.mrf.mxu2 }
  0xd0   : > { %v1179_v4 = vpop.f32.mrf.mxu3 }
  0xd1   : > { %1580 = vst [vmem:[%s2416_s7 + $0x20] sm:$0xff] %v1516_v2  ;;  %v1180_v5 = vadd.f32 %v1179_v4, %v1010_v3  ;;  %v932_v6 = vpop.f32.mrf.mxu0 }
  0xd2   : > { %v1101_v7 = vpop.f32.mrf.mxu1 }
  0xd3   : > { %v1484_v8 = vadd.f32 %v2408_v59, %v1180_v5  ;;  %v1102_v9 = vadd.f32 %v1101_v7, %v932_v6 }
  0xd5   : > { %v1548_v13 = vmax.f32 %v1484_v8, 0.0  ;;  %v1453_v14 = vadd.f32 %v2408_v59, %v1102_v9 }
  0xd7   : > { %1612 = vst [vmem:[%s2416_s7 + $0x120] sm:$0xff] %v1548_v13  ;;  %v1517_v20 = vmax.f32 %v1453_v14, 0.0  ;;  %v1012_v21 = vpop.f32.mrf.mxu2  ;;  %v2000_v13 = vld [vmem:[%s2322_s22 + $0x1d0] sm:$0xf] }
  0xd8   : > { %v1181_v22 = vpop.f32.mrf.mxu3 }
  0xd9   : > { %1581 = vst [vmem:[%s2416_s7 + $0x28] sm:$0xff] %v1517_v20  ;;  %v1182_v25 = vadd.f32 %v1181_v22, %v1012_v21  ;;  %v935_v26 = vpop.f32.mrf.mxu0  ;;  %v2002_v20 = vld [vmem:[%s2322_s22 + $0x1d8] sm:$0xf0] }
  0xda   : > { %v1104_v29 = vpop.f32.mrf.mxu1 }
  0xdb   : > { %v1485_v30 = vadd.f32 %v2408_v59, %v1182_v25  ;;  %v1105_v31 = vadd.f32 %v1104_v29, %v935_v26  ;;  %v2001_v25 = vor.u32 %v2148_v16, %v2000_v13  ;;  %v2005_v29 = vor.u32 %v2147_v19, %v2002_v20  ;;  %v2120_v13 = vld [vmem:[%s2322_s22 + $0xf4] sm:$0xf0]  ;;  %v1890_v19 = vld [vmem:[%s2322_s22 + $0xf8] sm:$0xf0]  ;;  %v2151_v20 = vld [vmem:[%s2322_s22 + $0x1f4] sm:$0xf] }
  0xdc   : > { %974 = vmatmul.bf16.gmra.mxu0 %v1857_v23  ;;  %1054 = vmatmul.bf16.gmra.mxu2 %v1985_v24  ;;  %v1873_v24 = vor.u32 %v2116_v12, %v1872_v11  ;;  %v1888_v12 = vld [vmem:[%s2322_s22 + $0xf0] sm:$0xf] }
  0xdd   : > { %v1549_v32 = vmax.f32 %v1485_v30, 0.0  ;;  %v1454_v33 = vadd.f32 %v2408_v59, %v1105_v31  ;;  %1143 = vmatmul.bf16.gmra.mxu1 %v1861_v27  ;;  %1223 = vmatmul.bf16.gmra.mxu3 %v1989_v28  ;;  %v1877_v28 = vor.u32 %v2115_v17, %v1874_v18  ;;  %v2152_v17 = vld [vmem:[%s2322_s22 + $0x1f4] sm:$0xf0]  ;;  %v2119_v18 = vld [vmem:[%s2322_s22 + $0xf4] sm:$0xf] }
  0xdf   : > { %1613 = vst [vmem:[%s2416_s7 + $0x128] sm:$0xff] %v1549_v32  ;;  %v1518_v34 = vmax.f32 %v1454_v33, 0.0  ;;  %v1015_v35 = vpop.f32.mrf.mxu2 }
  0xe0   : > { %v1184_v36 = vpop.f32.mrf.mxu3 }
  0xe1   : > { %1582 = vst [vmem:[%s2416_s7 + $0x30] sm:$0xff] %v1518_v34  ;;  %v1185_v37 = vadd.f32 %v1184_v36, %v1015_v35  ;;  %v937_v38 = vpop.f32.mrf.mxu0 }
  0xe2   : > { %v1106_v39 = vpop.f32.mrf.mxu1 }
  0xe3   : > { %v1486_v40 = vadd.f32 %v2408_v59, %v1185_v37  ;;  %v1107_v41 = vadd.f32 %v1106_v39, %v937_v38 }
  0xe5   : > { %v1550_v45 = vmax.f32 %v1486_v40, 0.0  ;;  %v1455_v46 = vadd.f32 %v2408_v59, %v1107_v41 }
  0xe7   : > { %1614 = vst [vmem:[%s2416_s7 + $0x130] sm:$0xff] %v1550_v45  ;;  %v1519_v52 = vmax.f32 %v1455_v46, 0.0  ;;  %v1017_v53 = vpop.f32.mrf.mxu2  ;;  %v2008_v45 = vld [vmem:[%s2322_s22 + $0x1e0] sm:$0xf] }
  0xe8   : > { %v1186_v54 = vpop.f32.mrf.mxu3 }
  0xe9   : > { %1583 = vst [vmem:[%s2416_s7 + $0x38] sm:$0xff] %v1519_v52  ;;  %v1187_v57 = vadd.f32 %v1186_v54, %v1017_v53  ;;  %v940_v58 = vpop.f32.mrf.mxu0  ;;  %v2010_v52 = vld [vmem:[%s2322_s22 + $0x1e8] sm:$0xf0] }
  0xea   : > { %v1109_v62 = vpop.f32.mrf.mxu1 }
  0xeb   : > { %v1487_v63 = vadd.f32 %v2408_v59, %v1187_v57  ;;  %v1110_v0 = vadd.f32 %v1109_v62, %v940_v58  ;;  %v2009_v57 = vor.u32 %v2150_v48, %v2008_v45  ;;  %v2013_v62 = vor.u32 %v2149_v51, %v2010_v52 }
  0xec   : > { %979 = vmatmul.bf16.gmra.mxu0 %v1865_v55  ;;  %1059 = vmatmul.bf16.gmra.mxu2 %v1993_v56  ;;  %v1881_v56 = vor.u32 %v2118_v44, %v1880_v43 }
  0xed   : > { %v1551_v1 = vmax.f32 %v1487_v63, 0.0  ;;  %v1456_v2 = vadd.f32 %v2408_v59, %v1110_v0  ;;  %1148 = vmatmul.bf16.gmra.mxu1 %v1869_v60  ;;  %1228 = vmatmul.bf16.gmra.mxu3 %v1997_v61  ;;  %v1885_v61 = vor.u32 %v2117_v49, %v1882_v50 }
  0xef   : > { %1615 = vst [vmem:[%s2416_s7 + $0x138] sm:$0xff] %v1551_v1  ;;  %v1520_v3 = vmax.f32 %v1456_v2, 0.0  ;;  %v1020_v4 = vpop.f32.mrf.mxu2 }
  0xf0   : > { %v1189_v5 = vpop.f32.mrf.mxu3 }
  0xf1   : > { %1584 = vst [vmem:[%s2416_s7 + $0x40] sm:$0xff] %v1520_v3  ;;  %v1190_v6 = vadd.f32 %v1189_v5, %v1020_v4  ;;  %v942_v7 = vpop.f32.mrf.mxu0 }
  0xf2   : > { %v1111_v8 = vpop.f32.mrf.mxu1 }
  0xf3   : > { %v1488_v9 = vadd.f32 %v2408_v59, %v1190_v6  ;;  %v1112_v10 = vadd.f32 %v1111_v8, %v942_v7 }
  0xf5   : > { %v1552_v14 = vmax.f32 %v1488_v9, 0.0  ;;  %v1457_v15 = vadd.f32 %v2408_v59, %v1112_v10 }
  0xf7   : > { %1616 = vst [vmem:[%s2416_s7 + $0x140] sm:$0xff] %v1552_v14  ;;  %v1521_v21 = vmax.f32 %v1457_v15, 0.0  ;;  %v1022_v22 = vpop.f32.mrf.mxu2  ;;  %v2016_v14 = vld [vmem:[%s2322_s22 + $0x1f0] sm:$0xf] }
  0xf8   : > { %v1191_v23 = vpop.f32.mrf.mxu3 }
  0xf9   : > { %1585 = vst [vmem:[%s2416_s7 + $0x48] sm:$0xff] %v1521_v21  ;;  %v1192_v26 = vadd.f32 %v1191_v23, %v1022_v22  ;;  %v945_v27 = vpop.f32.mrf.mxu0  ;;  %v2018_v21 = vld [vmem:[%s2322_s22 + $0x1f8] sm:$0xf0] }
  0xfa   : > { %v1114_v30 = vpop.f32.mrf.mxu1 }
  0xfb   : > { %v1489_v31 = vadd.f32 %v2408_v59, %v1192_v26  ;;  %v1115_v32 = vadd.f32 %v1114_v30, %v945_v27  ;;  %v2017_v26 = vor.u32 %v2152_v17, %v2016_v14  ;;  %v2021_v30 = vor.u32 %v2151_v20, %v2018_v21 }
  0xfc   : > { %984 = vmatmul.bf16.gmra.mxu0 %v1873_v24  ;;  %1064 = vmatmul.bf16.gmra.mxu2 %v2001_v25  ;;  %v1889_v25 = vor.u32 %v2120_v13, %v1888_v12 }
  0xfd   : > { %v1553_v33 = vmax.f32 %v1489_v31, 0.0  ;;  %v1458_v34 = vadd.f32 %v2408_v59, %v1115_v32  ;;  %1153 = vmatmul.bf16.gmra.mxu1 %v1877_v28  ;;  %1233 = vmatmul.bf16.gmra.mxu3 %v2005_v29  ;;  %v1893_v29 = vor.u32 %v2119_v18, %v1890_v19 }
  0xff   : > { %1617 = vst [vmem:[%s2416_s7 + $0x148] sm:$0xff] %v1553_v33  ;;  %v1522_v35 = vmax.f32 %v1458_v34, 0.0  ;;  %v1025_v36 = vpop.f32.mrf.mxu2 }
 0x100   : > { %v1194_v37 = vpop.f32.mrf.mxu3 }
 0x101   : > { %1586 = vst [vmem:[%s2416_s7 + $0x50] sm:$0xff] %v1522_v35  ;;  %v1195_v38 = vadd.f32 %v1194_v37, %v1025_v36  ;;  %v947_v39 = vpop.f32.mrf.mxu0 }
 0x102   : > { %v1116_v40 = vpop.f32.mrf.mxu1 }
 0x103   : > { %v1490_v41 = vadd.f32 %v2408_v59, %v1195_v38  ;;  %v1117_v42 = vadd.f32 %v1116_v40, %v947_v39 }
 0x105   : > { %v1554_v46 = vmax.f32 %v1490_v41, 0.0  ;;  %v1459_v47 = vadd.f32 %v2408_v59, %v1117_v42 }
 0x107   : > { %1618 = vst [vmem:[%s2416_s7 + $0x150] sm:$0xff] %v1554_v46  ;;  %v1523_v53 = vmax.f32 %v1459_v47, 0.0  ;;  %v1027_v54 = vpop.f32.mrf.mxu2 }
 0x108   : > { %v1196_v55 = vpop.f32.mrf.mxu3 }
 0x109   : > { %1587 = vst [vmem:[%s2416_s7 + $0x58] sm:$0xff] %v1523_v53  ;;  %v1197_v58 = vadd.f32 %v1196_v55, %v1027_v54  ;;  %v950_v60 = vpop.f32.mrf.mxu0 }
 0x10a   : > { %v1119_v63 = vpop.f32.mrf.mxu1 }
 0x10b   : > { %v1491_v0 = vadd.f32 %v2408_v59, %v1197_v58  ;;  %v1120_v1 = vadd.f32 %v1119_v63, %v950_v60 }
 0x10c   : > { %989 = vmatmul.bf16.gmra.mxu0 %v1881_v56  ;;  %1069 = vmatmul.bf16.gmra.mxu2 %v2009_v57 }
 0x10d   : > { %v1555_v2 = vmax.f32 %v1491_v0, 0.0  ;;  %v1460_v3 = vadd.f32 %v2408_v59, %v1120_v1  ;;  %1158 = vmatmul.bf16.gmra.mxu1 %v1885_v61  ;;  %1238 = vmatmul.bf16.gmra.mxu3 %v2013_v62 }
 0x10f   : > { %1619 = vst [vmem:[%s2416_s7 + $0x158] sm:$0xff] %v1555_v2  ;;  %v1524_v4 = vmax.f32 %v1460_v3, 0.0  ;;  %v1030_v5 = vpop.f32.mrf.mxu2 }
 0x110   : > { %v1199_v6 = vpop.f32.mrf.mxu3 }
 0x111   : > { %1588 = vst [vmem:[%s2416_s7 + $0x60] sm:$0xff] %v1524_v4  ;;  %v1200_v7 = vadd.f32 %v1199_v6, %v1030_v5  ;;  %v952_v8 = vpop.f32.mrf.mxu0 }
 0x112   : > { %v1121_v9 = vpop.f32.mrf.mxu1 }
 0x113   : > { %v1492_v10 = vadd.f32 %v2408_v59, %v1200_v7  ;;  %v1122_v11 = vadd.f32 %v1121_v9, %v952_v8 }
 0x115   : > { %v1556_v15 = vmax.f32 %v1492_v10, 0.0  ;;  %v1461_v16 = vadd.f32 %v2408_v59, %v1122_v11 }
 0x117   : > { %1620 = vst [vmem:[%s2416_s7 + $0x160] sm:$0xff] %v1556_v15  ;;  %v1525_v22 = vmax.f32 %v1461_v16, 0.0  ;;  %v1032_v23 = vpop.f32.mrf.mxu2 }
 0x118   : > { %v1201_v24 = vpop.f32.mrf.mxu3 }
 0x119   : > { %1589 = vst [vmem:[%s2416_s7 + $0x68] sm:$0xff] %v1525_v22  ;;  %v1202_v27 = vadd.f32 %v1201_v24, %v1032_v23  ;;  %v955_v28 = vpop.f32.mrf.mxu0 }
 0x11a   : > { %v1124_v31 = vpop.f32.mrf.mxu1 }
 0x11b   : > { %v1493_v32 = vadd.f32 %v2408_v59, %v1202_v27  ;;  %v1125_v33 = vadd.f32 %v1124_v31, %v955_v28 }
 0x11c   : > { %994 = vmatmul.bf16.gmra.mxu0 %v1889_v25  ;;  %1074 = vmatmul.bf16.gmra.mxu2 %v2017_v26 }
 0x11d   : > { %v1557_v34 = vmax.f32 %v1493_v32, 0.0  ;;  %v1462_v35 = vadd.f32 %v2408_v59, %v1125_v33  ;;  %1163 = vmatmul.bf16.gmra.mxu1 %v1893_v29  ;;  %1243 = vmatmul.bf16.gmra.mxu3 %v2021_v30 }
 0x11f   : > { %1621 = vst [vmem:[%s2416_s7 + $0x168] sm:$0xff] %v1557_v34  ;;  %v1526_v36 = vmax.f32 %v1462_v35, 0.0  ;;  %v1035_v37 = vpop.f32.mrf.mxu2 }
 0x120   : > { %v1204_v38 = vpop.f32.mrf.mxu3 }
 0x121   : > { %1590 = vst [vmem:[%s2416_s7 + $0x70] sm:$0xff] %v1526_v36  ;;  %v1205_v39 = vadd.f32 %v1204_v38, %v1035_v37  ;;  %v957_v40 = vpop.f32.mrf.mxu0 }
 0x122   : > { %v1126_v41 = vpop.f32.mrf.mxu1 }
 0x123   : > { %v1494_v42 = vadd.f32 %v2408_v59, %v1205_v39  ;;  %v1127_v43 = vadd.f32 %v1126_v41, %v957_v40 }
 0x125   : > { %v1558_v44 = vmax.f32 %v1494_v42, 0.0  ;;  %v1463_v45 = vadd.f32 %v2408_v59, %v1127_v43 }
 0x127   : > { %1622 = vst [vmem:[%s2416_s7 + $0x170] sm:$0xff] %v1558_v44  ;;  %v1527_v46 = vmax.f32 %v1463_v45, 0.0  ;;  %v1037_v47 = vpop.f32.mrf.mxu2 }
 0x128   : > { %v1206_v48 = vpop.f32.mrf.mxu3 }
 0x129   : > { %1591 = vst [vmem:[%s2416_s7 + $0x78] sm:$0xff] %v1527_v46  ;;  %v1207_v49 = vadd.f32 %v1206_v48, %v1037_v47  ;;  %v960_v50 = vpop.f32.mrf.mxu0 }
 0x12a   : > { %v1129_v51 = vpop.f32.mrf.mxu1 }
 0x12b   : > { %v1495_v52 = vadd.f32 %v2408_v59, %v1207_v49  ;;  %v1130_v53 = vadd.f32 %v1129_v51, %v960_v50 }
 0x12d   : > { %v1559_v54 = vmax.f32 %v1495_v52, 0.0  ;;  %v1464_v55 = vadd.f32 %v2408_v59, %v1130_v53 }
 0x12f   : > { %1623 = vst [vmem:[%s2416_s7 + $0x178] sm:$0xff] %v1559_v54  ;;  %v1528_v56 = vmax.f32 %v1464_v55, 0.0  ;;  %v1040_v57 = vpop.f32.mrf.mxu2 }
 0x130   : > { %v1209_v58 = vpop.f32.mrf.mxu3 }
 0x131   : > { %1592 = vst [vmem:[%s2416_s7 + $0x80] sm:$0xff] %v1528_v56  ;;  %v1210_v60 = vadd.f32 %v1209_v58, %v1040_v57  ;;  %v962_v61 = vpop.f32.mrf.mxu0 }
 0x132   : > { %v1131_v62 = vpop.f32.mrf.mxu1 }
 0x133   : > { %v1496_v63 = vadd.f32 %v2408_v59, %v1210_v60  ;;  %v1132_v0 = vadd.f32 %v1131_v62, %v962_v61 }
 0x135   : > { %v1560_v1 = vmax.f32 %v1496_v63, 0.0  ;;  %v1465_v2 = vadd.f32 %v2408_v59, %v1132_v0 }
 0x137   : > { %1624 = vst [vmem:[%s2416_s7 + $0x180] sm:$0xff] %v1560_v1  ;;  %v1529_v3 = vmax.f32 %v1465_v2, 0.0  ;;  %v1042_v4 = vpop.f32.mrf.mxu2 }
 0x138   : > { %v1211_v5 = vpop.f32.mrf.mxu3 }
 0x139   : > { %1593 = vst [vmem:[%s2416_s7 + $0x88] sm:$0xff] %v1529_v3  ;;  %v1212_v6 = vadd.f32 %v1211_v5, %v1042_v4  ;;  %v965_v7 = vpop.f32.mrf.mxu0 }
 0x13a   : > { %v1134_v8 = vpop.f32.mrf.mxu1 }
 0x13b   : > { %v1497_v9 = vadd.f32 %v2408_v59, %v1212_v6  ;;  %v1135_v10 = vadd.f32 %v1134_v8, %v965_v7 }
 0x13d   : > { %v1561_v11 = vmax.f32 %v1497_v9, 0.0  ;;  %v1466_v12 = vadd.f32 %v2408_v59, %v1135_v10 }
 0x13f   : > { %1625 = vst [vmem:[%s2416_s7 + $0x188] sm:$0xff] %v1561_v11  ;;  %v1530_v13 = vmax.f32 %v1466_v12, 0.0  ;;  %v1045_v14 = vpop.f32.mrf.mxu2 }
 0x140   : > { %v1214_v15 = vpop.f32.mrf.mxu3 }
 0x141   : > { %1594 = vst [vmem:[%s2416_s7 + $0x90] sm:$0xff] %v1530_v13  ;;  %v1215_v16 = vadd.f32 %v1214_v15, %v1045_v14  ;;  %v967_v17 = vpop.f32.mrf.mxu0 }
 0x142   : > { %v1136_v18 = vpop.f32.mrf.mxu1 }
 0x143   : > { %v1498_v19 = vadd.f32 %v2408_v59, %v1215_v16  ;;  %v1137_v20 = vadd.f32 %v1136_v18, %v967_v17 }
 0x145   : > { %v1562_v21 = vmax.f32 %v1498_v19, 0.0  ;;  %v1467_v22 = vadd.f32 %v2408_v59, %v1137_v20 }
 0x147   : > { %1626 = vst [vmem:[%s2416_s7 + $0x190] sm:$0xff] %v1562_v21  ;;  %v1531_v23 = vmax.f32 %v1467_v22, 0.0  ;;  %v1047_v24 = vpop.f32.mrf.mxu2 }
 0x148   : > { %v1216_v25 = vpop.f32.mrf.mxu3 }
 0x149   : > { %1595 = vst [vmem:[%s2416_s7 + $0x98] sm:$0xff] %v1531_v23  ;;  %v1217_v26 = vadd.f32 %v1216_v25, %v1047_v24  ;;  %v970_v27 = vpop.f32.mrf.mxu0 }
 0x14a   : > { %v1139_v28 = vpop.f32.mrf.mxu1 }
 0x14b   : > { %v1499_v29 = vadd.f32 %v2408_v59, %v1217_v26  ;;  %v1140_v30 = vadd.f32 %v1139_v28, %v970_v27 }
 0x14d   : > { %v1563_v31 = vmax.f32 %v1499_v29, 0.0  ;;  %v1468_v32 = vadd.f32 %v2408_v59, %v1140_v30 }
 0x14f   : > { %1627 = vst [vmem:[%s2416_s7 + $0x198] sm:$0xff] %v1563_v31  ;;  %v1532_v33 = vmax.f32 %v1468_v32, 0.0  ;;  %v1050_v34 = vpop.f32.mrf.mxu2 }
 0x150   : > { %v1219_v35 = vpop.f32.mrf.mxu3 }
 0x151   : > { %1596 = vst [vmem:[%s2416_s7 + $0xa0] sm:$0xff] %v1532_v33  ;;  %v1220_v36 = vadd.f32 %v1219_v35, %v1050_v34  ;;  %v972_v37 = vpop.f32.mrf.mxu0 }
 0x152   : > { %v1141_v38 = vpop.f32.mrf.mxu1 }
 0x153   : > { %v1500_v39 = vadd.f32 %v2408_v59, %v1220_v36  ;;  %v1142_v40 = vadd.f32 %v1141_v38, %v972_v37 }
 0x155   : > { %v1564_v41 = vmax.f32 %v1500_v39, 0.0  ;;  %v1469_v42 = vadd.f32 %v2408_v59, %v1142_v40 }
 0x157   : > { %1628 = vst [vmem:[%s2416_s7 + $0x1a0] sm:$0xff] %v1564_v41  ;;  %v1533_v43 = vmax.f32 %v1469_v42, 0.0  ;;  %v1052_v44 = vpop.f32.mrf.mxu2 }
 0x158   : > { %v1221_v45 = vpop.f32.mrf.mxu3 }
 0x159   : > { %1597 = vst [vmem:[%s2416_s7 + $0xa8] sm:$0xff] %v1533_v43  ;;  %v1222_v46 = vadd.f32 %v1221_v45, %v1052_v44  ;;  %v975_v47 = vpop.f32.mrf.mxu0 }
 0x15a   : > { %v1144_v48 = vpop.f32.mrf.mxu1 }
 0x15b   : > { %v1501_v49 = vadd.f32 %v2408_v59, %v1222_v46  ;;  %v1145_v50 = vadd.f32 %v1144_v48, %v975_v47 }
 0x15d   : > { %v1565_v51 = vmax.f32 %v1501_v49, 0.0  ;;  %v1470_v52 = vadd.f32 %v2408_v59, %v1145_v50 }
 0x15f   : > { %1629 = vst [vmem:[%s2416_s7 + $0x1a8] sm:$0xff] %v1565_v51  ;;  %v1534_v53 = vmax.f32 %v1470_v52, 0.0  ;;  %v1055_v54 = vpop.f32.mrf.mxu2 }
 0x160   : > { %v1224_v55 = vpop.f32.mrf.mxu3 }
 0x161   : > { %1598 = vst [vmem:[%s2416_s7 + $0xb0] sm:$0xff] %v1534_v53  ;;  %v1225_v56 = vadd.f32 %v1224_v55, %v1055_v54  ;;  %v977_v57 = vpop.f32.mrf.mxu0 }
 0x162   : > { %v1146_v58 = vpop.f32.mrf.mxu1 }
 0x163   : > { %v1502_v60 = vadd.f32 %v2408_v59, %v1225_v56  ;;  %v1147_v61 = vadd.f32 %v1146_v58, %v977_v57 }
 0x165   : > { %v1566_v62 = vmax.f32 %v1502_v60, 0.0  ;;  %v1471_v63 = vadd.f32 %v2408_v59, %v1147_v61 }
 0x167   : > { %1630 = vst [vmem:[%s2416_s7 + $0x1b0] sm:$0xff] %v1566_v62  ;;  %v1535_v0 = vmax.f32 %v1471_v63, 0.0  ;;  %v1057_v1 = vpop.f32.mrf.mxu2 }
 0x168   : > { %v1226_v2 = vpop.f32.mrf.mxu3 }
 0x169   : > { %1599 = vst [vmem:[%s2416_s7 + $0xb8] sm:$0xff] %v1535_v0  ;;  %v1227_v3 = vadd.f32 %v1226_v2, %v1057_v1  ;;  %v980_v4 = vpop.f32.mrf.mxu0 }
 0x16a   : > { %v1149_v5 = vpop.f32.mrf.mxu1 }
 0x16b   : > { %v1503_v6 = vadd.f32 %v2408_v59, %v1227_v3  ;;  %v1150_v7 = vadd.f32 %v1149_v5, %v980_v4 }
 0x16d   : > { %v1567_v8 = vmax.f32 %v1503_v6, 0.0  ;;  %v1472_v9 = vadd.f32 %v2408_v59, %v1150_v7 }
 0x16f   : > { %1631 = vst [vmem:[%s2416_s7 + $0x1b8] sm:$0xff] %v1567_v8  ;;  %v1536_v10 = vmax.f32 %v1472_v9, 0.0  ;;  %v1060_v11 = vpop.f32.mrf.mxu2 }
 0x170   : > { %v1229_v12 = vpop.f32.mrf.mxu3 }
 0x171   : > { %1600 = vst [vmem:[%s2416_s7 + $0xc0] sm:$0xff] %v1536_v10  ;;  %v1230_v13 = vadd.f32 %v1229_v12, %v1060_v11  ;;  %v982_v14 = vpop.f32.mrf.mxu0 }
 0x172   : > { %v1151_v15 = vpop.f32.mrf.mxu1 }
 0x173   : > { %v1504_v16 = vadd.f32 %v2408_v59, %v1230_v13  ;;  %v1152_v17 = vadd.f32 %v1151_v15, %v982_v14 }
 0x175   : > { %v1568_v18 = vmax.f32 %v1504_v16, 0.0  ;;  %v1473_v19 = vadd.f32 %v2408_v59, %v1152_v17 }
 0x177   : > { %1632 = vst [vmem:[%s2416_s7 + $0x1c0] sm:$0xff] %v1568_v18  ;;  %v1537_v20 = vmax.f32 %v1473_v19, 0.0  ;;  %v1062_v21 = vpop.f32.mrf.mxu2 }
 0x178   : > { %v1231_v22 = vpop.f32.mrf.mxu3 }
 0x179   : > { %1601 = vst [vmem:[%s2416_s7 + $0xc8] sm:$0xff] %v1537_v20  ;;  %v1232_v23 = vadd.f32 %v1231_v22, %v1062_v21  ;;  %v985_v24 = vpop.f32.mrf.mxu0 }
 0x17a   : > { %v1154_v25 = vpop.f32.mrf.mxu1 }
 0x17b   : > { %v1505_v26 = vadd.f32 %v2408_v59, %v1232_v23  ;;  %v1155_v27 = vadd.f32 %v1154_v25, %v985_v24 }
 0x17d   : > { %v1569_v28 = vmax.f32 %v1505_v26, 0.0  ;;  %v1474_v29 = vadd.f32 %v2408_v59, %v1155_v27 }
 0x17f   : > { %1633 = vst [vmem:[%s2416_s7 + $0x1c8] sm:$0xff] %v1569_v28  ;;  %v1538_v30 = vmax.f32 %v1474_v29, 0.0  ;;  %v1065_v31 = vpop.f32.mrf.mxu2 }
 0x180   : > { %v1234_v32 = vpop.f32.mrf.mxu3 }
 0x181   : > { %1602 = vst [vmem:[%s2416_s7 + $0xd0] sm:$0xff] %v1538_v30  ;;  %v1235_v33 = vadd.f32 %v1234_v32, %v1065_v31  ;;  %v987_v34 = vpop.f32.mrf.mxu0 }
 0x182   : > { %v1156_v35 = vpop.f32.mrf.mxu1 }
 0x183   : > { %v1506_v36 = vadd.f32 %v2408_v59, %v1235_v33  ;;  %v1157_v37 = vadd.f32 %v1156_v35, %v987_v34 }
 0x185   : > { %v1570_v38 = vmax.f32 %v1506_v36, 0.0  ;;  %v1475_v39 = vadd.f32 %v2408_v59, %v1157_v37 }
 0x187   : > { %1634 = vst [vmem:[%s2416_s7 + $0x1d0] sm:$0xff] %v1570_v38  ;;  %v1539_v40 = vmax.f32 %v1475_v39, 0.0  ;;  %v1067_v41 = vpop.f32.mrf.mxu2 }
 0x188   : > { %v1236_v42 = vpop.f32.mrf.mxu3 }
 0x189   : > { %1603 = vst [vmem:[%s2416_s7 + $0xd8] sm:$0xff] %v1539_v40  ;;  %v1237_v43 = vadd.f32 %v1236_v42, %v1067_v41  ;;  %v990_v44 = vpop.f32.mrf.mxu0 }
 0x18a   : > { %v1159_v45 = vpop.f32.mrf.mxu1 }
 0x18b   : > { %v1507_v46 = vadd.f32 %v2408_v59, %v1237_v43  ;;  %v1160_v47 = vadd.f32 %v1159_v45, %v990_v44 }
 0x18d   : > { %v1571_v48 = vmax.f32 %v1507_v46, 0.0  ;;  %v1476_v49 = vadd.f32 %v2408_v59, %v1160_v47 }
 0x18f   : > { %1635 = vst [vmem:[%s2416_s7 + $0x1d8] sm:$0xff] %v1571_v48  ;;  %v1540_v50 = vmax.f32 %v1476_v49, 0.0  ;;  %v1070_v51 = vpop.f32.mrf.mxu2 }
 0x190   : > { %v1239_v52 = vpop.f32.mrf.mxu3 }
 0x191   : > { %1604 = vst [vmem:[%s2416_s7 + $0xe0] sm:$0xff] %v1540_v50  ;;  %v1240_v53 = vadd.f32 %v1239_v52, %v1070_v51  ;;  %v992_v54 = vpop.f32.mrf.mxu0 }
 0x192   : > { %v1161_v55 = vpop.f32.mrf.mxu1 }
 0x193   : > { %v1508_v56 = vadd.f32 %v2408_v59, %v1240_v53  ;;  %v1162_v57 = vadd.f32 %v1161_v55, %v992_v54 }
 0x195   : > { %v1572_v58 = vmax.f32 %v1508_v56, 0.0  ;;  %v1477_v60 = vadd.f32 %v2408_v59, %v1162_v57 }
 0x197   : > { %1636 = vst [vmem:[%s2416_s7 + $0x1e0] sm:$0xff] %v1572_v58  ;;  %v1541_v61 = vmax.f32 %v1477_v60, 0.0  ;;  %v1072_v62 = vpop.f32.mrf.mxu2 }
 0x198   : > { %v1241_v63 = vpop.f32.mrf.mxu3 }
 0x199   : > { %1605 = vst [vmem:[%s2416_s7 + $0xe8] sm:$0xff] %v1541_v61  ;;  %v1242_v0 = vadd.f32 %v1241_v63, %v1072_v62  ;;  %v995_v1 = vpop.f32.mrf.mxu0 }
 0x19a   : > { %v1164_v2 = vpop.f32.mrf.mxu1 }
 0x19b   : > { %v1509_v3 = vadd.f32 %v2408_v59, %v1242_v0  ;;  %v1165_v4 = vadd.f32 %v1164_v2, %v995_v1 }
 0x19d   : > { %v1573_v5 = vmax.f32 %v1509_v3, 0.0  ;;  %v1478_v6 = vadd.f32 %v2408_v59, %v1165_v4 }
 0x19f   : > { %1637 = vst [vmem:[%s2416_s7 + $0x1e8] sm:$0xff] %v1573_v5  ;;  %v1542_v7 = vmax.f32 %v1478_v6, 0.0  ;;  %v1075_v8 = vpop.f32.mrf.mxu2 }
 0x1a0   : > { %v1244_v9 = vpop.f32.mrf.mxu3 }
 0x1a1   : > { %1606 = vst [vmem:[%s2416_s7 + $0xf0] sm:$0xff] %v1542_v7  ;;  %v1245_v10 = vadd.f32 %v1244_v9, %v1075_v8  ;;  %v997_v11 = vpop.f32.mrf.mxu0 }
 0x1a2   : > { %v1166_v12 = vpop.f32.mrf.mxu1 }
 0x1a3   : > { %v1510_v13 = vadd.f32 %v2408_v59, %v1245_v10  ;;  %v1167_v14 = vadd.f32 %v1166_v12, %v997_v11 }
 0x1a5   : > { %v1574_v15 = vmax.f32 %v1510_v13, 0.0  ;;  %v1479_v16 = vadd.f32 %v2408_v59, %v1167_v14 }
 0x1a7   : > { %1638 = vst [vmem:[%s2416_s7 + $0x1f0] sm:$0xff] %v1574_v15  ;;  %v1543_v17 = vmax.f32 %v1479_v16, 0.0  ;;  %v1077_v18 = vpop.f32.mrf.mxu2 }
 0x1a8   : > { %v1246_v19 = vpop.f32.mrf.mxu3 }
 0x1a9   : > { %1607 = vst [vmem:[%s2416_s7 + $0xf8] sm:$0xff] %v1543_v17  ;;  %v1247_v20 = vadd.f32 %v1246_v19, %v1077_v18 }
 0x1ab   : > { %v1511_v21 = vadd.f32 %v2408_v59, %v1247_v20 }
 0x1ad   : > { %v1575_v22 = vmax.f32 %v1511_v21, 0.0 }
 0x1af   : > { %1639 = vst [vmem:[%s2416_s7 + $0x1f8] sm:$0xff] %v1575_v22 }
 0x1b0 PF: > { %s13_s14 = sadd.s32 1, %s2232_s14   ;;  %s2614_s12 = smov %s2228_s13 }
 0x1b1   : > { %p10_p5 = scmp.ge.s32.totalorder %s13_s14, 4   ;;  %s2615_s13 = smov %s2617_s15 }
 0x1b3   :  { %12 = sbr.rel (!%p10_p5) target bundleno = 2 (0x2), region = 76 }

// kernel: faster_rcnn_forward.13
= control target key start
LH: loop header
LB: loop body
LE: loop exit
PB: predicated region body
PF: predicated region fallthrough
CT: control target
= control target key end

     0   :  { %s1433_s1 = inlined_call_operand.vmem [shape: bf16[256,128], index: 1, kind: input, shape index: {}]   ;;  %s1434_s0 = inlined_call_operand.vmem [shape: bf16[256,256], index: 0, kind: input, shape index: {}]   ;;  %s1435_s2 = inlined_call_operand.vmem [shape: f32[1,128], index: 2, kind: input, shape index: {}]   ;;  %s1436_s3 = inlined_call_operand.vmem [shape: f32[256,128], index: 3, kind: output, shape index: {}]  }
   0x1   :  { %v1014_v0 = vld [vmem:[%s1433_s1 + $0x38] sm:$0xff]  ;;  %v1013_v2 = vld [vmem:[%s1433_s1 + $0x30] sm:$0xff]  ;;  %v1012_v4 = vld [vmem:[%s1433_s1 + $0x28] sm:$0xff] }
   0x2   :  { %v1022_v1 = vld [vmem:[%s1433_s1 + $0x78] sm:$0xff]  ;;  %402 = vmatpush.bf16.msra.mxu0 %v1014_v0  ;;  %1023 = vmatpush.bf16.msra.mxu2 %v1014_v0  ;;  %v1021_v3 = vld [vmem:[%s1433_s1 + $0x70] sm:$0xff]  ;;  %v1020_v5 = vld [vmem:[%s1433_s1 + $0x68] sm:$0xff] }
   0x3   :  { %491 = vmatpush.bf16.msra.mxu1 %v1022_v1  ;;  %1031 = vmatpush.bf16.msra.mxu3 %v1022_v1  ;;  %v1011_v6 = vld [vmem:[%s1433_s1 + $0x20] sm:$0xff]  ;;  %v1010_v8 = vld [vmem:[%s1433_s1 + $0x18] sm:$0xff]  ;;  %v1009_v10 = vld [vmem:[%s1433_s1 + $0x10] sm:$0xff] }
   0x4   :  { %v1019_v7 = vld [vmem:[%s1433_s1 + $0x60] sm:$0xff]  ;;  %v1018_v9 = vld [vmem:[%s1433_s1 + $0x58] sm:$0xff]  ;;  %v1017_v11 = vld [vmem:[%s1433_s1 + $0x50] sm:$0xff] }
   0x5   :  { %v1008_v12 = vld [vmem:[%s1433_s1 + $0x8] sm:$0xff]  ;;  %v1007_v14 = vld [vmem:[%s1433_s1] sm:$0xff]  ;;  %v793_v28 = vld [vmem:[%s1434_s0 + $0x10] sm:$0xf] }
   0x6   :  { %403 = vmatpush.bf16.msra.mxu0 %v1013_v2  ;;  %1024 = vmatpush.bf16.msra.mxu2 %v1013_v2  ;;  %v1016_v13 = vld [vmem:[%s1433_s1 + $0x48] sm:$0xff]  ;;  %v1015_v15 = vld [vmem:[%s1433_s1 + $0x40] sm:$0xff]  ;;  %v978_v29 = vld [vmem:[%s1434_s0 + $0x14] sm:$0xf0] }
   0x7   :  { %492 = vmatpush.bf16.msra.mxu1 %v1021_v3  ;;  %1032 = vmatpush.bf16.msra.mxu3 %v1021_v3  ;;  %v785_v16 = vld [vmem:[%s1434_s0] sm:$0xf]  ;;  %v976_v17 = vld [vmem:[%s1434_s0 + $0x4] sm:$0xf0]  ;;  %v975_v20 = vld [vmem:[%s1434_s0 + $0x4] sm:$0xf]  ;;  %v794_v36 = vor.u32 %v978_v29, %v793_v28 }
   0x8   :  { %v849_v18 = vld [vmem:[%s1434_s0 + $0x80] sm:$0xf]  ;;  %v992_v19 = vld [vmem:[%s1434_s0 + $0x84] sm:$0xf0]  ;;  %v787_v21 = vld [vmem:[%s1434_s0 + $0x8] sm:$0xf0]  ;;  %v786_v24 = vor.u32 %v976_v17, %v785_v16 }
   0x9   :  { %v991_v22 = vld [vmem:[%s1434_s0 + $0x84] sm:$0xf]  ;;  %v851_v23 = vld [vmem:[%s1434_s0 + $0x88] sm:$0xf0]  ;;  %v850_v25 = vor.u32 %v992_v19, %v849_v18  ;;  %v790_v26 = vor.u32 %v975_v20, %v787_v21  ;;  %v857_v30 = vld [vmem:[%s1434_s0 + $0x90] sm:$0xf] }
   0xa   :  { %404 = vmatpush.bf16.msra.mxu0 %v1012_v4  ;;  %1025 = vmatpush.bf16.msra.mxu2 %v1012_v4  ;;  %v854_v27 = vor.u32 %v991_v22, %v851_v23  ;;  %v994_v31 = vld [vmem:[%s1434_s0 + $0x94] sm:$0xf0]  ;;  %v977_v32 = vld [vmem:[%s1434_s0 + $0x14] sm:$0xf]  ;;  %v795_v33 = vld [vmem:[%s1434_s0 + $0x18] sm:$0xf0] }
   0xb   :  { %493 = vmatpush.bf16.msra.mxu1 %v1020_v5  ;;  %1033 = vmatpush.bf16.msra.mxu3 %v1020_v5  ;;  %v993_v34 = vld [vmem:[%s1434_s0 + $0x94] sm:$0xf]  ;;  %v859_v35 = vld [vmem:[%s1434_s0 + $0x98] sm:$0xf0]  ;;  %v858_v37 = vor.u32 %v994_v31, %v857_v30  ;;  %v798_v38 = vor.u32 %v977_v32, %v795_v33  ;;  %v801_v40 = vld [vmem:[%s1434_s0 + $0x20] sm:$0xf] }
   0xc   :  { %v862_v39 = vor.u32 %v993_v34, %v859_v35  ;;  %v980_v41 = vld [vmem:[%s1434_s0 + $0x24] sm:$0xf0]  ;;  %v865_v42 = vld [vmem:[%s1434_s0 + $0xa0] sm:$0xf]  ;;  %v979_v44 = vld [vmem:[%s1434_s0 + $0x24] sm:$0xf] }
   0xd   :  { %v996_v43 = vld [vmem:[%s1434_s0 + $0xa4] sm:$0xf0]  ;;  %v803_v45 = vld [vmem:[%s1434_s0 + $0x28] sm:$0xf0]  ;;  %v995_v46 = vld [vmem:[%s1434_s0 + $0xa4] sm:$0xf]  ;;  %v802_v48 = vor.u32 %v980_v41, %v801_v40 }
   0xe   :  { %405 = vmatpush.bf16.msra.mxu0 %v1011_v6  ;;  %1026 = vmatpush.bf16.msra.mxu2 %v1011_v6  ;;  %v867_v47 = vld [vmem:[%s1434_s0 + $0xa8] sm:$0xf0]  ;;  %v866_v49 = vor.u32 %v996_v43, %v865_v42  ;;  %v806_v50 = vor.u32 %v979_v44, %v803_v45  ;;  %v809_v52 = vld [vmem:[%s1434_s0 + $0x30] sm:$0xf]  ;;  %v982_v53 = vld [vmem:[%s1434_s0 + $0x34] sm:$0xf0] }
   0xf   :  { %494 = vmatpush.bf16.msra.mxu1 %v1019_v7  ;;  %1034 = vmatpush.bf16.msra.mxu3 %v1019_v7  ;;  %v870_v51 = vor.u32 %v995_v46, %v867_v47  ;;  %v873_v54 = vld [vmem:[%s1434_s0 + $0xb0] sm:$0xf]  ;;  %v998_v55 = vld [vmem:[%s1434_s0 + $0xb4] sm:$0xf0]  ;;  %v981_v56 = vld [vmem:[%s1434_s0 + $0x34] sm:$0xf]  ;;  %v810_v60 = vor.u32 %v982_v53, %v809_v52 }
  0x10   :  { %v811_v57 = vld [vmem:[%s1434_s0 + $0x38] sm:$0xf0]  ;;  %v997_v58 = vld [vmem:[%s1434_s0 + $0xb4] sm:$0xf]  ;;  %v874_v61 = vor.u32 %v998_v55, %v873_v54  ;;  %v817_v0 = vld [vmem:[%s1434_s0 + $0x40] sm:$0xf] }
  0x11   :  { %v875_v59 = vld [vmem:[%s1434_s0 + $0xb8] sm:$0xf0]  ;;  %v814_v62 = vor.u32 %v981_v56, %v811_v57  ;;  %v984_v1 = vld [vmem:[%s1434_s0 + $0x44] sm:$0xf0]  ;;  %v881_v2 = vld [vmem:[%s1434_s0 + $0xc0] sm:$0xf] }
  0x12   :  { %406 = vmatpush.bf16.msra.mxu0 %v1010_v8  ;;  %1027 = vmatpush.bf16.msra.mxu2 %v1010_v8  ;;  %v878_v63 = vor.u32 %v997_v58, %v875_v59  ;;  %v1000_v3 = vld [vmem:[%s1434_s0 + $0xc4] sm:$0xf0]  ;;  %v983_v4 = vld [vmem:[%s1434_s0 + $0x44] sm:$0xf]  ;;  %v819_v5 = vld [vmem:[%s1434_s0 + $0x48] sm:$0xf0]  ;;  %v818_v8 = vor.u32 %v984_v1, %v817_v0 }
  0x13   :  { %495 = vmatpush.bf16.msra.mxu1 %v1018_v9  ;;  %1035 = vmatpush.bf16.msra.mxu3 %v1018_v9  ;;  %v999_v6 = vld [vmem:[%s1434_s0 + $0xc4] sm:$0xf]  ;;  %v883_v7 = vld [vmem:[%s1434_s0 + $0xc8] sm:$0xf0]  ;;  %v882_v9 = vor.u32 %v1000_v3, %v881_v2  ;;  %v985_v16 = vld [vmem:[%s1434_s0 + $0x54] sm:$0xf] }
  0x14   :  { %v827_v17 = vld [vmem:[%s1434_s0 + $0x58] sm:$0xf0]  ;;  %v1001_v18 = vld [vmem:[%s1434_s0 + $0xd4] sm:$0xf]  ;;  %v987_v28 = vld [vmem:[%s1434_s0 + $0x64] sm:$0xf] }
  0x15   :  { %v891_v19 = vld [vmem:[%s1434_s0 + $0xd8] sm:$0xf0]  ;;  %v830_v22 = vor.u32 %v985_v16, %v827_v17  ;;  %v835_v29 = vld [vmem:[%s1434_s0 + $0x68] sm:$0xf0]  ;;  %v1003_v30 = vld [vmem:[%s1434_s0 + $0xe4] sm:$0xf] }
  0x16   :  { %407 = vmatpush.bf16.msra.mxu0 %v1009_v10  ;;  %1028 = vmatpush.bf16.msra.mxu2 %v1009_v10  ;;  %v822_v10 = vor.u32 %v983_v4, %v819_v5  ;;  %v894_v23 = vor.u32 %v1001_v18, %v891_v19  ;;  %v899_v31 = vld [vmem:[%s1434_s0 + $0xe8] sm:$0xf0]  ;;  %v838_v34 = vor.u32 %v987_v28, %v835_v29  ;;  %v989_v40 = vld [vmem:[%s1434_s0 + $0x74] sm:$0xf]  ;;  %v843_v41 = vld [vmem:[%s1434_s0 + $0x78] sm:$0xf0] }
  0x17   :  { %496 = vmatpush.bf16.msra.mxu1 %v1017_v11  ;;  %1036 = vmatpush.bf16.msra.mxu3 %v1017_v11  ;;  %v886_v11 = vor.u32 %v999_v6, %v883_v7  ;;  %v902_v35 = vor.u32 %v1003_v30, %v899_v31  ;;  %v1005_v42 = vld [vmem:[%s1434_s0 + $0xf4] sm:$0xf]  ;;  %v907_v43 = vld [vmem:[%s1434_s0 + $0xf8] sm:$0xf0]  ;;  %v846_v46 = vor.u32 %v989_v40, %v843_v41 }
  0x18   :  { %v910_v47 = vor.u32 %v1005_v42, %v907_v43 }
  0x1a   :  { %408 = vmatpush.bf16.msra.mxu0 %v1008_v12  ;;  %1029 = vmatpush.bf16.msra.mxu2 %v1008_v12  ;;  %v825_v12 = vld [vmem:[%s1434_s0 + $0x50] sm:$0xf] }
  0x1b   :  { %497 = vmatpush.bf16.msra.mxu1 %v1016_v13  ;;  %1037 = vmatpush.bf16.msra.mxu3 %v1016_v13  ;;  %v986_v13 = vld [vmem:[%s1434_s0 + $0x54] sm:$0xf0] }
  0x1c   :  { %v826_v20 = vor.u32 %v986_v13, %v825_v12 }
  0x1e   :  { %409 = vmatpush.bf16.msra.mxu0 %v1007_v14  ;;  %1030 = vmatpush.bf16.msra.mxu2 %v1007_v14  ;;  %v889_v14 = vld [vmem:[%s1434_s0 + $0xd0] sm:$0xf] }
  0x1f   :  { %498 = vmatpush.bf16.msra.mxu1 %v1015_v15  ;;  %1038 = vmatpush.bf16.msra.mxu3 %v1015_v15  ;;  %v1002_v15 = vld [vmem:[%s1434_s0 + $0xd4] sm:$0xf0] }
  0x20   :  { %v890_v21 = vor.u32 %v1002_v15, %v889_v14 }
  0x21   :  { %410 = vmatmul.bf16.vlgmr.msra.gmra.mxu0 %v786_v24  ;;  %450 = vmatmul.bf16.vlgmr.msra.gmra.mxu2 %v850_v25  ;;  %v833_v24 = vld [vmem:[%s1434_s0 + $0x60] sm:$0xf]  ;;  %v988_v25 = vld [vmem:[%s1434_s0 + $0x64] sm:$0xf0] }
  0x22   :  { %499 = vmatmul.bf16.vlgmr.msra.gmra.mxu1 %v790_v26  ;;  %539 = vmatmul.bf16.vlgmr.msra.gmra.mxu3 %v854_v27  ;;  %v897_v26 = vld [vmem:[%s1434_s0 + $0xe0] sm:$0xf]  ;;  %v1004_v27 = vld [vmem:[%s1434_s0 + $0xe4] sm:$0xf0]  ;;  %v834_v32 = vor.u32 %v988_v25, %v833_v24 }
  0x23   :  { %v898_v33 = vor.u32 %v1004_v27, %v897_v26 }
  0x31   :  { %415 = vmatmul.bf16.gmra.mxu0 %v794_v36  ;;  %455 = vmatmul.bf16.gmra.mxu2 %v858_v37  ;;  %v841_v36 = vld [vmem:[%s1434_s0 + $0x70] sm:$0xf]  ;;  %v990_v37 = vld [vmem:[%s1434_s0 + $0x74] sm:$0xf0] }
  0x32   :  { %504 = vmatmul.bf16.gmra.mxu1 %v798_v38  ;;  %544 = vmatmul.bf16.gmra.mxu3 %v862_v39  ;;  %v905_v38 = vld [vmem:[%s1434_s0 + $0xf0] sm:$0xf]  ;;  %v1006_v39 = vld [vmem:[%s1434_s0 + $0xf4] sm:$0xf0]  ;;  %v842_v44 = vor.u32 %v990_v37, %v841_v36 }
  0x33   :  { %v906_v45 = vor.u32 %v1006_v39, %v905_v38 }
  0x41   :  { %420 = vmatmul.bf16.gmra.mxu0 %v802_v48  ;;  %460 = vmatmul.bf16.gmra.mxu2 %v866_v49  ;;  %v1303_v49 = vld [vmem:[%s1435_s2] ss:$0 sm:$0xff] }
  0x42   :  { %509 = vmatmul.bf16.gmra.mxu1 %v806_v50  ;;  %549 = vmatmul.bf16.gmra.mxu3 %v870_v51 }
  0x51   :  { %425 = vmatmul.bf16.gmra.mxu0 %v810_v60  ;;  %465 = vmatmul.bf16.gmra.mxu2 %v874_v61 }
  0x52   :  { %514 = vmatmul.bf16.gmra.mxu1 %v814_v62  ;;  %554 = vmatmul.bf16.gmra.mxu3 %v878_v63 }
  0x61   :  { %430 = vmatmul.bf16.gmra.mxu0 %v818_v8  ;;  %470 = vmatmul.bf16.gmra.mxu2 %v882_v9 }
  0x62   :  { %519 = vmatmul.bf16.gmra.mxu1 %v822_v10  ;;  %559 = vmatmul.bf16.gmra.mxu3 %v886_v11 }
  0x71   :  { %435 = vmatmul.bf16.gmra.mxu0 %v826_v20  ;;  %475 = vmatmul.bf16.gmra.mxu2 %v890_v21 }
  0x72   :  { %524 = vmatmul.bf16.gmra.mxu1 %v830_v22  ;;  %564 = vmatmul.bf16.gmra.mxu3 %v894_v23 }
  0x81   :  { %440 = vmatmul.bf16.gmra.mxu0 %v834_v32  ;;  %480 = vmatmul.bf16.gmra.mxu2 %v898_v33 }
  0x82   :  { %529 = vmatmul.bf16.gmra.mxu1 %v838_v34  ;;  %569 = vmatmul.bf16.gmra.mxu3 %v902_v35 }
  0x91   :  { %445 = vmatmul.bf16.gmra.mxu0 %v842_v44  ;;  %485 = vmatmul.bf16.gmra.mxu2 %v906_v45 }
  0x92   :  { %534 = vmatmul.bf16.gmra.mxu1 %v846_v46  ;;  %574 = vmatmul.bf16.gmra.mxu3 %v910_v47 }
  0x9e   :  { %v411_v48 = vpop.f32.mrf.mxu0 }
  0x9f   :  { %v500_v50 = vpop.f32.mrf.mxu1 }
  0xa0   :  { %v501_v51 = vadd.f32 %v500_v50, %v411_v48 }
  0xa2   :  { %v683_v52 = vadd.f32 %v1303_v49, %v501_v51 }
  0xa4   :  { %v715_v53 = vmax.f32 %v683_v52, 0.0  ;;  %v451_v54 = vpop.f32.mrf.mxu2 }
  0xa5   :  { %v540_v55 = vpop.f32.mrf.mxu3 }
  0xa6   :  { %747 = vst [vmem:[%s1436_s3] sm:$0xff] %v715_v53  ;;  %v541_v56 = vadd.f32 %v540_v55, %v451_v54  ;;  %v413_v57 = vpop.f32.mrf.mxu0 }
  0xa7   :  { %v502_v58 = vpop.f32.mrf.mxu1 }
  0xa8   :  { %v699_v59 = vadd.f32 %v1303_v49, %v541_v56  ;;  %v503_v60 = vadd.f32 %v502_v58, %v413_v57 }
  0xaa   :  { %v731_v61 = vmax.f32 %v699_v59, 0.0  ;;  %v684_v62 = vadd.f32 %v1303_v49, %v503_v60 }
  0xac   :  { %763 = vst [vmem:[%s1436_s3 + $0x80] sm:$0xff] %v731_v61  ;;  %v716_v63 = vmax.f32 %v684_v62, 0.0  ;;  %v453_v0 = vpop.f32.mrf.mxu2 }
  0xad   :  { %v542_v1 = vpop.f32.mrf.mxu3 }
  0xae   :  { %748 = vst [vmem:[%s1436_s3 + $0x8] sm:$0xff] %v716_v63  ;;  %v543_v2 = vadd.f32 %v542_v1, %v453_v0  ;;  %v416_v3 = vpop.f32.mrf.mxu0 }
  0xaf   :  { %v505_v4 = vpop.f32.mrf.mxu1 }
  0xb0   :  { %v700_v5 = vadd.f32 %v1303_v49, %v543_v2  ;;  %v506_v6 = vadd.f32 %v505_v4, %v416_v3 }
  0xb2   :  { %v732_v7 = vmax.f32 %v700_v5, 0.0  ;;  %v685_v8 = vadd.f32 %v1303_v49, %v506_v6 }
  0xb4   :  { %764 = vst [vmem:[%s1436_s3 + $0x88] sm:$0xff] %v732_v7  ;;  %v717_v9 = vmax.f32 %v685_v8, 0.0  ;;  %v456_v10 = vpop.f32.mrf.mxu2 }
  0xb5   :  { %v545_v11 = vpop.f32.mrf.mxu3 }
  0xb6   :  { %749 = vst [vmem:[%s1436_s3 + $0x10] sm:$0xff] %v717_v9  ;;  %v546_v12 = vadd.f32 %v545_v11, %v456_v10  ;;  %v418_v13 = vpop.f32.mrf.mxu0 }
  0xb7   :  { %v507_v14 = vpop.f32.mrf.mxu1 }
  0xb8   :  { %v701_v15 = vadd.f32 %v1303_v49, %v546_v12  ;;  %v508_v16 = vadd.f32 %v507_v14, %v418_v13 }
  0xba   :  { %v733_v17 = vmax.f32 %v701_v15, 0.0  ;;  %v686_v18 = vadd.f32 %v1303_v49, %v508_v16 }
  0xbc   :  { %765 = vst [vmem:[%s1436_s3 + $0x90] sm:$0xff] %v733_v17  ;;  %v718_v19 = vmax.f32 %v686_v18, 0.0  ;;  %v458_v20 = vpop.f32.mrf.mxu2 }
  0xbd   :  { %v547_v21 = vpop.f32.mrf.mxu3 }
  0xbe   :  { %750 = vst [vmem:[%s1436_s3 + $0x18] sm:$0xff] %v718_v19  ;;  %v548_v22 = vadd.f32 %v547_v21, %v458_v20  ;;  %v421_v23 = vpop.f32.mrf.mxu0 }
  0xbf   :  { %v510_v24 = vpop.f32.mrf.mxu1 }
  0xc0   :  { %v702_v25 = vadd.f32 %v1303_v49, %v548_v22  ;;  %v511_v26 = vadd.f32 %v510_v24, %v421_v23 }
  0xc2   :  { %v734_v27 = vmax.f32 %v702_v25, 0.0  ;;  %v687_v28 = vadd.f32 %v1303_v49, %v511_v26 }
  0xc4   :  { %766 = vst [vmem:[%s1436_s3 + $0x98] sm:$0xff] %v734_v27  ;;  %v719_v29 = vmax.f32 %v687_v28, 0.0  ;;  %v461_v30 = vpop.f32.mrf.mxu2 }
  0xc5   :  { %v550_v31 = vpop.f32.mrf.mxu3 }
  0xc6   :  { %751 = vst [vmem:[%s1436_s3 + $0x20] sm:$0xff] %v719_v29  ;;  %v551_v32 = vadd.f32 %v550_v31, %v461_v30  ;;  %v423_v33 = vpop.f32.mrf.mxu0 }
  0xc7   :  { %v512_v34 = vpop.f32.mrf.mxu1 }
  0xc8   :  { %v703_v35 = vadd.f32 %v1303_v49, %v551_v32  ;;  %v513_v36 = vadd.f32 %v512_v34, %v423_v33 }
  0xca   :  { %v735_v37 = vmax.f32 %v703_v35, 0.0  ;;  %v688_v38 = vadd.f32 %v1303_v49, %v513_v36 }
  0xcc   :  { %767 = vst [vmem:[%s1436_s3 + $0xa0] sm:$0xff] %v735_v37  ;;  %v720_v39 = vmax.f32 %v688_v38, 0.0  ;;  %v463_v40 = vpop.f32.mrf.mxu2 }
  0xcd   :  { %v552_v41 = vpop.f32.mrf.mxu3 }
  0xce   :  { %752 = vst [vmem:[%s1436_s3 + $0x28] sm:$0xff] %v720_v39  ;;  %v553_v42 = vadd.f32 %v552_v41, %v463_v40  ;;  %v426_v43 = vpop.f32.mrf.mxu0 }
  0xcf   :  { %v515_v44 = vpop.f32.mrf.mxu1 }
  0xd0   :  { %v704_v45 = vadd.f32 %v1303_v49, %v553_v42  ;;  %v516_v46 = vadd.f32 %v515_v44, %v426_v43 }
  0xd2   :  { %v736_v47 = vmax.f32 %v704_v45, 0.0  ;;  %v689_v48 = vadd.f32 %v1303_v49, %v516_v46 }
  0xd4   :  { %768 = vst [vmem:[%s1436_s3 + $0xa8] sm:$0xff] %v736_v47  ;;  %v721_v50 = vmax.f32 %v689_v48, 0.0  ;;  %v466_v51 = vpop.f32.mrf.mxu2 }
  0xd5   :  { %v555_v52 = vpop.f32.mrf.mxu3 }
  0xd6   :  { %753 = vst [vmem:[%s1436_s3 + $0x30] sm:$0xff] %v721_v50  ;;  %v556_v53 = vadd.f32 %v555_v52, %v466_v51  ;;  %v428_v54 = vpop.f32.mrf.mxu0 }
  0xd7   :  { %v517_v55 = vpop.f32.mrf.mxu1 }
  0xd8   :  { %v705_v56 = vadd.f32 %v1303_v49, %v556_v53  ;;  %v518_v57 = vadd.f32 %v517_v55, %v428_v54 }
  0xda   :  { %v737_v58 = vmax.f32 %v705_v56, 0.0  ;;  %v690_v59 = vadd.f32 %v1303_v49, %v518_v57 }
  0xdc   :  { %769 = vst [vmem:[%s1436_s3 + $0xb0] sm:$0xff] %v737_v58  ;;  %v722_v60 = vmax.f32 %v690_v59, 0.0  ;;  %v468_v61 = vpop.f32.mrf.mxu2 }
  0xdd   :  { %v557_v62 = vpop.f32.mrf.mxu3 }
  0xde   :  { %754 = vst [vmem:[%s1436_s3 + $0x38] sm:$0xff] %v722_v60  ;;  %v558_v63 = vadd.f32 %v557_v62, %v468_v61  ;;  %v431_v0 = vpop.f32.mrf.mxu0 }
  0xdf   :  { %v520_v1 = vpop.f32.mrf.mxu1 }
  0xe0   :  { %v706_v2 = vadd.f32 %v1303_v49, %v558_v63  ;;  %v521_v3 = vadd.f32 %v520_v1, %v431_v0 }
  0xe2   :  { %v738_v4 = vmax.f32 %v706_v2, 0.0  ;;  %v691_v5 = vadd.f32 %v1303_v49, %v521_v3 }
  0xe4   :  { %770 = vst [vmem:[%s1436_s3 + $0xb8] sm:$0xff] %v738_v4  ;;  %v723_v6 = vmax.f32 %v691_v5, 0.0  ;;  %v471_v7 = vpop.f32.mrf.mxu2 }
  0xe5   :  { %v560_v8 = vpop.f32.mrf.mxu3 }
  0xe6   :  { %755 = vst [vmem:[%s1436_s3 + $0x40] sm:$0xff] %v723_v6  ;;  %v561_v9 = vadd.f32 %v560_v8, %v471_v7  ;;  %v433_v10 = vpop.f32.mrf.mxu0 }
  0xe7   :  { %v522_v11 = vpop.f32.mrf.mxu1 }
  0xe8   :  { %v707_v12 = vadd.f32 %v1303_v49, %v561_v9  ;;  %v523_v13 = vadd.f32 %v522_v11, %v433_v10 }
  0xea   :  { %v739_v14 = vmax.f32 %v707_v12, 0.0  ;;  %v692_v15 = vadd.f32 %v1303_v49, %v523_v13 }
  0xec   :  { %771 = vst [vmem:[%s1436_s3 + $0xc0] sm:$0xff] %v739_v14  ;;  %v724_v16 = vmax.f32 %v692_v15, 0.0  ;;  %v473_v17 = vpop.f32.mrf.mxu2 }
  0xed   :  { %v562_v18 = vpop.f32.mrf.mxu3 }
  0xee   :  { %756 = vst [vmem:[%s1436_s3 + $0x48] sm:$0xff] %v724_v16  ;;  %v563_v19 = vadd.f32 %v562_v18, %v473_v17  ;;  %v436_v20 = vpop.f32.mrf.mxu0 }
  0xef   :  { %v525_v21 = vpop.f32.mrf.mxu1 }
  0xf0   :  { %v708_v22 = vadd.f32 %v1303_v49, %v563_v19  ;;  %v526_v23 = vadd.f32 %v525_v21, %v436_v20 }
  0xf2   :  { %v740_v24 = vmax.f32 %v708_v22, 0.0  ;;  %v693_v25 = vadd.f32 %v1303_v49, %v526_v23 }
  0xf4   :  { %772 = vst [vmem:[%s1436_s3 + $0xc8] sm:$0xff] %v740_v24  ;;  %v725_v26 = vmax.f32 %v693_v25, 0.0  ;;  %v476_v27 = vpop.f32.mrf.mxu2 }
  0xf5   :  { %v565_v28 = vpop.f32.mrf.mxu3 }
  0xf6   :  { %757 = vst [vmem:[%s1436_s3 + $0x50] sm:$0xff] %v725_v26  ;;  %v566_v29 = vadd.f32 %v565_v28, %v476_v27  ;;  %v438_v30 = vpop.f32.mrf.mxu0 }
  0xf7   :  { %v527_v31 = vpop.f32.mrf.mxu1 }
  0xf8   :  { %v709_v32 = vadd.f32 %v1303_v49, %v566_v29  ;;  %v528_v33 = vadd.f32 %v527_v31, %v438_v30 }
  0xfa   :  { %v741_v34 = vmax.f32 %v709_v32, 0.0  ;;  %v694_v35 = vadd.f32 %v1303_v49, %v528_v33 }
  0xfc   :  { %773 = vst [vmem:[%s1436_s3 + $0xd0] sm:$0xff] %v741_v34  ;;  %v726_v36 = vmax.f32 %v694_v35, 0.0  ;;  %v478_v37 = vpop.f32.mrf.mxu2 }
  0xfd   :  { %v567_v38 = vpop.f32.mrf.mxu3 }
  0xfe   :  { %758 = vst [vmem:[%s1436_s3 + $0x58] sm:$0xff] %v726_v36  ;;  %v568_v39 = vadd.f32 %v567_v38, %v478_v37  ;;  %v441_v40 = vpop.f32.mrf.mxu0 }
  0xff   :  { %v530_v41 = vpop.f32.mrf.mxu1 }
 0x100   :  { %v710_v42 = vadd.f32 %v1303_v49, %v568_v39  ;;  %v531_v43 = vadd.f32 %v530_v41, %v441_v40 }
 0x102   :  { %v742_v44 = vmax.f32 %v710_v42, 0.0  ;;  %v695_v45 = vadd.f32 %v1303_v49, %v531_v43 }
 0x104   :  { %774 = vst [vmem:[%s1436_s3 + $0xd8] sm:$0xff] %v742_v44  ;;  %v727_v46 = vmax.f32 %v695_v45, 0.0  ;;  %v481_v47 = vpop.f32.mrf.mxu2 }
 0x105   :  { %v570_v48 = vpop.f32.mrf.mxu3 }
 0x106   :  { %759 = vst [vmem:[%s1436_s3 + $0x60] sm:$0xff] %v727_v46  ;;  %v571_v50 = vadd.f32 %v570_v48, %v481_v47  ;;  %v443_v51 = vpop.f32.mrf.mxu0 }
 0x107   :  { %v532_v52 = vpop.f32.mrf.mxu1 }
 0x108   :  { %v711_v53 = vadd.f32 %v1303_v49, %v571_v50  ;;  %v533_v54 = vadd.f32 %v532_v52, %v443_v51 }
 0x10a   :  { %v743_v55 = vmax.f32 %v711_v53, 0.0  ;;  %v696_v56 = vadd.f32 %v1303_v49, %v533_v54 }
 0x10c   :  { %775 = vst [vmem:[%s1436_s3 + $0xe0] sm:$0xff] %v743_v55  ;;  %v728_v57 = vmax.f32 %v696_v56, 0.0  ;;  %v483_v58 = vpop.f32.mrf.mxu2 }
 0x10d   :  { %v572_v59 = vpop.f32.mrf.mxu3 }
 0x10e   :  { %760 = vst [vmem:[%s1436_s3 + $0x68] sm:$0xff] %v728_v57  ;;  %v573_v60 = vadd.f32 %v572_v59, %v483_v58  ;;  %v446_v61 = vpop.f32.mrf.mxu0 }
 0x10f   :  { %v535_v62 = vpop.f32.mrf.mxu1 }
 0x110   :  { %v712_v63 = vadd.f32 %v1303_v49, %v573_v60  ;;  %v536_v0 = vadd.f32 %v535_v62, %v446_v61 }
 0x112   :  { %v744_v1 = vmax.f32 %v712_v63, 0.0  ;;  %v697_v2 = vadd.f32 %v1303_v49, %v536_v0 }
 0x114   :  { %776 = vst [vmem:[%s1436_s3 + $0xe8] sm:$0xff] %v744_v1  ;;  %v729_v3 = vmax.f32 %v697_v2, 0.0  ;;  %v486_v4 = vpop.f32.mrf.mxu2 }
 0x115   :  { %v575_v5 = vpop.f32.mrf.mxu3 }
 0x116   :  { %761 = vst [vmem:[%s1436_s3 + $0x70] sm:$0xff] %v729_v3  ;;  %v576_v6 = vadd.f32 %v575_v5, %v486_v4  ;;  %v448_v7 = vpop.f32.mrf.mxu0 }
 0x117   :  { %v537_v8 = vpop.f32.mrf.mxu1 }
 0x118   :  { %v713_v9 = vadd.f32 %v1303_v49, %v576_v6  ;;  %v538_v10 = vadd.f32 %v537_v8, %v448_v7 }
 0x11a   :  { %v745_v11 = vmax.f32 %v713_v9, 0.0  ;;  %v698_v12 = vadd.f32 %v1303_v49, %v538_v10 }
 0x11c   :  { %777 = vst [vmem:[%s1436_s3 + $0xf0] sm:$0xff] %v745_v11  ;;  %v730_v13 = vmax.f32 %v698_v12, 0.0  ;;  %v488_v14 = vpop.f32.mrf.mxu2 }
 0x11d   :  { %v577_v15 = vpop.f32.mrf.mxu3 }
 0x11e   :  { %762 = vst [vmem:[%s1436_s3 + $0x78] sm:$0xff] %v730_v13  ;;  %v578_v16 = vadd.f32 %v577_v15, %v488_v14 }
 0x120   :  { %v714_v17 = vadd.f32 %v1303_v49, %v578_v16 }
 0x122   :  { %v746_v18 = vmax.f32 %v714_v17, 0.0 }
 0x124   :  { %778 = vst [vmem:[%s1436_s3 + $0xf8] sm:$0xff] %v746_v18 }

// kernel: faster_rcnn_forward.12
= control target key start
LH: loop header
LB: loop body
LE: loop exit
PB: predicated region body
PF: predicated region fallthrough
CT: control target
= control target key end

     0   :  { %vm2186_vm0 = vcmask 130048   ;;  %s4894_s0 = inlined_call_operand.vmem [shape: f32[1,34,34,16], index: 0, kind: input, shape index: {}]   ;;  %s4895_s1 = inlined_call_operand.vmem [shape: f32[1,32,32,16], index: 1, kind: output, shape index: {}]  }
   0x1   :  { %v8_v0 = vld [vmem:[%s4894_s0] sm:$0xff]  ;;  %v2319_v4 = vld [vmem:[%s4894_s0 + $0x28] sm:$0xff]  ;;  %v2703_v7 = vld [vmem:[%s4894_s0 + $0x50] sm:$0xff] }
   0x2   :  { %v136_v1 = vld [vmem:[%s4894_s0 + $0x1] sm:$0xff]  ;;  %v2447_v5 = vld [vmem:[%s4894_s0 + $0x29] sm:$0xff]  ;;  %v3121_v8 = vld [vmem:[%s4894_s0 + $0x51] sm:$0xff] }
   0x3   :  { %v392_v2 = vld [vmem:[%s4894_s0 + $0x2] sm:$0xff]  ;;  %v264_v3 = vmax.f32 %v8_v0, %v136_v1  ;;  %v2575_v6 = vld [vmem:[%s4894_s0 + $0x2a] sm:$0xff]  ;;  %v3126_v9 = vld [vmem:[%s4894_s0 + $0x52] sm:$0xff]  ;;  %v268_v10 = vmax.f32 %v2319_v4, %v2447_v5  ;;  %v272_v15 = vmax.f32 %v2703_v7, %v3121_v8 }
   0x4   :  { %v9_v12 = vld [vmem:[%s4894_s0 + $0x8] sm:$0xff]  ;;  %v2320_v17 = vld [vmem:[%s4894_s0 + $0x30] sm:$0xff]  ;;  %v2704_v22 = vld [vmem:[%s4894_s0 + $0x58] sm:$0xff] }
   0x5   :  { %v520_v11 = vmax.f32 %v264_v3, %v392_v2  ;;  %v137_v13 = vld [vmem:[%s4894_s0 + $0x9] sm:$0xff]  ;;  %v2448_v18 = vld [vmem:[%s4894_s0 + $0x31] sm:$0xff]  ;;  %v524_v20 = vmax.f32 %v268_v10, %v2575_v6  ;;  %v3153_v23 = vld [vmem:[%s4894_s0 + $0x59] sm:$0xff]  ;;  %v3180_v38 = vmax.f32 %v272_v15, %v3126_v9 }
   0x6   :  { %v393_v14 = vld [vmem:[%s4894_s0 + $0xa] sm:$0xff]  ;;  %v265_v16 = vmax.f32 %v9_v12, %v137_v13  ;;  %v2576_v19 = vld [vmem:[%s4894_s0 + $0x32] sm:$0xff]  ;;  %v3158_v24 = vld [vmem:[%s4894_s0 + $0x5a] sm:$0xff]  ;;  %v269_v25 = vmax.f32 %v2320_v17, %v2448_v18  ;;  %v273_v31 = vmax.f32 %v2704_v22, %v3153_v23 }
   0x7   :  { %v777_v21 = vmax.f32 %v520_v11, %v2319_v4  ;;  %v10_v27 = vld [vmem:[%s4894_s0 + $0x10] sm:$0xff]  ;;  %v781_v30 = vmax.f32 %v524_v20, %v2703_v7  ;;  %v2321_v34 = vld [vmem:[%s4894_s0 + $0x38] sm:$0xff]  ;;  %v2705_v40 = vld [vmem:[%s4894_s0 + $0x60] sm:$0xff] }
   0x8   :  { %v521_v26 = vmax.f32 %v265_v16, %v393_v14  ;;  %v138_v28 = vld [vmem:[%s4894_s0 + $0x11] sm:$0xff]  ;;  %v2449_v35 = vld [vmem:[%s4894_s0 + $0x39] sm:$0xff]  ;;  %v525_v37 = vmax.f32 %v269_v25, %v2576_v19  ;;  %v3188_v41 = vld [vmem:[%s4894_s0 + $0x61] sm:$0xff]  ;;  %v3197_v45 = vmax.f32 %v273_v31, %v3158_v24 }
   0x9   :  { %v394_v29 = vld [vmem:[%s4894_s0 + $0x12] sm:$0xff]  ;;  %v1033_v32 = vmax.f32 %v777_v21, %v2447_v5  ;;  %v266_v33 = vmax.f32 %v10_v27, %v138_v28  ;;  %v2577_v36 = vld [vmem:[%s4894_s0 + $0x3a] sm:$0xff]  ;;  %v3193_v42 = vld [vmem:[%s4894_s0 + $0x62] sm:$0xff]  ;;  %v1037_v43 = vmax.f32 %v781_v30, %v3121_v8  ;;  %v270_v44 = vmax.f32 %v2321_v34, %v2449_v35 }
   0xa   :  { %v778_v39 = vmax.f32 %v521_v26, %v2320_v17  ;;  %v11_v48 = vld [vmem:[%s4894_s0 + $0x18] sm:$0xff]  ;;  %v782_v51 = vmax.f32 %v525_v37, %v2704_v22  ;;  %v274_v52 = vmax.f32 %v2705_v40, %v3188_v41  ;;  %v2322_v55 = vld [vmem:[%s4894_s0 + $0x40] sm:$0xff]  ;;  %v3267_v31 = vld [vmem:[%s4894_s0 + $0x88] sm:$0xff] }
   0xb   :  { %v1289_v46 = vmax.f32 %v1033_v32, %v2575_v6  ;;  %v522_v47 = vmax.f32 %v266_v33, %v394_v29  ;;  %v139_v49 = vld [vmem:[%s4894_s0 + $0x19] sm:$0xff]  ;;  %v2450_v56 = vld [vmem:[%s4894_s0 + $0x41] sm:$0xff]  ;;  %v1293_v57 = vmax.f32 %v1037_v43, %v3126_v9  ;;  %v526_v58 = vmax.f32 %v270_v44, %v2577_v36 }
   0xc   :  { %v395_v50 = vld [vmem:[%s4894_s0 + $0x1a] sm:$0xff]  ;;  %v1034_v53 = vmax.f32 %v778_v39, %v2448_v18  ;;  %v267_v54 = vmax.f32 %v11_v48, %v139_v49  ;;  %v2578_v61 = vld [vmem:[%s4894_s0 + $0x42] sm:$0xff]  ;;  %v1038_v62 = vmax.f32 %v782_v51, %v3153_v23  ;;  %v271_v63 = vmax.f32 %v2322_v55, %v2450_v56 }
   0xd   :  { %v1546_v59 = vmax.f32 %v1289_v46, %v2703_v7  ;;  %v779_v60 = vmax.f32 %v522_v47, %v2321_v34  ;;  %v3223_v2 = vld [vmem:[%s4894_s0 + $0x78] sm:$0xff]  ;;  %v783_v3 = vmax.f32 %v526_v58, %v2705_v40  ;;  %v530_v4 = vmax.f32 %v274_v52, %v3193_v42  ;;  %v3237_v14 = vld [vmem:[%s4894_s0 + $0x80] sm:$0xff]  ;;  %v2706_v18 = vld [vmem:[%s4894_s0 + $0x68] sm:$0xff] }
   0xe   :  { %v1290_v0 = vmax.f32 %v1034_v53, %v2576_v19  ;;  %v523_v1 = vmax.f32 %v267_v54, %v395_v50  ;;  %v1550_v7 = vmax.f32 %v1293_v57, %v3223_v2  ;;  %v1294_v10 = vmax.f32 %v1038_v62, %v3158_v24  ;;  %v3232_v13 = vld [vmem:[%s4894_s0 + $0x79] sm:$0xff]  ;;  %v2710_v50 = vld [vmem:[%s4894_s0 + $0x90] sm:$0xff] }
   0xf   :  { %v1802_v5 = vmax.f32 %v1546_v59, %v3121_v8  ;;  %v1035_v6 = vmax.f32 %v779_v60, %v2449_v35  ;;  %v1039_v15 = vmax.f32 %v783_v3, %v3188_v41  ;;  %v527_v8 = vmax.f32 %v271_v63, %v2578_v61  ;;  %v2963_v25 = vld [vmem:[%s4894_s0 + $0x7a] sm:$0xff]  ;;  %v2964_v35 = vld [vmem:[%s4894_s0 + $0x82] sm:$0xff]  ;;  %v2838_v58 = vld [vmem:[%s4894_s0 + $0x91] sm:$0xff] }
  0x10   :  { %v1547_v11 = vmax.f32 %v1290_v0, %v2704_v22  ;;  %v780_v12 = vmax.f32 %v523_v1, %v2322_v55  ;;  %v1806_v19 = vmax.f32 %v1550_v7, %v3232_v13  ;;  %v1551_v20 = vmax.f32 %v1294_v10, %v3237_v14  ;;  %v2839_v1 = vld [vmem:[%s4894_s0 + $0xa1] sm:$0xff]  ;;  %v2713_v10 = vld [vmem:[%s4894_s0 + $0xb0] sm:$0xff] }
  0x11   :  { %v2058_v16 = vmax.f32 %v1802_v5, %v3126_v9  ;;  %v1291_v17 = vmax.f32 %v1035_v6, %v2577_v36  ;;  %v3253_v9 = vld [vmem:[%s4894_s0 + $0x81] sm:$0xff]  ;;  %v1295_v26 = vmax.f32 %v1039_v15, %v3193_v42  ;;  %v784_v27 = vmax.f32 %v527_v8, %v2706_v18  ;;  %v2840_v15 = vld [vmem:[%s4894_s0 + $0xa9] sm:$0xff] }
  0x12   :  { %v1803_v21 = vmax.f32 %v1547_v11, %v3153_v23  ;;  %v1036_v22 = vmax.f32 %v780_v12, %v2450_v56  ;;  %v2834_v23 = vld [vmem:[%s4894_s0 + $0x69] sm:$0xff]  ;;  %v2062_v29 = vmax.f32 %v1806_v19, %v2963_v25  ;;  %v1807_v30 = vmax.f32 %v1551_v20, %v3253_v9  ;;  %v2711_v56 = vld [vmem:[%s4894_s0 + $0xa0] sm:$0xff]  ;;  %v2841_v20 = vld [vmem:[%s4894_s0 + $0xb1] sm:$0xff] }
  0x13   :  { %2187 = vst.msk [vmem:[%s4895_s1] sm:$0xff] %vm2186_vm0, %v2058_v16  ;;  %v1548_v28 = vmax.f32 %v1291_v17, %v2705_v40  ;;  %v785_v32 = vmax.f32 %v3180_v38, %v3223_v2  ;;  %v1552_v36 = vmax.f32 %v1295_v26, %v3267_v31  ;;  %v1040_v37 = vmax.f32 %v784_v27, %v2834_v23  ;;  %v2962_v40 = vld [vmem:[%s4894_s0 + $0x6a] sm:$0xff] }
  0x14   :  { %v2059_v33 = vmax.f32 %v1803_v21, %v3158_v24  ;;  %v1292_v34 = vmax.f32 %v1036_v22, %v2578_v61  ;;  %2191 = vst.msk [vmem:[%s4895_s1 + $0x20] sm:$0xff] %vm2186_vm0, %v2062_v29  ;;  %v2063_v24 = vmax.f32 %v1807_v30, %v2964_v35  ;;  %v2837_v38 = vld [vmem:[%s4894_s0 + $0x89] sm:$0xff]  ;;  %v786_v44 = vmax.f32 %v3197_v45, %v3237_v14  ;;  %v2969_v29 = vld [vmem:[%s4894_s0 + $0xb2] sm:$0xff] }
  0x15   :  { %v1804_v39 = vmax.f32 %v1548_v28, %v3188_v41  ;;  %v1041_v43 = vmax.f32 %v785_v32, %v3232_v13  ;;  %v1808_v46 = vmax.f32 %v1552_v36, %v2837_v38  ;;  %v1296_v47 = vmax.f32 %v1040_v37, %v2962_v40  ;;  %v2965_v45 = vld [vmem:[%s4894_s0 + $0x8a] sm:$0xff] }
  0x16   :  { %2188 = vst.msk [vmem:[%s4895_s1 + $0x8] sm:$0xff] %vm2186_vm0, %v2059_v33  ;;  %v1549_v41 = vmax.f32 %v1292_v34, %v2706_v18  ;;  %v787_v48 = vmax.f32 %v530_v4, %v3267_v31  ;;  %v1042_v52 = vmax.f32 %v786_v44, %v3253_v9  ;;  %v275_v53 = vmax.f32 %v2706_v18, %v2834_v23  ;;  %v2712_v3 = vld [vmem:[%s4894_s0 + $0xa8] sm:$0xff]  ;;  %v2714_v34 = vld [vmem:[%s4894_s0 + $0xb8] sm:$0xff] }
  0x17   :  { %v2060_v49 = vmax.f32 %v1804_v39, %v3193_v42  ;;  %2192 = vst.msk [vmem:[%s4895_s1 + $0x28] sm:$0xff] %vm2186_vm0, %v2063_v24  ;;  %v1297_v51 = vmax.f32 %v1041_v43, %v2963_v25  ;;  %v2064_v55 = vmax.f32 %v1808_v46, %v2965_v45  ;;  %v1553_v42 = vmax.f32 %v1296_v47, %v2710_v50  ;;  %v2842_v43 = vld [vmem:[%s4894_s0 + $0xb9] sm:$0xff]  ;;  %v2715_v44 = vld [vmem:[%s4894_s0 + $0xc8] sm:$0xff] }
  0x18   :  { %v1805_v54 = vmax.f32 %v1549_v41, %v2834_v23  ;;  %v1043_v57 = vmax.f32 %v787_v48, %v2837_v38  ;;  %v1298_v60 = vmax.f32 %v1042_v52, %v2964_v35  ;;  %v531_v61 = vmax.f32 %v275_v53, %v2962_v40  ;;  %v2970_v53 = vld [vmem:[%s4894_s0 + $0xba] sm:$0xff] }
  0x19   :  { %2189 = vst.msk [vmem:[%s4895_s1 + $0x10] sm:$0xff] %vm2186_vm0, %v2060_v49  ;;  %v1554_v59 = vmax.f32 %v1297_v51, %v2711_v56  ;;  %v276_v62 = vmax.f32 %v3223_v2, %v3232_v13  ;;  %v1809_v0 = vmax.f32 %v1553_v42, %v2838_v58  ;;  %v277_v5 = vmax.f32 %v3237_v14, %v3253_v9  ;;  %v2966_v2 = vld [vmem:[%s4894_s0 + $0x92] sm:$0xff]  ;;  %v2967_v14 = vld [vmem:[%s4894_s0 + $0xa2] sm:$0xff] }
  0x1a   :  { %v2061_v63 = vmax.f32 %v1805_v54, %v2962_v40  ;;  %2193 = vst.msk [vmem:[%s4895_s1 + $0x30] sm:$0xff] %vm2186_vm0, %v2064_v55  ;;  %v1299_v4 = vmax.f32 %v1043_v57, %v2965_v45  ;;  %v1555_v7 = vmax.f32 %v1298_v60, %v2712_v3  ;;  %v788_v11 = vmax.f32 %v531_v61, %v2710_v50  ;;  %v2843_v54 = vld [vmem:[%s4894_s0 + $0xc9] sm:$0xff]  ;;  %v2844_v60 = vld [vmem:[%s4894_s0 + $0xd1] sm:$0xff] }
  0x1b   :  { %v1810_v6 = vmax.f32 %v1554_v59, %v2839_v1  ;;  %v532_v12 = vmax.f32 %v276_v62, %v2963_v25  ;;  %v2065_v13 = vmax.f32 %v1809_v0, %v2966_v2  ;;  %v533_v16 = vmax.f32 %v277_v5, %v2964_v35  ;;  %v2968_v25 = vld [vmem:[%s4894_s0 + $0xaa] sm:$0xff]  ;;  %v2717_v61 = vld [vmem:[%s4894_s0 + $0xd8] sm:$0xff] }
  0x1c   :  { %2190 = vst.msk [vmem:[%s4895_s1 + $0x18] sm:$0xff] %vm2186_vm0, %v2061_v63  ;;  %v1556_v8 = vmax.f32 %v1299_v4, %v2713_v10  ;;  %v278_v17 = vmax.f32 %v3267_v31, %v2837_v38  ;;  %v1811_v19 = vmax.f32 %v1555_v7, %v2840_v15  ;;  %v1044_v21 = vmax.f32 %v788_v11, %v2838_v58  ;;  %v2971_v0 = vld [vmem:[%s4894_s0 + $0xca] sm:$0xff]  ;;  %v2845_v7 = vld [vmem:[%s4894_s0 + $0xd9] sm:$0xff] }
  0x1d   :  { %v2066_v18 = vmax.f32 %v1810_v6, %v2967_v14  ;;  %v789_v22 = vmax.f32 %v532_v12, %v2711_v56  ;;  %2194 = vst.msk [vmem:[%s4895_s1 + $0x38] sm:$0xff] %vm2186_vm0, %v2065_v13  ;;  %v790_v26 = vmax.f32 %v533_v16, %v2712_v3  ;;  %v279_v28 = vmax.f32 %v2710_v50, %v2838_v58  ;;  %v2716_v50 = vld [vmem:[%s4894_s0 + $0xd0] sm:$0xff] }
  0x1e   :  { %v1812_v9 = vmax.f32 %v1556_v8, %v2841_v20  ;;  %v534_v27 = vmax.f32 %v278_v17, %v2965_v45  ;;  %v2067_v23 = vmax.f32 %v1811_v19, %v2968_v25  ;;  %v1300_v30 = vmax.f32 %v1044_v21, %v2966_v2  ;;  %v2972_v6 = vld [vmem:[%s4894_s0 + $0xd2] sm:$0xff]  ;;  %v2846_v19 = vld [vmem:[%s4894_s0 + $0xe1] sm:$0xff] }
  0x1f   :  { %2195 = vst.msk [vmem:[%s4895_s1 + $0x40] sm:$0xff] %vm2186_vm0, %v2066_v18  ;;  %v1045_v31 = vmax.f32 %v789_v22, %v2839_v1  ;;  %v280_v32 = vmax.f32 %v2711_v56, %v2839_v1  ;;  %v1046_v35 = vmax.f32 %v790_v26, %v2840_v15  ;;  %v535_v37 = vmax.f32 %v279_v28, %v2966_v2  ;;  %v2719_v16 = vld [vmem:[%s4894_s0 + $0xf0] sm:$0xff]  ;;  %v2973_v18 = vld [vmem:[%s4894_s0 + $0xda] sm:$0xff] }
  0x20   :  { %v2068_v33 = vmax.f32 %v1812_v9, %v2969_v29  ;;  %v791_v36 = vmax.f32 %v534_v27, %v2713_v10  ;;  %2196 = vst.msk [vmem:[%s4895_s1 + $0x48] sm:$0xff] %vm2186_vm0, %v2067_v23  ;;  %v1557_v39 = vmax.f32 %v1300_v30, %v2714_v34  ;;  %v281_v38 = vmax.f32 %v2712_v3, %v2840_v15  ;;  %v2847_v27 = vld [vmem:[%s4894_s0 + $0xf1] sm:$0xff]  ;;  %v2974_v30 = vld [vmem:[%s4894_s0 + $0xe2] sm:$0xff] }
  0x21   :  { %v1301_v40 = vmax.f32 %v1045_v31, %v2967_v14  ;;  %v536_v24 = vmax.f32 %v280_v32, %v2967_v14  ;;  %v1302_v41 = vmax.f32 %v1046_v35, %v2968_v25  ;;  %v792_v47 = vmax.f32 %v535_v37, %v2714_v34  ;;  %v2720_v28 = vld [vmem:[%s4894_s0 + $0xf8] sm:$0xff] }
  0x22   :  { %2197 = vst.msk [vmem:[%s4895_s1 + $0x50] sm:$0xff] %vm2186_vm0, %v2068_v33  ;;  %v1047_v46 = vmax.f32 %v791_v36, %v2841_v20  ;;  %v282_v48 = vmax.f32 %v2713_v10, %v2841_v20  ;;  %v1813_v49 = vmax.f32 %v1557_v39, %v2842_v43  ;;  %v537_v52 = vmax.f32 %v281_v38, %v2968_v25  ;;  %v2718_v10 = vld [vmem:[%s4894_s0 + $0xe0] sm:$0xff]  ;;  %v2975_v37 = vld [vmem:[%s4894_s0 + $0xf2] sm:$0xff] }
  0x23   :  { %v1558_v45 = vmax.f32 %v1301_v40, %v2715_v44  ;;  %v793_v51 = vmax.f32 %v536_v24, %v2715_v44  ;;  %v1559_v55 = vmax.f32 %v1302_v41, %v2716_v50  ;;  %v1048_v56 = vmax.f32 %v792_v47, %v2842_v43  ;;  %v2721_v33 = vld [vmem:[%s4894_s0 + $0x100] sm:$0xff] }
  0x24   :  { %v1303_v42 = vmax.f32 %v1047_v46, %v2969_v29  ;;  %v538_v57 = vmax.f32 %v282_v48, %v2969_v29  ;;  %v2069_v58 = vmax.f32 %v1813_v49, %v2970_v53  ;;  %v794_v63 = vmax.f32 %v537_v52, %v2716_v50  ;;  %v2848_v39 = vld [vmem:[%s4894_s0 + $0xf9] sm:$0xff]  ;;  %v2849_v41 = vld [vmem:[%s4894_s0 + $0x101] sm:$0xff] }
  0x25   :  { %v1814_v59 = vmax.f32 %v1558_v45, %v2843_v54  ;;  %v1049_v62 = vmax.f32 %v793_v51, %v2843_v54  ;;  %v1815_v1 = vmax.f32 %v1559_v55, %v2844_v60  ;;  %v1304_v4 = vmax.f32 %v1048_v56, %v2970_v53  ;;  %v2976_v48 = vld [vmem:[%s4894_s0 + $0xfa] sm:$0xff] }
  0x26   :  { %v1560_v3 = vmax.f32 %v1303_v42, %v2717_v61  ;;  %v795_v5 = vmax.f32 %v538_v57, %v2717_v61  ;;  %2198 = vst.msk [vmem:[%s4895_s1 + $0x58] sm:$0xff] %vm2186_vm0, %v2069_v58  ;;  %v1050_v12 = vmax.f32 %v794_v63, %v2844_v60  ;;  %v283_v13 = vmax.f32 %v2714_v34, %v2842_v43  ;;  %v2722_v57 = vld [vmem:[%s4894_s0 + $0x108] sm:$0xff] }
  0x27   :  { %v2070_v2 = vmax.f32 %v1814_v59, %v2971_v0  ;;  %v1305_v11 = vmax.f32 %v1049_v62, %v2971_v0  ;;  %v2071_v14 = vmax.f32 %v1815_v1, %v2972_v6  ;;  %v1561_v8 = vmax.f32 %v1304_v4, %v2718_v10  ;;  %v2850_v1 = vld [vmem:[%s4894_s0 + $0x109] sm:$0xff] }
  0x28   :  { %v1816_v15 = vmax.f32 %v1560_v3, %v2845_v7  ;;  %v1051_v17 = vmax.f32 %v795_v5, %v2845_v7  ;;  %v1306_v21 = vmax.f32 %v1050_v12, %v2972_v6  ;;  %v539_v22 = vmax.f32 %v283_v13, %v2970_v53  ;;  %v2977_v53 = vld [vmem:[%s4894_s0 + $0x102] sm:$0xff]  ;;  %v2723_v3 = vld [vmem:[%s4894_s0 + $0x118] sm:$0xff] }
  0x29   :  { %2199 = vst.msk [vmem:[%s4895_s1 + $0x60] sm:$0xff] %vm2186_vm0, %v2070_v2  ;;  %v1562_v20 = vmax.f32 %v1305_v11, %v2719_v16  ;;  %v284_v25 = vmax.f32 %v2715_v44, %v2843_v54  ;;  %v1817_v26 = vmax.f32 %v1561_v8, %v2846_v19  ;;  %v285_v29 = vmax.f32 %v2716_v50, %v2844_v60  ;;  %v2724_v11 = vld [vmem:[%s4894_s0 + $0x120] sm:$0xff] }
  0x2a   :  { %2200 = vst.msk [vmem:[%s4895_s1 + $0x68] sm:$0xff] %vm2186_vm0, %v2071_v14  ;;  %v2072_v9 = vmax.f32 %v1816_v15, %v2973_v18  ;;  %v1307_v23 = vmax.f32 %v1051_v17, %v2973_v18  ;;  %v1563_v32 = vmax.f32 %v1306_v21, %v2720_v28  ;;  %v796_v34 = vmax.f32 %v539_v22, %v2718_v10  ;;  %v2978_v14 = vld [vmem:[%s4894_s0 + $0x10a] sm:$0xff]  ;;  %v2851_v15 = vld [vmem:[%s4894_s0 + $0x119] sm:$0xff]  ;;  %v2852_v21 = vld [vmem:[%s4894_s0 + $0x121] sm:$0xff] }
  0x2b   :  { %v1818_v31 = vmax.f32 %v1562_v20, %v2847_v27  ;;  %v540_v35 = vmax.f32 %v284_v25, %v2971_v0  ;;  %v2073_v36 = vmax.f32 %v1817_v26, %v2974_v30  ;;  %v541_v24 = vmax.f32 %v285_v29, %v2972_v6  ;;  %v2725_v22 = vld [vmem:[%s4894_s0 + $0x128] sm:$0xff]  ;;  %v2979_v26 = vld [vmem:[%s4894_s0 + $0x11a] sm:$0xff] }
  0x2c   :  { %2201 = vst.msk [vmem:[%s4895_s1 + $0x70] sm:$0xff] %vm2186_vm0, %v2072_v9  ;;  %v1564_v40 = vmax.f32 %v1307_v23, %v2721_v33  ;;  %v286_v38 = vmax.f32 %v2717_v61, %v2845_v7  ;;  %v1819_v44 = vmax.f32 %v1563_v32, %v2848_v39  ;;  %v1052_v46 = vmax.f32 %v796_v34, %v2846_v19  ;;  %v2853_v32 = vld [vmem:[%s4894_s0 + $0x129] sm:$0xff] }
  0x2d   :  { %v2074_v43 = vmax.f32 %v1818_v31, %v2975_v37  ;;  %v797_v47 = vmax.f32 %v540_v35, %v2719_v16  ;;  %2202 = vst.msk [vmem:[%s4895_s1 + $0x78] sm:$0xff] %vm2186_vm0, %v2073_v36  ;;  %v798_v45 = vmax.f32 %v541_v24, %v2720_v28  ;;  %v287_v51 = vmax.f32 %v2718_v10, %v2846_v19  ;;  %v2980_v31 = vld [vmem:[%s4894_s0 + $0x122] sm:$0xff] }
  0x2e   :  { %v1820_v49 = vmax.f32 %v1564_v40, %v2849_v41  ;;  %v542_v50 = vmax.f32 %v286_v38, %v2973_v18  ;;  %v2075_v52 = vmax.f32 %v1819_v44, %v2976_v48  ;;  %v1308_v54 = vmax.f32 %v1052_v46, %v2974_v30  ;;  %v2727_v24 = vld [vmem:[%s4894_s0 + $0x140] sm:$0xff]  ;;  %v2854_v44 = vld [vmem:[%s4894_s0 + $0x131] sm:$0xff] }
  0x2f   :  { %2203 = vst.msk [vmem:[%s4895_s1 + $0x80] sm:$0xff] %vm2186_vm0, %v2074_v43  ;;  %v1053_v55 = vmax.f32 %v797_v47, %v2847_v27  ;;  %v288_v42 = vmax.f32 %v2719_v16, %v2847_v27  ;;  %v1054_v58 = vmax.f32 %v798_v45, %v2848_v39  ;;  %v543_v60 = vmax.f32 %v287_v51, %v2974_v30  ;;  %v2981_v43 = vld [vmem:[%s4894_s0 + $0x12a] sm:$0xff] }
  0x30   :  { %v2076_v56 = vmax.f32 %v1820_v49, %v2977_v53  ;;  %v799_v59 = vmax.f32 %v542_v50, %v2721_v33  ;;  %2204 = vst.msk [vmem:[%s4895_s1 + $0x88] sm:$0xff] %vm2186_vm0, %v2075_v52  ;;  %v1565_v61 = vmax.f32 %v1308_v54, %v2722_v57  ;;  %v289_v0 = vmax.f32 %v2720_v28, %v2848_v39  ;;  %v2855_v50 = vld [vmem:[%s4894_s0 + $0x141] sm:$0xff]  ;;  %v2982_v54 = vld [vmem:[%s4894_s0 + $0x132] sm:$0xff] }
  0x31   :  { %v1309_v62 = vmax.f32 %v1053_v55, %v2975_v37  ;;  %v544_v63 = vmax.f32 %v288_v42, %v2975_v37  ;;  %v1310_v4 = vmax.f32 %v1054_v58, %v2976_v48  ;;  %v800_v2 = vmax.f32 %v543_v60, %v2722_v57  ;;  %v2728_v51 = vld [vmem:[%s4894_s0 + $0x148] sm:$0xff] }
  0x32   :  { %2205 = vst.msk [vmem:[%s4895_s1 + $0x90] sm:$0xff] %vm2186_vm0, %v2076_v56  ;;  %v1055_v5 = vmax.f32 %v799_v59, %v2849_v41  ;;  %v290_v6 = vmax.f32 %v2721_v33, %v2849_v41  ;;  %v1821_v7 = vmax.f32 %v1565_v61, %v2850_v1  ;;  %v545_v13 = vmax.f32 %v289_v0, %v2976_v48  ;;  %v2726_v33 = vld [vmem:[%s4894_s0 + $0x130] sm:$0xff]  ;;  %v2983_v60 = vld [vmem:[%s4894_s0 + $0x142] sm:$0xff] }
  0x33   :  { %v1566_v10 = vmax.f32 %v1309_v62, %v2723_v3  ;;  %v801_v12 = vmax.f32 %v544_v63, %v2723_v3  ;;  %v1567_v8 = vmax.f32 %v1310_v4, %v2724_v11  ;;  %v1056_v17 = vmax.f32 %v800_v2, %v2850_v1  ;;  %v2729_v56 = vld [vmem:[%s4894_s0 + $0x150] sm:$0xff] }
  0x34   :  { %v1311_v16 = vmax.f32 %v1055_v5, %v2977_v53  ;;  %v546_v18 = vmax.f32 %v290_v6, %v2977_v53  ;;  %v2077_v19 = vmax.f32 %v1821_v7, %v2978_v14  ;;  %v802_v9 = vmax.f32 %v545_v13, %v2724_v11  ;;  %v2856_v61 = vld [vmem:[%s4894_s0 + $0x149] sm:$0xff]  ;;  %v2857_v4 = vld [vmem:[%s4894_s0 + $0x151] sm:$0xff] }
  0x35   :  { %v1822_v20 = vmax.f32 %v1566_v10, %v2851_v15  ;;  %v1057_v25 = vmax.f32 %v801_v12, %v2851_v15  ;;  %v1823_v27 = vmax.f32 %v1567_v8, %v2852_v21  ;;  %v1312_v23 = vmax.f32 %v1056_v17, %v2978_v14  ;;  %v2984_v6 = vld [vmem:[%s4894_s0 + $0x14a] sm:$0xff] }
  0x36   :  { %v1568_v28 = vmax.f32 %v1311_v16, %v2725_v22  ;;  %v803_v29 = vmax.f32 %v546_v18, %v2725_v22  ;;  %2206 = vst.msk [vmem:[%s4895_s1 + $0x98] sm:$0xff] %vm2186_vm0, %v2077_v19  ;;  %v1058_v35 = vmax.f32 %v802_v9, %v2852_v21  ;;  %v291_v36 = vmax.f32 %v2722_v57, %v2850_v1  ;;  %v2730_v18 = vld [vmem:[%s4894_s0 + $0x158] sm:$0xff] }
  0x37   :  { %v2078_v30 = vmax.f32 %v1822_v20, %v2979_v26  ;;  %v1313_v34 = vmax.f32 %v1057_v25, %v2979_v26  ;;  %v2079_v37 = vmax.f32 %v1823_v27, %v2980_v31  ;;  %v1569_v40 = vmax.f32 %v1312_v23, %v2726_v33  ;;  %v2858_v27 = vld [vmem:[%s4894_s0 + $0x159] sm:$0xff] }
  0x38   :  { %v1824_v39 = vmax.f32 %v1568_v28, %v2853_v32  ;;  %v1059_v38 = vmax.f32 %v803_v29, %v2853_v32  ;;  %v1314_v46 = vmax.f32 %v1058_v35, %v2980_v31  ;;  %v547_v47 = vmax.f32 %v291_v36, %v2978_v14  ;;  %v2985_v14 = vld [vmem:[%s4894_s0 + $0x152] sm:$0xff]  ;;  %v2731_v28 = vld [vmem:[%s4894_s0 + $0x168] sm:$0xff] }
  0x39   :  { %2207 = vst.msk [vmem:[%s4895_s1 + $0xa0] sm:$0xff] %vm2186_vm0, %v2078_v30  ;;  %v1570_v41 = vmax.f32 %v1313_v34, %v2727_v24  ;;  %v292_v48 = vmax.f32 %v2723_v3, %v2851_v15  ;;  %v1825_v45 = vmax.f32 %v1569_v40, %v2854_v44  ;;  %v293_v53 = vmax.f32 %v2724_v11, %v2852_v21  ;;  %v2732_v34 = vld [vmem:[%s4894_s0 + $0x170] sm:$0xff] }
  0x3a   :  { %2208 = vst.msk [vmem:[%s4895_s1 + $0xa8] sm:$0xff] %vm2186_vm0, %v2079_v37  ;;  %v2080_v49 = vmax.f32 %v1824_v39, %v2981_v43  ;;  %v1315_v52 = vmax.f32 %v1059_v38, %v2981_v43  ;;  %v1571_v42 = vmax.f32 %v1314_v46, %v2728_v51  ;;  %v804_v57 = vmax.f32 %v547_v47, %v2726_v33  ;;  %v2986_v37 = vld [vmem:[%s4894_s0 + $0x15a] sm:$0xff]  ;;  %v2859_v39 = vld [vmem:[%s4894_s0 + $0x169] sm:$0xff]  ;;  %v2860_v46 = vld [vmem:[%s4894_s0 + $0x171] sm:$0xff] }
  0x3b   :  { %v1826_v55 = vmax.f32 %v1570_v41, %v2855_v50  ;;  %v548_v58 = vmax.f32 %v292_v48, %v2979_v26  ;;  %v2081_v59 = vmax.f32 %v1825_v45, %v2982_v54  ;;  %v549_v63 = vmax.f32 %v293_v53, %v2980_v31  ;;  %v2733_v47 = vld [vmem:[%s4894_s0 + $0x178] sm:$0xff]  ;;  %v2987_v45 = vld [vmem:[%s4894_s0 + $0x16a] sm:$0xff] }
  0x3c   :  { %2209 = vst.msk [vmem:[%s4895_s1 + $0xb0] sm:$0xff] %vm2186_vm0, %v2080_v49  ;;  %v1572_v62 = vmax.f32 %v1315_v52, %v2729_v56  ;;  %v294_v0 = vmax.f32 %v2725_v22, %v2853_v32  ;;  %v1827_v3 = vmax.f32 %v1571_v42, %v2856_v61  ;;  %v1060_v5 = vmax.f32 %v804_v57, %v2854_v44  ;;  %v2861_v42 = vld [vmem:[%s4894_s0 + $0x179] sm:$0xff] }
  0x3d   :  { %v2082_v1 = vmax.f32 %v1826_v55, %v2983_v60  ;;  %v805_v2 = vmax.f32 %v548_v58, %v2727_v24  ;;  %2210 = vst.msk [vmem:[%s4895_s1 + $0xb8] sm:$0xff] %vm2186_vm0, %v2081_v59  ;;  %v806_v10 = vmax.f32 %v549_v63, %v2728_v51  ;;  %v295_v12 = vmax.f32 %v2726_v33, %v2854_v44  ;;  %v2988_v55 = vld [vmem:[%s4894_s0 + $0x172] sm:$0xff] }
  0x3e   :  { %v1828_v7 = vmax.f32 %v1572_v62, %v2857_v4  ;;  %v550_v11 = vmax.f32 %v294_v0, %v2981_v43  ;;  %v2083_v13 = vmax.f32 %v1827_v3, %v2984_v6  ;;  %v1316_v15 = vmax.f32 %v1060_v5, %v2982_v54  ;;  %v2735_v63 = vld [vmem:[%s4894_s0 + $0x190] sm:$0xff]  ;;  %v2862_v3 = vld [vmem:[%s4894_s0 + $0x181] sm:$0xff] }
  0x3f   :  { %2211 = vst.msk [vmem:[%s4895_s1 + $0xc0] sm:$0xff] %vm2186_vm0, %v2082_v1  ;;  %v1061_v8 = vmax.f32 %v805_v2, %v2855_v50  ;;  %v296_v16 = vmax.f32 %v2727_v24, %v2855_v50  ;;  %v1062_v19 = vmax.f32 %v806_v10, %v2856_v61  ;;  %v551_v21 = vmax.f32 %v295_v12, %v2982_v54  ;;  %v2989_v1 = vld [vmem:[%s4894_s0 + $0x17a] sm:$0xff] }
  0x40   :  { %v2084_v17 = vmax.f32 %v1828_v7, %v2985_v14  ;;  %v807_v20 = vmax.f32 %v550_v11, %v2729_v56  ;;  %2212 = vst.msk [vmem:[%s4895_s1 + $0xc8] sm:$0xff] %vm2186_vm0, %v2083_v13  ;;  %v1573_v22 = vmax.f32 %v1316_v15, %v2730_v18  ;;  %v297_v26 = vmax.f32 %v2728_v51, %v2856_v61  ;;  %v2863_v11 = vld [vmem:[%s4894_s0 + $0x191] sm:$0xff]  ;;  %v2990_v15 = vld [vmem:[%s4894_s0 + $0x182] sm:$0xff] }
  0x41   :  { %v1317_v25 = vmax.f32 %v1061_v8, %v2983_v60  ;;  %v552_v9 = vmax.f32 %v296_v16, %v2983_v60  ;;  %v1318_v23 = vmax.f32 %v1062_v19, %v2984_v6  ;;  %v808_v30 = vmax.f32 %v551_v21, %v2730_v18  ;;  %v2736_v12 = vld [vmem:[%s4894_s0 + $0x198] sm:$0xff] }
  0x42   :  { %2213 = vst.msk [vmem:[%s4895_s1 + $0xd0] sm:$0xff] %vm2186_vm0, %v2084_v17  ;;  %v1063_v29 = vmax.f32 %v807_v20, %v2857_v4  ;;  %v298_v31 = vmax.f32 %v2729_v56, %v2857_v4  ;;  %v1829_v32 = vmax.f32 %v1573_v22, %v2858_v27  ;;  %v553_v36 = vmax.f32 %v297_v26, %v2984_v6  ;;  %v2734_v56 = vld [vmem:[%s4894_s0 + $0x180] sm:$0xff]  ;;  %v2991_v21 = vld [vmem:[%s4894_s0 + $0x192] sm:$0xff] }
  0x43   :  { %v1574_v33 = vmax.f32 %v1317_v25, %v2731_v28  ;;  %v809_v35 = vmax.f32 %v552_v9, %v2731_v28  ;;  %v1575_v40 = vmax.f32 %v1318_v23, %v2732_v34  ;;  %v1064_v38 = vmax.f32 %v808_v30, %v2858_v27  ;;  %v2737_v17 = vld [vmem:[%s4894_s0 + $0x1a0] sm:$0xff] }
  0x44   :  { %v1319_v24 = vmax.f32 %v1063_v29, %v2985_v14  ;;  %v554_v43 = vmax.f32 %v298_v31, %v2985_v14  ;;  %v2085_v44 = vmax.f32 %v1829_v32, %v2986_v37  ;;  %v810_v49 = vmax.f32 %v553_v36, %v2732_v34  ;;  %v2864_v22 = vld [vmem:[%s4894_s0 + $0x199] sm:$0xff]  ;;  %v2865_v23 = vld [vmem:[%s4894_s0 + $0x1a1] sm:$0xff] }
  0x45   :  { %v1830_v41 = vmax.f32 %v1574_v33, %v2859_v39  ;;  %v1065_v48 = vmax.f32 %v809_v35, %v2859_v39  ;;  %v1831_v50 = vmax.f32 %v1575_v40, %v2860_v46  ;;  %v1320_v52 = vmax.f32 %v1064_v38, %v2986_v37  ;;  %v2992_v31 = vld [vmem:[%s4894_s0 + $0x19a] sm:$0xff] }
  0x46   :  { %v1576_v51 = vmax.f32 %v1319_v24, %v2733_v47  ;;  %v811_v53 = vmax.f32 %v554_v43, %v2733_v47  ;;  %2214 = vst.msk [vmem:[%s4895_s1 + $0xd8] sm:$0xff] %vm2186_vm0, %v2085_v44  ;;  %v1066_v58 = vmax.f32 %v810_v49, %v2860_v46  ;;  %v299_v59 = vmax.f32 %v2730_v18, %v2858_v27  ;;  %v2738_v43 = vld [vmem:[%s4894_s0 + $0x1a8] sm:$0xff] }
  0x47   :  { %v2086_v54 = vmax.f32 %v1830_v41, %v2987_v45  ;;  %v1321_v57 = vmax.f32 %v1065_v48, %v2987_v45  ;;  %v2087_v60 = vmax.f32 %v1831_v50, %v2988_v55  ;;  %v1577_v62 = vmax.f32 %v1320_v52, %v2734_v56  ;;  %v2866_v50 = vld [vmem:[%s4894_s0 + $0x1a9] sm:$0xff] }
  0x48   :  { %v1832_v61 = vmax.f32 %v1576_v51, %v2861_v42  ;;  %v1067_v0 = vmax.f32 %v811_v53, %v2861_v42  ;;  %v1322_v5 = vmax.f32 %v1066_v58, %v2988_v55  ;;  %v555_v2 = vmax.f32 %v299_v59, %v2986_v37  ;;  %v2993_v37 = vld [vmem:[%s4894_s0 + $0x1a2] sm:$0xff]  ;;  %v2739_v51 = vld [vmem:[%s4894_s0 + $0x1b8] sm:$0xff] }
  0x49   :  { %2215 = vst.msk [vmem:[%s4895_s1 + $0xe0] sm:$0xff] %vm2186_vm0, %v2086_v54  ;;  %v1578_v4 = vmax.f32 %v1321_v57, %v2735_v63  ;;  %v300_v6 = vmax.f32 %v2731_v28, %v2859_v39  ;;  %v1833_v10 = vmax.f32 %v1577_v62, %v2862_v3  ;;  %v301_v14 = vmax.f32 %v2732_v34, %v2860_v46  ;;  %v2740_v57 = vld [vmem:[%s4894_s0 + $0x1c0] sm:$0xff] }
  0x4a   :  { %2216 = vst.msk [vmem:[%s4895_s1 + $0xe8] sm:$0xff] %vm2186_vm0, %v2087_v60  ;;  %v2088_v7 = vmax.f32 %v1832_v61, %v2989_v1  ;;  %v1323_v13 = vmax.f32 %v1067_v0, %v2989_v1  ;;  %v1579_v16 = vmax.f32 %v1322_v5, %v2736_v12  ;;  %v812_v18 = vmax.f32 %v555_v2, %v2734_v56  ;;  %v2994_v60 = vld [vmem:[%s4894_s0 + $0x1aa] sm:$0xff]  ;;  %v2867_v61 = vld [vmem:[%s4894_s0 + $0x1b9] sm:$0xff]  ;;  %v2868_v5 = vld [vmem:[%s4894_s0 + $0x1c1] sm:$0xff] }
  0x4b   :  { %v1834_v8 = vmax.f32 %v1578_v4, %v2863_v11  ;;  %v556_v19 = vmax.f32 %v300_v6, %v2987_v45  ;;  %v2089_v20 = vmax.f32 %v1833_v10, %v2990_v15  ;;  %v557_v9 = vmax.f32 %v301_v14, %v2988_v55  ;;  %v2741_v2 = vld [vmem:[%s4894_s0 + $0x1c8] sm:$0xff]  ;;  %v2995_v10 = vld [vmem:[%s4894_s0 + $0x1ba] sm:$0xff] }
  0x4c   :  { %2217 = vst.msk [vmem:[%s4895_s1 + $0xf0] sm:$0xff] %vm2186_vm0, %v2088_v7  ;;  %v1580_v25 = vmax.f32 %v1323_v13, %v2737_v17  ;;  %v302_v26 = vmax.f32 %v2733_v47, %v2861_v42  ;;  %v1835_v28 = vmax.f32 %v1579_v16, %v2864_v22  ;;  %v1068_v29 = vmax.f32 %v812_v18, %v2862_v3  ;;  %v2869_v16 = vld [vmem:[%s4894_s0 + $0x1c9] sm:$0xff] }
  0x4d   :  { %v2090_v27 = vmax.f32 %v1834_v8, %v2991_v21  ;;  %v813_v30 = vmax.f32 %v556_v19, %v2735_v63  ;;  %2218 = vst.msk [vmem:[%s4895_s1 + $0xf8] sm:$0xff] %vm2186_vm0, %v2089_v20  ;;  %v814_v33 = vmax.f32 %v557_v9, %v2736_v12  ;;  %v303_v35 = vmax.f32 %v2734_v56, %v2862_v3  ;;  %v2996_v8 = vld [vmem:[%s4894_s0 + $0x1c2] sm:$0xff] }
  0x4e   :  { %v1836_v32 = vmax.f32 %v1580_v25, %v2865_v23  ;;  %v558_v34 = vmax.f32 %v302_v26, %v2989_v1  ;;  %v2091_v36 = vmax.f32 %v1835_v28, %v2992_v31  ;;  %v1324_v39 = vmax.f32 %v1068_v29, %v2990_v15  ;;  %v2743_v9 = vld [vmem:[%s4894_s0 + $0x1e0] sm:$0xff]  ;;  %v2870_v28 = vld [vmem:[%s4894_s0 + $0x1d1] sm:$0xff] }
  0x4f   :  { %2219 = vst.msk [vmem:[%s4895_s1 + $0x100] sm:$0xff] %vm2186_vm0, %v2090_v27  ;;  %v1069_v40 = vmax.f32 %v813_v30, %v2863_v11  ;;  %v304_v24 = vmax.f32 %v2735_v63, %v2863_v11  ;;  %v1070_v44 = vmax.f32 %v814_v33, %v2864_v22  ;;  %v559_v46 = vmax.f32 %v303_v35, %v2990_v15  ;;  %v2997_v27 = vld [vmem:[%s4894_s0 + $0x1ca] sm:$0xff] }
  0x50   :  { %v2092_v38 = vmax.f32 %v1836_v32, %v2993_v37  ;;  %v815_v41 = vmax.f32 %v558_v34, %v2737_v17  ;;  %2220 = vst.msk [vmem:[%s4895_s1 + $0x108] sm:$0xff] %vm2186_vm0, %v2091_v36  ;;  %v1581_v47 = vmax.f32 %v1324_v39, %v2738_v43  ;;  %v305_v45 = vmax.f32 %v2736_v12, %v2864_v22  ;;  %v2871_v34 = vld [vmem:[%s4894_s0 + $0x1e1] sm:$0xff]  ;;  %v2998_v39 = vld [vmem:[%s4894_s0 + $0x1d2] sm:$0xff] }
  0x51   :  { %v1325_v48 = vmax.f32 %v1069_v40, %v2991_v21  ;;  %v560_v49 = vmax.f32 %v304_v24, %v2991_v21  ;;  %v1326_v52 = vmax.f32 %v1070_v44, %v2992_v31  ;;  %v816_v54 = vmax.f32 %v559_v46, %v2738_v43  ;;  %v2744_v35 = vld [vmem:[%s4894_s0 + $0x1e8] sm:$0xff] }
  0x52   :  { %2221 = vst.msk [vmem:[%s4895_s1 + $0x110] sm:$0xff] %vm2186_vm0, %v2092_v38  ;;  %v1071_v53 = vmax.f32 %v815_v41, %v2865_v23  ;;  %v306_v55 = vmax.f32 %v2737_v17, %v2865_v23  ;;  %v1837_v42 = vmax.f32 %v1581_v47, %v2866_v50  ;;  %v561_v59 = vmax.f32 %v305_v45, %v2992_v31  ;;  %v2742_v17 = vld [vmem:[%s4894_s0 + $0x1d0] sm:$0xff]  ;;  %v2999_v46 = vld [vmem:[%s4894_s0 + $0x1e2] sm:$0xff] }
  0x53   :  { %v1582_v56 = vmax.f32 %v1325_v48, %v2739_v51  ;;  %v817_v58 = vmax.f32 %v560_v49, %v2739_v51  ;;  %v1583_v62 = vmax.f32 %v1326_v52, %v2740_v57  ;;  %v1072_v0 = vmax.f32 %v816_v54, %v2866_v50  ;;  %v2745_v38 = vld [vmem:[%s4894_s0 + $0x1f0] sm:$0xff] }
  0x54   :  { %v1327_v63 = vmax.f32 %v1071_v53, %v2993_v37  ;;  %v562_v1 = vmax.f32 %v306_v55, %v2993_v37  ;;  %v2093_v3 = vmax.f32 %v1837_v42, %v2994_v60  ;;  %v818_v7 = vmax.f32 %v561_v59, %v2740_v57  ;;  %v2872_v47 = vld [vmem:[%s4894_s0 + $0x1e9] sm:$0xff]  ;;  %v2873_v52 = vld [vmem:[%s4894_s0 + $0x1f1] sm:$0xff] }
  0x55   :  { %v1838_v4 = vmax.f32 %v1582_v56, %v2867_v61  ;;  %v1073_v6 = vmax.f32 %v817_v58, %v2867_v61  ;;  %v1839_v11 = vmax.f32 %v1583_v62, %v2868_v5  ;;  %v1328_v13 = vmax.f32 %v1072_v0, %v2994_v60  ;;  %v3000_v55 = vld [vmem:[%s4894_s0 + $0x1ea] sm:$0xff] }
  0x56   :  { %v1584_v12 = vmax.f32 %v1327_v63, %v2741_v2  ;;  %v819_v14 = vmax.f32 %v562_v1, %v2741_v2  ;;  %2222 = vst.msk [vmem:[%s4895_s1 + $0x118] sm:$0xff] %vm2186_vm0, %v2093_v3  ;;  %v1074_v19 = vmax.f32 %v818_v7, %v2868_v5  ;;  %v307_v20 = vmax.f32 %v2738_v43, %v2866_v50  ;;  %v2746_v1 = vld [vmem:[%s4894_s0 + $0x1f8] sm:$0xff] }
  0x57   :  { %v2094_v15 = vmax.f32 %v1838_v4, %v2995_v10  ;;  %v1329_v18 = vmax.f32 %v1073_v6, %v2995_v10  ;;  %v2095_v21 = vmax.f32 %v1839_v11, %v2996_v8  ;;  %v1585_v25 = vmax.f32 %v1328_v13, %v2742_v17  ;;  %v2874_v11 = vld [vmem:[%s4894_s0 + $0x1f9] sm:$0xff] }
  0x58   :  { %v1840_v22 = vmax.f32 %v1584_v12, %v2869_v16  ;;  %v1075_v26 = vmax.f32 %v819_v14, %v2869_v16  ;;  %v1330_v29 = vmax.f32 %v1074_v19, %v2996_v8  ;;  %v563_v30 = vmax.f32 %v307_v20, %v2994_v60  ;;  %v3001_v60 = vld [vmem:[%s4894_s0 + $0x1f2] sm:$0xff]  ;;  %v2747_v12 = vld [vmem:[%s4894_s0 + $0x208] sm:$0xff] }
  0x59   :  { %2223 = vst.msk [vmem:[%s4895_s1 + $0x120] sm:$0xff] %vm2186_vm0, %v2094_v15  ;;  %v1586_v23 = vmax.f32 %v1329_v18, %v2743_v9  ;;  %v308_v31 = vmax.f32 %v2739_v51, %v2867_v61  ;;  %v1841_v33 = vmax.f32 %v1585_v25, %v2870_v28  ;;  %v309_v37 = vmax.f32 %v2740_v57, %v2868_v5  ;;  %v2748_v18 = vld [vmem:[%s4894_s0 + $0x210] sm:$0xff] }
  0x5a   :  { %2224 = vst.msk [vmem:[%s4895_s1 + $0x128] sm:$0xff] %vm2186_vm0, %v2095_v21  ;;  %v2096_v32 = vmax.f32 %v1840_v22, %v2997_v27  ;;  %v1331_v36 = vmax.f32 %v1075_v26, %v2997_v27  ;;  %v1587_v24 = vmax.f32 %v1330_v29, %v2744_v35  ;;  %v820_v43 = vmax.f32 %v563_v30, %v2742_v17  ;;  %v3002_v21 = vld [vmem:[%s4894_s0 + $0x1fa] sm:$0xff]  ;;  %v2875_v22 = vld [vmem:[%s4894_s0 + $0x209] sm:$0xff]  ;;  %v2876_v29 = vld [vmem:[%s4894_s0 + $0x211] sm:$0xff] }
  0x5b   :  { %v1842_v40 = vmax.f32 %v1586_v23, %v2871_v34  ;;  %v564_v44 = vmax.f32 %v308_v31, %v2995_v10  ;;  %v2097_v41 = vmax.f32 %v1841_v33, %v2998_v39  ;;  %v565_v49 = vmax.f32 %v309_v37, %v2996_v8  ;;  %v2749_v30 = vld [vmem:[%s4894_s0 + $0x218] sm:$0xff]  ;;  %v3003_v33 = vld [vmem:[%s4894_s0 + $0x20a] sm:$0xff] }
  0x5c   :  { %2225 = vst.msk [vmem:[%s4895_s1 + $0x130] sm:$0xff] %vm2186_vm0, %v2096_v32  ;;  %v1588_v48 = vmax.f32 %v1331_v36, %v2745_v38  ;;  %v310_v45 = vmax.f32 %v2741_v2, %v2869_v16  ;;  %v1843_v51 = vmax.f32 %v1587_v24, %v2872_v47  ;;  %v1076_v53 = vmax.f32 %v820_v43, %v2870_v28  ;;  %v2877_v24 = vld [vmem:[%s4894_s0 + $0x219] sm:$0xff] }
  0x5d   :  { %v2098_v50 = vmax.f32 %v1842_v40, %v2999_v46  ;;  %v821_v54 = vmax.f32 %v564_v44, %v2743_v9  ;;  %2226 = vst.msk [vmem:[%s4895_s1 + $0x138] sm:$0xff] %vm2186_vm0, %v2097_v41  ;;  %v822_v56 = vmax.f32 %v565_v49, %v2744_v35  ;;  %v311_v58 = vmax.f32 %v2742_v17, %v2870_v28  ;;  %v3004_v40 = vld [vmem:[%s4894_s0 + $0x212] sm:$0xff] }
  0x5e   :  { %v1844_v42 = vmax.f32 %v1588_v48, %v2873_v52  ;;  %v566_v57 = vmax.f32 %v310_v45, %v2997_v27  ;;  %v2099_v59 = vmax.f32 %v1843_v51, %v3000_v55  ;;  %v1332_v61 = vmax.f32 %v1076_v53, %v2998_v39  ;;  %v2751_v49 = vld [vmem:[%s4894_s0 + $0x230] sm:$0xff]  ;;  %v2878_v51 = vld [vmem:[%s4894_s0 + $0x221] sm:$0xff] }
  0x5f   :  { %2227 = vst.msk [vmem:[%s4895_s1 + $0x140] sm:$0xff] %vm2186_vm0, %v2098_v50  ;;  %v1077_v62 = vmax.f32 %v821_v54, %v2871_v34  ;;  %v312_v63 = vmax.f32 %v2743_v9, %v2871_v34  ;;  %v1078_v3 = vmax.f32 %v822_v56, %v2872_v47  ;;  %v567_v5 = vmax.f32 %v311_v58, %v2998_v39  ;;  %v3005_v50 = vld [vmem:[%s4894_s0 + $0x21a] sm:$0xff] }
  0x60   :  { %v2100_v0 = vmax.f32 %v1844_v42, %v3001_v60  ;;  %v823_v4 = vmax.f32 %v566_v57, %v2745_v38  ;;  %2228 = vst.msk [vmem:[%s4895_s1 + $0x148] sm:$0xff] %vm2186_vm0, %v2099_v59  ;;  %v1589_v2 = vmax.f32 %v1332_v61, %v2746_v1  ;;  %v313_v10 = vmax.f32 %v2744_v35, %v2872_v47  ;;  %v2879_v57 = vld [vmem:[%s4894_s0 + $0x231] sm:$0xff]  ;;  %v3006_v61 = vld [vmem:[%s4894_s0 + $0x222] sm:$0xff] }
  0x61   :  { %v1333_v6 = vmax.f32 %v1077_v62, %v2999_v46  ;;  %v568_v7 = vmax.f32 %v312_v63, %v2999_v46  ;;  %v1334_v13 = vmax.f32 %v1078_v3, %v3000_v55  ;;  %v824_v15 = vmax.f32 %v567_v5, %v2746_v1  ;;  %v2752_v58 = vld [vmem:[%s4894_s0 + $0x238] sm:$0xff] }
  0x62   :  { %2229 = vst.msk [vmem:[%s4895_s1 + $0x150] sm:$0xff] %vm2186_vm0, %v2100_v0  ;;  %v1079_v14 = vmax.f32 %v823_v4, %v2873_v52  ;;  %v314_v8 = vmax.f32 %v2745_v38, %v2873_v52  ;;  %v1845_v16 = vmax.f32 %v1589_v2, %v2874_v11  ;;  %v569_v20 = vmax.f32 %v313_v10, %v3000_v55  ;;  %v2750_v38 = vld [vmem:[%s4894_s0 + $0x220] sm:$0xff]  ;;  %v3007_v5 = vld [vmem:[%s4894_s0 + $0x232] sm:$0xff] }
  0x63   :  { %v1590_v17 = vmax.f32 %v1333_v6, %v2747_v12  ;;  %v825_v19 = vmax.f32 %v568_v7, %v2747_v12  ;;  %v1591_v25 = vmax.f32 %v1334_v13, %v2748_v18  ;;  %v1080_v26 = vmax.f32 %v824_v15, %v2874_v11  ;;  %v2753_v0 = vld [vmem:[%s4894_s0 + $0x240] sm:$0xff] }
  0x64   :  { %v1335_v9 = vmax.f32 %v1079_v14, %v3001_v60  ;;  %v570_v27 = vmax.f32 %v314_v8, %v3001_v60  ;;  %v2101_v28 = vmax.f32 %v1845_v16, %v3002_v21  ;;  %v826_v32 = vmax.f32 %v569_v20, %v2748_v18  ;;  %v2880_v2 = vld [vmem:[%s4894_s0 + $0x239] sm:$0xff]  ;;  %v2881_v13 = vld [vmem:[%s4894_s0 + $0x241] sm:$0xff] }
  0x65   :  { %v1846_v23 = vmax.f32 %v1590_v17, %v2875_v22  ;;  %v1081_v31 = vmax.f32 %v825_v19, %v2875_v22  ;;  %v1847_v34 = vmax.f32 %v1591_v25, %v2876_v29  ;;  %v1336_v36 = vmax.f32 %v1080_v26, %v3002_v21  ;;  %v3008_v8 = vld [vmem:[%s4894_s0 + $0x23a] sm:$0xff] }
  0x66   :  { %v1592_v35 = vmax.f32 %v1335_v9, %v2749_v30  ;;  %v827_v37 = vmax.f32 %v570_v27, %v2749_v30  ;;  %2230 = vst.msk [vmem:[%s4895_s1 + $0x158] sm:$0xff] %vm2186_vm0, %v2101_v28  ;;  %v1082_v44 = vmax.f32 %v826_v32, %v2876_v29  ;;  %v315_v41 = vmax.f32 %v2746_v1, %v2874_v11  ;;  %v2754_v27 = vld [vmem:[%s4894_s0 + $0x248] sm:$0xff] }
  0x67   :  { %v2102_v39 = vmax.f32 %v1846_v23, %v3003_v33  ;;  %v1337_v43 = vmax.f32 %v1081_v31, %v3003_v33  ;;  %v2103_v46 = vmax.f32 %v1847_v34, %v3004_v40  ;;  %v1593_v48 = vmax.f32 %v1336_v36, %v2750_v38  ;;  %v2882_v34 = vld [vmem:[%s4894_s0 + $0x249] sm:$0xff] }
  0x68   :  { %v1848_v47 = vmax.f32 %v1592_v35, %v2877_v24  ;;  %v1083_v45 = vmax.f32 %v827_v37, %v2877_v24  ;;  %v1338_v53 = vmax.f32 %v1082_v44, %v3004_v40  ;;  %v571_v54 = vmax.f32 %v315_v41, %v3002_v21  ;;  %v3009_v21 = vld [vmem:[%s4894_s0 + $0x242] sm:$0xff]  ;;  %v2755_v35 = vld [vmem:[%s4894_s0 + $0x258] sm:$0xff] }
  0x69   :  { %2231 = vst.msk [vmem:[%s4895_s1 + $0x160] sm:$0xff] %vm2186_vm0, %v2102_v39  ;;  %v1594_v52 = vmax.f32 %v1337_v43, %v2751_v49  ;;  %v316_v55 = vmax.f32 %v2747_v12, %v2875_v22  ;;  %v1849_v56 = vmax.f32 %v1593_v48, %v2878_v51  ;;  %v317_v60 = vmax.f32 %v2748_v18, %v2876_v29  ;;  %v2756_v43 = vld [vmem:[%s4894_s0 + $0x260] sm:$0xff] }
  0x6a   :  { %2232 = vst.msk [vmem:[%s4895_s1 + $0x168] sm:$0xff] %vm2186_vm0, %v2103_v46  ;;  %v2104_v42 = vmax.f32 %v1848_v47, %v3005_v50  ;;  %v1339_v59 = vmax.f32 %v1083_v45, %v3005_v50  ;;  %v1595_v63 = vmax.f32 %v1338_v53, %v2752_v58  ;;  %v828_v1 = vmax.f32 %v571_v54, %v2750_v38  ;;  %v3010_v46 = vld [vmem:[%s4894_s0 + $0x24a] sm:$0xff]  ;;  %v2883_v47 = vld [vmem:[%s4894_s0 + $0x259] sm:$0xff]  ;;  %v2884_v53 = vld [vmem:[%s4894_s0 + $0x261] sm:$0xff] }
  0x6b   :  { %v1850_v62 = vmax.f32 %v1594_v52, %v2879_v57  ;;  %v572_v3 = vmax.f32 %v316_v55, %v3003_v33  ;;  %v2105_v4 = vmax.f32 %v1849_v56, %v3006_v61  ;;  %v573_v7 = vmax.f32 %v317_v60, %v3004_v40  ;;  %v2757_v54 = vld [vmem:[%s4894_s0 + $0x268] sm:$0xff]  ;;  %v3011_v56 = vld [vmem:[%s4894_s0 + $0x25a] sm:$0xff] }
  0x6c   :  { %2233 = vst.msk [vmem:[%s4895_s1 + $0x170] sm:$0xff] %vm2186_vm0, %v2104_v42  ;;  %v1596_v6 = vmax.f32 %v1339_v59, %v2753_v0  ;;  %v318_v10 = vmax.f32 %v2749_v30, %v2877_v24  ;;  %v1851_v12 = vmax.f32 %v1595_v63, %v2880_v2  ;;  %v1084_v14 = vmax.f32 %v828_v1, %v2878_v51  ;;  %v2885_v63 = vld [vmem:[%s4894_s0 + $0x269] sm:$0xff] }
  0x6d   :  { %v2106_v11 = vmax.f32 %v1850_v62, %v3007_v5  ;;  %v829_v15 = vmax.f32 %v572_v3, %v2751_v49  ;;  %2234 = vst.msk [vmem:[%s4895_s1 + $0x178] sm:$0xff] %vm2186_vm0, %v2105_v4  ;;  %v830_v17 = vmax.f32 %v573_v7, %v2752_v58  ;;  %v319_v19 = vmax.f32 %v2750_v38, %v2878_v51  ;;  %v3012_v62 = vld [vmem:[%s4894_s0 + $0x262] sm:$0xff] }
  0x6e   :  { %v1852_v16 = vmax.f32 %v1596_v6, %v2881_v13  ;;  %v574_v18 = vmax.f32 %v318_v10, %v3005_v50  ;;  %v2107_v20 = vmax.f32 %v1851_v12, %v3008_v8  ;;  %v1340_v22 = vmax.f32 %v1084_v14, %v3006_v61  ;;  %v2759_v7 = vld [vmem:[%s4894_s0 + $0x280] sm:$0xff]  ;;  %v2886_v12 = vld [vmem:[%s4894_s0 + $0x271] sm:$0xff] }
  0x6f   :  { %2235 = vst.msk [vmem:[%s4895_s1 + $0x180] sm:$0xff] %vm2186_vm0, %v2106_v11  ;;  %v1085_v25 = vmax.f32 %v829_v15, %v2879_v57  ;;  %v320_v9 = vmax.f32 %v2751_v49, %v2879_v57  ;;  %v1086_v28 = vmax.f32 %v830_v17, %v2880_v2  ;;  %v575_v29 = vmax.f32 %v319_v19, %v3006_v61  ;;  %v3013_v11 = vld [vmem:[%s4894_s0 + $0x26a] sm:$0xff] }
  0x70   :  { %v2108_v26 = vmax.f32 %v1852_v16, %v3009_v21  ;;  %v831_v23 = vmax.f32 %v574_v18, %v2753_v0  ;;  %2236 = vst.msk [vmem:[%s4895_s1 + $0x188] sm:$0xff] %vm2186_vm0, %v2107_v20  ;;  %v1597_v30 = vmax.f32 %v1340_v22, %v2754_v27  ;;  %v321_v33 = vmax.f32 %v2752_v58, %v2880_v2  ;;  %v2887_v18 = vld [vmem:[%s4894_s0 + $0x281] sm:$0xff]  ;;  %v3014_v22 = vld [vmem:[%s4894_s0 + $0x272] sm:$0xff] }
  0x71   :  { %v1341_v31 = vmax.f32 %v1085_v25, %v3007_v5  ;;  %v576_v32 = vmax.f32 %v320_v9, %v3007_v5  ;;  %v1342_v36 = vmax.f32 %v1086_v28, %v3008_v8  ;;  %v832_v39 = vmax.f32 %v575_v29, %v2754_v27  ;;  %v2760_v19 = vld [vmem:[%s4894_s0 + $0x288] sm:$0xff] }
  0x72   :  { %2237 = vst.msk [vmem:[%s4895_s1 + $0x190] sm:$0xff] %vm2186_vm0, %v2108_v26  ;;  %v1087_v37 = vmax.f32 %v831_v23, %v2881_v13  ;;  %v322_v40 = vmax.f32 %v2753_v0, %v2881_v13  ;;  %v1853_v24 = vmax.f32 %v1597_v30, %v2882_v34  ;;  %v577_v41 = vmax.f32 %v321_v33, %v3008_v8  ;;  %v2758_v0 = vld [vmem:[%s4894_s0 + $0x270] sm:$0xff]  ;;  %v3015_v29 = vld [vmem:[%s4894_s0 + $0x282] sm:$0xff] }
  0x73   :  { %v1598_v38 = vmax.f32 %v1341_v31, %v2755_v35  ;;  %v833_v44 = vmax.f32 %v576_v32, %v2755_v35  ;;  %v1599_v48 = vmax.f32 %v1342_v36, %v2756_v43  ;;  %v1088_v45 = vmax.f32 %v832_v39, %v2882_v34  ;;  %v2761_v26 = vld [vmem:[%s4894_s0 + $0x290] sm:$0xff] }
  0x74   :  { %v1343_v49 = vmax.f32 %v1087_v37, %v3009_v21  ;;  %v578_v50 = vmax.f32 %v322_v40, %v3009_v21  ;;  %v2109_v51 = vmax.f32 %v1853_v24, %v3010_v46  ;;  %v834_v42 = vmax.f32 %v577_v41, %v2756_v43  ;;  %v2888_v30 = vld [vmem:[%s4894_s0 + $0x289] sm:$0xff]  ;;  %v2889_v36 = vld [vmem:[%s4894_s0 + $0x291] sm:$0xff] }
  0x75   :  { %v1854_v52 = vmax.f32 %v1598_v38, %v2883_v47  ;;  %v1089_v55 = vmax.f32 %v833_v44, %v2883_v47  ;;  %v1855_v57 = vmax.f32 %v1599_v48, %v2884_v53  ;;  %v1344_v59 = vmax.f32 %v1088_v45, %v3010_v46  ;;  %v3016_v40 = vld [vmem:[%s4894_s0 + $0x28a] sm:$0xff] }
  0x76   :  { %v1600_v58 = vmax.f32 %v1343_v49, %v2757_v54  ;;  %v835_v60 = vmax.f32 %v578_v50, %v2757_v54  ;;  %2238 = vst.msk [vmem:[%s4895_s1 + $0x198] sm:$0xff] %vm2186_vm0, %v2109_v51  ;;  %v1090_v3 = vmax.f32 %v834_v42, %v2884_v53  ;;  %v323_v4 = vmax.f32 %v2754_v27, %v2882_v34  ;;  %v2762_v50 = vld [vmem:[%s4894_s0 + $0x298] sm:$0xff] }
  0x77   :  { %v2110_v61 = vmax.f32 %v1854_v52, %v3011_v56  ;;  %v1345_v1 = vmax.f32 %v1089_v55, %v3011_v56  ;;  %v2111_v5 = vmax.f32 %v1855_v57, %v3012_v62  ;;  %v1601_v6 = vmax.f32 %v1344_v59, %v2758_v0  ;;  %v2890_v57 = vld [vmem:[%s4894_s0 + $0x299] sm:$0xff] }
  0x78   :  { %v1856_v2 = vmax.f32 %v1600_v58, %v2885_v63  ;;  %v1091_v10 = vmax.f32 %v835_v60, %v2885_v63  ;;  %v1346_v14 = vmax.f32 %v1090_v3, %v3012_v62  ;;  %v579_v15 = vmax.f32 %v323_v4, %v3010_v46  ;;  %v3017_v46 = vld [vmem:[%s4894_s0 + $0x292] sm:$0xff]  ;;  %v2763_v58 = vld [vmem:[%s4894_s0 + $0x2a8] sm:$0xff] }
  0x79   :  { %2239 = vst.msk [vmem:[%s4895_s1 + $0x1a0] sm:$0xff] %vm2186_vm0, %v2110_v61  ;;  %v1602_v13 = vmax.f32 %v1345_v1, %v2759_v7  ;;  %v324_v8 = vmax.f32 %v2755_v35, %v2883_v47  ;;  %v1857_v17 = vmax.f32 %v1601_v6, %v2886_v12  ;;  %v325_v21 = vmax.f32 %v2756_v43, %v2884_v53  ;;  %v2764_v1 = vld [vmem:[%s4894_s0 + $0x2b0] sm:$0xff] }
  0x7a   :  { %2240 = vst.msk [vmem:[%s4895_s1 + $0x1a8] sm:$0xff] %vm2186_vm0, %v2111_v5  ;;  %v2112_v16 = vmax.f32 %v1856_v2, %v3013_v11  ;;  %v1347_v20 = vmax.f32 %v1091_v10, %v3013_v11  ;;  %v1603_v9 = vmax.f32 %v1346_v14, %v2760_v19  ;;  %v836_v27 = vmax.f32 %v579_v15, %v2758_v0  ;;  %v3018_v5 = vld [vmem:[%s4894_s0 + $0x29a] sm:$0xff]  ;;  %v2891_v2 = vld [vmem:[%s4894_s0 + $0x2a9] sm:$0xff]  ;;  %v2892_v14 = vld [vmem:[%s4894_s0 + $0x2b1] sm:$0xff] }
  0x7b   :  { %v1858_v25 = vmax.f32 %v1602_v13, %v2887_v18  ;;  %v580_v28 = vmax.f32 %v324_v8, %v3011_v56  ;;  %v2113_v23 = vmax.f32 %v1857_v17, %v3014_v22  ;;  %v581_v32 = vmax.f32 %v325_v21, %v3012_v62  ;;  %v2765_v15 = vld [vmem:[%s4894_s0 + $0x2b8] sm:$0xff]  ;;  %v3019_v17 = vld [vmem:[%s4894_s0 + $0x2aa] sm:$0xff] }
  0x7c   :  { %2241 = vst.msk [vmem:[%s4895_s1 + $0x1b0] sm:$0xff] %vm2186_vm0, %v2112_v16  ;;  %v1604_v31 = vmax.f32 %v1347_v20, %v2761_v26  ;;  %v326_v33 = vmax.f32 %v2757_v54, %v2885_v63  ;;  %v1859_v35 = vmax.f32 %v1603_v9, %v2888_v30  ;;  %v1092_v37 = vmax.f32 %v836_v27, %v2886_v12  ;;  %v2893_v9 = vld [vmem:[%s4894_s0 + $0x2b9] sm:$0xff] }
  0x7d   :  { %v2114_v34 = vmax.f32 %v1858_v25, %v3015_v29  ;;  %v837_v39 = vmax.f32 %v580_v28, %v2759_v7  ;;  %2242 = vst.msk [vmem:[%s4895_s1 + $0x1b8] sm:$0xff] %vm2186_vm0, %v2113_v23  ;;  %v838_v38 = vmax.f32 %v581_v32, %v2760_v19  ;;  %v327_v44 = vmax.f32 %v2758_v0, %v2886_v12  ;;  %v3020_v25 = vld [vmem:[%s4894_s0 + $0x2b2] sm:$0xff] }
  0x7e   :  { %v1860_v24 = vmax.f32 %v1604_v31, %v2889_v36  ;;  %v582_v43 = vmax.f32 %v326_v33, %v3013_v11  ;;  %v2115_v41 = vmax.f32 %v1859_v35, %v3016_v40  ;;  %v1348_v47 = vmax.f32 %v1092_v37, %v3014_v22  ;;  %v2767_v32 = vld [vmem:[%s4894_s0 + $0x2d0] sm:$0xff]  ;;  %v2894_v35 = vld [vmem:[%s4894_s0 + $0x2c1] sm:$0xff] }
  0x7f   :  { %2243 = vst.msk [vmem:[%s4895_s1 + $0x1c0] sm:$0xff] %vm2186_vm0, %v2114_v34  ;;  %v1093_v48 = vmax.f32 %v837_v39, %v2887_v18  ;;  %v328_v49 = vmax.f32 %v2759_v7, %v2887_v18  ;;  %v1094_v51 = vmax.f32 %v838_v38, %v2888_v30  ;;  %v583_v53 = vmax.f32 %v327_v44, %v3014_v22  ;;  %v3021_v34 = vld [vmem:[%s4894_s0 + $0x2ba] sm:$0xff] }
  0x80   :  { %v2116_v45 = vmax.f32 %v1860_v24, %v3017_v46  ;;  %v839_v52 = vmax.f32 %v582_v43, %v2761_v26  ;;  %2244 = vst.msk [vmem:[%s4895_s1 + $0x1c8] sm:$0xff] %vm2186_vm0, %v2115_v41  ;;  %v1605_v54 = vmax.f32 %v1348_v47, %v2762_v50  ;;  %v329_v56 = vmax.f32 %v2760_v19, %v2888_v30  ;;  %v2895_v43 = vld [vmem:[%s4894_s0 + $0x2d1] sm:$0xff]  ;;  %v3022_v47 = vld [vmem:[%s4894_s0 + $0x2c2] sm:$0xff] }
  0x81   :  { %v1349_v55 = vmax.f32 %v1093_v48, %v3015_v29  ;;  %v584_v42 = vmax.f32 %v328_v49, %v3015_v29  ;;  %v1350_v59 = vmax.f32 %v1094_v51, %v3016_v40  ;;  %v840_v61 = vmax.f32 %v583_v53, %v2762_v50  ;;  %v2768_v44 = vld [vmem:[%s4894_s0 + $0x2d8] sm:$0xff] }
  0x82   :  { %2245 = vst.msk [vmem:[%s4895_s1 + $0x1d0] sm:$0xff] %vm2186_vm0, %v2116_v45  ;;  %v1095_v60 = vmax.f32 %v839_v52, %v2889_v36  ;;  %v330_v62 = vmax.f32 %v2761_v26, %v2889_v36  ;;  %v1861_v63 = vmax.f32 %v1605_v54, %v2890_v57  ;;  %v585_v4 = vmax.f32 %v329_v56, %v3016_v40  ;;  %v2766_v26 = vld [vmem:[%s4894_s0 + $0x2c0] sm:$0xff]  ;;  %v3023_v53 = vld [vmem:[%s4894_s0 + $0x2d2] sm:$0xff] }
  0x83   :  { %v1606_v0 = vmax.f32 %v1349_v55, %v2763_v58  ;;  %v841_v3 = vmax.f32 %v584_v42, %v2763_v58  ;;  %v1607_v6 = vmax.f32 %v1350_v59, %v2764_v1  ;;  %v1096_v10 = vmax.f32 %v840_v61, %v2890_v57  ;;  %v2769_v45 = vld [vmem:[%s4894_s0 + $0x2e0] sm:$0xff] }
  0x84   :  { %v1351_v7 = vmax.f32 %v1095_v60, %v3017_v46  ;;  %v586_v11 = vmax.f32 %v330_v62, %v3017_v46  ;;  %v2117_v12 = vmax.f32 %v1861_v63, %v3018_v5  ;;  %v842_v16 = vmax.f32 %v585_v4, %v2764_v1  ;;  %v2896_v54 = vld [vmem:[%s4894_s0 + $0x2d9] sm:$0xff]  ;;  %v2897_v59 = vld [vmem:[%s4894_s0 + $0x2e1] sm:$0xff] }
  0x85   :  { %v1862_v13 = vmax.f32 %v1606_v0, %v2891_v2  ;;  %v1097_v8 = vmax.f32 %v841_v3, %v2891_v2  ;;  %v1863_v18 = vmax.f32 %v1607_v6, %v2892_v14  ;;  %v1352_v20 = vmax.f32 %v1096_v10, %v3018_v5  ;;  %v3024_v62 = vld [vmem:[%s4894_s0 + $0x2da] sm:$0xff] }
  0x86   :  { %v1608_v19 = vmax.f32 %v1351_v7, %v2765_v15  ;;  %v843_v21 = vmax.f32 %v586_v11, %v2765_v15  ;;  %2246 = vst.msk [vmem:[%s4895_s1 + $0x1d8] sm:$0xff] %vm2186_vm0, %v2117_v12  ;;  %v1098_v28 = vmax.f32 %v842_v16, %v2892_v14  ;;  %v331_v23 = vmax.f32 %v2762_v50, %v2890_v57  ;;  %v2770_v11 = vld [vmem:[%s4894_s0 + $0x2e8] sm:$0xff] }
  0x87   :  { %v2118_v22 = vmax.f32 %v1862_v13, %v3019_v17  ;;  %v1353_v27 = vmax.f32 %v1097_v8, %v3019_v17  ;;  %v2119_v29 = vmax.f32 %v1863_v18, %v3020_v25  ;;  %v1609_v31 = vmax.f32 %v1352_v20, %v2766_v26  ;;  %v2898_v18 = vld [vmem:[%s4894_s0 + $0x2e9] sm:$0xff] }
  0x88   :  { %v1864_v30 = vmax.f32 %v1608_v19, %v2893_v9  ;;  %v1099_v33 = vmax.f32 %v843_v21, %v2893_v9  ;;  %v1354_v37 = vmax.f32 %v1098_v28, %v3020_v25  ;;  %v587_v39 = vmax.f32 %v331_v23, %v3018_v5  ;;  %v3025_v5 = vld [vmem:[%s4894_s0 + $0x2e2] sm:$0xff]  ;;  %v2771_v19 = vld [vmem:[%s4894_s0 + $0x2f8] sm:$0xff] }
  0x89   :  { %2247 = vst.msk [vmem:[%s4895_s1 + $0x1e0] sm:$0xff] %vm2186_vm0, %v2118_v22  ;;  %v1610_v36 = vmax.f32 %v1353_v27, %v2767_v32  ;;  %v332_v40 = vmax.f32 %v2763_v58, %v2891_v2  ;;  %v1865_v38 = vmax.f32 %v1609_v31, %v2894_v35  ;;  %v333_v46 = vmax.f32 %v2764_v1, %v2892_v14  ;;  %v2772_v27 = vld [vmem:[%s4894_s0 + $0x300] sm:$0xff] }
  0x8a   :  { %2248 = vst.msk [vmem:[%s4895_s1 + $0x1e8] sm:$0xff] %vm2186_vm0, %v2119_v29  ;;  %v2120_v24 = vmax.f32 %v1864_v30, %v3021_v34  ;;  %v1355_v41 = vmax.f32 %v1099_v33, %v3021_v34  ;;  %v1611_v49 = vmax.f32 %v1354_v37, %v2768_v44  ;;  %v844_v50 = vmax.f32 %v587_v39, %v2766_v26  ;;  %v3026_v29 = vld [vmem:[%s4894_s0 + $0x2ea] sm:$0xff]  ;;  %v2899_v30 = vld [vmem:[%s4894_s0 + $0x2f9] sm:$0xff]  ;;  %v2900_v37 = vld [vmem:[%s4894_s0 + $0x301] sm:$0xff] }
  0x8b   :  { %v1866_v48 = vmax.f32 %v1610_v36, %v2895_v43  ;;  %v588_v51 = vmax.f32 %v332_v40, %v3019_v17  ;;  %v2121_v52 = vmax.f32 %v1865_v38, %v3022_v47  ;;  %v589_v42 = vmax.f32 %v333_v46, %v3020_v25  ;;  %v2773_v39 = vld [vmem:[%s4894_s0 + $0x308] sm:$0xff]  ;;  %v3027_v38 = vld [vmem:[%s4894_s0 + $0x2fa] sm:$0xff] }
  0x8c   :  { %2249 = vst.msk [vmem:[%s4895_s1 + $0x1f0] sm:$0xff] %vm2186_vm0, %v2120_v24  ;;  %v1612_v55 = vmax.f32 %v1355_v41, %v2769_v45  ;;  %v334_v56 = vmax.f32 %v2765_v15, %v2893_v9  ;;  %v1867_v58 = vmax.f32 %v1611_v49, %v2896_v54  ;;  %v1100_v60 = vmax.f32 %v844_v50, %v2894_v35  ;;  %v2901_v49 = vld [vmem:[%s4894_s0 + $0x309] sm:$0xff] }
  0x8d   :  { %v2122_v57 = vmax.f32 %v1866_v48, %v3023_v53  ;;  %v845_v61 = vmax.f32 %v588_v51, %v2767_v32  ;;  %2250 = vst.msk [vmem:[%s4895_s1 + $0x1f8] sm:$0xff] %vm2186_vm0, %v2121_v52  ;;  %v846_v0 = vmax.f32 %v589_v42, %v2768_v44  ;;  %v335_v3 = vmax.f32 %v2766_v26, %v2894_v35  ;;  %v3028_v48 = vld [vmem:[%s4894_s0 + $0x302] sm:$0xff] }
  0x8e   :  { %v1868_v63 = vmax.f32 %v1612_v55, %v2897_v59  ;;  %v590_v1 = vmax.f32 %v334_v56, %v3021_v34  ;;  %v2123_v4 = vmax.f32 %v1867_v58, %v3024_v62  ;;  %v1356_v2 = vmax.f32 %v1100_v60, %v3022_v47  ;;  %v2775_v42 = vld [vmem:[%s4894_s0 + $0x320] sm:$0xff]  ;;  %v2902_v58 = vld [vmem:[%s4894_s0 + $0x311] sm:$0xff] }
  0x8f   :  { %2251 = vst.msk [vmem:[%s4895_s1 + $0x200] sm:$0xff] %vm2186_vm0, %v2122_v57  ;;  %v1101_v6 = vmax.f32 %v845_v61, %v2895_v43  ;;  %v336_v7 = vmax.f32 %v2767_v32, %v2895_v43  ;;  %v1102_v12 = vmax.f32 %v846_v0, %v2896_v54  ;;  %v591_v14 = vmax.f32 %v335_v3, %v3022_v47  ;;  %v3029_v57 = vld [vmem:[%s4894_s0 + $0x30a] sm:$0xff] }
  0x90   :  { %v2124_v10 = vmax.f32 %v1868_v63, %v3025_v5  ;;  %v847_v13 = vmax.f32 %v590_v1, %v2769_v45  ;;  %2252 = vst.msk [vmem:[%s4895_s1 + $0x208] sm:$0xff] %vm2186_vm0, %v2123_v4  ;;  %v1613_v15 = vmax.f32 %v1356_v2, %v2770_v11  ;;  %v337_v17 = vmax.f32 %v2768_v44, %v2896_v54  ;;  %v2903_v1 = vld [vmem:[%s4894_s0 + $0x321] sm:$0xff]  ;;  %v3030_v2 = vld [vmem:[%s4894_s0 + $0x312] sm:$0xff] }
  0x91   :  { %v1357_v8 = vmax.f32 %v1101_v6, %v3023_v53  ;;  %v592_v16 = vmax.f32 %v336_v7, %v3023_v53  ;;  %v1358_v20 = vmax.f32 %v1102_v12, %v3024_v62  ;;  %v848_v22 = vmax.f32 %v591_v14, %v2770_v11  ;;  %v2776_v3 = vld [vmem:[%s4894_s0 + $0x328] sm:$0xff] }
  0x92   :  { %2253 = vst.msk [vmem:[%s4895_s1 + $0x210] sm:$0xff] %vm2186_vm0, %v2124_v10  ;;  %v1103_v21 = vmax.f32 %v847_v13, %v2897_v59  ;;  %v338_v25 = vmax.f32 %v2769_v45, %v2897_v59  ;;  %v1869_v9 = vmax.f32 %v1613_v15, %v2898_v18  ;;  %v593_v23 = vmax.f32 %v337_v17, %v3024_v62  ;;  %v2774_v45 = vld [vmem:[%s4894_s0 + $0x310] sm:$0xff]  ;;  %v3031_v14 = vld [vmem:[%s4894_s0 + $0x322] sm:$0xff] }
  0x93   :  { %v1614_v26 = vmax.f32 %v1357_v8, %v2771_v19  ;;  %v849_v28 = vmax.f32 %v592_v16, %v2771_v19  ;;  %v1615_v31 = vmax.f32 %v1358_v20, %v2772_v27  ;;  %v1104_v33 = vmax.f32 %v848_v22, %v2898_v18  ;;  %v2777_v10 = vld [vmem:[%s4894_s0 + $0x330] sm:$0xff] }
  0x94   :  { %v1359_v32 = vmax.f32 %v1103_v21, %v3025_v5  ;;  %v594_v34 = vmax.f32 %v338_v25, %v3025_v5  ;;  %v2125_v35 = vmax.f32 %v1869_v9, %v3026_v29  ;;  %v850_v24 = vmax.f32 %v593_v23, %v2772_v27  ;;  %v2904_v15 = vld [vmem:[%s4894_s0 + $0x329] sm:$0xff]  ;;  %v2905_v20 = vld [vmem:[%s4894_s0 + $0x331] sm:$0xff] }
  0x95   :  { %v1870_v36 = vmax.f32 %v1614_v26, %v2899_v30  ;;  %v1105_v40 = vmax.f32 %v849_v28, %v2899_v30  ;;  %v1871_v43 = vmax.f32 %v1615_v31, %v2900_v37  ;;  %v1360_v41 = vmax.f32 %v1104_v33, %v3026_v29  ;;  %v3032_v25 = vld [vmem:[%s4894_s0 + $0x32a] sm:$0xff] }
  0x96   :  { %v1616_v44 = vmax.f32 %v1359_v32, %v2773_v39  ;;  %v851_v46 = vmax.f32 %v594_v34, %v2773_v39  ;;  %2254 = vst.msk [vmem:[%s4895_s1 + $0x218] sm:$0xff] %vm2186_vm0, %v2125_v35  ;;  %v1106_v51 = vmax.f32 %v850_v24, %v2900_v37  ;;  %v339_v52 = vmax.f32 %v2770_v11, %v2898_v18  ;;  %v2778_v34 = vld [vmem:[%s4894_s0 + $0x338] sm:$0xff] }
  0x97   :  { %v2126_v47 = vmax.f32 %v1870_v36, %v3027_v38  ;;  %v1361_v50 = vmax.f32 %v1105_v40, %v3027_v38  ;;  %v2127_v53 = vmax.f32 %v1871_v43, %v3028_v48  ;;  %v1617_v55 = vmax.f32 %v1360_v41, %v2774_v45  ;;  %v2906_v43 = vld [vmem:[%s4894_s0 + $0x339] sm:$0xff] }
  0x98   :  { %v1872_v54 = vmax.f32 %v1616_v44, %v2901_v49  ;;  %v1107_v56 = vmax.f32 %v851_v46, %v2901_v49  ;;  %v1362_v60 = vmax.f32 %v1106_v51, %v3028_v48  ;;  %v595_v61 = vmax.f32 %v339_v52, %v3026_v29  ;;  %v3033_v29 = vld [vmem:[%s4894_s0 + $0x332] sm:$0xff]  ;;  %v2779_v44 = vld [vmem:[%s4894_s0 + $0x348] sm:$0xff] }
  0x99   :  { %2255 = vst.msk [vmem:[%s4895_s1 + $0x220] sm:$0xff] %vm2186_vm0, %v2126_v47  ;;  %v1618_v59 = vmax.f32 %v1361_v50, %v2775_v42  ;;  %v340_v62 = vmax.f32 %v2771_v19, %v2899_v30  ;;  %v1873_v0 = vmax.f32 %v1617_v55, %v2902_v58  ;;  %v341_v5 = vmax.f32 %v2772_v27, %v2900_v37  ;;  %v2780_v50 = vld [vmem:[%s4894_s0 + $0x350] sm:$0xff] }
  0x9a   :  { %2256 = vst.msk [vmem:[%s4895_s1 + $0x228] sm:$0xff] %vm2186_vm0, %v2127_v53  ;;  %v2128_v63 = vmax.f32 %v1872_v54, %v3029_v57  ;;  %v1363_v4 = vmax.f32 %v1107_v56, %v3029_v57  ;;  %v1619_v7 = vmax.f32 %v1362_v60, %v2776_v3  ;;  %v852_v11 = vmax.f32 %v595_v61, %v2774_v45  ;;  %v3034_v53 = vld [vmem:[%s4894_s0 + $0x33a] sm:$0xff]  ;;  %v2907_v54 = vld [vmem:[%s4894_s0 + $0x349] sm:$0xff]  ;;  %v2908_v60 = vld [vmem:[%s4894_s0 + $0x351] sm:$0xff] }
  0x9b   :  { %v1874_v6 = vmax.f32 %v1618_v59, %v2903_v1  ;;  %v596_v12 = vmax.f32 %v340_v62, %v3027_v38  ;;  %v2129_v13 = vmax.f32 %v1873_v0, %v3030_v2  ;;  %v597_v16 = vmax.f32 %v341_v5, %v3028_v48  ;;  %v2781_v61 = vld [vmem:[%s4894_s0 + $0x358] sm:$0xff]  ;;  %v3035_v0 = vld [vmem:[%s4894_s0 + $0x34a] sm:$0xff] }
  0x9c   :  { %2257 = vst.msk [vmem:[%s4895_s1 + $0x230] sm:$0xff] %vm2186_vm0, %v2128_v63  ;;  %v1620_v8 = vmax.f32 %v1363_v4, %v2777_v10  ;;  %v342_v17 = vmax.f32 %v2773_v39, %v2901_v49  ;;  %v1875_v19 = vmax.f32 %v1619_v7, %v2904_v15  ;;  %v1108_v21 = vmax.f32 %v852_v11, %v2902_v58  ;;  %v2909_v7 = vld [vmem:[%s4894_s0 + $0x359] sm:$0xff] }
  0x9d   :  { %v2130_v18 = vmax.f32 %v1874_v6, %v3031_v14  ;;  %v853_v22 = vmax.f32 %v596_v12, %v2775_v42  ;;  %2258 = vst.msk [vmem:[%s4895_s1 + $0x238] sm:$0xff] %vm2186_vm0, %v2129_v13  ;;  %v854_v26 = vmax.f32 %v597_v16, %v2776_v3  ;;  %v343_v28 = vmax.f32 %v2774_v45, %v2902_v58  ;;  %v3036_v6 = vld [vmem:[%s4894_s0 + $0x352] sm:$0xff] }
  0x9e   :  { %v1876_v9 = vmax.f32 %v1620_v8, %v2905_v20  ;;  %v598_v27 = vmax.f32 %v342_v17, %v3029_v57  ;;  %v2131_v23 = vmax.f32 %v1875_v19, %v3032_v25  ;;  %v1364_v30 = vmax.f32 %v1108_v21, %v3030_v2  ;;  %v2783_v16 = vld [vmem:[%s4894_s0 + $0x370] sm:$0xff]  ;;  %v2910_v19 = vld [vmem:[%s4894_s0 + $0x361] sm:$0xff] }
  0x9f   :  { %2259 = vst.msk [vmem:[%s4895_s1 + $0x240] sm:$0xff] %vm2186_vm0, %v2130_v18  ;;  %v1109_v31 = vmax.f32 %v853_v22, %v2903_v1  ;;  %v344_v32 = vmax.f32 %v2775_v42, %v2903_v1  ;;  %v1110_v35 = vmax.f32 %v854_v26, %v2904_v15  ;;  %v599_v37 = vmax.f32 %v343_v28, %v3030_v2  ;;  %v3037_v18 = vld [vmem:[%s4894_s0 + $0x35a] sm:$0xff] }
  0xa0   :  { %v2132_v33 = vmax.f32 %v1876_v9, %v3033_v29  ;;  %v855_v36 = vmax.f32 %v598_v27, %v2777_v10  ;;  %2260 = vst.msk [vmem:[%s4895_s1 + $0x248] sm:$0xff] %vm2186_vm0, %v2131_v23  ;;  %v1621_v39 = vmax.f32 %v1364_v30, %v2778_v34  ;;  %v345_v38 = vmax.f32 %v2776_v3, %v2904_v15  ;;  %v2911_v27 = vld [vmem:[%s4894_s0 + $0x371] sm:$0xff]  ;;  %v3038_v30 = vld [vmem:[%s4894_s0 + $0x362] sm:$0xff] }
  0xa1   :  { %v1365_v40 = vmax.f32 %v1109_v31, %v3031_v14  ;;  %v600_v24 = vmax.f32 %v344_v32, %v3031_v14  ;;  %v1366_v41 = vmax.f32 %v1110_v35, %v3032_v25  ;;  %v856_v47 = vmax.f32 %v599_v37, %v2778_v34  ;;  %v2784_v28 = vld [vmem:[%s4894_s0 + $0x378] sm:$0xff] }
  0xa2   :  { %2261 = vst.msk [vmem:[%s4895_s1 + $0x250] sm:$0xff] %vm2186_vm0, %v2132_v33  ;;  %v1111_v46 = vmax.f32 %v855_v36, %v2905_v20  ;;  %v346_v48 = vmax.f32 %v2777_v10, %v2905_v20  ;;  %v1877_v49 = vmax.f32 %v1621_v39, %v2906_v43  ;;  %v601_v52 = vmax.f32 %v345_v38, %v3032_v25  ;;  %v2782_v10 = vld [vmem:[%s4894_s0 + $0x360] sm:$0xff]  ;;  %v3039_v37 = vld [vmem:[%s4894_s0 + $0x372] sm:$0xff] }
  0xa3   :  { %v1622_v45 = vmax.f32 %v1365_v40, %v2779_v44  ;;  %v857_v51 = vmax.f32 %v600_v24, %v2779_v44  ;;  %v1623_v55 = vmax.f32 %v1366_v41, %v2780_v50  ;;  %v1112_v56 = vmax.f32 %v856_v47, %v2906_v43  ;;  %v2785_v33 = vld [vmem:[%s4894_s0 + $0x380] sm:$0xff] }
  0xa4   :  { %v1367_v42 = vmax.f32 %v1111_v46, %v3033_v29  ;;  %v602_v57 = vmax.f32 %v346_v48, %v3033_v29  ;;  %v2133_v58 = vmax.f32 %v1877_v49, %v3034_v53  ;;  %v858_v63 = vmax.f32 %v601_v52, %v2780_v50  ;;  %v2912_v39 = vld [vmem:[%s4894_s0 + $0x379] sm:$0xff]  ;;  %v2913_v41 = vld [vmem:[%s4894_s0 + $0x381] sm:$0xff] }
  0xa5   :  { %v1878_v59 = vmax.f32 %v1622_v45, %v2907_v54  ;;  %v1113_v62 = vmax.f32 %v857_v51, %v2907_v54  ;;  %v1879_v1 = vmax.f32 %v1623_v55, %v2908_v60  ;;  %v1368_v4 = vmax.f32 %v1112_v56, %v3034_v53  ;;  %v3040_v48 = vld [vmem:[%s4894_s0 + $0x37a] sm:$0xff] }
  0xa6   :  { %v1624_v3 = vmax.f32 %v1367_v42, %v2781_v61  ;;  %v859_v5 = vmax.f32 %v602_v57, %v2781_v61  ;;  %2262 = vst.msk [vmem:[%s4895_s1 + $0x258] sm:$0xff] %vm2186_vm0, %v2133_v58  ;;  %v1114_v12 = vmax.f32 %v858_v63, %v2908_v60  ;;  %v347_v13 = vmax.f32 %v2778_v34, %v2906_v43  ;;  %v2786_v57 = vld [vmem:[%s4894_s0 + $0x388] sm:$0xff] }
  0xa7   :  { %v2134_v2 = vmax.f32 %v1878_v59, %v3035_v0  ;;  %v1369_v11 = vmax.f32 %v1113_v62, %v3035_v0  ;;  %v2135_v14 = vmax.f32 %v1879_v1, %v3036_v6  ;;  %v1625_v8 = vmax.f32 %v1368_v4, %v2782_v10  ;;  %v2914_v1 = vld [vmem:[%s4894_s0 + $0x389] sm:$0xff] }
  0xa8   :  { %v1880_v15 = vmax.f32 %v1624_v3, %v2909_v7  ;;  %v1115_v17 = vmax.f32 %v859_v5, %v2909_v7  ;;  %v1370_v21 = vmax.f32 %v1114_v12, %v3036_v6  ;;  %v603_v22 = vmax.f32 %v347_v13, %v3034_v53  ;;  %v3041_v53 = vld [vmem:[%s4894_s0 + $0x382] sm:$0xff]  ;;  %v2787_v3 = vld [vmem:[%s4894_s0 + $0x398] sm:$0xff] }
  0xa9   :  { %2263 = vst.msk [vmem:[%s4895_s1 + $0x260] sm:$0xff] %vm2186_vm0, %v2134_v2  ;;  %v1626_v20 = vmax.f32 %v1369_v11, %v2783_v16  ;;  %v348_v25 = vmax.f32 %v2779_v44, %v2907_v54  ;;  %v1881_v26 = vmax.f32 %v1625_v8, %v2910_v19  ;;  %v349_v29 = vmax.f32 %v2780_v50, %v2908_v60  ;;  %v2788_v11 = vld [vmem:[%s4894_s0 + $0x3a0] sm:$0xff] }
  0xaa   :  { %2264 = vst.msk [vmem:[%s4895_s1 + $0x268] sm:$0xff] %vm2186_vm0, %v2135_v14  ;;  %v2136_v9 = vmax.f32 %v1880_v15, %v3037_v18  ;;  %v1371_v23 = vmax.f32 %v1115_v17, %v3037_v18  ;;  %v1627_v32 = vmax.f32 %v1370_v21, %v2784_v28  ;;  %v860_v34 = vmax.f32 %v603_v22, %v2782_v10  ;;  %v3042_v14 = vld [vmem:[%s4894_s0 + $0x38a] sm:$0xff]  ;;  %v2915_v15 = vld [vmem:[%s4894_s0 + $0x399] sm:$0xff]  ;;  %v2916_v21 = vld [vmem:[%s4894_s0 + $0x3a1] sm:$0xff] }
  0xab   :  { %v1882_v31 = vmax.f32 %v1626_v20, %v2911_v27  ;;  %v604_v35 = vmax.f32 %v348_v25, %v3035_v0  ;;  %v2137_v36 = vmax.f32 %v1881_v26, %v3038_v30  ;;  %v605_v24 = vmax.f32 %v349_v29, %v3036_v6  ;;  %v2789_v22 = vld [vmem:[%s4894_s0 + $0x3a8] sm:$0xff]  ;;  %v3043_v26 = vld [vmem:[%s4894_s0 + $0x39a] sm:$0xff] }
  0xac   :  { %2265 = vst.msk [vmem:[%s4895_s1 + $0x270] sm:$0xff] %vm2186_vm0, %v2136_v9  ;;  %v1628_v40 = vmax.f32 %v1371_v23, %v2785_v33  ;;  %v350_v38 = vmax.f32 %v2781_v61, %v2909_v7  ;;  %v1883_v44 = vmax.f32 %v1627_v32, %v2912_v39  ;;  %v1116_v46 = vmax.f32 %v860_v34, %v2910_v19  ;;  %v2917_v32 = vld [vmem:[%s4894_s0 + $0x3a9] sm:$0xff] }
  0xad   :  { %v2138_v43 = vmax.f32 %v1882_v31, %v3039_v37  ;;  %v861_v47 = vmax.f32 %v604_v35, %v2783_v16  ;;  %2266 = vst.msk [vmem:[%s4895_s1 + $0x278] sm:$0xff] %vm2186_vm0, %v2137_v36  ;;  %v862_v45 = vmax.f32 %v605_v24, %v2784_v28  ;;  %v351_v51 = vmax.f32 %v2782_v10, %v2910_v19  ;;  %v3044_v31 = vld [vmem:[%s4894_s0 + $0x3a2] sm:$0xff] }
  0xae   :  { %v1884_v49 = vmax.f32 %v1628_v40, %v2913_v41  ;;  %v606_v50 = vmax.f32 %v350_v38, %v3037_v18  ;;  %v2139_v52 = vmax.f32 %v1883_v44, %v3040_v48  ;;  %v1372_v54 = vmax.f32 %v1116_v46, %v3038_v30  ;;  %v2791_v24 = vld [vmem:[%s4894_s0 + $0x3c0] sm:$0xff]  ;;  %v2918_v44 = vld [vmem:[%s4894_s0 + $0x3b1] sm:$0xff] }
  0xaf   :  { %2267 = vst.msk [vmem:[%s4895_s1 + $0x280] sm:$0xff] %vm2186_vm0, %v2138_v43  ;;  %v1117_v55 = vmax.f32 %v861_v47, %v2911_v27  ;;  %v352_v42 = vmax.f32 %v2783_v16, %v2911_v27  ;;  %v1118_v58 = vmax.f32 %v862_v45, %v2912_v39  ;;  %v607_v60 = vmax.f32 %v351_v51, %v3038_v30  ;;  %v3045_v43 = vld [vmem:[%s4894_s0 + $0x3aa] sm:$0xff] }
  0xb0   :  { %v2140_v56 = vmax.f32 %v1884_v49, %v3041_v53  ;;  %v863_v59 = vmax.f32 %v606_v50, %v2785_v33  ;;  %2268 = vst.msk [vmem:[%s4895_s1 + $0x288] sm:$0xff] %vm2186_vm0, %v2139_v52  ;;  %v1629_v61 = vmax.f32 %v1372_v54, %v2786_v57  ;;  %v353_v0 = vmax.f32 %v2784_v28, %v2912_v39  ;;  %v2919_v50 = vld [vmem:[%s4894_s0 + $0x3c1] sm:$0xff]  ;;  %v3046_v54 = vld [vmem:[%s4894_s0 + $0x3b2] sm:$0xff] }
  0xb1   :  { %v1373_v62 = vmax.f32 %v1117_v55, %v3039_v37  ;;  %v608_v63 = vmax.f32 %v352_v42, %v3039_v37  ;;  %v1374_v4 = vmax.f32 %v1118_v58, %v3040_v48  ;;  %v864_v2 = vmax.f32 %v607_v60, %v2786_v57  ;;  %v2792_v51 = vld [vmem:[%s4894_s0 + $0x3c8] sm:$0xff] }
  0xb2   :  { %2269 = vst.msk [vmem:[%s4895_s1 + $0x290] sm:$0xff] %vm2186_vm0, %v2140_v56  ;;  %v1119_v5 = vmax.f32 %v863_v59, %v2913_v41  ;;  %v354_v6 = vmax.f32 %v2785_v33, %v2913_v41  ;;  %v1885_v7 = vmax.f32 %v1629_v61, %v2914_v1  ;;  %v609_v13 = vmax.f32 %v353_v0, %v3040_v48  ;;  %v2790_v33 = vld [vmem:[%s4894_s0 + $0x3b0] sm:$0xff]  ;;  %v3047_v60 = vld [vmem:[%s4894_s0 + $0x3c2] sm:$0xff] }
  0xb3   :  { %v1630_v10 = vmax.f32 %v1373_v62, %v2787_v3  ;;  %v865_v12 = vmax.f32 %v608_v63, %v2787_v3  ;;  %v1631_v8 = vmax.f32 %v1374_v4, %v2788_v11  ;;  %v1120_v17 = vmax.f32 %v864_v2, %v2914_v1  ;;  %v2793_v56 = vld [vmem:[%s4894_s0 + $0x3d0] sm:$0xff] }
  0xb4   :  { %v1375_v16 = vmax.f32 %v1119_v5, %v3041_v53  ;;  %v610_v18 = vmax.f32 %v354_v6, %v3041_v53  ;;  %v2141_v19 = vmax.f32 %v1885_v7, %v3042_v14  ;;  %v866_v9 = vmax.f32 %v609_v13, %v2788_v11  ;;  %v2920_v61 = vld [vmem:[%s4894_s0 + $0x3c9] sm:$0xff]  ;;  %v2921_v4 = vld [vmem:[%s4894_s0 + $0x3d1] sm:$0xff] }
  0xb5   :  { %v1886_v20 = vmax.f32 %v1630_v10, %v2915_v15  ;;  %v1121_v25 = vmax.f32 %v865_v12, %v2915_v15  ;;  %v1887_v27 = vmax.f32 %v1631_v8, %v2916_v21  ;;  %v1376_v23 = vmax.f32 %v1120_v17, %v3042_v14  ;;  %v3048_v6 = vld [vmem:[%s4894_s0 + $0x3ca] sm:$0xff] }
  0xb6   :  { %v1632_v28 = vmax.f32 %v1375_v16, %v2789_v22  ;;  %v867_v29 = vmax.f32 %v610_v18, %v2789_v22  ;;  %2270 = vst.msk [vmem:[%s4895_s1 + $0x298] sm:$0xff] %vm2186_vm0, %v2141_v19  ;;  %v1122_v35 = vmax.f32 %v866_v9, %v2916_v21  ;;  %v355_v36 = vmax.f32 %v2786_v57, %v2914_v1  ;;  %v2794_v18 = vld [vmem:[%s4894_s0 + $0x3d8] sm:$0xff] }
  0xb7   :  { %v2142_v30 = vmax.f32 %v1886_v20, %v3043_v26  ;;  %v1377_v34 = vmax.f32 %v1121_v25, %v3043_v26  ;;  %v2143_v37 = vmax.f32 %v1887_v27, %v3044_v31  ;;  %v1633_v40 = vmax.f32 %v1376_v23, %v2790_v33  ;;  %v2922_v27 = vld [vmem:[%s4894_s0 + $0x3d9] sm:$0xff] }
  0xb8   :  { %v1888_v39 = vmax.f32 %v1632_v28, %v2917_v32  ;;  %v1123_v38 = vmax.f32 %v867_v29, %v2917_v32  ;;  %v1378_v46 = vmax.f32 %v1122_v35, %v3044_v31  ;;  %v611_v47 = vmax.f32 %v355_v36, %v3042_v14  ;;  %v3049_v14 = vld [vmem:[%s4894_s0 + $0x3d2] sm:$0xff]  ;;  %v2795_v28 = vld [vmem:[%s4894_s0 + $0x3e8] sm:$0xff] }
  0xb9   :  { %2271 = vst.msk [vmem:[%s4895_s1 + $0x2a0] sm:$0xff] %vm2186_vm0, %v2142_v30  ;;  %v1634_v41 = vmax.f32 %v1377_v34, %v2791_v24  ;;  %v356_v48 = vmax.f32 %v2787_v3, %v2915_v15  ;;  %v1889_v45 = vmax.f32 %v1633_v40, %v2918_v44  ;;  %v357_v53 = vmax.f32 %v2788_v11, %v2916_v21  ;;  %v2796_v34 = vld [vmem:[%s4894_s0 + $0x3f0] sm:$0xff] }
  0xba   :  { %2272 = vst.msk [vmem:[%s4895_s1 + $0x2a8] sm:$0xff] %vm2186_vm0, %v2143_v37  ;;  %v2144_v49 = vmax.f32 %v1888_v39, %v3045_v43  ;;  %v1379_v52 = vmax.f32 %v1123_v38, %v3045_v43  ;;  %v1635_v42 = vmax.f32 %v1378_v46, %v2792_v51  ;;  %v868_v57 = vmax.f32 %v611_v47, %v2790_v33  ;;  %v3050_v37 = vld [vmem:[%s4894_s0 + $0x3da] sm:$0xff]  ;;  %v2923_v39 = vld [vmem:[%s4894_s0 + $0x3e9] sm:$0xff]  ;;  %v2924_v46 = vld [vmem:[%s4894_s0 + $0x3f1] sm:$0xff] }
  0xbb   :  { %v1890_v55 = vmax.f32 %v1634_v41, %v2919_v50  ;;  %v612_v58 = vmax.f32 %v356_v48, %v3043_v26  ;;  %v2145_v59 = vmax.f32 %v1889_v45, %v3046_v54  ;;  %v613_v63 = vmax.f32 %v357_v53, %v3044_v31  ;;  %v2797_v47 = vld [vmem:[%s4894_s0 + $0x3f8] sm:$0xff]  ;;  %v3051_v45 = vld [vmem:[%s4894_s0 + $0x3ea] sm:$0xff] }
  0xbc   :  { %2273 = vst.msk [vmem:[%s4895_s1 + $0x2b0] sm:$0xff] %vm2186_vm0, %v2144_v49  ;;  %v1636_v62 = vmax.f32 %v1379_v52, %v2793_v56  ;;  %v358_v0 = vmax.f32 %v2789_v22, %v2917_v32  ;;  %v1891_v3 = vmax.f32 %v1635_v42, %v2920_v61  ;;  %v1124_v5 = vmax.f32 %v868_v57, %v2918_v44  ;;  %v2925_v42 = vld [vmem:[%s4894_s0 + $0x3f9] sm:$0xff] }
  0xbd   :  { %v2146_v1 = vmax.f32 %v1890_v55, %v3047_v60  ;;  %v869_v2 = vmax.f32 %v612_v58, %v2791_v24  ;;  %2274 = vst.msk [vmem:[%s4895_s1 + $0x2b8] sm:$0xff] %vm2186_vm0, %v2145_v59  ;;  %v870_v10 = vmax.f32 %v613_v63, %v2792_v51  ;;  %v359_v12 = vmax.f32 %v2790_v33, %v2918_v44  ;;  %v3052_v55 = vld [vmem:[%s4894_s0 + $0x3f2] sm:$0xff] }
  0xbe   :  { %v1892_v7 = vmax.f32 %v1636_v62, %v2921_v4  ;;  %v614_v11 = vmax.f32 %v358_v0, %v3045_v43  ;;  %v2147_v13 = vmax.f32 %v1891_v3, %v3048_v6  ;;  %v1380_v15 = vmax.f32 %v1124_v5, %v3046_v54  ;;  %v2799_v63 = vld [vmem:[%s4894_s0 + $0x410] sm:$0xff]  ;;  %v2926_v3 = vld [vmem:[%s4894_s0 + $0x401] sm:$0xff] }
  0xbf   :  { %2275 = vst.msk [vmem:[%s4895_s1 + $0x2c0] sm:$0xff] %vm2186_vm0, %v2146_v1  ;;  %v1125_v8 = vmax.f32 %v869_v2, %v2919_v50  ;;  %v360_v16 = vmax.f32 %v2791_v24, %v2919_v50  ;;  %v1126_v19 = vmax.f32 %v870_v10, %v2920_v61  ;;  %v615_v21 = vmax.f32 %v359_v12, %v3046_v54  ;;  %v3053_v1 = vld [vmem:[%s4894_s0 + $0x3fa] sm:$0xff] }
  0xc0   :  { %v2148_v17 = vmax.f32 %v1892_v7, %v3049_v14  ;;  %v871_v20 = vmax.f32 %v614_v11, %v2793_v56  ;;  %2276 = vst.msk [vmem:[%s4895_s1 + $0x2c8] sm:$0xff] %vm2186_vm0, %v2147_v13  ;;  %v1637_v22 = vmax.f32 %v1380_v15, %v2794_v18  ;;  %v361_v26 = vmax.f32 %v2792_v51, %v2920_v61  ;;  %v2927_v11 = vld [vmem:[%s4894_s0 + $0x411] sm:$0xff]  ;;  %v3054_v15 = vld [vmem:[%s4894_s0 + $0x402] sm:$0xff] }
  0xc1   :  { %v1381_v25 = vmax.f32 %v1125_v8, %v3047_v60  ;;  %v616_v9 = vmax.f32 %v360_v16, %v3047_v60  ;;  %v1382_v23 = vmax.f32 %v1126_v19, %v3048_v6  ;;  %v872_v30 = vmax.f32 %v615_v21, %v2794_v18  ;;  %v2800_v12 = vld [vmem:[%s4894_s0 + $0x418] sm:$0xff] }
  0xc2   :  { %2277 = vst.msk [vmem:[%s4895_s1 + $0x2d0] sm:$0xff] %vm2186_vm0, %v2148_v17  ;;  %v1127_v29 = vmax.f32 %v871_v20, %v2921_v4  ;;  %v362_v31 = vmax.f32 %v2793_v56, %v2921_v4  ;;  %v1893_v32 = vmax.f32 %v1637_v22, %v2922_v27  ;;  %v617_v36 = vmax.f32 %v361_v26, %v3048_v6  ;;  %v2798_v56 = vld [vmem:[%s4894_s0 + $0x400] sm:$0xff]  ;;  %v3055_v21 = vld [vmem:[%s4894_s0 + $0x412] sm:$0xff] }
  0xc3   :  { %v1638_v33 = vmax.f32 %v1381_v25, %v2795_v28  ;;  %v873_v35 = vmax.f32 %v616_v9, %v2795_v28  ;;  %v1639_v40 = vmax.f32 %v1382_v23, %v2796_v34  ;;  %v1128_v38 = vmax.f32 %v872_v30, %v2922_v27  ;;  %v2801_v17 = vld [vmem:[%s4894_s0 + $0x420] sm:$0xff] }
  0xc4   :  { %v1383_v24 = vmax.f32 %v1127_v29, %v3049_v14  ;;  %v618_v43 = vmax.f32 %v362_v31, %v3049_v14  ;;  %v2149_v44 = vmax.f32 %v1893_v32, %v3050_v37  ;;  %v874_v49 = vmax.f32 %v617_v36, %v2796_v34  ;;  %v2928_v22 = vld [vmem:[%s4894_s0 + $0x419] sm:$0xff]  ;;  %v2929_v23 = vld [vmem:[%s4894_s0 + $0x421] sm:$0xff] }
  0xc5   :  { %v1894_v41 = vmax.f32 %v1638_v33, %v2923_v39  ;;  %v1129_v48 = vmax.f32 %v873_v35, %v2923_v39  ;;  %v1895_v50 = vmax.f32 %v1639_v40, %v2924_v46  ;;  %v1384_v52 = vmax.f32 %v1128_v38, %v3050_v37  ;;  %v3056_v31 = vld [vmem:[%s4894_s0 + $0x41a] sm:$0xff] }
  0xc6   :  { %v1640_v51 = vmax.f32 %v1383_v24, %v2797_v47  ;;  %v875_v53 = vmax.f32 %v618_v43, %v2797_v47  ;;  %2278 = vst.msk [vmem:[%s4895_s1 + $0x2d8] sm:$0xff] %vm2186_vm0, %v2149_v44  ;;  %v1130_v58 = vmax.f32 %v874_v49, %v2924_v46  ;;  %v363_v59 = vmax.f32 %v2794_v18, %v2922_v27  ;;  %v2802_v43 = vld [vmem:[%s4894_s0 + $0x428] sm:$0xff] }
  0xc7   :  { %v2150_v54 = vmax.f32 %v1894_v41, %v3051_v45  ;;  %v1385_v57 = vmax.f32 %v1129_v48, %v3051_v45  ;;  %v2151_v60 = vmax.f32 %v1895_v50, %v3052_v55  ;;  %v1641_v62 = vmax.f32 %v1384_v52, %v2798_v56  ;;  %v2930_v50 = vld [vmem:[%s4894_s0 + $0x429] sm:$0xff] }
  0xc8   :  { %v1896_v61 = vmax.f32 %v1640_v51, %v2925_v42  ;;  %v1131_v0 = vmax.f32 %v875_v53, %v2925_v42  ;;  %v1386_v5 = vmax.f32 %v1130_v58, %v3052_v55  ;;  %v619_v2 = vmax.f32 %v363_v59, %v3050_v37  ;;  %v3057_v37 = vld [vmem:[%s4894_s0 + $0x422] sm:$0xff]  ;;  %v2803_v51 = vld [vmem:[%s4894_s0 + $0x438] sm:$0xff] }
  0xc9   :  { %2279 = vst.msk [vmem:[%s4895_s1 + $0x2e0] sm:$0xff] %vm2186_vm0, %v2150_v54  ;;  %v1642_v4 = vmax.f32 %v1385_v57, %v2799_v63  ;;  %v364_v6 = vmax.f32 %v2795_v28, %v2923_v39  ;;  %v1897_v10 = vmax.f32 %v1641_v62, %v2926_v3  ;;  %v365_v14 = vmax.f32 %v2796_v34, %v2924_v46  ;;  %v2804_v57 = vld [vmem:[%s4894_s0 + $0x440] sm:$0xff] }
  0xca   :  { %2280 = vst.msk [vmem:[%s4895_s1 + $0x2e8] sm:$0xff] %vm2186_vm0, %v2151_v60  ;;  %v2152_v7 = vmax.f32 %v1896_v61, %v3053_v1  ;;  %v1387_v13 = vmax.f32 %v1131_v0, %v3053_v1  ;;  %v1643_v16 = vmax.f32 %v1386_v5, %v2800_v12  ;;  %v876_v18 = vmax.f32 %v619_v2, %v2798_v56  ;;  %v3058_v60 = vld [vmem:[%s4894_s0 + $0x42a] sm:$0xff]  ;;  %v2931_v61 = vld [vmem:[%s4894_s0 + $0x439] sm:$0xff]  ;;  %v2932_v5 = vld [vmem:[%s4894_s0 + $0x441] sm:$0xff] }
  0xcb   :  { %v1898_v8 = vmax.f32 %v1642_v4, %v2927_v11  ;;  %v620_v19 = vmax.f32 %v364_v6, %v3051_v45  ;;  %v2153_v20 = vmax.f32 %v1897_v10, %v3054_v15  ;;  %v621_v9 = vmax.f32 %v365_v14, %v3052_v55  ;;  %v2805_v2 = vld [vmem:[%s4894_s0 + $0x448] sm:$0xff]  ;;  %v3059_v10 = vld [vmem:[%s4894_s0 + $0x43a] sm:$0xff] }
  0xcc   :  { %2281 = vst.msk [vmem:[%s4895_s1 + $0x2f0] sm:$0xff] %vm2186_vm0, %v2152_v7  ;;  %v1644_v25 = vmax.f32 %v1387_v13, %v2801_v17  ;;  %v366_v26 = vmax.f32 %v2797_v47, %v2925_v42  ;;  %v1899_v28 = vmax.f32 %v1643_v16, %v2928_v22  ;;  %v1132_v29 = vmax.f32 %v876_v18, %v2926_v3  ;;  %v2933_v16 = vld [vmem:[%s4894_s0 + $0x449] sm:$0xff] }
  0xcd   :  { %v2154_v27 = vmax.f32 %v1898_v8, %v3055_v21  ;;  %v877_v30 = vmax.f32 %v620_v19, %v2799_v63  ;;  %2282 = vst.msk [vmem:[%s4895_s1 + $0x2f8] sm:$0xff] %vm2186_vm0, %v2153_v20  ;;  %v878_v33 = vmax.f32 %v621_v9, %v2800_v12  ;;  %v367_v35 = vmax.f32 %v2798_v56, %v2926_v3  ;;  %v3060_v8 = vld [vmem:[%s4894_s0 + $0x442] sm:$0xff] }
  0xce   :  { %v1900_v32 = vmax.f32 %v1644_v25, %v2929_v23  ;;  %v622_v34 = vmax.f32 %v366_v26, %v3053_v1  ;;  %v2155_v36 = vmax.f32 %v1899_v28, %v3056_v31  ;;  %v1388_v39 = vmax.f32 %v1132_v29, %v3054_v15  ;;  %v2807_v9 = vld [vmem:[%s4894_s0 + $0x460] sm:$0xff]  ;;  %v2934_v28 = vld [vmem:[%s4894_s0 + $0x451] sm:$0xff] }
  0xcf   :  { %2283 = vst.msk [vmem:[%s4895_s1 + $0x300] sm:$0xff] %vm2186_vm0, %v2154_v27  ;;  %v1133_v40 = vmax.f32 %v877_v30, %v2927_v11  ;;  %v368_v24 = vmax.f32 %v2799_v63, %v2927_v11  ;;  %v1134_v44 = vmax.f32 %v878_v33, %v2928_v22  ;;  %v623_v46 = vmax.f32 %v367_v35, %v3054_v15  ;;  %v3061_v27 = vld [vmem:[%s4894_s0 + $0x44a] sm:$0xff] }
  0xd0   :  { %v2156_v38 = vmax.f32 %v1900_v32, %v3057_v37  ;;  %v879_v41 = vmax.f32 %v622_v34, %v2801_v17  ;;  %2284 = vst.msk [vmem:[%s4895_s1 + $0x308] sm:$0xff] %vm2186_vm0, %v2155_v36  ;;  %v1645_v47 = vmax.f32 %v1388_v39, %v2802_v43  ;;  %v369_v45 = vmax.f32 %v2800_v12, %v2928_v22  ;;  %v2935_v34 = vld [vmem:[%s4894_s0 + $0x461] sm:$0xff]  ;;  %v3062_v39 = vld [vmem:[%s4894_s0 + $0x452] sm:$0xff] }
  0xd1   :  { %v1389_v48 = vmax.f32 %v1133_v40, %v3055_v21  ;;  %v624_v49 = vmax.f32 %v368_v24, %v3055_v21  ;;  %v1390_v52 = vmax.f32 %v1134_v44, %v3056_v31  ;;  %v880_v54 = vmax.f32 %v623_v46, %v2802_v43  ;;  %v2808_v35 = vld [vmem:[%s4894_s0 + $0x468] sm:$0xff] }
  0xd2   :  { %2285 = vst.msk [vmem:[%s4895_s1 + $0x310] sm:$0xff] %vm2186_vm0, %v2156_v38  ;;  %v1135_v53 = vmax.f32 %v879_v41, %v2929_v23  ;;  %v370_v55 = vmax.f32 %v2801_v17, %v2929_v23  ;;  %v1901_v42 = vmax.f32 %v1645_v47, %v2930_v50  ;;  %v625_v59 = vmax.f32 %v369_v45, %v3056_v31  ;;  %v2806_v17 = vld [vmem:[%s4894_s0 + $0x450] sm:$0xff]  ;;  %v3063_v46 = vld [vmem:[%s4894_s0 + $0x462] sm:$0xff] }
  0xd3   :  { %v1646_v56 = vmax.f32 %v1389_v48, %v2803_v51  ;;  %v881_v58 = vmax.f32 %v624_v49, %v2803_v51  ;;  %v1647_v62 = vmax.f32 %v1390_v52, %v2804_v57  ;;  %v1136_v0 = vmax.f32 %v880_v54, %v2930_v50  ;;  %v2809_v38 = vld [vmem:[%s4894_s0 + $0x470] sm:$0xff] }
  0xd4   :  { %v1391_v63 = vmax.f32 %v1135_v53, %v3057_v37  ;;  %v626_v1 = vmax.f32 %v370_v55, %v3057_v37  ;;  %v2157_v3 = vmax.f32 %v1901_v42, %v3058_v60  ;;  %v882_v7 = vmax.f32 %v625_v59, %v2804_v57  ;;  %v2936_v47 = vld [vmem:[%s4894_s0 + $0x469] sm:$0xff]  ;;  %v2937_v52 = vld [vmem:[%s4894_s0 + $0x471] sm:$0xff] }
  0xd5   :  { %v1902_v4 = vmax.f32 %v1646_v56, %v2931_v61  ;;  %v1137_v6 = vmax.f32 %v881_v58, %v2931_v61  ;;  %v1903_v11 = vmax.f32 %v1647_v62, %v2932_v5  ;;  %v1392_v13 = vmax.f32 %v1136_v0, %v3058_v60  ;;  %v3064_v55 = vld [vmem:[%s4894_s0 + $0x46a] sm:$0xff] }
  0xd6   :  { %v1648_v12 = vmax.f32 %v1391_v63, %v2805_v2  ;;  %v883_v14 = vmax.f32 %v626_v1, %v2805_v2  ;;  %2286 = vst.msk [vmem:[%s4895_s1 + $0x318] sm:$0xff] %vm2186_vm0, %v2157_v3  ;;  %v1138_v19 = vmax.f32 %v882_v7, %v2932_v5  ;;  %v371_v20 = vmax.f32 %v2802_v43, %v2930_v50  ;;  %v2810_v1 = vld [vmem:[%s4894_s0 + $0x478] sm:$0xff] }
  0xd7   :  { %v2158_v15 = vmax.f32 %v1902_v4, %v3059_v10  ;;  %v1393_v18 = vmax.f32 %v1137_v6, %v3059_v10  ;;  %v2159_v21 = vmax.f32 %v1903_v11, %v3060_v8  ;;  %v1649_v25 = vmax.f32 %v1392_v13, %v2806_v17  ;;  %v2938_v11 = vld [vmem:[%s4894_s0 + $0x479] sm:$0xff] }
  0xd8   :  { %v1904_v22 = vmax.f32 %v1648_v12, %v2933_v16  ;;  %v1139_v26 = vmax.f32 %v883_v14, %v2933_v16  ;;  %v1394_v29 = vmax.f32 %v1138_v19, %v3060_v8  ;;  %v627_v30 = vmax.f32 %v371_v20, %v3058_v60  ;;  %v3065_v60 = vld [vmem:[%s4894_s0 + $0x472] sm:$0xff]  ;;  %v2811_v12 = vld [vmem:[%s4894_s0 + $0x488] sm:$0xff] }
  0xd9   :  { %2287 = vst.msk [vmem:[%s4895_s1 + $0x320] sm:$0xff] %vm2186_vm0, %v2158_v15  ;;  %v1650_v23 = vmax.f32 %v1393_v18, %v2807_v9  ;;  %v372_v31 = vmax.f32 %v2803_v51, %v2931_v61  ;;  %v1905_v33 = vmax.f32 %v1649_v25, %v2934_v28  ;;  %v373_v37 = vmax.f32 %v2804_v57, %v2932_v5  ;;  %v2812_v18 = vld [vmem:[%s4894_s0 + $0x490] sm:$0xff] }
  0xda   :  { %2288 = vst.msk [vmem:[%s4895_s1 + $0x328] sm:$0xff] %vm2186_vm0, %v2159_v21  ;;  %v2160_v32 = vmax.f32 %v1904_v22, %v3061_v27  ;;  %v1395_v36 = vmax.f32 %v1139_v26, %v3061_v27  ;;  %v1651_v24 = vmax.f32 %v1394_v29, %v2808_v35  ;;  %v884_v43 = vmax.f32 %v627_v30, %v2806_v17  ;;  %v3066_v21 = vld [vmem:[%s4894_s0 + $0x47a] sm:$0xff]  ;;  %v2939_v22 = vld [vmem:[%s4894_s0 + $0x489] sm:$0xff]  ;;  %v2940_v29 = vld [vmem:[%s4894_s0 + $0x491] sm:$0xff] }
  0xdb   :  { %v1906_v40 = vmax.f32 %v1650_v23, %v2935_v34  ;;  %v628_v44 = vmax.f32 %v372_v31, %v3059_v10  ;;  %v2161_v41 = vmax.f32 %v1905_v33, %v3062_v39  ;;  %v629_v49 = vmax.f32 %v373_v37, %v3060_v8  ;;  %v2813_v30 = vld [vmem:[%s4894_s0 + $0x498] sm:$0xff]  ;;  %v3067_v33 = vld [vmem:[%s4894_s0 + $0x48a] sm:$0xff] }
  0xdc   :  { %2289 = vst.msk [vmem:[%s4895_s1 + $0x330] sm:$0xff] %vm2186_vm0, %v2160_v32  ;;  %v1652_v48 = vmax.f32 %v1395_v36, %v2809_v38  ;;  %v374_v45 = vmax.f32 %v2805_v2, %v2933_v16  ;;  %v1907_v51 = vmax.f32 %v1651_v24, %v2936_v47  ;;  %v1140_v53 = vmax.f32 %v884_v43, %v2934_v28  ;;  %v2941_v24 = vld [vmem:[%s4894_s0 + $0x499] sm:$0xff] }
  0xdd   :  { %v2162_v50 = vmax.f32 %v1906_v40, %v3063_v46  ;;  %v885_v54 = vmax.f32 %v628_v44, %v2807_v9  ;;  %2290 = vst.msk [vmem:[%s4895_s1 + $0x338] sm:$0xff] %vm2186_vm0, %v2161_v41  ;;  %v886_v56 = vmax.f32 %v629_v49, %v2808_v35  ;;  %v375_v58 = vmax.f32 %v2806_v17, %v2934_v28  ;;  %v3068_v40 = vld [vmem:[%s4894_s0 + $0x492] sm:$0xff] }
  0xde   :  { %v1908_v42 = vmax.f32 %v1652_v48, %v2937_v52  ;;  %v630_v57 = vmax.f32 %v374_v45, %v3061_v27  ;;  %v2163_v59 = vmax.f32 %v1907_v51, %v3064_v55  ;;  %v1396_v61 = vmax.f32 %v1140_v53, %v3062_v39  ;;  %v2815_v49 = vld [vmem:[%s4894_s0 + $0x4b0] sm:$0xff]  ;;  %v2942_v51 = vld [vmem:[%s4894_s0 + $0x4a1] sm:$0xff] }
  0xdf   :  { %2291 = vst.msk [vmem:[%s4895_s1 + $0x340] sm:$0xff] %vm2186_vm0, %v2162_v50  ;;  %v1141_v62 = vmax.f32 %v885_v54, %v2935_v34  ;;  %v376_v63 = vmax.f32 %v2807_v9, %v2935_v34  ;;  %v1142_v3 = vmax.f32 %v886_v56, %v2936_v47  ;;  %v631_v5 = vmax.f32 %v375_v58, %v3062_v39  ;;  %v3069_v50 = vld [vmem:[%s4894_s0 + $0x49a] sm:$0xff] }
  0xe0   :  { %v2164_v0 = vmax.f32 %v1908_v42, %v3065_v60  ;;  %v887_v4 = vmax.f32 %v630_v57, %v2809_v38  ;;  %2292 = vst.msk [vmem:[%s4895_s1 + $0x348] sm:$0xff] %vm2186_vm0, %v2163_v59  ;;  %v1653_v2 = vmax.f32 %v1396_v61, %v2810_v1  ;;  %v377_v10 = vmax.f32 %v2808_v35, %v2936_v47  ;;  %v2943_v57 = vld [vmem:[%s4894_s0 + $0x4b1] sm:$0xff]  ;;  %v3070_v61 = vld [vmem:[%s4894_s0 + $0x4a2] sm:$0xff] }
  0xe1   :  { %v1397_v6 = vmax.f32 %v1141_v62, %v3063_v46  ;;  %v632_v7 = vmax.f32 %v376_v63, %v3063_v46  ;;  %v1398_v13 = vmax.f32 %v1142_v3, %v3064_v55  ;;  %v888_v15 = vmax.f32 %v631_v5, %v2810_v1  ;;  %v2816_v58 = vld [vmem:[%s4894_s0 + $0x4b8] sm:$0xff] }
  0xe2   :  { %2293 = vst.msk [vmem:[%s4895_s1 + $0x350] sm:$0xff] %vm2186_vm0, %v2164_v0  ;;  %v1143_v14 = vmax.f32 %v887_v4, %v2937_v52  ;;  %v378_v8 = vmax.f32 %v2809_v38, %v2937_v52  ;;  %v1909_v16 = vmax.f32 %v1653_v2, %v2938_v11  ;;  %v633_v20 = vmax.f32 %v377_v10, %v3064_v55  ;;  %v2814_v38 = vld [vmem:[%s4894_s0 + $0x4a0] sm:$0xff]  ;;  %v3071_v5 = vld [vmem:[%s4894_s0 + $0x4b2] sm:$0xff] }
  0xe3   :  { %v1654_v17 = vmax.f32 %v1397_v6, %v2811_v12  ;;  %v889_v19 = vmax.f32 %v632_v7, %v2811_v12  ;;  %v1655_v25 = vmax.f32 %v1398_v13, %v2812_v18  ;;  %v1144_v26 = vmax.f32 %v888_v15, %v2938_v11  ;;  %v2817_v0 = vld [vmem:[%s4894_s0 + $0x4c0] sm:$0xff] }
  0xe4   :  { %v1399_v9 = vmax.f32 %v1143_v14, %v3065_v60  ;;  %v634_v27 = vmax.f32 %v378_v8, %v3065_v60  ;;  %v2165_v28 = vmax.f32 %v1909_v16, %v3066_v21  ;;  %v890_v32 = vmax.f32 %v633_v20, %v2812_v18  ;;  %v2944_v2 = vld [vmem:[%s4894_s0 + $0x4b9] sm:$0xff]  ;;  %v2945_v13 = vld [vmem:[%s4894_s0 + $0x4c1] sm:$0xff] }
  0xe5   :  { %v1910_v23 = vmax.f32 %v1654_v17, %v2939_v22  ;;  %v1145_v31 = vmax.f32 %v889_v19, %v2939_v22  ;;  %v1911_v34 = vmax.f32 %v1655_v25, %v2940_v29  ;;  %v1400_v36 = vmax.f32 %v1144_v26, %v3066_v21  ;;  %v3072_v8 = vld [vmem:[%s4894_s0 + $0x4ba] sm:$0xff] }
  0xe6   :  { %v1656_v35 = vmax.f32 %v1399_v9, %v2813_v30  ;;  %v891_v37 = vmax.f32 %v634_v27, %v2813_v30  ;;  %2294 = vst.msk [vmem:[%s4895_s1 + $0x358] sm:$0xff] %vm2186_vm0, %v2165_v28  ;;  %v1146_v44 = vmax.f32 %v890_v32, %v2940_v29  ;;  %v379_v41 = vmax.f32 %v2810_v1, %v2938_v11  ;;  %v2818_v27 = vld [vmem:[%s4894_s0 + $0x4c8] sm:$0xff] }
  0xe7   :  { %v2166_v39 = vmax.f32 %v1910_v23, %v3067_v33  ;;  %v1401_v43 = vmax.f32 %v1145_v31, %v3067_v33  ;;  %v2167_v46 = vmax.f32 %v1911_v34, %v3068_v40  ;;  %v1657_v48 = vmax.f32 %v1400_v36, %v2814_v38  ;;  %v2946_v34 = vld [vmem:[%s4894_s0 + $0x4c9] sm:$0xff] }
  0xe8   :  { %v1912_v47 = vmax.f32 %v1656_v35, %v2941_v24  ;;  %v1147_v45 = vmax.f32 %v891_v37, %v2941_v24  ;;  %v1402_v53 = vmax.f32 %v1146_v44, %v3068_v40  ;;  %v635_v54 = vmax.f32 %v379_v41, %v3066_v21  ;;  %v3073_v21 = vld [vmem:[%s4894_s0 + $0x4c2] sm:$0xff]  ;;  %v2819_v35 = vld [vmem:[%s4894_s0 + $0x4d8] sm:$0xff] }
  0xe9   :  { %2295 = vst.msk [vmem:[%s4895_s1 + $0x360] sm:$0xff] %vm2186_vm0, %v2166_v39  ;;  %v1658_v52 = vmax.f32 %v1401_v43, %v2815_v49  ;;  %v380_v55 = vmax.f32 %v2811_v12, %v2939_v22  ;;  %v1913_v56 = vmax.f32 %v1657_v48, %v2942_v51  ;;  %v381_v60 = vmax.f32 %v2812_v18, %v2940_v29  ;;  %v2820_v43 = vld [vmem:[%s4894_s0 + $0x4e0] sm:$0xff] }
  0xea   :  { %2296 = vst.msk [vmem:[%s4895_s1 + $0x368] sm:$0xff] %vm2186_vm0, %v2167_v46  ;;  %v2168_v42 = vmax.f32 %v1912_v47, %v3069_v50  ;;  %v1403_v59 = vmax.f32 %v1147_v45, %v3069_v50  ;;  %v1659_v63 = vmax.f32 %v1402_v53, %v2816_v58  ;;  %v892_v1 = vmax.f32 %v635_v54, %v2814_v38  ;;  %v3074_v46 = vld [vmem:[%s4894_s0 + $0x4ca] sm:$0xff]  ;;  %v2947_v47 = vld [vmem:[%s4894_s0 + $0x4d9] sm:$0xff]  ;;  %v2948_v53 = vld [vmem:[%s4894_s0 + $0x4e1] sm:$0xff] }
  0xeb   :  { %v1914_v62 = vmax.f32 %v1658_v52, %v2943_v57  ;;  %v636_v3 = vmax.f32 %v380_v55, %v3067_v33  ;;  %v2169_v4 = vmax.f32 %v1913_v56, %v3070_v61  ;;  %v637_v7 = vmax.f32 %v381_v60, %v3068_v40  ;;  %v2821_v54 = vld [vmem:[%s4894_s0 + $0x4e8] sm:$0xff]  ;;  %v3075_v56 = vld [vmem:[%s4894_s0 + $0x4da] sm:$0xff] }
  0xec   :  { %2297 = vst.msk [vmem:[%s4895_s1 + $0x370] sm:$0xff] %vm2186_vm0, %v2168_v42  ;;  %v1660_v6 = vmax.f32 %v1403_v59, %v2817_v0  ;;  %v382_v10 = vmax.f32 %v2813_v30, %v2941_v24  ;;  %v1915_v12 = vmax.f32 %v1659_v63, %v2944_v2  ;;  %v1148_v14 = vmax.f32 %v892_v1, %v2942_v51  ;;  %v2949_v63 = vld [vmem:[%s4894_s0 + $0x4e9] sm:$0xff] }
  0xed   :  { %v2170_v11 = vmax.f32 %v1914_v62, %v3071_v5  ;;  %v893_v15 = vmax.f32 %v636_v3, %v2815_v49  ;;  %2298 = vst.msk [vmem:[%s4895_s1 + $0x378] sm:$0xff] %vm2186_vm0, %v2169_v4  ;;  %v894_v17 = vmax.f32 %v637_v7, %v2816_v58  ;;  %v383_v19 = vmax.f32 %v2814_v38, %v2942_v51  ;;  %v3076_v62 = vld [vmem:[%s4894_s0 + $0x4e2] sm:$0xff] }
  0xee   :  { %v1916_v16 = vmax.f32 %v1660_v6, %v2945_v13  ;;  %v638_v18 = vmax.f32 %v382_v10, %v3069_v50  ;;  %v2171_v20 = vmax.f32 %v1915_v12, %v3072_v8  ;;  %v1404_v22 = vmax.f32 %v1148_v14, %v3070_v61  ;;  %v2823_v7 = vld [vmem:[%s4894_s0 + $0x500] sm:$0xff]  ;;  %v2950_v12 = vld [vmem:[%s4894_s0 + $0x4f1] sm:$0xff] }
  0xef   :  { %2299 = vst.msk [vmem:[%s4895_s1 + $0x380] sm:$0xff] %vm2186_vm0, %v2170_v11  ;;  %v1149_v25 = vmax.f32 %v893_v15, %v2943_v57  ;;  %v384_v9 = vmax.f32 %v2815_v49, %v2943_v57  ;;  %v1150_v28 = vmax.f32 %v894_v17, %v2944_v2  ;;  %v639_v29 = vmax.f32 %v383_v19, %v3070_v61  ;;  %v3077_v11 = vld [vmem:[%s4894_s0 + $0x4ea] sm:$0xff] }
  0xf0   :  { %v2172_v26 = vmax.f32 %v1916_v16, %v3073_v21  ;;  %v895_v23 = vmax.f32 %v638_v18, %v2817_v0  ;;  %2300 = vst.msk [vmem:[%s4895_s1 + $0x388] sm:$0xff] %vm2186_vm0, %v2171_v20  ;;  %v1661_v30 = vmax.f32 %v1404_v22, %v2818_v27  ;;  %v385_v33 = vmax.f32 %v2816_v58, %v2944_v2  ;;  %v2951_v18 = vld [vmem:[%s4894_s0 + $0x501] sm:$0xff]  ;;  %v3078_v22 = vld [vmem:[%s4894_s0 + $0x4f2] sm:$0xff] }
  0xf1   :  { %v1405_v31 = vmax.f32 %v1149_v25, %v3071_v5  ;;  %v640_v32 = vmax.f32 %v384_v9, %v3071_v5  ;;  %v1406_v36 = vmax.f32 %v1150_v28, %v3072_v8  ;;  %v896_v39 = vmax.f32 %v639_v29, %v2818_v27  ;;  %v2824_v19 = vld [vmem:[%s4894_s0 + $0x508] sm:$0xff] }
  0xf2   :  { %2301 = vst.msk [vmem:[%s4895_s1 + $0x390] sm:$0xff] %vm2186_vm0, %v2172_v26  ;;  %v1151_v37 = vmax.f32 %v895_v23, %v2945_v13  ;;  %v386_v40 = vmax.f32 %v2817_v0, %v2945_v13  ;;  %v1917_v24 = vmax.f32 %v1661_v30, %v2946_v34  ;;  %v641_v41 = vmax.f32 %v385_v33, %v3072_v8  ;;  %v2822_v0 = vld [vmem:[%s4894_s0 + $0x4f0] sm:$0xff]  ;;  %v3079_v29 = vld [vmem:[%s4894_s0 + $0x502] sm:$0xff] }
  0xf3   :  { %v1662_v38 = vmax.f32 %v1405_v31, %v2819_v35  ;;  %v897_v44 = vmax.f32 %v640_v32, %v2819_v35  ;;  %v1663_v48 = vmax.f32 %v1406_v36, %v2820_v43  ;;  %v1152_v45 = vmax.f32 %v896_v39, %v2946_v34  ;;  %v2825_v26 = vld [vmem:[%s4894_s0 + $0x510] sm:$0xff] }
  0xf4   :  { %v1407_v49 = vmax.f32 %v1151_v37, %v3073_v21  ;;  %v642_v50 = vmax.f32 %v386_v40, %v3073_v21  ;;  %v2173_v51 = vmax.f32 %v1917_v24, %v3074_v46  ;;  %v898_v42 = vmax.f32 %v641_v41, %v2820_v43  ;;  %v2952_v30 = vld [vmem:[%s4894_s0 + $0x509] sm:$0xff]  ;;  %v2953_v36 = vld [vmem:[%s4894_s0 + $0x511] sm:$0xff] }
  0xf5   :  { %v1918_v52 = vmax.f32 %v1662_v38, %v2947_v47  ;;  %v1153_v55 = vmax.f32 %v897_v44, %v2947_v47  ;;  %v1919_v57 = vmax.f32 %v1663_v48, %v2948_v53  ;;  %v1408_v59 = vmax.f32 %v1152_v45, %v3074_v46  ;;  %v3080_v40 = vld [vmem:[%s4894_s0 + $0x50a] sm:$0xff]  ;;  %v2826_v48 = vld [vmem:[%s4894_s0 + $0x518] sm:$0xff] }
  0xf6   :  { %v1664_v58 = vmax.f32 %v1407_v49, %v2821_v54  ;;  %v899_v60 = vmax.f32 %v642_v50, %v2821_v54  ;;  %2302 = vst.msk [vmem:[%s4895_s1 + $0x398] sm:$0xff] %vm2186_vm0, %v2173_v51  ;;  %v1154_v3 = vmax.f32 %v898_v42, %v2948_v53  ;;  %v387_v4 = vmax.f32 %v2818_v27, %v2946_v34  ;;  %v2827_v50 = vld [vmem:[%s4894_s0 + $0x528] sm:$0xff] }
  0xf7   :  { %v2174_v61 = vmax.f32 %v1918_v52, %v3075_v56  ;;  %v1409_v1 = vmax.f32 %v1153_v55, %v3075_v56  ;;  %v2175_v5 = vmax.f32 %v1919_v57, %v3076_v62  ;;  %v1665_v6 = vmax.f32 %v1408_v59, %v2822_v0  ;;  %v2954_v55 = vld [vmem:[%s4894_s0 + $0x519] sm:$0xff]  ;;  %v2955_v57 = vld [vmem:[%s4894_s0 + $0x529] sm:$0xff] }
  0xf8   :  { %v1920_v2 = vmax.f32 %v1664_v58, %v2949_v63  ;;  %v1155_v10 = vmax.f32 %v899_v60, %v2949_v63  ;;  %v1410_v14 = vmax.f32 %v1154_v3, %v3076_v62  ;;  %v643_v15 = vmax.f32 %v387_v4, %v3074_v46  ;;  %v3081_v46 = vld [vmem:[%s4894_s0 + $0x512] sm:$0xff]  ;;  %v3083_v3 = vld [vmem:[%s4894_s0 + $0x52a] sm:$0xff] }
  0xf9   :  { %2303 = vst.msk [vmem:[%s4895_s1 + $0x3a0] sm:$0xff] %vm2186_vm0, %v2174_v61  ;;  %v1666_v13 = vmax.f32 %v1409_v1, %v2823_v7  ;;  %v388_v8 = vmax.f32 %v2819_v35, %v2947_v47  ;;  %v1921_v17 = vmax.f32 %v1665_v6, %v2950_v12  ;;  %v389_v21 = vmax.f32 %v2820_v43, %v2948_v53  ;;  %v2829_v1 = vld [vmem:[%s4894_s0 + $0x538] sm:$0xff] }
  0xfa   :  { %2304 = vst.msk [vmem:[%s4895_s1 + $0x3a8] sm:$0xff] %vm2186_vm0, %v2175_v5  ;;  %v2176_v16 = vmax.f32 %v1920_v2, %v3077_v11  ;;  %v1411_v20 = vmax.f32 %v1155_v10, %v3077_v11  ;;  %v1667_v9 = vmax.f32 %v1410_v14, %v2824_v19  ;;  %v900_v27 = vmax.f32 %v643_v15, %v2822_v0  ;;  %v3084_v10 = vld [vmem:[%s4894_s0 + $0x532] sm:$0xff] }
  0xfb   :  { %v1922_v25 = vmax.f32 %v1666_v13, %v2951_v18  ;;  %v644_v28 = vmax.f32 %v388_v8, %v3075_v56  ;;  %v2177_v23 = vmax.f32 %v1921_v17, %v3078_v22  ;;  %v645_v32 = vmax.f32 %v389_v21, %v3076_v62  ;;  %v2828_v56 = vld [vmem:[%s4894_s0 + $0x530] sm:$0xff]  ;;  %v3082_v62 = vld [vmem:[%s4894_s0 + $0x51a] sm:$0xff]  ;;  %v3086_v21 = vld [vmem:[%s4894_s0 + $0x542] sm:$0xff] }
  0xfc   :  { %2305 = vst.msk [vmem:[%s4895_s1 + $0x3b0] sm:$0xff] %vm2186_vm0, %v2176_v16  ;;  %v1668_v31 = vmax.f32 %v1411_v20, %v2825_v26  ;;  %v390_v33 = vmax.f32 %v2821_v54, %v2949_v63  ;;  %v1923_v35 = vmax.f32 %v1667_v9, %v2952_v30  ;;  %v1156_v37 = vmax.f32 %v900_v27, %v2950_v12  ;;  %v3085_v16 = vld [vmem:[%s4894_s0 + $0x53a] sm:$0xff] }
  0xfd   :  { %v2178_v34 = vmax.f32 %v1922_v25, %v3079_v29  ;;  %v901_v39 = vmax.f32 %v644_v28, %v2823_v7  ;;  %2306 = vst.msk [vmem:[%s4895_s1 + $0x3b8] sm:$0xff] %vm2186_vm0, %v2177_v23  ;;  %v902_v38 = vmax.f32 %v645_v32, %v2824_v19  ;;  %v391_v44 = vmax.f32 %v2822_v0, %v2950_v12  ;;  %v2956_v0 = vld [vmem:[%s4894_s0 + $0x531] sm:$0xff]  ;;  %v2830_v12 = vld [vmem:[%s4894_s0 + $0x540] sm:$0xff] }
  0xfe   :  { %v1924_v24 = vmax.f32 %v1668_v31, %v2953_v36  ;;  %v646_v43 = vmax.f32 %v390_v33, %v3077_v11  ;;  %v2179_v41 = vmax.f32 %v1923_v35, %v3080_v40  ;;  %v1412_v47 = vmax.f32 %v1156_v37, %v3078_v22  ;;  %v2957_v11 = vld [vmem:[%s4894_s0 + $0x539] sm:$0xff]  ;;  %v2958_v17 = vld [vmem:[%s4894_s0 + $0x541] sm:$0xff] }
  0xff   :  { %2307 = vst.msk [vmem:[%s4895_s1 + $0x3c0] sm:$0xff] %vm2186_vm0, %v2178_v34  ;;  %v1157_v49 = vmax.f32 %v901_v39, %v2951_v18  ;;  %v1158_v51 = vmax.f32 %v902_v38, %v2952_v30  ;;  %v647_v53 = vmax.f32 %v391_v44, %v3078_v22 }
 0x100   :  { %v2180_v45 = vmax.f32 %v1924_v24, %v3081_v46  ;;  %v903_v52 = vmax.f32 %v646_v43, %v2825_v26  ;;  %2308 = vst.msk [vmem:[%s4895_s1 + $0x3c8] sm:$0xff] %vm2186_vm0, %v2179_v41  ;;  %v1669_v54 = vmax.f32 %v1412_v47, %v2826_v48 }
 0x101   :  { %v1413_v42 = vmax.f32 %v1157_v49, %v3079_v29  ;;  %v1414_v58 = vmax.f32 %v1158_v51, %v3080_v40  ;;  %v904_v60 = vmax.f32 %v647_v53, %v2826_v48 }
 0x102   :  { %2309 = vst.msk [vmem:[%s4895_s1 + $0x3d0] sm:$0xff] %vm2186_vm0, %v2180_v45  ;;  %v1159_v59 = vmax.f32 %v903_v52, %v2953_v36  ;;  %v1925_v61 = vmax.f32 %v1669_v54, %v2954_v55 }
 0x103   :  { %v1670_v63 = vmax.f32 %v1413_v42, %v2827_v50  ;;  %v1671_v4 = vmax.f32 %v1414_v58, %v2828_v56  ;;  %v1160_v2 = vmax.f32 %v904_v60, %v2954_v55 }
 0x104   :  { %v1415_v5 = vmax.f32 %v1159_v59, %v3081_v46  ;;  %v2181_v6 = vmax.f32 %v1925_v61, %v3082_v62 }
 0x105   :  { %v1926_v7 = vmax.f32 %v1670_v63, %v2955_v57  ;;  %v1927_v13 = vmax.f32 %v1671_v4, %v2956_v0  ;;  %v1416_v15 = vmax.f32 %v1160_v2, %v3082_v62 }
 0x106   :  { %v1672_v14 = vmax.f32 %v1415_v5, %v2829_v1  ;;  %2310 = vst.msk [vmem:[%s4895_s1 + $0x3d8] sm:$0xff] %vm2186_vm0, %v2181_v6 }
 0x107   :  { %v2182_v8 = vmax.f32 %v1926_v7, %v3083_v3  ;;  %v2183_v18 = vmax.f32 %v1927_v13, %v3084_v10  ;;  %v1673_v20 = vmax.f32 %v1416_v15, %v2830_v12 }
 0x108   :  { %v1928_v19 = vmax.f32 %v1672_v14, %v2957_v11 }
 0x109   :  { %2311 = vst.msk [vmem:[%s4895_s1 + $0x3e0] sm:$0xff] %vm2186_vm0, %v2182_v8  ;;  %v1929_v25 = vmax.f32 %v1673_v20, %v2958_v17 }
 0x10a   :  { %2312 = vst.msk [vmem:[%s4895_s1 + $0x3e8] sm:$0xff] %vm2186_vm0, %v2183_v18  ;;  %v2184_v22 = vmax.f32 %v1928_v19, %v3085_v16 }
 0x10b   :  { %v2185_v9 = vmax.f32 %v1929_v25, %v3086_v21 }
 0x10c   :  { %2313 = vst.msk [vmem:[%s4895_s1 + $0x3f0] sm:$0xff] %vm2186_vm0, %v2184_v22 }
 0x10d   :  { %2314 = vst.msk [vmem:[%s4895_s1 + $0x3f8] sm:$0xff] %vm2186_vm0, %v2185_v9 }

// kernel: faster_rcnn_forward.14
= control target key start
LH: loop header
LB: loop body
LE: loop exit
PB: predicated region body
PF: predicated region fallthrough
CT: control target
= control target key end

     0   :  { %s832_s1 = inlined_call_operand.vmem [shape: bf16[384,128], index: 1, kind: input, shape index: {}]   ;;  %s833_s0 = inlined_call_operand.vmem [shape: bf16[64,384], index: 0, kind: input, shape index: {}]   ;;  %s834_s2 = inlined_call_operand.vmem [shape: f32[1,128], index: 2, kind: input, shape index: {}]   ;;  %s835_s3 = inlined_call_operand.vmem [shape: f32[64,128], index: 3, kind: output, shape index: {}]  }
   0x1   :  { %v615_v0 = vld [vmem:[%s832_s1 + $0x38] sm:$0xff]  ;;  %v614_v3 = vld [vmem:[%s832_s1 + $0x30] sm:$0xff]  ;;  %v613_v6 = vld [vmem:[%s832_s1 + $0x28] sm:$0xff] }
   0x2   :  { %v623_v1 = vld [vmem:[%s832_s1 + $0x78] sm:$0xff]  ;;  %306 = vmatpush.bf16.msra.mxu0 %v615_v0  ;;  %v622_v4 = vld [vmem:[%s832_s1 + $0x70] sm:$0xff]  ;;  %632 = vmatpush.bf16.msra.mxu3 %v615_v0  ;;  %v621_v7 = vld [vmem:[%s832_s1 + $0x68] sm:$0xff] }
   0x3   :  { %v631_v2 = vld [vmem:[%s832_s1 + $0xb8] sm:$0xff]  ;;  %335 = vmatpush.bf16.msra.mxu1 %v623_v1  ;;  %v630_v5 = vld [vmem:[%s832_s1 + $0xb0] sm:$0xff]  ;;  %v629_v8 = vld [vmem:[%s832_s1 + $0xa8] sm:$0xff] }
   0x4   :  { %364 = vmatpush.bf16.msra.mxu2 %v631_v2  ;;  %v612_v9 = vld [vmem:[%s832_s1 + $0x20] sm:$0xff]  ;;  %v611_v12 = vld [vmem:[%s832_s1 + $0x18] sm:$0xff]  ;;  %v610_v15 = vld [vmem:[%s832_s1 + $0x10] sm:$0xff] }
   0x5   :  { %v620_v10 = vld [vmem:[%s832_s1 + $0x60] sm:$0xff]  ;;  %v619_v13 = vld [vmem:[%s832_s1 + $0x58] sm:$0xff]  ;;  %v618_v16 = vld [vmem:[%s832_s1 + $0x50] sm:$0xff] }
   0x6   :  { %307 = vmatpush.bf16.msra.mxu0 %v614_v3  ;;  %633 = vmatpush.bf16.msra.mxu3 %v614_v3  ;;  %v628_v11 = vld [vmem:[%s832_s1 + $0xa0] sm:$0xff]  ;;  %v627_v14 = vld [vmem:[%s832_s1 + $0x98] sm:$0xff]  ;;  %v626_v17 = vld [vmem:[%s832_s1 + $0x90] sm:$0xff] }
   0x7   :  { %336 = vmatpush.bf16.msra.mxu1 %v622_v4  ;;  %v609_v18 = vld [vmem:[%s832_s1 + $0x8] sm:$0xff]  ;;  %v608_v21 = vld [vmem:[%s832_s1] sm:$0xff]  ;;  %v456_v27 = vld [vmem:[%s833_s0 + $0xc] sm:$0xf0] }
   0x8   :  { %365 = vmatpush.bf16.msra.mxu2 %v630_v5  ;;  %v617_v19 = vld [vmem:[%s832_s1 + $0x48] sm:$0xff]  ;;  %v616_v22 = vld [vmem:[%s832_s1 + $0x40] sm:$0xff]  ;;  %v598_v29 = vld [vmem:[%s833_s0 + $0x10] sm:$0xf0] }
   0x9   :  { %v625_v20 = vld [vmem:[%s832_s1 + $0x88] sm:$0xff]  ;;  %v624_v23 = vld [vmem:[%s832_s1 + $0x80] sm:$0xff]  ;;  %v466_v30 = vld [vmem:[%s833_s0 + $0x18] sm:$0xf] }
   0xa   :  { %308 = vmatpush.bf16.msra.mxu0 %v613_v6  ;;  %634 = vmatpush.bf16.msra.mxu3 %v613_v6  ;;  %v454_v24 = vld [vmem:[%s833_s0] sm:$0xf]  ;;  %v597_v25 = vld [vmem:[%s833_s0 + $0x8] sm:$0xf0]  ;;  %v596_v26 = vld [vmem:[%s833_s0 + $0x4] sm:$0xf] }
   0xb   :  { %337 = vmatpush.bf16.msra.mxu1 %v621_v7  ;;  %v462_v28 = vld [vmem:[%s833_s0 + $0x8] sm:$0xf]  ;;  %v600_v31 = vld [vmem:[%s833_s0 + $0x20] sm:$0xf0]  ;;  %v455_v32 = vor.u32 %v597_v25, %v454_v24  ;;  %v459_v33 = vor.u32 %v596_v26, %v456_v27  ;;  %v599_v36 = vld [vmem:[%s833_s0 + $0x1c] sm:$0xf] }
   0xc   :  { %366 = vmatpush.bf16.msra.mxu2 %v629_v8  ;;  %v463_v34 = vor.u32 %v598_v29, %v462_v28  ;;  %v467_v35 = vor.u32 %v600_v31, %v466_v30  ;;  %v468_v37 = vld [vmem:[%s833_s0 + $0x24] sm:$0xf0]  ;;  %v474_v38 = vld [vmem:[%s833_s0 + $0x20] sm:$0xf]  ;;  %v601_v39 = vld [vmem:[%s833_s0 + $0x28] sm:$0xf0] }
   0xd   :  { %v478_v40 = vld [vmem:[%s833_s0 + $0x30] sm:$0xf]  ;;  %v603_v41 = vld [vmem:[%s833_s0 + $0x38] sm:$0xf0]  ;;  %v471_v42 = vor.u32 %v599_v36, %v468_v37  ;;  %v475_v43 = vor.u32 %v601_v39, %v474_v38  ;;  %v602_v45 = vld [vmem:[%s833_s0 + $0x34] sm:$0xf] }
   0xe   :  { %309 = vmatpush.bf16.msra.mxu0 %v612_v9  ;;  %635 = vmatpush.bf16.msra.mxu3 %v612_v9  ;;  %v479_v44 = vor.u32 %v603_v41, %v478_v40  ;;  %v480_v46 = vld [vmem:[%s833_s0 + $0x3c] sm:$0xf0]  ;;  %v486_v47 = vld [vmem:[%s833_s0 + $0x38] sm:$0xf]  ;;  %v604_v48 = vld [vmem:[%s833_s0 + $0x40] sm:$0xf0] }
   0xf   :  { %338 = vmatpush.bf16.msra.mxu1 %v620_v10  ;;  %v490_v49 = vld [vmem:[%s833_s0 + $0x48] sm:$0xf]  ;;  %v606_v50 = vld [vmem:[%s833_s0 + $0x50] sm:$0xf0]  ;;  %v483_v51 = vor.u32 %v602_v45, %v480_v46  ;;  %v487_v52 = vor.u32 %v604_v48, %v486_v47  ;;  %v605_v54 = vld [vmem:[%s833_s0 + $0x4c] sm:$0xf] }
  0x10   :  { %367 = vmatpush.bf16.msra.mxu2 %v628_v11  ;;  %v491_v53 = vor.u32 %v606_v50, %v490_v49  ;;  %v492_v55 = vld [vmem:[%s833_s0 + $0x54] sm:$0xf0]  ;;  %v498_v56 = vld [vmem:[%s833_s0 + $0x50] sm:$0xf]  ;;  %v607_v57 = vld [vmem:[%s833_s0 + $0x58] sm:$0xf0] }
  0x11   :  { %v495_v58 = vor.u32 %v605_v54, %v492_v55  ;;  %v499_v59 = vor.u32 %v607_v57, %v498_v56  ;;  %v640_v63 = vld [vmem:[%s834_s2] ss:$0 sm:$0xff] }
  0x12   :  { %310 = vmatpush.bf16.msra.mxu0 %v611_v12  ;;  %636 = vmatpush.bf16.msra.mxu3 %v611_v12 }
  0x13   :  { %339 = vmatpush.bf16.msra.mxu1 %v619_v13 }
  0x14   :  { %368 = vmatpush.bf16.msra.mxu2 %v627_v14 }
  0x16   :  { %311 = vmatpush.bf16.msra.mxu0 %v610_v15  ;;  %637 = vmatpush.bf16.msra.mxu3 %v610_v15 }
  0x17   :  { %340 = vmatpush.bf16.msra.mxu1 %v618_v16 }
  0x18   :  { %369 = vmatpush.bf16.msra.mxu2 %v626_v17 }
  0x1a   :  { %312 = vmatpush.bf16.msra.mxu0 %v609_v18  ;;  %638 = vmatpush.bf16.msra.mxu3 %v609_v18 }
  0x1b   :  { %341 = vmatpush.bf16.msra.mxu1 %v617_v19 }
  0x1c   :  { %370 = vmatpush.bf16.msra.mxu2 %v625_v20 }
  0x1e   :  { %313 = vmatpush.bf16.msra.mxu0 %v608_v21  ;;  %639 = vmatpush.bf16.msra.mxu3 %v608_v21 }
  0x1f   :  { %342 = vmatpush.bf16.msra.mxu1 %v616_v22 }
  0x20   :  { %371 = vmatpush.bf16.msra.mxu2 %v624_v23 }
  0x21   :  { %314 = vmatmul.bf16.vlgmr.msra.gmra.mxu0 %v455_v32  ;;  %319 = vmatmul.bf16.vlgmr.msra.gmra.mxu3 %v467_v35 }
  0x22   :  { %343 = vmatmul.bf16.vlgmr.msra.gmra.mxu1 %v459_v33 }
  0x23   :  { %372 = vmatmul.bf16.vlgmr.msra.gmra.mxu2 %v463_v34 }
  0x31   :  { %324 = vmatmul.bf16.gmra.mxu3 %v479_v44 }
  0x32   :  { %348 = vmatmul.bf16.gmra.mxu1 %v471_v42 }
  0x33   :  { %377 = vmatmul.bf16.gmra.mxu2 %v475_v43 }
  0x41   :  { %329 = vmatmul.bf16.gmra.mxu3 %v491_v53 }
  0x42   :  { %353 = vmatmul.bf16.gmra.mxu1 %v483_v51 }
  0x43   :  { %382 = vmatmul.bf16.gmra.mxu2 %v487_v52 }
  0x52   :  { %358 = vmatmul.bf16.gmra.mxu1 %v495_v58 }
  0x53   :  { %387 = vmatmul.bf16.gmra.mxu2 %v499_v59 }
  0x9e   :  { %v315_v61 = vpop.f32.mrf.mxu0 }
  0x9f   :  { %v344_v60 = vpop.f32.mrf.mxu1 }
  0xa0   :  { %v345_v62 = vadd.f32 %v344_v60, %v315_v61 }
  0xa4   :  { %v320_v5 = vpop.f32.mrf.mxu3 }
  0xa6   :  { %v373_v0 = vpop.f32.mrf.mxu2  ;;  %v317_v4 = vpop.f32.mrf.mxu0 }
  0xa7   :  { %v374_v1 = vadd.f32 %v373_v0, %v345_v62  ;;  %v346_v2 = vpop.f32.mrf.mxu1 }
  0xa8   :  { %v347_v7 = vadd.f32 %v346_v2, %v317_v4 }
  0xa9   :  { %v424_v3 = vadd.f32 %v640_v63, %v374_v1 }
  0xab   :  { %v432_v6 = vmax.f32 %v424_v3, 0.0 }
  0xac   :  { %v322_v14 = vpop.f32.mrf.mxu3 }
  0xad   :  { %440 = vst [vmem:[%s835_s3] sm:$0xff] %v432_v6 }
  0xae   :  { %v375_v8 = vpop.f32.mrf.mxu2 }
  0xaf   :  { %v376_v9 = vadd.f32 %v375_v8, %v347_v7  ;;  %v349_v10 = vpop.f32.mrf.mxu1 }
  0xb0   :  { %v350_v13 = vadd.f32 %v349_v10, %v320_v5 }
  0xb1   :  { %v425_v11 = vadd.f32 %v640_v63, %v376_v9 }
  0xb3   :  { %v433_v12 = vmax.f32 %v425_v11, 0.0 }
  0xb4   :  { %v325_v21 = vpop.f32.mrf.mxu3 }
  0xb5   :  { %441 = vst [vmem:[%s835_s3 + $0x8] sm:$0xff] %v433_v12 }
  0xb6   :  { %v378_v15 = vpop.f32.mrf.mxu2 }
  0xb7   :  { %v379_v16 = vadd.f32 %v378_v15, %v350_v13  ;;  %v351_v17 = vpop.f32.mrf.mxu1 }
  0xb8   :  { %v352_v20 = vadd.f32 %v351_v17, %v322_v14 }
  0xb9   :  { %v426_v18 = vadd.f32 %v640_v63, %v379_v16 }
  0xbb   :  { %v434_v19 = vmax.f32 %v426_v18, 0.0 }
  0xbc   :  { %v327_v31 = vpop.f32.mrf.mxu3 }
  0xbd   :  { %442 = vst [vmem:[%s835_s3 + $0x10] sm:$0xff] %v434_v19 }
  0xbe   :  { %v380_v22 = vpop.f32.mrf.mxu2 }
  0xbf   :  { %v381_v23 = vadd.f32 %v380_v22, %v352_v20  ;;  %v354_v24 = vpop.f32.mrf.mxu1 }
  0xc0   :  { %v355_v27 = vadd.f32 %v354_v24, %v325_v21 }
  0xc1   :  { %v427_v25 = vadd.f32 %v640_v63, %v381_v23 }
  0xc3   :  { %v435_v26 = vmax.f32 %v427_v25, 0.0 }
  0xc4   :  { %v330_v39 = vpop.f32.mrf.mxu3 }
  0xc5   :  { %443 = vst [vmem:[%s835_s3 + $0x18] sm:$0xff] %v435_v26 }
  0xc6   :  { %v383_v28 = vpop.f32.mrf.mxu2 }
  0xc7   :  { %v384_v29 = vadd.f32 %v383_v28, %v355_v27  ;;  %v356_v30 = vpop.f32.mrf.mxu1 }
  0xc8   :  { %v357_v34 = vadd.f32 %v356_v30, %v327_v31 }
  0xc9   :  { %v428_v32 = vadd.f32 %v640_v63, %v384_v29 }
  0xcb   :  { %v436_v33 = vmax.f32 %v428_v32, 0.0 }
  0xcc   :  { %v332_v47 = vpop.f32.mrf.mxu3 }
  0xcd   :  { %444 = vst [vmem:[%s835_s3 + $0x20] sm:$0xff] %v436_v33 }
  0xce   :  { %v385_v35 = vpop.f32.mrf.mxu2 }
  0xcf   :  { %v386_v36 = vadd.f32 %v385_v35, %v357_v34  ;;  %v359_v37 = vpop.f32.mrf.mxu1 }
  0xd0   :  { %v360_v41 = vadd.f32 %v359_v37, %v330_v39 }
  0xd1   :  { %v429_v38 = vadd.f32 %v640_v63, %v386_v36 }
  0xd3   :  { %v437_v40 = vmax.f32 %v429_v38, 0.0 }
  0xd5   :  { %445 = vst [vmem:[%s835_s3 + $0x28] sm:$0xff] %v437_v40 }
  0xd6   :  { %v388_v42 = vpop.f32.mrf.mxu2 }
  0xd7   :  { %v389_v43 = vadd.f32 %v388_v42, %v360_v41  ;;  %v361_v45 = vpop.f32.mrf.mxu1 }
  0xd8   :  { %v362_v48 = vadd.f32 %v361_v45, %v332_v47 }
  0xd9   :  { %v430_v44 = vadd.f32 %v640_v63, %v389_v43 }
  0xdb   :  { %v438_v46 = vmax.f32 %v430_v44, 0.0 }
  0xdd   :  { %446 = vst [vmem:[%s835_s3 + $0x30] sm:$0xff] %v438_v46 }
  0xde   :  { %v390_v49 = vpop.f32.mrf.mxu2 }
  0xdf   :  { %v391_v50 = vadd.f32 %v390_v49, %v362_v48 }
  0xe1   :  { %v431_v51 = vadd.f32 %v640_v63, %v391_v50 }
  0xe3   :  { %v439_v52 = vmax.f32 %v431_v51, 0.0 }
  0xe5   :  { %447 = vst [vmem:[%s835_s3 + $0x38] sm:$0xff] %v439_v52 }

// kernel: faster_rcnn_forward.15
= control target key start
LH: loop header
LB: loop body
LE: loop exit
PB: predicated region body
PF: predicated region fallthrough
CT: control target
= control target key end

     0   :  { %s872_s1 = inlined_call_operand.vmem [shape: bf16[640,128], index: 1, kind: input, shape index: {}]   ;;  %s873_s0 = inlined_call_operand.vmem [shape: bf16[16,640], index: 0, kind: input, shape index: {}]   ;;  %s874_s2 = inlined_call_operand.vmem [shape: f32[1,128], index: 2, kind: input, shape index: {}]   ;;  %s875_s3 = inlined_call_operand.vmem [shape: f32[16,128], index: 3, kind: output, shape index: {}]  }
   0x1   :  { %v659_v0 = vld [vmem:[%s872_s1 + $0x38] sm:$0xff]  ;;  %v658_v4 = vld [vmem:[%s872_s1 + $0x30] sm:$0xff]  ;;  %v657_v8 = vld [vmem:[%s872_s1 + $0x28] sm:$0xff] }
   0x2   :  { %v675_v1 = vld [vmem:[%s872_s1 + $0xb8] sm:$0xff]  ;;  %374 = vmatpush.bf16.msra.mxu0 %v659_v0  ;;  %v674_v5 = vld [vmem:[%s872_s1 + $0xb0] sm:$0xff]  ;;  %v673_v9 = vld [vmem:[%s872_s1 + $0xa8] sm:$0xff] }
   0x3   :  { %v683_v2 = vld [vmem:[%s872_s1 + $0xf8] sm:$0xff]  ;;  %402 = vmatpush.bf16.msra.mxu2 %v675_v1  ;;  %v682_v6 = vld [vmem:[%s872_s1 + $0xf0] sm:$0xff]  ;;  %v681_v10 = vld [vmem:[%s872_s1 + $0xe8] sm:$0xff] }
   0x4   :  { %v667_v3 = vld [vmem:[%s872_s1 + $0x78] sm:$0xff]  ;;  %416 = vmatpush.bf16.msra.mxu3 %v683_v2  ;;  %v666_v7 = vld [vmem:[%s872_s1 + $0x70] sm:$0xff]  ;;  %v665_v11 = vld [vmem:[%s872_s1 + $0x68] sm:$0xff] }
   0x5   :  { %388 = vmatpush.bf16.msra.mxu1 %v667_v3  ;;  %v656_v12 = vld [vmem:[%s872_s1 + $0x20] sm:$0xff]  ;;  %v655_v16 = vld [vmem:[%s872_s1 + $0x18] sm:$0xff]  ;;  %v654_v20 = vld [vmem:[%s872_s1 + $0x10] sm:$0xff] }
   0x6   :  { %375 = vmatpush.bf16.msra.mxu0 %v658_v4  ;;  %v672_v13 = vld [vmem:[%s872_s1 + $0xa0] sm:$0xff]  ;;  %v671_v17 = vld [vmem:[%s872_s1 + $0x98] sm:$0xff]  ;;  %v670_v21 = vld [vmem:[%s872_s1 + $0x90] sm:$0xff] }
   0x7   :  { %403 = vmatpush.bf16.msra.mxu2 %v674_v5  ;;  %v680_v14 = vld [vmem:[%s872_s1 + $0xe0] sm:$0xff]  ;;  %v679_v18 = vld [vmem:[%s872_s1 + $0xd8] sm:$0xff]  ;;  %v678_v22 = vld [vmem:[%s872_s1 + $0xd0] sm:$0xff] }
   0x8   :  { %417 = vmatpush.bf16.msra.mxu3 %v682_v6  ;;  %v664_v15 = vld [vmem:[%s872_s1 + $0x60] sm:$0xff]  ;;  %v663_v19 = vld [vmem:[%s872_s1 + $0x58] sm:$0xff]  ;;  %v662_v23 = vld [vmem:[%s872_s1 + $0x50] sm:$0xff] }
   0x9   :  { %389 = vmatpush.bf16.msra.mxu1 %v666_v7  ;;  %v653_v24 = vld [vmem:[%s872_s1 + $0x8] sm:$0xff]  ;;  %v652_v28 = vld [vmem:[%s872_s1] sm:$0xff]  ;;  %v691_v30 = vld [vmem:[%s872_s1 + $0x138] sm:$0xff] }
   0xa   :  { %376 = vmatpush.bf16.msra.mxu0 %v657_v8  ;;  %v669_v25 = vld [vmem:[%s872_s1 + $0x88] sm:$0xff]  ;;  %v668_v29 = vld [vmem:[%s872_s1 + $0x80] sm:$0xff]  ;;  %v650_v32 = vld [vmem:[%s873_s0 + $0x18] sm:$0xf0] }
   0xb   :  { %404 = vmatpush.bf16.msra.mxu2 %v673_v9  ;;  %v677_v26 = vld [vmem:[%s872_s1 + $0xc8] sm:$0xff]  ;;  %v469_v33 = vld [vmem:[%s873_s0] sm:$0xf]  ;;  %v649_v34 = vld [vmem:[%s873_s0 + $0x10] sm:$0xf0] }
   0xc   :  { %418 = vmatpush.bf16.msra.mxu3 %v681_v10  ;;  %v661_v27 = vld [vmem:[%s872_s1 + $0x48] sm:$0xff]  ;;  %v676_v35 = vld [vmem:[%s872_s1 + $0xc0] sm:$0xff]  ;;  %v471_v40 = vld [vmem:[%s873_s0 + $0x14] sm:$0xf0]  ;;  %v470_v42 = vor.u32 %v649_v34, %v469_v33 }
   0xd   :  { %390 = vmatpush.bf16.msra.mxu1 %v665_v11  ;;  %v477_v31 = vld [vmem:[%s873_s0 + $0x8] sm:$0xf]  ;;  %v648_v36 = vld [vmem:[%s873_s0 + $0xc] sm:$0xf]  ;;  %v479_v37 = vld [vmem:[%s873_s0 + $0x1c] sm:$0xf0] }
   0xe   :  { %377 = vmatpush.bf16.msra.mxu0 %v656_v12  ;;  %v660_v38 = vld [vmem:[%s872_s1 + $0x40] sm:$0xff]  ;;  %v478_v41 = vor.u32 %v650_v32, %v477_v31  ;;  %v482_v43 = vor.u32 %v648_v36, %v479_v37  ;;  %v690_v44 = vld [vmem:[%s872_s1 + $0x130] sm:$0xff]  ;;  %v689_v46 = vld [vmem:[%s872_s1 + $0x128] sm:$0xff] }
   0xf   :  { %405 = vmatpush.bf16.msra.mxu2 %v672_v13  ;;  %v647_v39 = vld [vmem:[%s873_s0 + $0x4] sm:$0xf]  ;;  %v687_v48 = vld [vmem:[%s872_s1 + $0x118] sm:$0xff]  ;;  %v686_v49 = vld [vmem:[%s872_s1 + $0x110] sm:$0xff] }
  0x10   :  { %419 = vmatpush.bf16.msra.mxu3 %v680_v14  ;;  %v474_v45 = vor.u32 %v647_v39, %v471_v40  ;;  %v688_v47 = vld [vmem:[%s872_s1 + $0x120] sm:$0xff]  ;;  %v685_v50 = vld [vmem:[%s872_s1 + $0x108] sm:$0xff]  ;;  %v485_v52 = vld [vmem:[%s873_s0 + $0x10] sm:$0xf] }
  0x11   :  { %391 = vmatpush.bf16.msra.mxu1 %v664_v15  ;;  %v684_v51 = vld [vmem:[%s872_s1 + $0x100] sm:$0xff] }
  0x12   :  { %378 = vmatpush.bf16.msra.mxu0 %v655_v16  ;;  %v651_v53 = vld [vmem:[%s873_s0 + $0x20] sm:$0xf0]  ;;  %v692_v1 = vld [vmem:[%s874_s2] ss:$0 sm:$0xff] }
  0x13   :  { %406 = vmatpush.bf16.msra.mxu2 %v671_v17  ;;  %v486_v54 = vor.u32 %v651_v53, %v485_v52 }
  0x14   :  { %420 = vmatpush.bf16.msra.mxu3 %v679_v18 }
  0x15   :  { %392 = vmatpush.bf16.msra.mxu1 %v663_v19 }
  0x16   :  { %379 = vmatpush.bf16.msra.mxu0 %v654_v20 }
  0x17   :  { %407 = vmatpush.bf16.msra.mxu2 %v670_v21 }
  0x18   :  { %421 = vmatpush.bf16.msra.mxu3 %v678_v22 }
  0x19   :  { %393 = vmatpush.bf16.msra.mxu1 %v662_v23 }
  0x1a   :  { %380 = vmatpush.bf16.msra.mxu0 %v653_v24 }
  0x1b   :  { %408 = vmatpush.bf16.msra.mxu2 %v669_v25 }
  0x1c   :  { %422 = vmatpush.bf16.msra.mxu3 %v677_v26 }
  0x1d   :  { %394 = vmatpush.bf16.msra.mxu1 %v661_v27 }
  0x1e   :  { %381 = vmatpush.bf16.msra.mxu0 %v652_v28 }
  0x1f   :  { %409 = vmatpush.bf16.msra.mxu2 %v668_v29 }
  0x20   :  { %423 = vmatpush.bf16.msra.mxu3 %v676_v35 }
  0x21   :  { %395 = vmatpush.bf16.msra.mxu1 %v660_v38  ;;  %382 = vmatmul.bf16.vlgmr.msra.gmra.mxu0 %v470_v42 }
  0x22   :  { %430 = vmatpush.bf16.msrb.mxu0 %v691_v30  ;;  %410 = vmatmul.bf16.vlgmr.msra.gmra.mxu2 %v478_v41 }
  0x23   :  { %424 = vmatmul.bf16.vlgmr.msra.gmra.mxu3 %v482_v43 }
  0x24   :  { %396 = vmatmul.bf16.vlgmr.msra.gmra.mxu1 %v474_v45 }
  0x26   :  { %431 = vmatpush.bf16.msrb.mxu0 %v690_v44 }
  0x2a   :  { %432 = vmatpush.bf16.msrb.mxu0 %v689_v46 }
  0x2e   :  { %433 = vmatpush.bf16.msrb.mxu0 %v688_v47 }
  0x32   :  { %434 = vmatpush.bf16.msrb.mxu0 %v687_v48 }
  0x36   :  { %435 = vmatpush.bf16.msrb.mxu0 %v686_v49 }
  0x3a   :  { %436 = vmatpush.bf16.msrb.mxu0 %v685_v50 }
  0x3e   :  { %437 = vmatpush.bf16.msrb.mxu0 %v684_v51 }
  0x41   :  { %438 = vmatmul.bf16.vlgmr.msrb.gmra.mxu0 %v486_v54 }
  0x9e   :  { %v383_v55 = vpop.f32.mrf.mxu0 }
  0xa1   :  { %v397_v56 = vpop.f32.mrf.mxu1 }
  0xa2   :  { %v398_v58 = vadd.f32 %v397_v56, %v383_v55 }
  0xa5   :  { %v411_v57 = vpop.f32.mrf.mxu2 }
  0xa6   :  { %v385_v59 = vpop.f32.mrf.mxu0  ;;  %v425_v60 = vpop.f32.mrf.mxu3  ;;  %v412_v61 = vadd.f32 %v411_v57, %v398_v58 }
  0xa8   :  { %v426_v63 = vadd.f32 %v425_v60, %v412_v61 }
  0xa9   :  { %v399_v62 = vpop.f32.mrf.mxu1 }
  0xaa   :  { %v400_v0 = vadd.f32 %v399_v62, %v385_v59 }
  0xad   :  { %v413_v2 = vpop.f32.mrf.mxu2 }
  0xae   :  { %v414_v5 = vadd.f32 %v413_v2, %v400_v0  ;;  %v427_v7 = vpop.f32.mrf.mxu3 }
  0xb0   :  { %v428_v9 = vadd.f32 %v427_v7, %v414_v5 }
  0xbe   :  { %v439_v3 = vpop.f32.mrf.mxu0 }
  0xbf   :  { %v440_v4 = vadd.f32 %v439_v3, %v426_v63 }
  0xc1   :  { %v457_v6 = vadd.f32 %v692_v1, %v440_v4 }
  0xc3   :  { %v459_v8 = vmax.f32 %v457_v6, 0.0 }
  0xc5   :  { %461 = vst [vmem:[%s875_s3] sm:$0xff] %v459_v8 }
  0xc6   :  { %v441_v10 = vpop.f32.mrf.mxu0 }
  0xc7   :  { %v442_v11 = vadd.f32 %v441_v10, %v428_v9 }
  0xc9   :  { %v458_v12 = vadd.f32 %v692_v1, %v442_v11 }
  0xcb   :  { %v460_v13 = vmax.f32 %v458_v12, 0.0 }
  0xcd   :  { %462 = vst [vmem:[%s875_s3 + $0x8] sm:$0xff] %v460_v13 }

// kernel: faster_rcnn_forward.17
= control target key start
LH: loop header
LB: loop body
LE: loop exit
PB: predicated region body
PF: predicated region fallthrough
CT: control target
= control target key end

     0   :  { %s231_s1 = inlined_call_operand.vmem [shape: bf16[128,128], index: 1, kind: input, shape index: {}]   ;;  %s232_s2 = inlined_call_operand.vmem [shape: f32[1,128], index: 2, kind: input, shape index: {}]   ;;  %s233_s0 = inlined_call_operand.vmem [shape: bf16[16,128], index: 0, kind: input, shape index: {}]   ;;  %s234_s3 = inlined_call_operand.vmem [shape: f32[16,128], index: 3, kind: output, shape index: {}]  }
   0x1   :  { %v173_v0 = vld [vmem:[%s231_s1 + $0x38] sm:$0xff]  ;;  %v172_v1 = vld [vmem:[%s231_s1 + $0x30] sm:$0xff]  ;;  %v171_v2 = vld [vmem:[%s231_s1 + $0x28] sm:$0xff] }
   0x2   :  { %94 = vmatpush.bf16.msra.mxu0 %v173_v0  ;;  %v170_v3 = vld [vmem:[%s231_s1 + $0x20] sm:$0xff]  ;;  %v169_v4 = vld [vmem:[%s231_s1 + $0x18] sm:$0xff]  ;;  %v168_v5 = vld [vmem:[%s231_s1 + $0x10] sm:$0xff] }
   0x3   :  { %v167_v6 = vld [vmem:[%s231_s1 + $0x8] sm:$0xff]  ;;  %v166_v7 = vld [vmem:[%s231_s1] sm:$0xff] }
   0x4   :  { %v165_v8 = vld [vmem:[%s233_s0] sm:$0xff] }
   0x5   :  { %v174_v9 = vld [vmem:[%s232_s2] ss:$0 sm:$0xff] }
   0x6   :  { %95 = vmatpush.bf16.msra.mxu0 %v172_v1 }
   0xa   :  { %96 = vmatpush.bf16.msra.mxu0 %v171_v2 }
   0xe   :  { %97 = vmatpush.bf16.msra.mxu0 %v170_v3 }
  0x12   :  { %98 = vmatpush.bf16.msra.mxu0 %v169_v4 }
  0x16   :  { %99 = vmatpush.bf16.msra.mxu0 %v168_v5 }
  0x1a   :  { %100 = vmatpush.bf16.msra.mxu0 %v167_v6 }
  0x1e   :  { %101 = vmatpush.bf16.msra.mxu0 %v166_v7 }
  0x21   :  { %102 = vmatmul.bf16.vlgmr.msra.gmra.mxu0 %v165_v8 }
  0x9e   :  { %v103_v10 = vpop.f32.mrf.mxu0 }
  0x9f   :  { %v121_v11 = vadd.f32 %v174_v9, %v103_v10 }
  0xa1   :  { %123 = vst [vmem:[%s234_s3] sm:$0xff] %v121_v11 }
  0xa6   :  { %v105_v12 = vpop.f32.mrf.mxu0 }
  0xa7   :  { %v122_v13 = vadd.f32 %v174_v9, %v105_v12 }
  0xa9   :  { %124 = vst [vmem:[%s234_s3 + $0x8] sm:$0xff] %v122_v13 }

// kernel: faster_rcnn_forward.18
= control target key start
LH: loop header
LB: loop body
LE: loop exit
PB: predicated region body
PF: predicated region fallthrough
CT: control target
= control target key end

     0   :  { %s2250_s9 = smov 0   ;;  %s2799_s0 = inlined_call_operand.vmem [shape: f32[448,16], index: 0, kind: input, shape index: {}]   ;;  %s2800_s1 = inlined_call_operand.vmem [shape: f32[16,128], index: 1, kind: input, shape index: {}]   ;;  %s2801_s2 = inlined_call_operand.vmem [shape: f32[448,128], index: 2, kind: output, shape index: {}]  }
   0x1 LB: > { %s2148_s10 = sadd.s32 4294967295, %s2233_s9   ;;  %p2152_p0 = scmp.ge.s32.totalorder %s2233_s9, 1  ;;  %s2233_s9 = sphi %s2250_s9, %s12_s9  }
   0x2   : > { %p113_p1 = scmp.lt.s32.totalorder %s2233_s9, 8 }
   0x4   : > { %p114_p2 = pnand %p2152_p0, %p113_p1 }
   0x5   : > { %s2153_s11 = sshll.u32 (!%p114_p2), %s2148_s10, 3 }
   0x6   : > { %117 = sbr.rel (%p114_p2) target bundleno = 764 (0x2fc), region = 28  ;;  %p136_p3 = scmp.lt.s32.totalorder (!%p114_p2), %s2153_s11, 55 }
   0xb   : > { %v158_v0 = vlaneseq  ;;  %s2810_s11 = smov (!%p136_p3, %s2153_s11), 55 }
   0xc   : > { %s2154_s12 = sshll.u32 %s2810_s11, 3 }
   0xd   : > { %v2258_v1 = vshrl.u32 %v158_v0, 7  ;;  %s2271_s15 = scalar_lea.vmem %s2799_s0, %s2154_s12  ;;  %v2406_v0 = vld [vmem:[%s2800_s1 + $0x8] sm:$0xff]  ;;  %s2510_s22 = scalar_lea.vmem %s2801_s2, %s2154_s12 }
   0xe   : > { %v2274_v2 = vld [vmem:[%s2271_s15] sm:$0xff]  ;;  %v2288_v8 = vld [vmem:[%s2271_s15 + $0x8] sm:$0xff]  ;;  %v2297_v12 = vld [vmem:[%s2271_s15 + $0x10] sm:$0xff] }
   0xf   : > { %2169 = vset.pattern.permute.xlu2 %v2258_v1  ;;  %2168 = vset.pattern.permute.xlu1 %v2258_v1  ;;  %v183_v3 = vperm.slane %v2274_v2, 2  ;;  %v170_v4 = vperm.slane %v2274_v2, 1  ;;  %v157_v5 = vperm.slane %v2274_v2, 0  ;;  %v2282_v6 = vadd.s32 8, %v2258_v1  ;;  %v2304_v14 = vld [vmem:[%s2271_s15 + $0x18] sm:$0xff]  ;;  %v2316_v19 = vld [vmem:[%s2271_s15 + $0x20] sm:$0xff] }
  0x10   : > { %2167 = vset.pattern.permute.xlu0 %v2258_v1  ;;  %v209_v7 = vperm.slane %v2274_v2, 4  ;;  %v274_v9 = vperm.slane %v2288_v8, 1  ;;  %v196_v10 = vperm.slane %v2274_v2, 3  ;;  %v339_v11 = vperm.slane %v2288_v8, 6  ;;  %v2328_v23 = vld [vmem:[%s2271_s15 + $0x28] sm:$0xff]  ;;  %v2335_v26 = vld [vmem:[%s2271_s15 + $0x30] sm:$0xff] }
  0x11   : > { %v404_v13 = vperm.slane %v2297_v12, 3  ;;  %v222_v15 = vperm.slane %v2274_v2, 5  ;;  %v469_v16 = vperm.slane %v2304_v14, 0  ;;  %v235_v17 = vperm.slane %v2274_v2, 6  ;;  %v2347_v30 = vld [vmem:[%s2271_s15 + $0x38] sm:$0xff] }
  0x12   : > { %v534_v18 = vperm.slane %v2304_v14, 5  ;;  %v599_v20 = vperm.slane %v2316_v19, 2  ;;  %v248_v21 = vperm.slane %v2274_v2, 7  ;;  %v664_v22 = vperm.slane %v2316_v19, 7 }
  0x13   : > { %v261_v24 = vperm.slane %v2288_v8, 0  ;;  %v729_v25 = vperm.slane %v2328_v23, 4  ;;  %v794_v27 = vperm.slane %v2335_v26, 1  ;;  %v287_v28 = vperm.slane %v2288_v8, 2 }
  0x14   : > { %v859_v29 = vperm.slane %v2335_v26, 6  ;;  %v300_v31 = vperm.slane %v2288_v8, 3  ;;  %v924_v32 = vperm.slane %v2347_v30, 3  ;;  %v313_v33 = vperm.slane %v2288_v8, 4 }
  0x15   : > { %v326_v35 = vperm.slane %v2288_v8, 5  ;;  %v352_v38 = vperm.slane %v2288_v8, 7  ;;  %v365_v39 = vperm.slane %v2297_v12, 0  ;;  %v430_v43 = vperm.slane %v2297_v12, 5 }
  0x16   : > { %v378_v46 = vperm.slane %v2297_v12, 1  ;;  %v391_v50 = vperm.slane %v2297_v12, 2  ;;  %v417_v57 = vperm.slane %v2297_v12, 4  ;;  %v495_v2 = vperm.slane %v2304_v14, 2 }
  0x17   : > { %188 = vperm.xlu2 %2169, %v183_v3   ;;  %175 = vperm.xlu1 %2168, %v170_v4   ;;  %v443_v8 = vperm.slane %v2297_v12, 6 }
  0x18   : > { %162 = vperm.xlu0 %2167, %v157_v5  }
  0x1f   : > { %2172 = vset.pattern.permute.xlu2 %v2282_v6  ;;  %2170 = vset.pattern.permute.xlu1 %v2282_v6 }
  0x20   : > { %214 = vperm.xlu0 %2167, %v209_v7  }
  0x27   : > { %194 = vperm.xlu2 %2172, %v183_v3   ;;  %181 = vperm.xlu1 %2170, %v170_v4   ;;  %v2412_v3 = vld [vmem:[%s2800_s1] sm:$0xff] }
  0x28   : > { %279 = vperm.xlu0 %2167, %v274_v9  }
  0x2f   : > { %207 = vperm.xlu2 %2172, %v196_v10   ;;  %2171 = vset.pattern.permute.xlu1 %v2258_v1 }
  0x30   : > { %344 = vperm.xlu0 %2167, %v339_v11  }
  0x37   : > { %2174 = vset.pattern.permute.xlu2 %v2258_v1  ;;  %201 = vperm.xlu1 %2171, %v196_v10  }
  0x38   : > { %409 = vperm.xlu0 %2167, %v404_v13  }
  0x3f   : > { %227 = vperm.xlu2 %2174, %v222_v15   ;;  %2173 = vset.pattern.permute.xlu1 %v2282_v6 }
  0x40   : > { %474 = vperm.xlu0 %2167, %v469_v16  }
  0x47   : > { %240 = vperm.xlu2 %2174, %v235_v17   ;;  %220 = vperm.xlu1 %2173, %v209_v7  }
  0x48   : > { %539 = vperm.xlu0 %2167, %v534_v18  }
  0x4f   : > { %2176 = vset.pattern.permute.xlu2 %v2282_v6  ;;  %233 = vperm.xlu1 %2173, %v222_v15  }
  0x50   : > { %604 = vperm.xlu0 %2167, %v599_v20  }
  0x57   : > { %259 = vperm.xlu2 %2176, %v248_v21   ;;  %2175 = vset.pattern.permute.xlu1 %v2258_v1 }
  0x58   : > { %669 = vperm.xlu0 %2167, %v664_v22  }
  0x5f   : > { %272 = vperm.xlu2 %2176, %v261_v24   ;;  %253 = vperm.xlu1 %2175, %v248_v21  }
  0x60   : > { %734 = vperm.xlu0 %2167, %v729_v25  }
  0x67   : > { %2178 = vset.pattern.permute.xlu2 %v2258_v1  ;;  %266 = vperm.xlu1 %2175, %v261_v24  }
  0x68   : > { %799 = vperm.xlu0 %2167, %v794_v27  }
  0x6f   : > { %292 = vperm.xlu2 %2178, %v287_v28   ;;  %2177 = vset.pattern.permute.xlu1 %v2282_v6 }
  0x70   : > { %864 = vperm.xlu0 %2167, %v859_v29  }
  0x71   : > { %v189_v42 = vpop.permute.xlu2 %188 }
  0x72   : > { %vm993_vm0 = vcmp.gt.f32.partialorder %v189_v42, 0.5 }
  0x73   : > { %v1377_v4 = vsel %vm993_vm0, %v2412_v3, -inf }
  0x77   : > { %305 = vperm.xlu2 %2178, %v300_v31   ;;  %285 = vperm.xlu1 %2177, %v274_v9  }
  0x78   : > { %929 = vperm.xlu0 %2167, %v924_v32  }
  0x7f   : > { %2180 = vset.pattern.permute.xlu2 %v2282_v6  ;;  %298 = vperm.xlu1 %2177, %v287_v28  }
  0x80   : > { %2217 = vset.pattern.permute.xlu0 %v2282_v6 }
  0x81   : > { %v195_v47 = vpop.permute.xlu2 %194 }
  0x82   : > { %vm994_vm1 = vcmp.gt.f32.partialorder %v195_v47, 0.5 }
  0x87   : > { %324 = vperm.xlu2 %2180, %v313_v33   ;;  %2179 = vset.pattern.permute.xlu1 %v2258_v1 }
  0x88   : > { %168 = vperm.xlu0 %2217, %v157_v5   ;;  %v1378_v5 = vsel %vm994_vm1, %v2406_v0, -inf }
  0x89   : > { %v176_v45 = vpop.permute.xlu1 %175  ;;  %v208_v51 = vpop.permute.xlu2 %207  ;;  %v1515_v9 = vmax.f32 %v1377_v4, %v1378_v5 }
  0x8a   : > { %v2359_v34 = vpop.permute.xlu0 %162  ;;  %vm991_vm4 = vcmp.gt.f32.partialorder %v176_v45, 0.5  ;;  %vm996_vm5 = vcmp.gt.f32.partialorder %v208_v51, 0.5 }
  0x8b   : > { %v1380_v21 = vsel %vm996_vm5, %v2406_v0, -inf  ;;  %vm989_vm12 = vcmp.gt.f32.partialorder %v2359_v34, 0.5 }
  0x8f   : > { %337 = vperm.xlu2 %2180, %v326_v35   ;;  %318 = vperm.xlu1 %2179, %v313_v33  }
  0x90   : > { %246 = vperm.xlu0 %2217, %v235_v17   ;;  %v1375_v17 = vsel %vm991_vm4, %v2412_v3, -inf }
  0x92   : > { %v2362_v36 = vpop.permute.xlu0 %214 }
  0x93   : > { %vm997_vm6 = vcmp.gt.f32.partialorder %v2362_v36, 0.5 }
  0x94   : > { %v1381_v33 = vsel %vm997_vm6, %v2412_v3, -inf }
  0x97   : > { %2182 = vset.pattern.permute.xlu2 %v2258_v1  ;;  %331 = vperm.xlu1 %2179, %v326_v35  }
  0x98   : > { %311 = vperm.xlu0 %2217, %v300_v31   ;;  %v1516_v31 = vrot.slane %v1515_v9, 4 }
  0x99   : > { %v182_v49 = vpop.permute.xlu1 %181  ;;  %v2387_v54 = vpop.permute.xlu2 %227 }
  0x9a   : > { %v2365_v37 = vpop.permute.xlu0 %279  ;;  %vm992_vm2 = vcmp.gt.f32.partialorder %v182_v49, 0.5  ;;  %v1517_v45 = vmax.f32 %v1515_v9, %v1516_v31  ;;  %vm999_vm11 = vcmp.gt.f32.partialorder %v2387_v54, 0.5  ;;  %v1373_v31 = vsel %vm989_vm12, %v2412_v3, -inf }
  0x9b   : > { %v1376_v10 = vsel %vm992_vm2, %v2406_v0, -inf  ;;  %vm1007_vm14 = vcmp.gt.f32.partialorder %v2365_v37, 0.5 }
  0x9c   : > { %v1508_v24 = vmax.f32 %v1375_v17, %v1376_v10 }
  0x9e   : > { %v1509_v42 = vrot.slane %v1508_v24, 4 }
  0x9f   : > { %357 = vperm.xlu2 %2182, %v352_v38   ;;  %2181 = vset.pattern.permute.xlu1 %v2282_v6 }
  0xa0   : > { %376 = vperm.xlu0 %2217, %v365_v39  }
  0xa1   : > { %v2394_v58 = vpop.permute.xlu2 %240 }
  0xa2   : > { %v2370_v40 = vpop.permute.xlu0 %344  ;;  %vm1001_vm15 = vcmp.gt.f32.partialorder %v2394_v58, 0.5  ;;  %v1391_v58 = vsel %vm1007_vm14, %v2412_v3, -inf  ;;  %vm2019_vm14 = vcmask 1044484  }
  0xa7   : > { %370 = vperm.xlu2 %2182, %v365_v39   ;;  %350 = vperm.xlu1 %2181, %v339_v11   ;;  %v456_v39 = vperm.slane %v2297_v12, 7 }
  0xa8   : > { %441 = vperm.xlu0 %2217, %v430_v43  }
  0xa9   : > { %v202_v53 = vpop.permute.xlu1 %201 }
  0xaa   : > { %v2374_v41 = vpop.permute.xlu0 %409  ;;  %vm995_vm3 = vcmp.gt.f32.partialorder %v202_v53, 0.5 }
  0xab   : > { %v1379_v11 = vsel %vm995_vm3, %v2412_v3, -inf }
  0xac   : > { %v1522_v28 = vmax.f32 %v1379_v11, %v1380_v21 }
  0xaf   : > { %2184 = vset.pattern.permute.xlu2 %v2282_v6  ;;  %363 = vperm.xlu1 %2181, %v352_v38  }
  0xb0   : > { %506 = vperm.xlu0 %2217, %v495_v2  }
  0xb1   : > { %v260_v61 = vpop.permute.xlu2 %259 }
  0xb2   : > { %v2378_v44 = vpop.permute.xlu0 %474  ;;  %vm1004_vm9 = vcmp.gt.f32.partialorder %v260_v61, 0.5 }
  0xb3   : > { %v1388_v12 = vsel %vm1004_vm9, %v2406_v0, -inf }
  0xb7   : > { %389 = vperm.xlu2 %2184, %v378_v46   ;;  %2183 = vset.pattern.permute.xlu1 %v2258_v1 }
  0xb9   : > { %v221_v56 = vpop.permute.xlu1 %220  ;;  %v2418_v7 = vpop.permute.xlu2 %272 }
  0xba   : > { %v2382_v48 = vpop.permute.xlu0 %539  ;;  %vm998_vm7 = vcmp.gt.f32.partialorder %v221_v56, 0.5  ;;  %v1518_v56 = vrot.slane %v1517_v45, 2  ;;  %vm1006_vm0 = vcmp.gt.f32.partialorder %v2418_v7, 0.5 }
  0xbb   : > { %v1382_v35 = vsel %vm998_vm7, %v2406_v0, -inf }
  0xbf   : > { %402 = vperm.xlu2 %2184, %v391_v50   ;;  %383 = vperm.xlu1 %2183, %v378_v46   ;;  %v1529_v46 = vmax.f32 %v1381_v33, %v1382_v35 }
  0xc1   : > { %v234_v60 = vpop.permute.xlu1 %233 }
  0xc2   : > { %v2385_v52 = vpop.permute.xlu0 %604  ;;  %vm1000_vm8 = vcmp.gt.f32.partialorder %v234_v60, 0.5  ;;  %v1530_v60 = vrot.slane %v1529_v46, 4 }
  0xc3   : > { %v1384_v47 = vsel %vm1000_vm8, %v2406_v0, -inf  ;;  %vm2013_vm8 = vcmask 1041409  }
  0xc4   : > { %v1531_v9 = vmax.f32 %v1529_v46, %v1530_v60 }
  0xc6   : > { %v1532_v33 = vrot.slane %v1531_v9, 2 }
  0xc7   : > { %2186 = vset.pattern.permute.xlu2 %v2258_v1  ;;  %396 = vperm.xlu1 %2183, %v391_v50   ;;  %v1510_v50 = vmax.f32 %v1508_v24, %v1509_v42 }
  0xc9   : > { %v2433_v38 = vpop.permute.xlu2 %292 }
  0xca   : > { %v2390_v55 = vpop.permute.xlu0 %669  ;;  %vm1009_vm2 = vcmp.gt.f32.partialorder %v2433_v38, 0.5 }
  0xcb   : > { %v1393_v37 = vsel %vm1009_vm2, %v2412_v3, -inf  ;;  %vm2802_vm2 = vcmask 1047559  }
  0xcf   : > { %422 = vperm.xlu2 %2186, %v417_v57   ;;  %2185 = vset.pattern.permute.xlu1 %v2282_v6 }
  0xd1   : > { %v254_v63 = vpop.permute.xlu1 %253  ;;  %v2445_v5 = vpop.permute.xlu2 %305 }
  0xd2   : > { %v2396_v59 = vpop.permute.xlu0 %734  ;;  %vm1003_vm10 = vcmp.gt.f32.partialorder %v254_v63, 0.5  ;;  %v1511_v63 = vrot.slane %v1510_v50, 2  ;;  %vm1011_vm6 = vcmp.gt.f32.partialorder %v2445_v5, 0.5 }
  0xd3   : > { %v1387_v53 = vsel %vm1003_vm10, %v2412_v3, -inf  ;;  %vm2015_vm10 = vcmask 1042434  }
  0xd4   : > { %v1550_v54 = vmax.f32 %v1387_v53, %v1388_v12  ;;  %v1512_v17 = vmax.f32 %v1510_v50, %v1511_v63  ;;  %v1533_v12 = vmax.f32 %v1531_v9, %v1532_v33  ;;  %v1390_v9 = vsel %vm1006_vm0, %v2406_v0, -inf }
  0xd5   : > { %vm2021_vm0 = vcmask 1045509  }
  0xd6   : > { %v1551_v11 = vrot.slane %v1550_v54, 4  ;;  %v1513_v46 = vrot.slane %v1512_v17, 1 }
  0xd7   : > { %435 = vperm.xlu2 %2186, %v430_v43   ;;  %415 = vperm.xlu1 %2185, %v404_v13   ;;  %v1523_v43 = vrot.slane %v1522_v28, 4 }
  0xd8   : > { %v1552_v34 = vmax.f32 %v1550_v54, %v1551_v11 }
  0xd9   : > { %v2425_v15 = vpop.permute.xlu1 %266  ;;  %v1524_v51 = vmax.f32 %v1522_v28, %v1523_v43  ;;  %v482_v43 = vperm.slane %v2304_v14, 1 }
  0xda   : > { %v2400_v62 = vpop.permute.xlu0 %799  ;;  %vm1005_vm1 = vcmp.gt.f32.partialorder %v2425_v15, 0.5  ;;  %v1553_v60 = vrot.slane %v1552_v34, 2  ;;  %v1514_v15 = vmax.f32 %v1512_v17, %v1513_v46  ;;  %v1395_v46 = vsel %vm1011_vm6, %v2412_v3, -inf }
  0xdb   : > { %v1525_v4 = vrot.slane %v1524_v51, 2  ;;  %v1389_v54 = vsel %vm1005_vm1, %v2412_v3, -inf  ;;  %vm2023_vm1 = vcmask 1046534  }
  0xdd   : > { %v1526_v21 = vmax.f32 %v1524_v51, %v1525_v4 }
  0xdf   : > { %2188 = vset.pattern.permute.xlu2 %v2282_v6  ;;  %428 = vperm.xlu1 %2185, %v417_v57   ;;  %v1383_v57 = vsel %vm999_vm11, %v2412_v3, -inf  ;;  %vm2017_vm11 = vcmask 1043459  }
  0xe0   : > { %v1536_v61 = vmax.f32 %v1383_v57, %v1384_v47  ;;  %v1385_v57 = vsel %vm1001_vm15, %v2412_v3, -inf }
  0xe1   : > { %v325_v47 = vpop.permute.xlu2 %324 }
  0xe2   : > { %v2423_v13 = vpop.permute.xlu0 %864  ;;  %v1537_v10 = vrot.slane %v1536_v61, 4  ;;  %vm1014_vm7 = vcmp.gt.f32.partialorder %v325_v47, 0.5 }
  0xe4   : > { %v1538_v42 = vmax.f32 %v1536_v61, %v1537_v10 }
  0xe6   : > { %v1539_v53 = vrot.slane %v1538_v42, 2 }
  0xe7   : > { %454 = vperm.xlu2 %2188, %v443_v8   ;;  %2187 = vset.pattern.permute.xlu1 %v2258_v1 }
  0xe8   : > { %v1540_v17 = vmax.f32 %v1538_v42, %v1539_v53 }
  0xe9   : > { %v2437_v36 = vpop.permute.xlu1 %285 }
  0xea   : > { %v2440_v49 = vpop.permute.xlu0 %929  ;;  %vm1008_vm3 = vcmp.gt.f32.partialorder %v2437_v36, 0.5  ;;  %v1541_v42 = vrot.slane %v1540_v17, 1 }
  0xeb   : > { %v1392_v10 = vsel %vm1008_vm3, %v2406_v0, -inf  ;;  %vm1017_vm3 = vcmp.gt.f32.partialorder %v2370_v40, 0.5  ;;  %v521_v40 = vperm.slane %v2304_v14, 4 }
  0xec   : > { %v1564_v33 = vmax.f32 %v1391_v58, %v1392_v10 }
  0xef   : > { %467 = vperm.xlu2 %2188, %v456_v39   ;;  %448 = vperm.xlu1 %2187, %v443_v8   ;;  %v1519_v8 = vmax.f32 %v1517_v45, %v1518_v56 }
  0xf1   : > { %v299_v24 = vpop.permute.xlu1 %298  ;;  %v1520_v28 = vrot.slane %v1519_v8, 1 }
  0xf2   : > { %vm1010_vm4 = vcmp.gt.f32.partialorder %v299_v24, 0.5 }
  0xf3   : > { %v2454_v51 = vmax.f32 %v1519_v8, %v1520_v28  ;;  %v1534_v8 = vrot.slane %v1533_v12, 1  ;;  %v2478_v28 = vmax.f32 %v1552_v34, %v1553_v60 }
  0xf5   : > { %v1555_v5 = vrot.slane %v2478_v28, 1 }
  0xf7   : > { %2190 = vset.pattern.permute.xlu2 %v2258_v1  ;;  %461 = vperm.xlu1 %2187, %v456_v39   ;;  %v1527_v39 = vrot.slane %v1526_v21, 1 }
  0xf9   : > { %v1528_v61 = vmax.f32 %v1526_v21, %v1527_v39  ;;  %v1394_v21 = vsel %vm1010_vm4, %v2406_v0, -inf }
  0xfa   : > { %v169_v35 = vpop.permute.xlu0 %168  ;;  %v1571_v36 = vmax.f32 %v1393_v37, %v1394_v21 }
  0xfb   : > { %vm990_vm13 = vcmp.gt.f32.partialorder %v169_v35, 0.5 }
  0xfc   : > { %v1374_v45 = vsel %vm990_vm13, %v2406_v0, -inf }
  0xfd   : > { %v1501_v50 = vmax.f32 %v1373_v31, %v1374_v45  ;;  %v1557_v31 = vmax.f32 %v1389_v54, %v1390_v9  ;;  %v1535_v45 = vmax.f32 %v1533_v12, %v1534_v8  ;;  %v1398_v12 = vsel %vm1014_vm7, %v2406_v0, -inf }
  0xff   : > { %v1502_v56 = vrot.slane %v1501_v50, 4  ;;  %487 = vperm.xlu2 %2190, %v482_v43   ;;  %2189 = vset.pattern.permute.xlu1 %v2282_v6  ;;  %v1558_v53 = vrot.slane %v1557_v31, 4 }
 0x101   : > { %v1503_v63 = vmax.f32 %v1501_v50, %v1502_v56  ;;  %v319_v4 = vpop.permute.xlu1 %318  ;;  %v338_v50 = vpop.permute.xlu2 %337  ;;  %v1565_v56 = vrot.slane %v1564_v33, 4 }
 0x102   : > { %v247_v11 = vpop.permute.xlu0 %246  ;;  %vm1013_vm9 = vcmp.gt.f32.partialorder %v319_v4, 0.5  ;;  %vm1016_vm12 = vcmp.gt.f32.partialorder %v338_v50, 0.5 }
 0x103   : > { %v1504_v24 = vrot.slane %v1503_v63, 2  ;;  %vm1002_vm5 = vcmp.gt.f32.partialorder %v247_v11, 0.5  ;;  %v1566_v10 = vmax.f32 %v1564_v33, %v1565_v56 }
 0x104   : > { %v1386_v7 = vsel %vm1002_vm5, %v2406_v0, -inf }
 0x105   : > { %v1505_v38 = vmax.f32 %v1503_v63, %v1504_v24  ;;  %v1543_v35 = vmax.f32 %v1385_v57, %v1386_v7  ;;  %v1397_v57 = vsel %vm1013_vm9, %v2412_v3, -inf  ;;  %v1572_v63 = vrot.slane %v1571_v36, 4 }
 0x106   : > { %v1585_v8 = vmax.f32 %v1397_v57, %v1398_v12  ;;  %v1559_v7 = vmax.f32 %v1557_v31, %v1558_v53  ;;  %v560_v31 = vperm.slane %v2304_v14, 7 }
 0x107   : > { %v1506_v39 = vrot.slane %v1505_v38, 1  ;;  %v1544_v34 = vrot.slane %v1543_v35, 4  ;;  %500 = vperm.xlu2 %2190, %v495_v2   ;;  %480 = vperm.xlu1 %2189, %v469_v16  }
 0x108   : > { %v1586_v33 = vrot.slane %v1585_v8, 4  ;;  %v1560_v53 = vrot.slane %v1559_v7, 2  ;;  %571 = vperm.xlu0 %2217, %v560_v31  }
 0x109   : > { %v1507_v58 = vmax.f32 %v1505_v38, %v1506_v39  ;;  %v1545_v60 = vmax.f32 %v1543_v35, %v1544_v34  ;;  %v332_v54 = vpop.permute.xlu1 %331  ;;  %v1573_v38 = vmax.f32 %v1571_v36, %v1572_v63  ;;  %v1567_v36 = vrot.slane %v1566_v10, 2 }
 0x10a   : > { %vm1015_vm13 = vcmp.gt.f32.partialorder %v332_v54, 0.5  ;;  %v312_v2 = vpop.permute.xlu0 %311 }
 0x10b   : > { %v2014_v16 = vsel %vm2013_vm8, %v1514_v15, %v1507_v58  ;;  %v1546_v4 = vrot.slane %v1545_v60, 2  ;;  %vm1012_vm15 = vcmp.gt.f32.partialorder %v312_v2, 0.5  ;;  %v1399_v9 = vsel %vm1015_vm13, %v2412_v3, -inf }
 0x10c   : > { %v2016_v47 = vsel %vm2015_vm10, %v2454_v51, %v2014_v16  ;;  %v1396_v37 = vsel %vm1012_vm15, %v2406_v0, -inf  ;;  %v1400_v15 = vsel %vm1016_vm12, %v2406_v0, -inf  ;;  %v1574_v12 = vrot.slane %v1573_v38, 2 }
 0x10d   : > { %v2018_v11 = vsel %vm2017_vm11, %v1528_v61, %v2016_v47  ;;  %v1547_v21 = vmax.f32 %v1545_v60, %v1546_v4  ;;  %v1578_v24 = vmax.f32 %v1395_v46, %v1396_v37  ;;  %v1592_v51 = vmax.f32 %v1399_v9, %v1400_v15 }
 0x10e   : > { %v2020_v35 = vsel %vm2019_vm14, %v1535_v45, %v2018_v11  ;;  %v1542_v61 = vmax.f32 %v1540_v17, %v1541_v42  ;;  %v1556_v45 = vmax.f32 %v2478_v28, %v1555_v5  ;;  %v508_v28 = vperm.slane %v2304_v14, 3 }
 0x10f   : > { %v1548_v39 = vrot.slane %v1547_v21, 1  ;;  %v1579_v34 = vrot.slane %v1578_v24, 4  ;;  %2192 = vset.pattern.permute.xlu2 %v2282_v6  ;;  %493 = vperm.xlu1 %2189, %v482_v43   ;;  %v1593_v42 = vrot.slane %v1592_v51, 4  ;;  %v1587_v5 = vmax.f32 %v1585_v8, %v1586_v33 }
 0x110   : > { %v2022_v43 = vsel %vm2021_vm0, %v1542_v61, %v2020_v35  ;;  %v1568_v57 = vmax.f32 %v1566_v10, %v1567_v36  ;;  %v1561_v60 = vmax.f32 %v1559_v7, %v1560_v53  ;;  %v1575_v54 = vmax.f32 %v1573_v38, %v1574_v12  ;;  %v358_v61 = vpop.permute.xlu2 %357 }
 0x111   : > { %v1549_v46 = vmax.f32 %v1547_v21, %v1548_v39  ;;  %v1580_v50 = vmax.f32 %v1578_v24, %v1579_v34  ;;  %v1594_v63 = vmax.f32 %v1592_v51, %v1593_v42  ;;  %v1588_v16 = vrot.slane %v1587_v5, 2 }
 0x112   : > { %v1401_v4 = vsel %vm1017_vm3, %v2412_v3, -inf  ;;  %v1569_v47 = vrot.slane %v1568_v57, 1  ;;  %v1562_v37 = vrot.slane %v1561_v60, 1  ;;  %v1576_v8 = vrot.slane %v1575_v54, 1 }
 0x113   : > { %v2024_v17 = vsel %vm2023_vm1, %v1549_v46, %v2022_v43  ;;  %v1581_v56 = vrot.slane %v1580_v50, 2  ;;  %v1595_v11 = vrot.slane %v1594_v63, 2  ;;  %v1589_v24 = vmax.f32 %v1587_v5, %v1588_v16 }
 0x114   : > { %v2026_v58 = vsel %vm2802_vm2, %v1556_v45, %v2024_v17  ;;  %v1570_v38 = vmax.f32 %v1568_v57, %v1569_v47  ;;  %v1577_v15 = vmax.f32 %v1575_v54, %v1576_v8  ;;  %v1563_v39 = vmax.f32 %v1561_v60, %v1562_v37 }
 0x115   : > { %2084 = vst [vmem:[%s2510_s22] sm:$0xff] %v2026_v58  ;;  %v1582_v2 = vmax.f32 %v1580_v50, %v1581_v56  ;;  %v1596_v51 = vmax.f32 %v1594_v63, %v1595_v11  ;;  %v1590_v33 = vrot.slane %v1589_v24, 1  ;;  %vm1019_vm5 = vcmp.gt.f32.partialorder %v358_v61, 0.5 }
 0x116   : > { %v2027_v46 = vsel %vm2013_vm8, %v1570_v38, %v1563_v39  ;;  %v1403_v17 = vsel %vm1019_vm5, %v2412_v3, -inf  ;;  %vm1027_vm3 = vcmp.gt.f32.partialorder %v2374_v41, 0.5 }
 0x117   : > { %519 = vperm.xlu2 %2192, %v508_v28   ;;  %2191 = vset.pattern.permute.xlu1 %v2258_v1  ;;  %v1583_v10 = vrot.slane %v1582_v2, 1  ;;  %v2028_v45 = vsel %vm2015_vm10, %v1577_v15, %v2027_v46  ;;  %v1597_v12 = vrot.slane %v1596_v51, 1  ;;  %v1591_v56 = vmax.f32 %v1589_v24, %v1590_v33 }
 0x118   : > { %v371_v11 = vpop.permute.xlu2 %370 }
 0x119   : > { %v351_v9 = vpop.permute.xlu1 %350  ;;  %v1584_v34 = vmax.f32 %v1582_v2, %v1583_v10  ;;  %v1598_v54 = vmax.f32 %v1596_v51, %v1597_v12  ;;  %vm1021_vm12 = vcmp.gt.f32.partialorder %v371_v11, 0.5 }
 0x11a   : > { %vm1018_vm4 = vcmp.gt.f32.partialorder %v351_v9, 0.5  ;;  %v547_v9 = vperm.slane %v2304_v14, 6  ;;  %v586_v14 = vperm.slane %v2316_v19, 1 }
 0x11b   : > { %v1402_v21 = vsel %vm1018_vm4, %v2406_v0, -inf  ;;  %v2029_v43 = vsel %vm2017_vm11, %v1584_v34, %v2028_v45  ;;  %v1411_v45 = vsel %vm1027_vm3, %v2412_v3, -inf  ;;  %vm2803_vm3 = vcmask 1047559  }
 0x11c   : > { %v1599_v7 = vmax.f32 %v1401_v4, %v1402_v21  ;;  %v2030_v58 = vsel %vm2019_vm14, %v1591_v56, %v2029_v43 }
 0x11d   : > { %v2031_v16 = vsel %vm2021_vm0, %v1598_v54, %v2030_v58 }
 0x11e   : > { %v1600_v35 = vrot.slane %v1599_v7, 4 }
 0x11f   : > { %532 = vperm.xlu2 %2192, %v521_v40   ;;  %513 = vperm.xlu1 %2191, %v508_v28  }
 0x120   : > { %v1601_v36 = vmax.f32 %v1599_v7, %v1600_v35  ;;  %v625_v7 = vperm.slane %v2316_v19, 4  ;;  %v573_v35 = vperm.slane %v2316_v19, 0 }
 0x121   : > { %v364_v50 = vpop.permute.xlu1 %363 }
 0x122   : > { %v1602_v53 = vrot.slane %v1601_v36, 2  ;;  %vm1020_vm6 = vcmp.gt.f32.partialorder %v364_v50, 0.5  ;;  %636 = vperm.xlu0 %2217, %v625_v7  }
 0x123   : > { %v1404_v42 = vsel %vm1020_vm6, %v2406_v0, -inf }
 0x124   : > { %v1603_v5 = vmax.f32 %v1601_v36, %v1602_v53  ;;  %v1606_v28 = vmax.f32 %v1403_v17, %v1404_v42  ;;  %v1405_v36 = vsel %vm1021_vm12, %v2412_v3, -inf }
 0x126   : > { %v1604_v57 = vrot.slane %v1603_v5, 1  ;;  %v1607_v60 = vrot.slane %v1606_v28, 4 }
 0x127   : > { %2194 = vset.pattern.permute.xlu2 %v2258_v1  ;;  %526 = vperm.xlu1 %2191, %v521_v40   ;;  %v390_v40 = vpop.permute.xlu2 %389 }
 0x128   : > { %v1605_v63 = vmax.f32 %v1603_v5, %v1604_v57  ;;  %v1608_v2 = vmax.f32 %v1606_v28, %v1607_v60  ;;  %vm1024_vm7 = vcmp.gt.f32.partialorder %v390_v40, 0.5 }
 0x129   : > { %v1408_v34 = vsel %vm1024_vm7, %v2406_v0, -inf }
 0x12a   : > { %v2032_v4 = vsel %vm2023_vm1, %v1605_v63, %v2031_v16  ;;  %v1609_v47 = vrot.slane %v1608_v2, 2  ;;  %v612_v16 = vperm.slane %v2316_v19, 3 }
 0x12c   : > { %v1610_v37 = vmax.f32 %v1608_v2, %v1609_v47 }
 0x12e   : > { %v1611_v8 = vrot.slane %v1610_v37, 1 }
 0x12f   : > { %552 = vperm.xlu2 %2194, %v547_v9   ;;  %2193 = vset.pattern.permute.xlu1 %v2282_v6  ;;  %v403_v38 = vpop.permute.xlu2 %402 }
 0x130   : > { %v1612_v10 = vmax.f32 %v1610_v37, %v1611_v8  ;;  %vm1026_vm5 = vcmp.gt.f32.partialorder %v403_v38, 0.5 }
 0x131   : > { %v384_v24 = vpop.permute.xlu1 %383  ;;  %v1410_v12 = vsel %vm1026_vm5, %v2406_v0, -inf  ;;  %vm1037_vm5 = vcmp.gt.f32.partialorder %v2378_v44, 0.5 }
 0x132   : > { %v2033_v21 = vsel %vm2802_vm2, %v1612_v10, %v2032_v4  ;;  %vm1023_vm9 = vcmp.gt.f32.partialorder %v384_v24, 0.5 }
 0x133   : > { %2085 = vst [vmem:[%s2510_s22 + $0x8] sm:$0xff] %v2033_v21  ;;  %v1407_v61 = vsel %vm1023_vm9, %v2412_v3, -inf }
 0x134   : > { %v1620_v43 = vmax.f32 %v1407_v61, %v1408_v34 }
 0x136   : > { %v1621_v57 = vrot.slane %v1620_v43, 4 }
 0x137   : > { %565 = vperm.xlu2 %2194, %v560_v31   ;;  %545 = vperm.xlu1 %2193, %v534_v18   ;;  %v423_v39 = vpop.permute.xlu2 %422  ;;  %v377_v18 = vpop.permute.xlu0 %376 }
 0x138   : > { %vm1022_vm13 = vcmp.gt.f32.partialorder %v377_v18, 0.5  ;;  %vm1029_vm2 = vcmp.gt.f32.partialorder %v423_v39, 0.5  ;;  %v1622_v37 = vmax.f32 %v1620_v43, %v1621_v57 }
 0x139   : > { %v397_v15 = vpop.permute.xlu1 %396  ;;  %v1406_v46 = vsel %vm1022_vm13, %v2406_v0, -inf  ;;  %v1413_v5 = vsel %vm1029_vm2, %v2412_v3, -inf }
 0x13a   : > { %vm1025_vm15 = vcmp.gt.f32.partialorder %v397_v15, 0.5  ;;  %v1613_v42 = vmax.f32 %v1405_v36, %v1406_v46  ;;  %v1623_v15 = vrot.slane %v1622_v37, 2 }
 0x13b   : > { %v1409_v50 = vsel %vm1025_vm15, %v2412_v3, -inf }
 0x13c   : > { %v1627_v56 = vmax.f32 %v1409_v50, %v1410_v12  ;;  %v1614_v4 = vrot.slane %v1613_v42, 4 }
 0x13e   : > { %v1628_v60 = vrot.slane %v1627_v56, 4  ;;  %v1615_v10 = vmax.f32 %v1613_v42, %v1614_v4 }
 0x13f   : > { %2196 = vset.pattern.permute.xlu2 %v2282_v6  ;;  %558 = vperm.xlu1 %2193, %v547_v9   ;;  %v436_v33 = vpop.permute.xlu2 %435  ;;  %v442_v53 = vpop.permute.xlu0 %441 }
 0x140   : > { %vm1031_vm7 = vcmp.gt.f32.partialorder %v436_v33, 0.5  ;;  %vm1032_vm9 = vcmp.gt.f32.partialorder %v442_v53, 0.5  ;;  %v1629_v11 = vmax.f32 %v1627_v56, %v1628_v60  ;;  %v1624_v33 = vmax.f32 %v1622_v37, %v1623_v15 }
 0x141   : > { %v1415_v54 = vsel %vm1031_vm7, %v2412_v3, -inf  ;;  %v1416_v63 = vsel %vm1032_vm9, %v2406_v0, -inf }
 0x142   : > { %v1648_v8 = vmax.f32 %v1415_v54, %v1416_v63  ;;  %v1630_v39 = vrot.slane %v1629_v11, 2 }
 0x144   : > { %v1631_v50 = vmax.f32 %v1629_v11, %v1630_v39  ;;  %v690_v11 = vperm.slane %v2328_v23, 1  ;;  %v638_v39 = vperm.slane %v2316_v19, 5 }
 0x146   : > { %701 = vperm.xlu0 %2217, %v690_v11  }
 0x147   : > { %584 = vperm.xlu2 %2196, %v573_v35   ;;  %2195 = vset.pattern.permute.xlu1 %v2258_v1  ;;  %v455_v2 = vpop.permute.xlu2 %454 }
 0x148   : > { %vm1034_vm12 = vcmp.gt.f32.partialorder %v455_v2, 0.5 }
 0x149   : > { %v416_v31 = vpop.permute.xlu1 %415  ;;  %v1418_v24 = vsel %vm1034_vm12, %v2406_v0, -inf }
 0x14a   : > { %vm1028_vm4 = vcmp.gt.f32.partialorder %v416_v31, 0.5 }
 0x14b   : > { %v1412_v41 = vsel %vm1028_vm4, %v2406_v0, -inf }
 0x14c   : > { %v1634_v28 = vmax.f32 %v1411_v45, %v1412_v41 }
 0x14e   : > { %v1635_v47 = vrot.slane %v1634_v28, 4 }
 0x14f   : > { %597 = vperm.xlu2 %2196, %v586_v14   ;;  %578 = vperm.xlu1 %2195, %v573_v35   ;;  %v1649_v35 = vrot.slane %v1648_v8, 4  ;;  %v468_v61 = vpop.permute.xlu2 %467 }
 0x150   : > { %v1636_v21 = vmax.f32 %v1634_v28, %v1635_v47  ;;  %vm1036_vm13 = vcmp.gt.f32.partialorder %v468_v61, 0.5 }
 0x151   : > { %v429_v51 = vpop.permute.xlu1 %428  ;;  %v1650_v36 = vmax.f32 %v1648_v8, %v1649_v35  ;;  %v1420_v28 = vsel %vm1036_vm13, %v2406_v0, -inf }
 0x152   : > { %vm1030_vm6 = vcmp.gt.f32.partialorder %v429_v51, 0.5  ;;  %v1637_v18 = vrot.slane %v1636_v21, 2 }
 0x153   : > { %v1414_v17 = vsel %vm1030_vm6, %v2406_v0, -inf  ;;  %v1651_v42 = vrot.slane %v1650_v36, 2 }
 0x154   : > { %v1641_v58 = vmax.f32 %v1413_v5, %v1414_v17  ;;  %v1638_v53 = vmax.f32 %v1636_v21, %v1637_v18  ;;  %v1625_v17 = vrot.slane %v1624_v33, 1  ;;  %v1632_v5 = vrot.slane %v1631_v50, 1 }
 0x155   : > { %v1652_v2 = vmax.f32 %v1650_v36, %v1651_v42 }
 0x156   : > { %v1642_v9 = vrot.slane %v1641_v58, 4  ;;  %v1626_v63 = vmax.f32 %v1624_v33, %v1625_v17  ;;  %v1633_v47 = vmax.f32 %v1631_v50, %v1632_v5  ;;  %v651_v50 = vperm.slane %v2316_v19, 6 }
 0x157   : > { %2198 = vset.pattern.permute.xlu2 %v2258_v1  ;;  %591 = vperm.xlu1 %2195, %v586_v14   ;;  %v1616_v14 = vrot.slane %v1615_v10, 2 }
 0x158   : > { %v1643_v40 = vmax.f32 %v1641_v58, %v1642_v9 }
 0x159   : > { %v1617_v45 = vmax.f32 %v1615_v10, %v1616_v14  ;;  %v488_v15 = vpop.permute.xlu2 %487 }
 0x15a   : > { %v1644_v34 = vrot.slane %v1643_v40, 2  ;;  %vm1039_vm6 = vcmp.gt.f32.partialorder %v488_v15, 0.5 }
 0x15b   : > { %v1618_v57 = vrot.slane %v1617_v45, 1 }
 0x15c   : > { %v1645_v12 = vmax.f32 %v1643_v40, %v1644_v34 }
 0x15d   : > { %v1619_v9 = vmax.f32 %v1617_v45, %v1618_v57  ;;  %v1423_v57 = vsel %vm1039_vm6, %v2412_v3, -inf  ;;  %vm1047_vm6 = vcmp.gt.f32.partialorder %v2382_v48, 0.5 }
 0x15e   : > { %v1646_v54 = vrot.slane %v1645_v12, 1 }
 0x15f   : > { %617 = vperm.xlu2 %2198, %v612_v16   ;;  %2197 = vset.pattern.permute.xlu1 %v2282_v6  ;;  %v2034_v40 = vsel %vm2013_vm8, %v1626_v63, %v1619_v9 }
 0x160   : > { %v1647_v10 = vmax.f32 %v1645_v12, %v1646_v54  ;;  %v2035_v35 = vsel %vm2015_vm10, %v1633_v47, %v2034_v40 }
 0x161   : > { %v449_v38 = vpop.permute.xlu1 %448  ;;  %v501_v45 = vpop.permute.xlu2 %500 }
 0x162   : > { %vm1033_vm2 = vcmp.gt.f32.partialorder %v449_v38, 0.5 }
 0x163   : > { %v1417_v31 = vsel %vm1033_vm2, %v2412_v3, -inf  ;;  %vm1041_vm2 = vcmp.gt.f32.partialorder %v501_v45, 0.5  ;;  %v1431_v45 = vsel %vm1047_vm6, %v2412_v3, -inf }
 0x164   : > { %v1655_v51 = vmax.f32 %v1417_v31, %v1418_v24  ;;  %v1653_v24 = vrot.slane %v1652_v2, 1  ;;  %v1425_v63 = vsel %vm1041_vm2, %v2412_v3, -inf  ;;  %vm2804_vm2 = vcmask 1047559  }
 0x166   : > { %v1656_v46 = vrot.slane %v1655_v51, 4 }
 0x167   : > { %630 = vperm.xlu2 %2198, %v625_v7   ;;  %610 = vperm.xlu1 %2197, %v599_v20   ;;  %v1639_v7 = vrot.slane %v1638_v53, 1 }
 0x168   : > { %v1657_v41 = vmax.f32 %v1655_v51, %v1656_v46  ;;  %v1654_v51 = vmax.f32 %v1652_v2, %v1653_v24 }
 0x169   : > { %v462_v43 = vpop.permute.xlu1 %461  ;;  %v1640_v37 = vmax.f32 %v1638_v53, %v1639_v7 }
 0x16a   : > { %v1658_v56 = vrot.slane %v1657_v41, 2  ;;  %vm1035_vm15 = vcmp.gt.f32.partialorder %v462_v43, 0.5  ;;  %v677_v43 = vperm.slane %v2328_v23, 0 }
 0x16b   : > { %v1419_v58 = vsel %vm1035_vm15, %v2412_v3, -inf }
 0x16c   : > { %v1662_v60 = vmax.f32 %v1419_v58, %v1420_v28  ;;  %v1659_v20 = vmax.f32 %v1657_v41, %v1658_v56  ;;  %v507_v56 = vpop.permute.xlu0 %506  ;;  %v1421_v28 = vsel %vm1037_vm5, %v2412_v3, -inf }
 0x16d   : > { %vm1042_vm13 = vcmp.gt.f32.partialorder %v507_v56, 0.5 }
 0x16e   : > { %v1663_v4 = vrot.slane %v1662_v60, 4  ;;  %v1660_v21 = vrot.slane %v1659_v20, 1  ;;  %v1426_v2 = vsel %vm1042_vm13, %v2406_v0, -inf }
 0x16f   : > { %2200 = vset.pattern.permute.xlu2 %v2282_v6  ;;  %623 = vperm.xlu1 %2197, %v612_v16   ;;  %v2036_v16 = vsel %vm2017_vm11, %v1640_v37, %v2035_v35  ;;  %v1683_v37 = vmax.f32 %v1425_v63, %v1426_v2 }
 0x170   : > { %v1664_v8 = vmax.f32 %v1662_v60, %v1663_v4  ;;  %v2037_v14 = vsel %vm2019_vm14, %v1647_v10, %v2036_v16  ;;  %v1661_v18 = vmax.f32 %v1659_v20, %v1660_v21 }
 0x171   : > { %v2038_v61 = vsel %vm2021_vm0, %v1654_v51, %v2037_v14  ;;  %v520_v41 = vpop.permute.xlu2 %519  ;;  %v1684_v35 = vrot.slane %v1683_v37, 4 }
 0x172   : > { %v1665_v38 = vrot.slane %v1664_v8, 2  ;;  %v2039_v36 = vsel %vm2023_vm1, %v1661_v18, %v2038_v61  ;;  %vm1044_vm9 = vcmp.gt.f32.partialorder %v520_v41, 0.5 }
 0x173   : > { %v1428_v60 = vsel %vm1044_vm9, %v2406_v0, -inf  ;;  %v1685_v51 = vmax.f32 %v1683_v37, %v1684_v35 }
 0x174   : > { %v1666_v31 = vmax.f32 %v1664_v8, %v1665_v38  ;;  %v2605_v38 = vld [vmem:[%s2271_s15 + $0x28] sm:$0xff] }
 0x175   : > { %v755_v15 = vperm.slane %v2605_v38, 6 }
 0x176   : > { %v1667_v34 = vrot.slane %v1666_v31, 1 }
 0x177   : > { %649 = vperm.xlu2 %2200, %v638_v39   ;;  %2199 = vset.pattern.permute.xlu1 %v2258_v1 }
 0x178   : > { %v1668_v33 = vmax.f32 %v1666_v31, %v1667_v34  ;;  %766 = vperm.xlu0 %2217, %v755_v15   ;;  %v703_v31 = vperm.slane %v2605_v38, 2 }
 0x179   : > { %v481_v53 = vpop.permute.xlu1 %480  ;;  %v533_v17 = vpop.permute.xlu2 %532 }
 0x17a   : > { %v2040_v46 = vsel %vm2803_vm3, %v1668_v33, %v2039_v36  ;;  %vm1038_vm7 = vcmp.gt.f32.partialorder %v481_v53, 0.5  ;;  %vm1046_vm15 = vcmp.gt.f32.partialorder %v533_v17, 0.5  ;;  %v572_v24 = vpop.permute.xlu0 %571  ;;  %v1686_v53 = vrot.slane %v1685_v51, 2 }
 0x17b   : > { %2086 = vst [vmem:[%s2510_s22 + $0x10] sm:$0xff] %v2040_v46  ;;  %v1422_v7 = vsel %vm1038_vm7, %v2406_v0, -inf  ;;  %v1430_v19 = vsel %vm1046_vm15, %v2406_v0, -inf  ;;  %vm1052_vm5 = vcmp.gt.f32.partialorder %v572_v24, 0.5  ;;  %vm1057_vm15 = vcmp.gt.f32.partialorder %v2385_v52, 0.5  ;;  %v2664_v52 = vld [vmem:[%s2800_s1 + $0x8] sm:$0xff] }
 0x17c   : > { %v1669_v4 = vmax.f32 %v1421_v28, %v1422_v7  ;;  %v1436_v36 = vsel %vm1052_vm5, %v2406_v0, -inf }
 0x17f   : > { %662 = vperm.xlu2 %2200, %v651_v50   ;;  %643 = vperm.xlu1 %2199, %v638_v39  }
 0x181   : > { %v494_v12 = vpop.permute.xlu1 %493 }
 0x182   : > { %vm1040_vm4 = vcmp.gt.f32.partialorder %v494_v12, 0.5 }
 0x183   : > { %v1424_v5 = vsel %vm1040_vm4, %v2406_v0, -inf }
 0x184   : > { %v1676_v44 = vmax.f32 %v1423_v57, %v1424_v5  ;;  %v1687_v57 = vmax.f32 %v1685_v51, %v1686_v53 }
 0x186   : > { %v1677_v9 = vrot.slane %v1676_v44, 4 }
 0x187   : > { %2202 = vset.pattern.permute.xlu2 %v2258_v1  ;;  %656 = vperm.xlu1 %2199, %v651_v50  }
 0x188   : > { %v1678_v10 = vmax.f32 %v1676_v44, %v1677_v9 }
 0x189   : > { %v2591_v58 = vpop.permute.xlu2 %552 }
 0x18a   : > { %v1679_v14 = vrot.slane %v1678_v10, 2  ;;  %vm1049_vm9 = vcmp.gt.f32.partialorder %v2591_v58, 0.5 }
 0x18c   : > { %v1680_v46 = vmax.f32 %v1678_v10, %v1679_v14 }
 0x18e   : > { %v1681_v56 = vrot.slane %v1680_v46, 1 }
 0x18f   : > { %682 = vperm.xlu2 %2202, %v677_v43   ;;  %2201 = vset.pattern.permute.xlu1 %v2282_v6 }
 0x191   : > { %v514_v42 = vpop.permute.xlu1 %513  ;;  %v566_v40 = vpop.permute.xlu2 %565 }
 0x192   : > { %vm1043_vm12 = vcmp.gt.f32.partialorder %v514_v42, 0.5  ;;  %vm1051_vm4 = vcmp.gt.f32.partialorder %v566_v40, 0.5  ;;  %v716_v42 = vperm.slane %v2605_v38, 3 }
 0x193   : > { %v1427_v54 = vsel %vm1043_vm12, %v2412_v3, -inf  ;;  %v1435_v33 = vsel %vm1051_vm4, %v2412_v3, -inf }
 0x194   : > { %v1718_v12 = vmax.f32 %v1435_v33, %v1436_v36  ;;  %v742_v36 = vperm.slane %v2605_v38, 5 }
 0x196   : > { %v1719_v44 = vrot.slane %v1718_v12, 4 }
 0x197   : > { %695 = vperm.xlu2 %2202, %v690_v11   ;;  %675 = vperm.xlu1 %2201, %v664_v22   ;;  %v1690_v22 = vmax.f32 %v1427_v54, %v1428_v60  ;;  %v1670_v11 = vrot.slane %v1669_v4, 4 }
 0x198   : > { %v1720_v9 = vmax.f32 %v1718_v12, %v1719_v44 }
 0x199   : > { %v527_v20 = vpop.permute.xlu1 %526  ;;  %v1691_v21 = vrot.slane %v1690_v22, 4  ;;  %v1671_v16 = vmax.f32 %v1669_v4, %v1670_v11  ;;  %v1688_v4 = vrot.slane %v1687_v57, 1 }
 0x19a   : > { %vm1045_vm3 = vcmp.gt.f32.partialorder %v527_v20, 0.5  ;;  %v1682_v20 = vmax.f32 %v1680_v46, %v1681_v56  ;;  %v1721_v58 = vrot.slane %v1720_v9, 2 }
 0x19b   : > { %v1429_v47 = vsel %vm1045_vm3, %v2412_v3, -inf  ;;  %v1692_v18 = vmax.f32 %v1690_v22, %v1691_v21  ;;  %v1672_v61 = vrot.slane %v1671_v16, 2  ;;  %v1689_v35 = vmax.f32 %v1687_v57, %v1688_v4 }
 0x19c   : > { %v1697_v8 = vmax.f32 %v1429_v47, %v1430_v19 }
 0x19d   : > { %v1693_v50 = vrot.slane %v1692_v18, 2  ;;  %v1673_v17 = vmax.f32 %v1671_v16, %v1672_v61 }
 0x19e   : > { %v1698_v39 = vrot.slane %v1697_v8, 4 }
 0x19f   : > { %2204 = vset.pattern.permute.xlu2 %v2282_v6  ;;  %688 = vperm.xlu1 %2201, %v677_v43   ;;  %v1694_v5 = vmax.f32 %v1692_v18, %v1693_v50  ;;  %v1674_v60 = vrot.slane %v1673_v17, 1 }
 0x1a0   : > { %v1699_v34 = vmax.f32 %v1697_v8, %v1698_v39  ;;  %v1433_v8 = vsel %vm1049_vm9, %v2412_v3, -inf }
 0x1a1   : > { %v1695_v63 = vrot.slane %v1694_v5, 1  ;;  %v1675_v22 = vmax.f32 %v1673_v17, %v1674_v60  ;;  %v585_v17 = vpop.permute.xlu2 %584 }
 0x1a2   : > { %v1700_v41 = vrot.slane %v1699_v34, 2  ;;  %vm1054_vm4 = vcmp.gt.f32.partialorder %v585_v17, 0.5 }
 0x1a3   : > { %v2041_v10 = vsel %vm2013_vm8, %v1682_v20, %v1675_v22  ;;  %v1696_v21 = vmax.f32 %v1694_v5, %v1695_v63  ;;  %v2647_v20 = vld [vmem:[%s2271_s15 + $0x38] sm:$0xff] }
 0x1a4   : > { %v1701_v7 = vmax.f32 %v1699_v34, %v1700_v41  ;;  %v2042_v14 = vsel %vm2015_vm10, %v1689_v35, %v2041_v10  ;;  %v1722_v34 = vmax.f32 %v1720_v9, %v1721_v58  ;;  %v637_v9 = vpop.permute.xlu0 %636  ;;  %v950_v22 = vperm.slane %v2647_v20, 5 }
 0x1a5   : > { %v2043_v18 = vsel %vm2017_vm11, %v1696_v21, %v2042_v14 }
 0x1a6   : > { %v1702_v47 = vrot.slane %v1701_v7, 1  ;;  %v1723_v50 = vrot.slane %v1722_v34, 1 }
 0x1a7   : > { %714 = vperm.xlu2 %2204, %v703_v31   ;;  %2203 = vset.pattern.permute.xlu1 %v2258_v1 }
 0x1a8   : > { %v1703_v39 = vmax.f32 %v1701_v7, %v1702_v47  ;;  %v1724_v41 = vmax.f32 %v1722_v34, %v1723_v50 }
 0x1a9   : > { %v546_v43 = vpop.permute.xlu1 %545  ;;  %v598_v5 = vpop.permute.xlu2 %597 }
 0x1aa   : > { %vm1048_vm7 = vcmp.gt.f32.partialorder %v546_v43, 0.5  ;;  %v2044_v51 = vsel %vm2019_vm14, %v1703_v39, %v2043_v18  ;;  %vm1056_vm5 = vcmp.gt.f32.partialorder %v598_v5, 0.5 }
 0x1ab   : > { %v1432_v48 = vsel %vm1048_vm7, %v2406_v0, -inf }
 0x1ac   : > { %v1704_v28 = vmax.f32 %v1431_v45, %v1432_v48 }
 0x1ae   : > { %v1705_v54 = vrot.slane %v1704_v28, 4 }
 0x1af   : > { %727 = vperm.xlu2 %2204, %v716_v42   ;;  %708 = vperm.xlu1 %2203, %v703_v31  }
 0x1b0   : > { %v1706_v2 = vmax.f32 %v1704_v28, %v1705_v54  ;;  %v768_v28 = vperm.slane %v2605_v38, 7  ;;  %v885_v38 = vperm.slane %v2647_v20, 0 }
 0x1b1   : > { %v559_v19 = vpop.permute.xlu1 %558 }
 0x1b2   : > { %v1707_v37 = vrot.slane %v1706_v2, 2  ;;  %vm1050_vm12 = vcmp.gt.f32.partialorder %v559_v19, 0.5 }
 0x1b3   : > { %v1434_v11 = vsel %vm1050_vm12, %v2406_v0, -inf }
 0x1b4   : > { %v1708_v40 = vmax.f32 %v1706_v2, %v1707_v37  ;;  %v1711_v24 = vmax.f32 %v1433_v8, %v1434_v11  ;;  %v2657_v2 = vld [vmem:[%s2800_s1] sm:$0xff]  ;;  %v1438_v37 = vsel %vm1054_vm4, %v2664_v52, -inf  ;;  %v1440_v8 = vsel %vm1056_vm5, %v2664_v52, -inf }
 0x1b5   : > { %v1441_v47 = vsel %vm1057_vm15, %v2657_v2, -inf  ;;  %vm1062_vm15 = vcmp.gt.f32.partialorder %v637_v9, 0.5  ;;  %vm1067_vm5 = vcmp.gt.f32.partialorder %v2390_v55, 0.5 }
 0x1b6   : > { %v1709_v16 = vrot.slane %v1708_v40, 1  ;;  %v1712_v31 = vrot.slane %v1711_v24, 4 }
 0x1b7   : > { %2206 = vset.pattern.permute.xlu2 %v2258_v1  ;;  %721 = vperm.xlu1 %2203, %v716_v42   ;;  %v2638_v42 = vld [vmem:[%s2271_s15 + $0x30] sm:$0xff] }
 0x1b8   : > { %v1710_v3 = vmax.f32 %v1708_v40, %v1709_v16  ;;  %v1713_v0 = vmax.f32 %v1711_v24, %v1712_v31  ;;  %v820_v56 = vperm.slane %v2638_v42, 3  ;;  %v807_v60 = vperm.slane %v2638_v42, 2 }
 0x1b9   : > { %v618_v23 = vpop.permute.xlu2 %617  ;;  %v846_v55 = vperm.slane %v2638_v42, 5 }
 0x1ba   : > { %v2045_v61 = vsel %vm2021_vm0, %v1710_v3, %v2044_v51  ;;  %v1714_v33 = vrot.slane %v1713_v0, 2  ;;  %831 = vperm.xlu0 %2217, %v820_v56   ;;  %vm1059_vm9 = vcmp.gt.f32.partialorder %v618_v23, 0.5 }
 0x1bb   : > { %v1443_v24 = vsel %vm1059_vm9, %v2657_v2, -inf }
 0x1bc   : > { %v1715_v46 = vmax.f32 %v1713_v0, %v1714_v33  ;;  %v1446_v0 = vsel %vm1062_vm15, %v2664_v52, -inf }
 0x1be   : > { %v1716_v45 = vrot.slane %v1715_v46, 1 }
 0x1bf   : > { %747 = vperm.xlu2 %2206, %v742_v36   ;;  %2205 = vset.pattern.permute.xlu1 %v2282_v6 }
 0x1c0   : > { %v1717_v53 = vmax.f32 %v1715_v46, %v1716_v45 }
 0x1c1   : > { %v579_v48 = vpop.permute.xlu1 %578  ;;  %v631_v7 = vpop.permute.xlu2 %630 }
 0x1c2   : > { %v2046_v12 = vsel %vm2023_vm1, %v1717_v53, %v2045_v61  ;;  %896 = vperm.xlu0 %2217, %v885_v38   ;;  %vm1053_vm6 = vcmp.gt.f32.partialorder %v579_v48, 0.5 }
 0x1c3   : > { %v2047_v43 = vsel %vm2804_vm2, %v1724_v41, %v2046_v12  ;;  %v1437_v11 = vsel %vm1053_vm6, %v2657_v2, -inf }
 0x1c4   : > { %2087 = vst [vmem:[%s2510_s22 + $0x18] sm:$0xff] %v2047_v43  ;;  %v1725_v39 = vmax.f32 %v1437_v11, %v1438_v37 }
 0x1c6   : > { %v1726_v61 = vrot.slane %v1725_v39, 4 }
 0x1c7   : > { %760 = vperm.xlu2 %2206, %v755_v15   ;;  %740 = vperm.xlu1 %2205, %v729_v25   ;;  %v781_v25 = vperm.slane %v2638_v42, 0 }
 0x1c8   : > { %v1727_v41 = vmax.f32 %v1725_v39, %v1726_v61 }
 0x1c9   : > { %v592_v57 = vpop.permute.xlu1 %591 }
 0x1ca   : > { %vm1055_vm13 = vcmp.gt.f32.partialorder %v592_v57, 0.5  ;;  %961 = vperm.xlu0 %2217, %v950_v22   ;;  %v1728_v57 = vrot.slane %v1727_v41, 2 }
 0x1cb   : > { %v1439_v4 = vsel %vm1055_vm13, %v2657_v2, -inf  ;;  %vm1061_vm13 = vcmp.gt.f32.partialorder %v631_v7, 0.5 }
 0x1cc   : > { %v1732_v21 = vmax.f32 %v1439_v4, %v1440_v8  ;;  %v1445_v3 = vsel %vm1061_vm13, %v2657_v2, -inf }
 0x1cd   : > { %v1753_v46 = vmax.f32 %v1445_v3, %v1446_v0 }
 0x1ce   : > { %v1733_v18 = vrot.slane %v1732_v21, 4 }
 0x1cf   : > { %2208 = vset.pattern.permute.xlu2 %v2282_v6  ;;  %753 = vperm.xlu1 %2205, %v742_v36   ;;  %v1754_v17 = vrot.slane %v1753_v46, 4 }
 0x1d0   : > { %v1734_v45 = vmax.f32 %v1732_v21, %v1733_v18 }
 0x1d1   : > { %v650_v54 = vpop.permute.xlu2 %649 }
 0x1d2   : > { %vm1064_vm12 = vcmp.gt.f32.partialorder %v650_v54, 0.5 }
 0x1d3   : > { %v1448_v16 = vsel %vm1064_vm12, %v2664_v52, -inf }
 0x1d7   : > { %779 = vperm.xlu2 %2208, %v768_v28   ;;  %2207 = vset.pattern.permute.xlu1 %v2258_v1 }
 0x1d9   : > { %v611_v15 = vpop.permute.xlu1 %610  ;;  %v663_v40 = vpop.permute.xlu2 %662 }
 0x1da   : > { %vm1058_vm3 = vcmp.gt.f32.partialorder %v611_v15, 0.5  ;;  %v1755_v15 = vmax.f32 %v1753_v46, %v1754_v17 }
 0x1db   : > { %v1442_v19 = vsel %vm1058_vm3, %v2664_v52, -inf  ;;  %vm1066_vm3 = vcmp.gt.f32.partialorder %v663_v40, 0.5 }
 0x1dc   : > { %v1739_v35 = vmax.f32 %v1441_v47, %v1442_v19  ;;  %v1451_v47 = vsel %vm1067_vm5, %v2657_v2, -inf  ;;  %v1756_v9 = vrot.slane %v1755_v15, 2 }
 0x1de   : > { %v1740_v51 = vrot.slane %v1739_v35, 4  ;;  %v1757_v39 = vmax.f32 %v1755_v15, %v1756_v9 }
 0x1df   : > { %792 = vperm.xlu2 %2208, %v781_v25   ;;  %773 = vperm.xlu1 %2207, %v768_v28   ;;  %v833_v28 = vperm.slane %v2638_v42, 4 }
 0x1e0   : > { %v1741_v53 = vmax.f32 %v1739_v35, %v1740_v51  ;;  %v1758_v61 = vrot.slane %v1757_v39, 1 }
 0x1e1   : > { %v624_v44 = vpop.permute.xlu1 %623 }
 0x1e2   : > { %vm1060_vm7 = vcmp.gt.f32.partialorder %v624_v44, 0.5  ;;  %v1742_v5 = vrot.slane %v1741_v53, 2 }
 0x1e3   : > { %v1444_v10 = vsel %vm1060_vm7, %v2664_v52, -inf  ;;  %vm2805_vm7 = vcmask 1047559  }
 0x1e4   : > { %v1746_v58 = vmax.f32 %v1443_v24, %v1444_v10  ;;  %v1743_v54 = vmax.f32 %v1741_v53, %v1742_v5 }
 0x1e6   : > { %v1747_v33 = vrot.slane %v1746_v58, 4  ;;  %v1744_v11 = vrot.slane %v1743_v54, 1 }
 0x1e7   : > { %2210 = vset.pattern.permute.xlu2 %v2258_v1  ;;  %786 = vperm.xlu1 %2207, %v781_v25  }
 0x1e8   : > { %v1748_v12 = vmax.f32 %v1746_v58, %v1747_v33 }
 0x1e9   : > { %v683_v51 = vpop.permute.xlu2 %682 }
 0x1ea   : > { %v1749_v23 = vrot.slane %v1748_v12, 2 }
 0x1ef   : > { %812 = vperm.xlu2 %2210, %v807_v60   ;;  %2209 = vset.pattern.permute.xlu1 %v2282_v6 }
 0x1f1   : > { %v644_v63 = vpop.permute.xlu1 %643 }
 0x1f2   : > { %vm1063_vm2 = vcmp.gt.f32.partialorder %v644_v63, 0.5  ;;  %v1750_v63 = vmax.f32 %v1748_v12, %v1749_v23  ;;  %v872_v23 = vperm.slane %v2638_v42, 7 }
 0x1f3   : > { %v1447_v31 = vsel %vm1063_vm2, %v2657_v2, -inf }
 0x1f4   : > { %v1760_v36 = vmax.f32 %v1447_v31, %v1448_v16  ;;  %v1751_v40 = vrot.slane %v1750_v63, 1 }
 0x1f6   : > { %v1761_v43 = vrot.slane %v1760_v36, 4  ;;  %v1752_v3 = vmax.f32 %v1750_v63, %v1751_v40  ;;  %v702_v63 = vpop.permute.xlu0 %701 }
 0x1f7   : > { %825 = vperm.xlu2 %2210, %v820_v56   ;;  %805 = vperm.xlu1 %2209, %v794_v27   ;;  %v1450_v27 = vsel %vm1066_vm3, %v2664_v52, -inf  ;;  %v1735_v56 = vrot.slane %v1734_v45, 2  ;;  %vm1072_vm9 = vcmp.gt.f32.partialorder %v702_v63, 0.5  ;;  %vm1069_vm3 = vcmp.gt.f32.partialorder %v683_v51, 0.5 }
 0x1f8   : > { %v1762_v25 = vmax.f32 %v1760_v36, %v1761_v43  ;;  %v1456_v26 = vsel %vm1072_vm9, %v2664_v52, -inf }
 0x1f9   : > { %v657_v14 = vpop.permute.xlu1 %656  ;;  %v1736_v44 = vmax.f32 %v1734_v45, %v1735_v56 }
 0x1fa   : > { %vm1065_vm4 = vcmp.gt.f32.partialorder %v657_v14, 0.5  ;;  %v1763_v4 = vrot.slane %v1762_v25, 2  ;;  %v1745_v14 = vmax.f32 %v1743_v54, %v1744_v11 }
 0x1fb   : > { %v1449_v34 = vsel %vm1065_vm4, %v2657_v2, -inf  ;;  %v1737_v8 = vrot.slane %v1736_v44, 1 }
 0x1fc   : > { %v1767_v50 = vmax.f32 %v1449_v34, %v1450_v27  ;;  %v1764_v24 = vmax.f32 %v1762_v25, %v1763_v4  ;;  %v911_v4 = vperm.slane %v2647_v20, 2 }
 0x1fd   : > { %v1738_v16 = vmax.f32 %v1736_v44, %v1737_v8 }
 0x1fe   : > { %v1768_v48 = vrot.slane %v1767_v50, 4  ;;  %v1765_v0 = vrot.slane %v1764_v24, 1 }
 0x1ff   : > { %2212 = vset.pattern.permute.xlu2 %v2282_v6  ;;  %818 = vperm.xlu1 %2209, %v807_v60   ;;  %v1729_v60 = vmax.f32 %v1727_v41, %v1728_v57  ;;  %v1759_v41 = vmax.f32 %v1757_v39, %v1758_v61 }
 0x200   : > { %v1769_v7 = vmax.f32 %v1767_v50, %v1768_v48  ;;  %v1766_v45 = vmax.f32 %v1764_v24, %v1765_v0 }
 0x201   : > { %v1730_v21 = vrot.slane %v1729_v60, 1 }
 0x202   : > { %v1770_v19 = vrot.slane %v1769_v7, 2 }
 0x203   : > { %v1731_v18 = vmax.f32 %v1729_v60, %v1730_v21  ;;  %v898_v60 = vperm.slane %v2647_v20, 1 }
 0x204   : > { %v1771_v58 = vmax.f32 %v1769_v7, %v1770_v19 }
 0x205   : > { %v2048_v27 = vsel %vm2013_vm8, %v1738_v16, %v1731_v18 }
 0x206   : > { %v1772_v33 = vrot.slane %v1771_v58, 1  ;;  %v2049_v46 = vsel %vm2015_vm10, %v1745_v14, %v2048_v27 }
 0x207   : > { %844 = vperm.xlu2 %2212, %v833_v28   ;;  %2211 = vset.pattern.permute.xlu1 %v2258_v1  ;;  %v2050_v50 = vsel %vm2017_vm11, %v1752_v3, %v2049_v46 }
 0x208   : > { %v1773_v12 = vmax.f32 %v1771_v58, %v1772_v33  ;;  %v2051_v17 = vsel %vm2019_vm14, %v1759_v41, %v2050_v50 }
 0x209   : > { %v676_v37 = vpop.permute.xlu1 %675  ;;  %v2052_v48 = vsel %vm2021_vm0, %v1766_v45, %v2051_v17 }
 0x20a   : > { %vm1068_vm6 = vcmp.gt.f32.partialorder %v676_v37, 0.5  ;;  %v2053_v5 = vsel %vm2023_vm1, %v1773_v12, %v2052_v48  ;;  %v1453_v37 = vsel %vm1069_vm3, %v2657_v2, -inf }
 0x20b   : > { %v1452_v10 = vsel %vm1068_vm6, %v2664_v52, -inf }
 0x20c   : > { %v1774_v35 = vmax.f32 %v1451_v47, %v1452_v10 }
 0x20e   : > { %v1775_v31 = vrot.slane %v1774_v35, 4 }
 0x20f   : > { %857 = vperm.xlu2 %2212, %v846_v55   ;;  %838 = vperm.xlu1 %2211, %v833_v28   ;;  %v696_v28 = vpop.permute.xlu2 %695 }
 0x210   : > { %v1776_v34 = vmax.f32 %v1774_v35, %v1775_v31  ;;  %vm1071_vm2 = vcmp.gt.f32.partialorder %v696_v28, 0.5 }
 0x211   : > { %v689_v25 = vpop.permute.xlu1 %688  ;;  %v1455_v47 = vsel %vm1071_vm2, %v2657_v2, -inf }
 0x212   : > { %v1777_v36 = vrot.slane %v1776_v34, 2  ;;  %vm1070_vm12 = vcmp.gt.f32.partialorder %v689_v25, 0.5  ;;  %v1788_v40 = vmax.f32 %v1455_v47, %v1456_v26 }
 0x214   : > { %v1778_v53 = vmax.f32 %v1776_v34, %v1777_v36  ;;  %v1789_v14 = vrot.slane %v1788_v40, 4 }
 0x216   : > { %v1779_v43 = vrot.slane %v1778_v53, 1 }
 0x217   : > { %2214 = vset.pattern.permute.xlu2 %v2258_v1  ;;  %851 = vperm.xlu1 %2211, %v846_v55   ;;  %v715_v15 = vpop.permute.xlu2 %714  ;;  %v767_v55 = vpop.permute.xlu0 %766 }
 0x218   : > { %v1780_v56 = vmax.f32 %v1778_v53, %v1779_v43  ;;  %vm1074_vm13 = vcmp.gt.f32.partialorder %v715_v15, 0.5  ;;  %vm1082_vm2 = vcmp.gt.f32.partialorder %v767_v55, 0.5  ;;  %v1790_v53 = vmax.f32 %v1788_v40, %v1789_v14 }
 0x219   : > { %v1458_v9 = vsel %vm1074_vm13, %v2664_v52, -inf  ;;  %v1466_v61 = vsel %vm1082_vm2, %v2664_v52, -inf }
 0x21a   : > { %v2054_v57 = vsel %vm2805_vm7, %v1780_v56, %v2053_v5  ;;  %vm1077_vm7 = vcmp.gt.f32.partialorder %v2396_v59, 0.5  ;;  %v937_v5 = vperm.slane %v2647_v20, 4  ;;  %v1791_v28 = vrot.slane %v1790_v53, 2 }
 0x21b   : > { %2088 = vst [vmem:[%s2510_s22 + $0x20] sm:$0xff] %v2054_v57  ;;  %v1461_v39 = vsel %vm1077_vm7, %v2657_v2, -inf  ;;  %vm1087_vm7 = vcmp.gt.f32.partialorder %v2400_v62, 0.5 }
 0x21f   : > { %877 = vperm.xlu2 %2214, %v872_v23   ;;  %2213 = vset.pattern.permute.xlu1 %v2282_v6  ;;  %v728_v44 = vpop.permute.xlu2 %727 }
 0x220   : > { %vm1076_vm6 = vcmp.gt.f32.partialorder %v728_v44, 0.5 }
 0x221   : > { %v709_v7 = vpop.permute.xlu1 %708  ;;  %v1460_v24 = vsel %vm1076_vm6, %v2664_v52, -inf }
 0x222   : > { %vm1073_vm15 = vcmp.gt.f32.partialorder %v709_v7, 0.5 }
 0x223   : > { %v1457_v19 = vsel %vm1073_vm15, %v2657_v2, -inf }
 0x224   : > { %v1795_v35 = vmax.f32 %v1457_v19, %v1458_v9 }
 0x226   : > { %v1796_v18 = vrot.slane %v1795_v35, 4 }
 0x227   : > { %890 = vperm.xlu2 %2214, %v885_v38   ;;  %870 = vperm.xlu1 %2213, %v859_v29   ;;  %v748_v42 = vpop.permute.xlu2 %747  ;;  %v1454_v29 = vsel %vm1070_vm12, %v2664_v52, -inf }
 0x228   : > { %v1781_v11 = vmax.f32 %v1453_v37, %v1454_v29  ;;  %vm1079_vm9 = vcmp.gt.f32.partialorder %v748_v42, 0.5  ;;  %v1797_v50 = vmax.f32 %v1795_v35, %v1796_v18 }
 0x229   : > { %v722_v54 = vpop.permute.xlu1 %721  ;;  %v1463_v3 = vsel %vm1079_vm9, %v2657_v2, -inf }
 0x22a   : > { %vm1075_vm4 = vcmp.gt.f32.partialorder %v722_v54, 0.5  ;;  %v1782_v31 = vrot.slane %v1781_v11, 4  ;;  %v1798_v48 = vrot.slane %v1797_v50, 2 }
 0x22b   : > { %v1459_v8 = vsel %vm1075_vm4, %v2657_v2, -inf  ;;  %vm2806_vm4 = vcmask 1047559  }
 0x22c   : > { %v1802_v58 = vmax.f32 %v1459_v8, %v1460_v24  ;;  %v1783_v36 = vmax.f32 %v1781_v11, %v1782_v31  ;;  %v1799_v44 = vmax.f32 %v1797_v50, %v1798_v48  ;;  %v963_v50 = vperm.slane %v2647_v20, 6 }
 0x22e   : > { %v1803_v51 = vrot.slane %v1802_v58, 4  ;;  %v1784_v43 = vrot.slane %v1783_v36, 2  ;;  %v1800_v47 = vrot.slane %v1799_v44, 1 }
 0x22f   : > { %2216 = vset.pattern.permute.xlu2 %v2282_v6  ;;  %883 = vperm.xlu1 %2213, %v872_v23   ;;  %v761_v10 = vpop.permute.xlu2 %760 }
 0x230   : > { %vm1081_vm12 = vcmp.gt.f32.partialorder %v761_v10, 0.5  ;;  %v1804_v41 = vmax.f32 %v1802_v58, %v1803_v51  ;;  %v1785_v15 = vmax.f32 %v1783_v36, %v1784_v43  ;;  %v1801_v24 = vmax.f32 %v1799_v44, %v1800_v47 }
 0x231   : > { %v1465_v34 = vsel %vm1081_vm12, %v2657_v2, -inf }
 0x232   : > { %v1823_v45 = vmax.f32 %v1465_v34, %v1466_v61  ;;  %v1805_v57 = vrot.slane %v1804_v41, 2  ;;  %v1786_v29 = vrot.slane %v1785_v15, 1 }
 0x234   : > { %v1824_v56 = vrot.slane %v1823_v45, 4  ;;  %v1806_v42 = vmax.f32 %v1804_v41, %v1805_v57  ;;  %v1787_v55 = vmax.f32 %v1785_v15, %v1786_v29  ;;  %v976_v41 = vperm.slane %v2647_v20, 7 }
 0x236   : > { %v1825_v54 = vmax.f32 %v1823_v45, %v1824_v56  ;;  %v1807_v8 = vrot.slane %v1806_v42, 1  ;;  %v832_v56 = vpop.permute.xlu0 %831 }
 0x237   : > { %909 = vperm.xlu2 %2216, %v898_v60   ;;  %2215 = vset.pattern.permute.xlu1 %v2258_v1  ;;  %v780_v25 = vpop.permute.xlu2 %779 }
 0x238   : > { %vm1084_vm15 = vcmp.gt.f32.partialorder %v780_v25, 0.5  ;;  %v1826_v9 = vrot.slane %v1825_v54, 2  ;;  %v1808_v58 = vmax.f32 %v1806_v42, %v1807_v8 }
 0x239   : > { %v741_v38 = vpop.permute.xlu1 %740 }
 0x23a   : > { %vm1078_vm5 = vcmp.gt.f32.partialorder %v741_v38, 0.5  ;;  %v1468_v38 = vsel %vm1084_vm15, %v2664_v52, -inf  ;;  %v1827_v35 = vmax.f32 %v1825_v54, %v1826_v9 }
 0x23b   : > { %v1462_v21 = vsel %vm1078_vm5, %v2664_v52, -inf }
 0x23c   : > { %v1809_v59 = vmax.f32 %v1461_v39, %v1462_v21 }
 0x23e   : > { %v1810_v27 = vrot.slane %v1809_v59, 4 }
 0x23f   : > { %922 = vperm.xlu2 %2216, %v911_v4   ;;  %903 = vperm.xlu1 %2215, %v898_v60   ;;  %v1792_v60 = vmax.f32 %v1790_v53, %v1791_v28 }
 0x240   : > { %v1811_v12 = vmax.f32 %v1809_v59, %v1810_v27 }
 0x241   : > { %v754_v16 = vpop.permute.xlu1 %753  ;;  %v1793_v37 = vrot.slane %v1792_v60, 1 }
 0x242   : > { %vm1080_vm13 = vcmp.gt.f32.partialorder %v754_v16, 0.5  ;;  %v1812_v23 = vrot.slane %v1811_v12, 2 }
 0x243   : > { %v1464_v0 = vsel %vm1080_vm13, %v2664_v52, -inf  ;;  %v1794_v39 = vmax.f32 %v1792_v60, %v1793_v37 }
 0x244   : > { %v1816_v33 = vmax.f32 %v1463_v3, %v1464_v0  ;;  %v1813_v63 = vmax.f32 %v1811_v12, %v1812_v23  ;;  %v1828_v0 = vrot.slane %v1827_v35, 1 }
 0x245   : > { %v2055_v31 = vsel %vm2013_vm8, %v1794_v39, %v1787_v55 }
 0x246   : > { %v1817_v46 = vrot.slane %v1816_v33, 4  ;;  %v1814_v10 = vrot.slane %v1813_v63, 1  ;;  %v2056_v3 = vsel %vm2015_vm10, %v1801_v24, %v2055_v31  ;;  %v1829_v61 = vmax.f32 %v1827_v35, %v1828_v0 }
 0x247   : > { %2219 = vset.pattern.permute.xlu2 %v2258_v1  ;;  %916 = vperm.xlu1 %2215, %v911_v4   ;;  %v2057_v51 = vsel %vm2017_vm11, %v1808_v58, %v2056_v3 }
 0x248   : > { %v1818_v17 = vmax.f32 %v1816_v33, %v1817_v46  ;;  %v1815_v16 = vmax.f32 %v1813_v63, %v1814_v10  ;;  %v793_v33 = vpop.permute.xlu2 %792 }
 0x249   : > { %vm1086_vm2 = vcmp.gt.f32.partialorder %v793_v33, 0.5 }
 0x24a   : > { %v1819_v7 = vrot.slane %v1818_v17, 2  ;;  %v1470_v62 = vsel %vm1086_vm2, %v2664_v52, -inf }
 0x24c   : > { %v1820_v4 = vmax.f32 %v1818_v17, %v1819_v7 }
 0x24e   : > { %v1821_v21 = vrot.slane %v1820_v4, 1 }
 0x24f   : > { %942 = vperm.xlu2 %2219, %v937_v5   ;;  %2218 = vset.pattern.permute.xlu1 %v2282_v6 }
 0x250   : > { %v1822_v14 = vmax.f32 %v1820_v4, %v1821_v21  ;;  %v813_v53 = vpop.permute.xlu2 %812 }
 0x251   : > { %v774_v26 = vpop.permute.xlu1 %773  ;;  %vm1089_vm12 = vcmp.gt.f32.partialorder %v813_v53, 0.5 }
 0x252   : > { %vm1083_vm3 = vcmp.gt.f32.partialorder %v774_v26, 0.5  ;;  %v1473_v57 = vsel %vm1089_vm12, %v2657_v2, -inf }
 0x253   : > { %v1467_v19 = vsel %vm1083_vm3, %v2657_v2, -inf }
 0x254   : > { %v1830_v11 = vmax.f32 %v1467_v19, %v1468_v38 }
 0x256   : > { %v1831_v40 = vrot.slane %v1830_v11, 4 }
 0x257   : > { %955 = vperm.xlu2 %2219, %v950_v22   ;;  %935 = vperm.xlu1 %2218, %v924_v32   ;;  %v2058_v22 = vsel %vm2019_vm14, %v1815_v16, %v2057_v51 }
 0x258   : > { %v1832_v59 = vmax.f32 %v1830_v11, %v1831_v40  ;;  %v2059_v30 = vsel %vm2021_vm0, %v1822_v14, %v2058_v22 }
 0x259   : > { %v2060_v36 = vsel %vm2023_vm1, %v1829_v61, %v2059_v30  ;;  %v787_v45 = vpop.permute.xlu1 %786 }
 0x25a   : > { %v1833_v18 = vrot.slane %v1832_v59, 2  ;;  %vm1085_vm9 = vcmp.gt.f32.partialorder %v787_v45, 0.5 }
 0x25b   : > { %v1469_v28 = vsel %vm1085_vm9, %v2657_v2, -inf }
 0x25c   : > { %v1834_v34 = vmax.f32 %v1832_v59, %v1833_v18  ;;  %v1837_v7 = vmax.f32 %v1469_v28, %v1470_v62 }
 0x25e   : > { %v1835_v32 = vrot.slane %v1834_v34, 1  ;;  %v1838_v9 = vrot.slane %v1837_v7, 4 }
 0x25f   : > { %948 = vperm.xlu1 %2218, %v937_v5   ;;  %2221 = vset.pattern.permute.xlu2 %v2282_v6  ;;  %v826_v6 = vpop.permute.xlu2 %825  ;;  %v1471_v5 = vsel %vm1087_vm7, %v2657_v2, -inf  ;;  %vm1097_vm7 = vcmp.gt.f32.partialorder %v2423_v13, 0.5 }
 0x260   : > { %v1836_v27 = vmax.f32 %v1834_v34, %v1835_v32  ;;  %vm1091_vm3 = vcmp.gt.f32.partialorder %v826_v6, 0.5  ;;  %v1839_v55 = vmax.f32 %v1837_v7, %v1838_v9  ;;  %v1481_v22 = vsel %vm1097_vm7, %v2657_v2, -inf }
 0x261   : > { %v1475_v42 = vsel %vm1091_vm3, %v2657_v2, -inf }
 0x262   : > { %v2061_v46 = vsel %vm2806_vm4, %v1836_v27, %v2060_v36  ;;  %vm1092_vm4 = vcmp.gt.f32.partialorder %v832_v56, 0.5  ;;  %v1840_v58 = vrot.slane %v1839_v55, 2 }
 0x263   : > { %2089 = vst [vmem:[%s2510_s22 + $0x28] sm:$0xff] %v2061_v46  ;;  %v1476_v63 = vsel %vm1092_vm4, %v2664_v52, -inf }
 0x264   : > { %v1858_v19 = vmax.f32 %v1475_v42, %v1476_v63  ;;  %v1841_v3 = vmax.f32 %v1839_v55, %v1840_v58 }
 0x266   : > { %v1859_v21 = vrot.slane %v1858_v19, 4  ;;  %v1842_v36 = vrot.slane %v1841_v3, 1 }
 0x267   : > { %2220 = vset.pattern.permute.xlu1 %v2258_v1  ;;  %974 = vperm.xlu2 %2221, %v963_v50   ;;  %v845_v17 = vpop.permute.xlu2 %844 }
 0x268   : > { %vm1094_vm13 = vcmp.gt.f32.partialorder %v845_v17, 0.5  ;;  %v1860_v59 = vmax.f32 %v1858_v19, %v1859_v21 }
 0x269   : > { %v806_v12 = vpop.permute.xlu1 %805  ;;  %v1478_v44 = vsel %vm1094_vm13, %v2664_v52, -inf  ;;  %vm2807_vm13 = vcmask 1047559  }
 0x26a   : > { %vm1088_vm5 = vcmp.gt.f32.partialorder %v806_v12, 0.5  ;;  %v1861_v0 = vrot.slane %v1860_v59, 2 }
 0x26b   : > { %v1472_v1 = vsel %vm1088_vm5, %v2664_v52, -inf }
 0x26c   : > { %v1844_v23 = vmax.f32 %v1471_v5, %v1472_v1  ;;  %v1862_v46 = vmax.f32 %v1860_v59, %v1861_v0 }
 0x26e   : > { %v1845_v38 = vrot.slane %v1844_v23, 4  ;;  %v1863_v17 = vrot.slane %v1862_v46, 1 }
 0x26f   : > { %968 = vperm.xlu1 %2220, %v963_v50   ;;  %987 = vperm.xlu2 %2221, %v976_v41   ;;  %v858_v25 = vpop.permute.xlu2 %857 }
 0x270   : > { %vm1096_vm5 = vcmp.gt.f32.partialorder %v858_v25, 0.5  ;;  %v1846_v8 = vmax.f32 %v1844_v23, %v1845_v38 }
 0x271   : > { %v819_v43 = vpop.permute.xlu1 %818  ;;  %v1480_v29 = vsel %vm1096_vm5, %v2664_v52, -inf }
 0x272   : > { %vm1090_vm6 = vcmp.gt.f32.partialorder %v819_v43, 0.5  ;;  %v1847_v24 = vrot.slane %v1846_v8, 2  ;;  %v1843_v43 = vmax.f32 %v1841_v3, %v1842_v36 }
 0x273   : > { %v1474_v20 = vsel %vm1090_vm6, %v2664_v52, -inf }
 0x274   : > { %v1851_v15 = vmax.f32 %v1473_v57, %v1474_v20  ;;  %v1848_v31 = vmax.f32 %v1846_v8, %v1847_v24 }
 0x276   : > { %v1852_v4 = vrot.slane %v1851_v15, 4  ;;  %v1849_v30 = vrot.slane %v1848_v31, 1 }
 0x277   : > { %981 = vperm.xlu1 %2220, %v976_v41  }
 0x278   : > { %v1853_v11 = vmax.f32 %v1851_v15, %v1852_v4  ;;  %v1850_v13 = vmax.f32 %v1848_v31, %v1849_v30  ;;  %v1864_v15 = vmax.f32 %v1862_v46, %v1863_v17 }
 0x279   : > { %v878_v53 = vpop.permute.xlu2 %877 }
 0x27a   : > { %v1854_v35 = vrot.slane %v1853_v11, 2  ;;  %vm1099_vm12 = vcmp.gt.f32.partialorder %v878_v53, 0.5  ;;  %v2062_v20 = vsel %vm2013_vm8, %v1850_v13, %v1843_v43 }
 0x27b   : > { %v1483_v5 = vsel %vm1099_vm12, %v2657_v2, -inf }
 0x27c   : > { %v1855_v14 = vmax.f32 %v1853_v11, %v1854_v35  ;;  %v897_v35 = vpop.permute.xlu0 %896 }
 0x27d   : > { %vm1102_vm5 = vcmp.gt.f32.partialorder %v897_v35, 0.5 }
 0x27e   : > { %v1856_v61 = vrot.slane %v1855_v14, 1 }
 0x280   : > { %v1857_v41 = vmax.f32 %v1855_v14, %v1856_v61  ;;  %v1486_v14 = vsel %vm1102_vm5, %v2664_v52, -inf }
 0x281   : > { %v839_v48 = vpop.permute.xlu1 %838  ;;  %v891_v9 = vpop.permute.xlu2 %890 }
 0x282   : > { %vm1093_vm15 = vcmp.gt.f32.partialorder %v839_v48, 0.5  ;;  %v2063_v57 = vsel %vm2015_vm10, %v1857_v41, %v2062_v20 }
 0x283   : > { %v1477_v54 = vsel %vm1093_vm15, %v2657_v2, -inf }
 0x284   : > { %v1865_v47 = vmax.f32 %v1477_v54, %v1478_v44  ;;  %v962_v30 = vpop.permute.xlu0 %961 }
 0x286   : > { %v1866_v10 = vrot.slane %v1865_v47, 4 }
 0x288   : > { %v1867_v39 = vmax.f32 %v1865_v47, %v1866_v10 }
 0x289   : > { %v852_v60 = vpop.permute.xlu1 %851 }
 0x28a   : > { %vm1095_vm6 = vcmp.gt.f32.partialorder %v852_v60, 0.5  ;;  %v1868_v18 = vrot.slane %v1867_v39, 2  ;;  %v2064_v60 = vsel %vm2017_vm11, %v1864_v15, %v2063_v57 }
 0x28b   : > { %v1479_v26 = vsel %vm1095_vm6, %v2657_v2, -inf  ;;  %vm1101_vm6 = vcmp.gt.f32.partialorder %v891_v9, 0.5 }
 0x28c   : > { %v1872_v37 = vmax.f32 %v1479_v26, %v1480_v29  ;;  %v1869_v33 = vmax.f32 %v1867_v39, %v1868_v18  ;;  %v1485_v18 = vsel %vm1101_vm6, %v2657_v2, -inf }
 0x28d   : > { %v1893_v61 = vmax.f32 %v1485_v18, %v1486_v14 }
 0x28e   : > { %v1873_v40 = vrot.slane %v1872_v37, 4  ;;  %v1870_v12 = vrot.slane %v1869_v33, 1 }
 0x28f   : > { %v1894_v13 = vrot.slane %v1893_v61, 4 }
 0x290   : > { %v1874_v16 = vmax.f32 %v1872_v37, %v1873_v40  ;;  %v1871_v23 = vmax.f32 %v1869_v33, %v1870_v12 }
 0x291   : > { %v910_v11 = vpop.permute.xlu2 %909 }
 0x292   : > { %v1875_v51 = vrot.slane %v1874_v16, 2  ;;  %v2065_v42 = vsel %vm2019_vm14, %v1871_v23, %v2064_v60  ;;  %vm1104_vm15 = vcmp.gt.f32.partialorder %v910_v11, 0.5 }
 0x293   : > { %v1488_v58 = vsel %vm1104_vm15, %v2664_v52, -inf }
 0x294   : > { %v1876_v50 = vmax.f32 %v1874_v16, %v1875_v51 }
 0x296   : > { %v1877_v48 = vrot.slane %v1876_v50, 1 }
 0x298   : > { %v1878_v7 = vmax.f32 %v1876_v50, %v1877_v48  ;;  %v1895_v48 = vmax.f32 %v1893_v61, %v1894_v13 }
 0x299   : > { %v871_v34 = vpop.permute.xlu1 %870  ;;  %v923_v55 = vpop.permute.xlu2 %922 }
 0x29a   : > { %vm1098_vm9 = vcmp.gt.f32.partialorder %v871_v34, 0.5  ;;  %v2066_v26 = vsel %vm2021_vm0, %v1878_v7, %v2065_v42 }
 0x29b   : > { %v1482_v32 = vsel %vm1098_vm9, %v2664_v52, -inf  ;;  %vm1106_vm9 = vcmp.gt.f32.partialorder %v923_v55, 0.5 }
 0x29c   : > { %v1879_v27 = vmax.f32 %v1481_v22, %v1482_v32  ;;  %v1490_v0 = vsel %vm1106_vm9, %v2664_v52, -inf  ;;  %vm2808_vm9 = vcmask 1047559  }
 0x29e   : > { %v1880_v45 = vrot.slane %v1879_v27, 4 }
 0x2a0   : > { %v1881_v6 = vmax.f32 %v1879_v27, %v1880_v45 }
 0x2a1   : > { %v884_v56 = vpop.permute.xlu1 %883 }
 0x2a2   : > { %v1882_v1 = vrot.slane %v1881_v6, 2  ;;  %vm1100_vm2 = vcmp.gt.f32.partialorder %v884_v56, 0.5 }
 0x2a3   : > { %v1484_v28 = vsel %vm1100_vm2, %v2664_v52, -inf  ;;  %vm1107_vm2 = vcmp.gt.f32.partialorder %v2440_v49, 0.5 }
 0x2a4   : > { %v1883_v62 = vmax.f32 %v1881_v6, %v1882_v1  ;;  %v1886_v25 = vmax.f32 %v1483_v5, %v1484_v28  ;;  %v1491_v22 = vsel %vm1107_vm2, %v2657_v2, -inf }
 0x2a6   : > { %v1884_v44 = vrot.slane %v1883_v62, 1  ;;  %v1887_v54 = vrot.slane %v1886_v25, 4 }
 0x2a8   : > { %v1885_v63 = vmax.f32 %v1883_v62, %v1884_v44  ;;  %v1888_v38 = vmax.f32 %v1886_v25, %v1887_v54  ;;  %v1896_v25 = vrot.slane %v1895_v48, 2 }
 0x2a9   : > { %v943_v40 = vpop.permute.xlu2 %942 }
 0x2aa   : > { %v2067_v29 = vsel %vm2023_vm1, %v1885_v63, %v2066_v26  ;;  %v1889_v4 = vrot.slane %v1888_v38, 2  ;;  %v1897_v26 = vmax.f32 %v1895_v48, %v1896_v25 }
 0x2ac   : > { %v1890_v47 = vmax.f32 %v1888_v38, %v1889_v4 }
 0x2ae   : > { %v1891_v19 = vrot.slane %v1890_v47, 1 }
 0x2b0   : > { %v1892_v37 = vmax.f32 %v1890_v47, %v1891_v19 }
 0x2b1   : > { %v904_v10 = vpop.permute.xlu1 %903  ;;  %v956_v59 = vpop.permute.xlu2 %955 }
 0x2b2   : > { %v2068_v8 = vsel %vm2807_vm13, %v1892_v37, %v2067_v29  ;;  %vm1103_vm3 = vcmp.gt.f32.partialorder %v904_v10, 0.5  ;;  %vm1109_vm13 = vcmp.gt.f32.partialorder %v943_v40, 0.5  ;;  %vm1111_vm15 = vcmp.gt.f32.partialorder %v956_v59, 0.5 }
 0x2b3   : > { %2090 = vst [vmem:[%s2510_s22 + $0x30] sm:$0xff] %v2068_v8  ;;  %v1487_v16 = vsel %vm1103_vm3, %v2657_v2, -inf  ;;  %v1493_v49 = vsel %vm1109_vm13, %v2657_v2, -inf  ;;  %vm1112_vm3 = vcmp.gt.f32.partialorder %v962_v30, 0.5  ;;  %v1495_v46 = vsel %vm1111_vm15, %v2657_v2, -inf }
 0x2b4   : > { %v1900_v51 = vmax.f32 %v1487_v16, %v1488_v58  ;;  %v1496_v41 = vsel %vm1112_vm3, %v2664_v52, -inf }
 0x2b5   : > { %v1928_v6 = vmax.f32 %v1495_v46, %v1496_v41 }
 0x2b6   : > { %v1901_v36 = vrot.slane %v1900_v51, 4 }
 0x2b7   : > { %v1929_v28 = vrot.slane %v1928_v6, 4 }
 0x2b8   : > { %v1902_v43 = vmax.f32 %v1900_v51, %v1901_v36 }
 0x2b9   : > { %v917_v21 = vpop.permute.xlu1 %916  ;;  %v1930_v60 = vmax.f32 %v1928_v6, %v1929_v28 }
 0x2ba   : > { %vm1105_vm4 = vcmp.gt.f32.partialorder %v917_v21, 0.5  ;;  %v1903_v57 = vrot.slane %v1902_v43, 2  ;;  %v1898_v21 = vrot.slane %v1897_v26, 1 }
 0x2bb   : > { %v1489_v31 = vsel %vm1105_vm4, %v2657_v2, -inf  ;;  %v1931_v19 = vrot.slane %v1930_v60, 2 }
 0x2bc   : > { %v1907_v32 = vmax.f32 %v1489_v31, %v1490_v0  ;;  %v1904_v42 = vmax.f32 %v1902_v43, %v1903_v57  ;;  %v1899_v14 = vmax.f32 %v1897_v26, %v1898_v21 }
 0x2bd   : > { %v1932_v58 = vmax.f32 %v1930_v60, %v1931_v19 }
 0x2be   : > { %v1908_v50 = vrot.slane %v1907_v32, 4  ;;  %v1905_v37 = vrot.slane %v1904_v42, 1 }
 0x2c0   : > { %v1909_v17 = vmax.f32 %v1907_v32, %v1908_v50  ;;  %v1906_v59 = vmax.f32 %v1904_v42, %v1905_v37 }
 0x2c1   : > { %v975_v45 = vpop.permute.xlu2 %974 }
 0x2c2   : > { %vm1114_vm4 = vcmp.gt.f32.partialorder %v975_v45, 0.5  ;;  %v1910_v23 = vrot.slane %v1909_v17, 2 }
 0x2c3   : > { %v1498_v20 = vsel %vm1114_vm4, %v2664_v52, -inf }
 0x2c4   : > { %v1911_v38 = vmax.f32 %v1909_v17, %v1910_v23 }
 0x2c6   : > { %v1912_v11 = vrot.slane %v1911_v38, 1 }
 0x2c8   : > { %v1913_v31 = vmax.f32 %v1911_v38, %v1912_v11 }
 0x2c9   : > { %v936_v24 = vpop.permute.xlu1 %935  ;;  %v988_v54 = vpop.permute.xlu2 %987 }
 0x2ca   : > { %vm1108_vm7 = vcmp.gt.f32.partialorder %v936_v24, 0.5  ;;  %vm1116_vm6 = vcmp.gt.f32.partialorder %v988_v54, 0.5 }
 0x2cb   : > { %v1492_v3 = vsel %vm1108_vm7, %v2664_v52, -inf  ;;  %v1500_v10 = vsel %vm1116_vm6, %v2664_v52, -inf }
 0x2cc   : > { %v1914_v33 = vmax.f32 %v1491_v22, %v1492_v3 }
 0x2ce   : > { %v1915_v53 = vrot.slane %v1914_v33, 4 }
 0x2d0   : > { %v1916_v56 = vmax.f32 %v1914_v33, %v1915_v53 }
 0x2d1   : > { %v949_v39 = vpop.permute.xlu1 %948 }
 0x2d2   : > { %vm1110_vm12 = vcmp.gt.f32.partialorder %v949_v39, 0.5  ;;  %v1917_v15 = vrot.slane %v1916_v56, 2 }
 0x2d3   : > { %v1494_v34 = vsel %vm1110_vm12, %v2664_v52, -inf  ;;  %v2069_v52 = vsel %vm2013_vm8, %v1906_v59, %v1899_v14 }
 0x2d4   : > { %v1921_v27 = vmax.f32 %v1493_v49, %v1494_v34  ;;  %v1918_v29 = vmax.f32 %v1916_v56, %v1917_v15  ;;  %v1933_v34 = vrot.slane %v1932_v58, 1 }
 0x2d6   : > { %v1922_v12 = vrot.slane %v1921_v27, 4  ;;  %v1919_v40 = vrot.slane %v1918_v29, 1  ;;  %v1934_v33 = vmax.f32 %v1932_v58, %v1933_v34 }
 0x2d8   : > { %v1923_v1 = vmax.f32 %v1921_v27, %v1922_v12  ;;  %v1920_v18 = vmax.f32 %v1918_v29, %v1919_v40 }
 0x2da   : > { %v1924_v44 = vrot.slane %v1923_v1, 2 }
 0x2dc   : > { %v1925_v47 = vmax.f32 %v1923_v1, %v1924_v44 }
 0x2de   : > { %v1926_v35 = vrot.slane %v1925_v47, 1 }
 0x2e0   : > { %v1927_v0 = vmax.f32 %v1925_v47, %v1926_v35 }
 0x2e1   : > { %v969_v5 = vpop.permute.xlu1 %968 }
 0x2e2   : > { %vm1113_vm5 = vcmp.gt.f32.partialorder %v969_v5, 0.5 }
 0x2e3   : > { %v1497_v62 = vsel %vm1113_vm5, %v2657_v2, -inf }
 0x2e4   : > { %v1935_v7 = vmax.f32 %v1497_v62, %v1498_v20 }
 0x2e6   : > { %v1936_v63 = vrot.slane %v1935_v7, 4 }
 0x2e8   : > { %v1937_v4 = vmax.f32 %v1935_v7, %v1936_v63 }
 0x2e9   : > { %v982_v9 = vpop.permute.xlu1 %981 }
 0x2ea   : > { %v1938_v8 = vrot.slane %v1937_v4, 2  ;;  %vm1115_vm7 = vcmp.gt.f32.partialorder %v982_v9, 0.5 }
 0x2eb   : > { %v1499_v55 = vsel %vm1115_vm7, %v2657_v2, -inf  ;;  %v2070_v2 = vsel %vm2015_vm10, %v1913_v31, %v2069_v52 }
 0x2ec   : > { %v1942_v24 = vmax.f32 %v1499_v55, %v1500_v10  ;;  %v1939_v39 = vmax.f32 %v1937_v4, %v1938_v8  ;;  %v2071_v30 = vsel %vm2017_vm11, %v1920_v18, %v2070_v2 }
 0x2ed   : > { %v2072_v61 = vsel %vm2019_vm14, %v1927_v0, %v2071_v30 }
 0x2ee   : > { %v1943_v16 = vrot.slane %v1942_v24, 4  ;;  %v1940_v51 = vrot.slane %v1939_v39, 1  ;;  %v2073_v36 = vsel %vm2021_vm0, %v1934_v33, %v2072_v61 }
 0x2f0   : > { %v1944_v3 = vmax.f32 %v1942_v24, %v1943_v16  ;;  %v1941_v49 = vmax.f32 %v1939_v39, %v1940_v51 }
 0x2f2   : > { %v1945_v22 = vrot.slane %v1944_v3, 2  ;;  %v2074_v50 = vsel %vm2023_vm1, %v1941_v49, %v2073_v36 }
 0x2f4   : > { %v1946_v32 = vmax.f32 %v1944_v3, %v1945_v22 }
 0x2f6   : > { %v1947_v27 = vrot.slane %v1946_v32, 1 }
 0x2f8   : > { %v1948_v46 = vmax.f32 %v1946_v32, %v1947_v27 }
 0x2fa   : > { %v2075_v45 = vsel %vm2808_vm9, %v1948_v46, %v2074_v50 }
 0x2fb   : > { %2091 = vst [vmem:[%s2510_s22 + $0x38] sm:$0xff] %v2075_v45 }
 0x2fc PF: > { %s12_s9 = sadd.s32 1, %s2233_s9  }
 0x2fd   : > { %p9_p4 = scmp.ge.s32.totalorder %s12_s9, 9  }
 0x2ff   :  { %11 = sbr.rel (!%p9_p4) target bundleno = 1 (0x1), region = 58 }

// kernel: faster_rcnn_forward.19
= control target key start
LH: loop header
LB: loop body
LE: loop exit
PB: predicated region body
PF: predicated region fallthrough
CT: control target
= control target key end

     0   :  { %s847_s12 = smov 0   ;;  %s849_s13 = smov 0   ;;  %s1010_s0 = inlined_call_operand.vmem [shape: bf16[49,8,128], index: 0, kind: input, shape index: {}]   ;;  %s1011_s1 = inlined_call_operand.vmem [shape: bf16[128,2048], index: 1, kind: input, shape index: {}]   ;;  %s1012_s2 = inlined_call_operand.vmem [shape: f32[1,2048], index: 2, kind: input, shape index: {}]   ;;  %s1013_s3 = inlined_call_operand.vmem [shape: f32[8,2048], index: 3, kind: output, shape index: {}]  }
   0x1   :  { %s851_s14 = smov 0   ;;  %s853_s15 = smov 0  }
   0x2   :  { %s855_s16 = smov 0   ;;  %s857_s17 = smov 0  }
   0x3   :  { %s859_s18 = smov 0  }
   0x4 LB: > { %s25_s19 = sadd.s32 1, %s816_s16  ;;  %s28_s20 = sadd.s32 1, %s820_s17  ;;  %s824_s18 = sphi %s859_s18, %s13_s18   ;;  %s820_s17 = sphi %s857_s17, %s1019_s17   ;;  %s816_s16 = sphi %s855_s16, %s1018_s16   ;;  %s812_s15 = sphi %s853_s15, %s1017_s15   ;;  %s808_s14 = sphi %s851_s14, %s1016_s14   ;;  %s804_s13 = sphi %s849_s13, %s1015_s13   ;;  %s800_s12 = sphi %s847_s12, %s1014_s12  }
   0x5   : > { %p26_p0 = scmp.ge.s32.totalorder %s25_s19, 49  ;;  %p74_p1 = scmp.ne.s32.totalorder %s804_s13, %s800_s12 }
   0x6   : > { %p75_p2 = scmp.eq.s32.totalorder %s824_s18, 0  ;;  %s67_s22 = sadd.s32 1, %s804_s13 }
   0x7   : > { %s1021_s19 = smov (%p26_p0, %s25_s19), 0  ;;  %s1023_s20 = smov (!%p26_p0, %s28_s20), %s820_s17 }
   0x8   : > { %p76_p3 = por %p75_p2, %p74_p1  ;;  %p30_p4 = scmp.ge.s32.totalorder %s1023_s20, 8 }
   0x9   : > { %p618_p6 = scmp.ge.s32.totalorder %s824_s18, 392 }
   0xa   : > { %s1025_s20 = smov (%p30_p4, %s1023_s20), 0 }
   0xb   : > { %s64_s21 = ssub.s32 %s820_s17, %s1025_s20  ;;  %154 = sbr.rel (%p618_p6) target bundleno = 36 (0x24), region = 16 }
   0xc   : > { %p65_p5 = scmp.eq.s32.totalorder %s64_s21, 0 }
   0xe   : > { %s896_s23 = scalar_select %p65_p5, %s804_s13, %s67_s22  }
  0x10   : > { %167 = sbr.rel (!%p76_p3) target bundleno = 36 (0x24), region = 24  ;;  %s169_s24 = sand.u32 (%p76_p3), 1, %s804_s13  }
  0x11   : > { %s696_s25 = sshll.u32 (%p76_p3), %s820_s17, 3  ;;  %s619_s26 = sshll.u32 (%p76_p3), %s169_s24, 7 }
  0x12   : > { %s904_s29 = scalar_lea.vmem (%p76_p3), %s1011_s1, %s696_s25  ;;  %s171_s30 = scalar_lea.vmem (%p76_p3), [#allocation3], %s619_s26 }
  0x13   : > { %v233_v0 = vld [vmem:[%s904_s29] sm:$0xff] (%p76_p3) }
  0x14   : > { %v235_v1 = vld [vmem:[%s904_s29 + $0x40] sm:$0xff] (%p76_p3)  ;;  %234 = vst [vmem:[%s171_s30] sm:$0xff] (%p76_p3), %v233_v0 }
  0x15   : > { %v237_v2 = vld [vmem:[%s904_s29 + $0x80] sm:$0xff]  ;;  %236 = vst [vmem:[%s171_s30 + $0x8] sm:$0xff] %v235_v1 }
  0x16   : > { %v239_v3 = vld [vmem:[%s904_s29 + $0xc0] sm:$0xff]  ;;  %238 = vst [vmem:[%s171_s30 + $0x10] sm:$0xff] %v237_v2 }
  0x17   : > { %v241_v4 = vld [vmem:[%s904_s29 + $0x100] sm:$0xff]  ;;  %240 = vst [vmem:[%s171_s30 + $0x18] sm:$0xff] %v239_v3 }
  0x18   : > { %v243_v5 = vld [vmem:[%s904_s29 + $0x140] sm:$0xff]  ;;  %242 = vst [vmem:[%s171_s30 + $0x20] sm:$0xff] %v241_v4 }
  0x19   : > { %v245_v6 = vld [vmem:[%s904_s29 + $0x180] sm:$0xff]  ;;  %244 = vst [vmem:[%s171_s30 + $0x28] sm:$0xff] %v243_v5 }
  0x1a   : > { %v247_v7 = vld [vmem:[%s904_s29 + $0x1c0] sm:$0xff]  ;;  %246 = vst [vmem:[%s171_s30 + $0x30] sm:$0xff] %v245_v6 }
  0x1b   : > { %v249_v8 = vld [vmem:[%s904_s29 + $0x200] sm:$0xff]  ;;  %248 = vst [vmem:[%s171_s30 + $0x38] sm:$0xff] %v247_v7 }
  0x1c   : > { %v251_v9 = vld [vmem:[%s904_s29 + $0x240] sm:$0xff]  ;;  %250 = vst [vmem:[%s171_s30 + $0x40] sm:$0xff] %v249_v8 }
  0x1d   : > { %v253_v10 = vld [vmem:[%s904_s29 + $0x280] sm:$0xff]  ;;  %252 = vst [vmem:[%s171_s30 + $0x48] sm:$0xff] %v251_v9 }
  0x1e   : > { %v255_v11 = vld [vmem:[%s904_s29 + $0x2c0] sm:$0xff]  ;;  %254 = vst [vmem:[%s171_s30 + $0x50] sm:$0xff] %v253_v10 }
  0x1f   : > { %v257_v12 = vld [vmem:[%s904_s29 + $0x300] sm:$0xff]  ;;  %256 = vst [vmem:[%s171_s30 + $0x58] sm:$0xff] %v255_v11 }
  0x20   : > { %v259_v13 = vld [vmem:[%s904_s29 + $0x340] sm:$0xff]  ;;  %258 = vst [vmem:[%s171_s30 + $0x60] sm:$0xff] %v257_v12 }
  0x21   : > { %v261_v14 = vld [vmem:[%s904_s29 + $0x380] sm:$0xff]  ;;  %260 = vst [vmem:[%s171_s30 + $0x68] sm:$0xff] %v259_v13 }
  0x22   : > { %v263_v15 = vld [vmem:[%s904_s29 + $0x3c0] sm:$0xff]  ;;  %262 = vst [vmem:[%s171_s30 + $0x70] sm:$0xff] %v261_v14 }
  0x23   : > { %264 = vst [vmem:[%s171_s30 + $0x78] sm:$0xff] %v263_v15 }
  0x24 PF: > { %p622_p7 = scmp.ge.s32.totalorder %s824_s18, 1  ;;  %p277_p8 = scmp.lt.s32.totalorder %s824_s18, 393 }
  0x26   : > { %p278_p9 = pnand %p622_p7, %p277_p8 }
  0x27   : > { %s284_s4 = sand.u32 (!%p278_p9), 1, %s800_s12   ;;  %p322_p10 = scmp.lt.s32.totalorder (!%p278_p9), %s808_s14, 48 }
  0x28   : > { %281 = sbr.rel (%p278_p9) target bundleno = 232 (0xe8), region = 66  ;;  %s623_s5 = sshll.u32 (!%p278_p9), %s284_s4, 7 }
  0x29   : > { %s625_s6 = sshll.u32 (!%p278_p9), %s812_s15, 1  ;;  %s945_s27 = scalar_lea.vmem (!%p278_p9), [#allocation3], %s623_s5 }
  0x2a   : > { %p331_p11 = scmp.lt.s32.totalorder (!%p278_p9), %s625_s6, 15  ;;  %p628_p12 = scmp.ne.s32.totalorder (!%p278_p9), %s808_s14, 0 }
  0x2d   : > { %s323_s7 = scalar_select %p322_p10, %s808_s14, 48 }
  0x2e   : > { %s1027_s6 = smov (!%p331_p11, %s625_s6), 15  ;;  %348 = sbr.rel (%p628_p12) target bundleno = 54 (0x36), region = 74 }
  0x2f   : > { %s624_s8 = sshll.u32 %s323_s7, 2  ;;  %s333_s24 = scalar_lea.vmem %s1012_s2, %s1027_s6 }
  0x30   : > { %s933_s11 = scalar_lea.vmem %s1010_s0, %s624_s8  ;;  %s627_s12 = sshll.u32 %s1027_s6, 3 }
  0x31   : > { %s943_s15 = scalar_lea.vmem %s1013_s3, %s627_s12 }
  0x33   : > { %v826_v16 = vmov 0.0  }
  0x34   : > { %349 = vst [vmem:[#allocation2] sm:$0xff] %v826_v16 }
  0x35   : > { %350 = vst [vmem:[#allocation2 + $0x8] sm:$0xff] %v826_v16 }
  0x36 PF: > { %v687_v17 = vld [vmem:[%s945_s27 + $0x70] sm:$0xf]  ;;  %v712_v18 = vld [vmem:[%s945_s27 + $0x74] sm:$0xf0]  ;;  %v711_v19 = vld [vmem:[%s945_s27 + $0x74] sm:$0xf] }
  0x37   : > { %v688_v20 = vor.u32 %v712_v18, %v687_v17  ;;  %v689_v21 = vld [vmem:[%s945_s27 + $0x78] sm:$0xf0]  ;;  %v679_v22 = vld [vmem:[%s945_s27 + $0x60] sm:$0xf]  ;;  %v710_v23 = vld [vmem:[%s945_s27 + $0x64] sm:$0xf0] }
  0x38   : > { %v692_v24 = vor.u32 %v711_v19, %v689_v21  ;;  %v709_v25 = vld [vmem:[%s945_s27 + $0x64] sm:$0xf]  ;;  %v681_v26 = vld [vmem:[%s945_s27 + $0x68] sm:$0xf0]  ;;  %v680_v27 = vor.u32 %v710_v23, %v679_v22  ;;  %v671_v29 = vld [vmem:[%s945_s27 + $0x50] sm:$0xf] }
  0x39   : > { %454 = vmatpush.bf16.msra.mxu0 %v688_v20  ;;  %v684_v28 = vor.u32 %v709_v25, %v681_v26  ;;  %v708_v30 = vld [vmem:[%s945_s27 + $0x54] sm:$0xf0]  ;;  %v707_v31 = vld [vmem:[%s945_s27 + $0x54] sm:$0xf]  ;;  %v673_v32 = vld [vmem:[%s945_s27 + $0x58] sm:$0xf0] }
  0x3a   : > { %467 = vmatpush.bf16.msra.mxu1 %v692_v24  ;;  %v672_v33 = vor.u32 %v708_v30, %v671_v29  ;;  %v676_v34 = vor.u32 %v707_v31, %v673_v32  ;;  %v663_v35 = vld [vmem:[%s945_s27 + $0x40] sm:$0xf]  ;;  %v706_v36 = vld [vmem:[%s945_s27 + $0x44] sm:$0xf0]  ;;  %v705_v37 = vld [vmem:[%s945_s27 + $0x44] sm:$0xf] }
  0x3b   : > { %v665_v38 = vld [vmem:[%s945_s27 + $0x48] sm:$0xf0]  ;;  %v664_v39 = vor.u32 %v706_v36, %v663_v35  ;;  %v655_v41 = vld [vmem:[%s945_s27 + $0x30] sm:$0xf]  ;;  %v704_v42 = vld [vmem:[%s945_s27 + $0x34] sm:$0xf0] }
  0x3c   : > { %v668_v40 = vor.u32 %v705_v37, %v665_v38  ;;  %v703_v43 = vld [vmem:[%s945_s27 + $0x34] sm:$0xf]  ;;  %v657_v44 = vld [vmem:[%s945_s27 + $0x38] sm:$0xf0]  ;;  %v656_v45 = vor.u32 %v704_v42, %v655_v41  ;;  %v647_v47 = vld [vmem:[%s945_s27 + $0x20] sm:$0xf] }
  0x3d   : > { %455 = vmatpush.bf16.msra.mxu0 %v680_v27  ;;  %v660_v46 = vor.u32 %v703_v43, %v657_v44  ;;  %v702_v48 = vld [vmem:[%s945_s27 + $0x24] sm:$0xf0]  ;;  %v701_v49 = vld [vmem:[%s945_s27 + $0x24] sm:$0xf]  ;;  %v649_v50 = vld [vmem:[%s945_s27 + $0x28] sm:$0xf0] }
  0x3e   : > { %468 = vmatpush.bf16.msra.mxu1 %v684_v28  ;;  %v648_v51 = vor.u32 %v702_v48, %v647_v47  ;;  %v652_v52 = vor.u32 %v701_v49, %v649_v50  ;;  %v639_v53 = vld [vmem:[%s945_s27 + $0x10] sm:$0xf]  ;;  %v700_v54 = vld [vmem:[%s945_s27 + $0x14] sm:$0xf0]  ;;  %v699_v55 = vld [vmem:[%s945_s27 + $0x14] sm:$0xf] }
  0x3f   : > { %v641_v56 = vld [vmem:[%s945_s27 + $0x18] sm:$0xf0]  ;;  %v640_v57 = vor.u32 %v700_v54, %v639_v53  ;;  %v631_v59 = vld [vmem:[%s945_s27] sm:$0xf]  ;;  %v698_v60 = vld [vmem:[%s945_s27 + $0x4] sm:$0xf0] }
  0x40   : > { %v644_v58 = vor.u32 %v699_v55, %v641_v56  ;;  %v697_v61 = vld [vmem:[%s945_s27 + $0x4] sm:$0xf]  ;;  %v633_v62 = vld [vmem:[%s945_s27 + $0x8] sm:$0xf0]  ;;  %v632_v63 = vor.u32 %v698_v60, %v631_v59  ;;  %v351_v1 = vld [vmem:[%s933_s11] sm:$0xf] }
  0x41   : > { %456 = vmatpush.bf16.msra.mxu0 %v672_v33  ;;  %v636_v0 = vor.u32 %v697_v61, %v633_v62  ;;  %v368_v2 = vld [vmem:[%s333_s24] sm:$0x3]  ;;  %v481_v11 = vld [vmem:[#allocation2 + $0x8] sm:$0xff]  ;;  %p693_p13 = scmp.ne.s32.totalorder %s808_s14, 48 }
  0x42   : > { %469 = vmatpush.bf16.msra.mxu1 %v676_v34  ;;  %v370_v3 = vperm.slane %v368_v2, 0  ;;  %v371_v4 = vperm.slane %v368_v2, 1  ;;  %v480_v8 = vld [vmem:[#allocation2] sm:$0xff] }
  0x45   : > { %457 = vmatpush.bf16.msra.mxu0 %v664_v39 }
  0x46   : > { %470 = vmatpush.bf16.msra.mxu1 %v668_v40 }
  0x49   : > { %458 = vmatpush.bf16.msra.mxu0 %v656_v45 }
  0x4a   : > { %471 = vmatpush.bf16.msra.mxu1 %v660_v46 }
  0x4d   : > { %459 = vmatpush.bf16.msra.mxu0 %v648_v51 }
  0x4e   : > { %472 = vmatpush.bf16.msra.mxu1 %v652_v52 }
  0x51   : > { %460 = vmatpush.bf16.msra.mxu0 %v640_v57 }
  0x52   : > { %473 = vmatpush.bf16.msra.mxu1 %v644_v58 }
  0x55   : > { %461 = vmatpush.bf16.msra.mxu0 %v632_v63 }
  0x56   : > { %474 = vmatpush.bf16.msra.mxu1 %v636_v0 }
  0x58   : > { %462 = vmatmul.bf16.vlgmr.msra.gmra.mxu0 %v351_v1 }
  0x59   : > { %475 = vmatmul.bf16.vlgmr.msra.gmra.mxu1 %v351_v1 }
  0xd5   : > { %v463_v5 = vpop.f32.mrf.mxu0 }
  0xd6   : > { %v464_v6 = vadd.f32 %v463_v5, %v370_v3  ;;  %v476_v7 = vpop.f32.mrf.mxu1 }
  0xd7   : > { %v477_v9 = vadd.f32 %v476_v7, %v371_v4 }
  0xd8   : > { %v482_v10 = vmax.f32 %v464_v6, 0.0 }
  0xd9   : > { %v483_v12 = vmax.f32 %v477_v9, 0.0 }
  0xda   : > { %v484_v13 = vadd.f32 %v482_v10, %v480_v8  ;;  %491 = sbr.rel (%p693_p13) target bundleno = 232 (0xe8), region = 78 }
  0xdb   : > { %v485_v14 = vadd.f32 %v483_v12, %v481_v11 }
  0xdc   : > { %486 = vst [vmem:[#allocation2] sm:$0xff] %v484_v13 }
  0xdd   : > { %487 = vst [vmem:[#allocation2 + $0x8] sm:$0xff] %v485_v14  ;;  %v465_v15 = vpop.f32.mrf.mxu0 }
  0xde   : > { %v478_v16 = vpop.f32.mrf.mxu1 }
  0xe3   : > { %v492_v17 = vld [vmem:[#allocation2] sm:$0xff] }
  0xe4   : > { %v493_v18 = vld [vmem:[#allocation2 + $0x8] sm:$0xff]  ;;  %v494_v19 = vmul.f32 0.020408163, %v492_v17 }
  0xe5   : > { %v495_v20 = vmul.f32 0.020408163, %v493_v18 }
  0xe6   : > { %496 = vst [vmem:[%s943_s15] sm:$0xff] %v494_v19 }
  0xe7   : > { %497 = vst [vmem:[%s943_s15 + $0x8] sm:$0xff] %v495_v20 }
  0xe8 PF: > { %s13_s18 = sadd.s32 1, %s824_s18   ;;  %s1014_s12 = smov %s804_s13 }
  0xe9   : > { %p10_p0 = scmp.ge.s32.totalorder %s13_s18, 394   ;;  %s1015_s13 = smov %s896_s23 }
  0xea   : > { %s1016_s14 = smov %s816_s16  ;;  %s1017_s15 = smov %s820_s17 }
  0xeb   : > { %s1018_s16 = smov %s1021_s19  ;;  %s1019_s17 = smov %s1025_s20 }
  0xec   :  { %12 = sbr.rel (!%p10_p0) target bundleno = 4 (0x4), region = 119 }

// kernel: faster_rcnn_forward.21
= control target key start
LH: loop header
LB: loop body
LE: loop exit
PB: predicated region body
PF: predicated region fallthrough
CT: control target
= control target key end

     0   :  { %vm10_vm0 = vcmask 171008   ;;  %s103_s0 = inlined_call_operand.vmem [shape: f32[8,21], index: 0, kind: input, shape index: {}]   ;;  %s104_s1 = inlined_call_operand.hbm [shape: f32[8,21], index: 1, kind: output, shape index: {}]  }
   0x1   :  { %v9_v0 = vld [vmem:[%s103_s0] sm:$0xff] }
   0x2   :  { %6 = vsyncpa [#allocation3], 0  ;;  %v11_v1 = vsel %vm10_vm0, %v9_v0, -inf  ;;  %s83_s0 = smov [#allocation2]   ;;  %s43_s11 = sshll.u32 %s104_s1, 4  ;;  %s44_s11 = int_to_ptr.hbm [resolvable:$true] %s43_s11 }
   0x3   :  { %12 = vmax.xlane.f32.xlu0 %v11_v1  ;;  %s41_s8 = sshll.u32 %s83_s0, 4  ;;  %s42_s8 = int_to_ptr.vmem [resolvable:$true] %s41_s8 }
  0x76   :  { %v13_v2 = vpop.xlane.xlu0 %12 }
  0x77   :  { %v14_v3 = vsub.f32 %v9_v0, %v13_v2 }
  0x79   :  { %v15_v4 = vmul.f32 1.442695, %v14_v3 }
  0x7b   :  { %53 = vpow2.f32 %v15_v4 }
  0x81   :  { %v54_v5 = vpop.eup %53 }
  0x82   :  { %v17_v6 = vsel %vm10_vm0, %v54_v5, 0.0 }
  0x83   :  { %18 = vadd.xlane.f32.xlu0 %v17_v6 }
  0xf6   :  { %v19_v7 = vpop.xlane.xlu0 %18 }
  0xf7   :  { %55 = vrcp.f32 %v19_v7  ;;  %v31_v11 = vand.u32 2147483648, %v19_v7  ;;  %v29_v13 = vand.u32 2147483647, %v19_v7  ;;  %vm25_vm2 = vweird.f32 %v19_v7 }
  0xf9   :  { %v32_v15 = vor.u32 1.1754944e-38, %v31_v11  ;;  %vm30_vm4 = vcmp.eq.f32.partialorder %v29_v13, 8.507059e+37 }
  0xfd   :  { %v56_v8 = vpop.eup %55 }
  0xfe   :  { %v21_v9 = vmul.f32 %v56_v8, %v19_v7  ;;  %vm26_vm1 = vweird.f32 %v56_v8 }
  0xff   :  { %vm27_vm3 = vmor %vm25_vm2, %vm26_vm1 }
 0x100   :  { %v22_v10 = vsub.f32 1.0, %v21_v9 }
 0x102   :  { %v23_v12 = vmul.f32 %v56_v8, %v22_v10 }
 0x104   :  { %v24_v14 = vadd.f32 %v56_v8, %v23_v12 }
 0x106   :  { %v28_v16 = vsel %vm27_vm3, %v56_v8, %v24_v14 }
 0x107   :  { %v33_v17 = vsel %vm30_vm4, %v32_v15, %v28_v16 }
 0x108   :  { %v34_v18 = vmul.f32 %v54_v5, %v33_v17 }
 0x10a   :  { %35 = vst.msk [vmem:[#allocation2] sm:$0xff] %vm10_vm0, %v34_v18 }
 0x10b   :  { %46 = dma.vmem_to_hbm [thread:$0]  %s42_s8, 128, %s44_s11, [#allocation3]  }
 0x10c   :  { %81 = dma.done.wait [#allocation3], 128  }
 0x10d   :  { %82 = vsyncadd [#allocation3], 4294967168 }
 0x10e   :  { %51 = vsyncpa [#allocation3], 1 }

// kernel: faster_rcnn_forward.20
= control target key start
LH: loop header
LB: loop body
LE: loop exit
PB: predicated region body
PF: predicated region fallthrough
CT: control target
= control target key end

     0   :  { %s952_s12 = smov 0   ;;  %s954_s13 = smov 0   ;;  %s1035_s0 = inlined_call_operand.vmem [shape: bf16[8,2048], index: 0, kind: input, shape index: {}]   ;;  %s1036_s1 = inlined_call_operand.vmem [shape: bf16[2048,128], index: 1, kind: input, shape index: {}]   ;;  %s1037_s2 = inlined_call_operand.vmem [shape: f32[1,128], index: 2, kind: input, shape index: {}]   ;;  %s1038_s3 = inlined_call_operand.vmem [shape: f32[8,128], index: 3, kind: output, shape index: {}]  }
   0x1   :  { %s956_s14 = smov 0  }
   0x2 LB: > { %s25_s15 = sadd.s32 1, %s925_s13  ;;  %p711_p0 = scmp.ge.s32.totalorder %s929_s14, 1  ;;  %s929_s14 = sphi %s956_s14, %s13_s14   ;;  %s925_s13 = sphi %s954_s13, %s1040_s13   ;;  %s921_s12 = sphi %s952_s12, %s1039_s12  }
   0x3   : > { %p26_p1 = scmp.ge.s32.totalorder %s25_s15, 4  ;;  %p189_p2 = scmp.lt.s32.totalorder %s929_s14, 5 }
   0x5   : > { %s1042_s15 = smov (%p26_p1, %s25_s15), 0  ;;  %p190_p3 = pnand %p711_p0, %p189_p2 }
   0x6   : > { %s712_s16 = sshll.u32 (!%p190_p3), %s921_s12, 2  ;;  %s714_s17 = sshll.u32 (!%p190_p3), %s921_s12, 6 }
   0x7   : > { %193 = sbr.rel (%p190_p3) target bundleno = 205 (0xcd), region = 32  ;;  %p233_p4 = scmp.lt.s32.totalorder (!%p190_p3), %s712_s16, 15 }
   0x8   : > { %p241_p5 = scmp.lt.s32.totalorder (!%p190_p3), %s714_s17, 255  ;;  %p716_p6 = scmp.ne.s32.totalorder (!%p190_p3), %s921_s12, 0 }
   0xc   : > { %s1044_s16 = smov (!%p233_p4, %s712_s16), 15  ;;  %s1046_s17 = smov (!%p241_p5, %s714_s17), 255 }
   0xd   : > { %s713_s18 = sshll.u32 %s1044_s16, 2  ;;  %s715_s22 = sshll.u32 %s1046_s17, 2 }
   0xe   : > { %s977_s21 = scalar_lea.vmem %s1035_s0, %s713_s18  ;;  %s982_s25 = scalar_lea.vmem %s1036_s1, %s715_s22 }
   0xf   : > { %262 = sbr.rel (%p716_p6) target bundleno = 22 (0x16), region = 36 }
  0x14   : > { %v931_v0 = vmov 0.0  }
  0x15   : > { %263 = vst [vmem:[#allocation2] sm:$0xff] %v931_v0 }
  0x16 PF: > { %v856_v1 = vld [vmem:[%s982_s25 + $0x38] sm:$0xff]  ;;  %v855_v5 = vld [vmem:[%s982_s25 + $0x30] sm:$0xff]  ;;  %v854_v9 = vld [vmem:[%s982_s25 + $0x28] sm:$0xff]  ;;  %p845_p7 = scmp.ne.s32.totalorder %s921_s12, 3 }
  0x17   : > { %v864_v2 = vld [vmem:[%s982_s25 + $0x78] sm:$0xff]  ;;  %537 = vmatpush.bf16.msra.mxu0 %v856_v1  ;;  %v863_v6 = vld [vmem:[%s982_s25 + $0x70] sm:$0xff]  ;;  %v862_v10 = vld [vmem:[%s982_s25 + $0x68] sm:$0xff] }
  0x18   : > { %v872_v3 = vld [vmem:[%s982_s25 + $0xb8] sm:$0xff]  ;;  %550 = vmatpush.bf16.msra.mxu1 %v864_v2  ;;  %v871_v7 = vld [vmem:[%s982_s25 + $0xb0] sm:$0xff]  ;;  %v870_v11 = vld [vmem:[%s982_s25 + $0xa8] sm:$0xff] }
  0x19   : > { %v880_v4 = vld [vmem:[%s982_s25 + $0xf8] sm:$0xff]  ;;  %563 = vmatpush.bf16.msra.mxu2 %v872_v3  ;;  %v879_v8 = vld [vmem:[%s982_s25 + $0xf0] sm:$0xff]  ;;  %v878_v12 = vld [vmem:[%s982_s25 + $0xe8] sm:$0xff] }
  0x1a   : > { %576 = vmatpush.bf16.msra.mxu3 %v880_v4  ;;  %v853_v13 = vld [vmem:[%s982_s25 + $0x20] sm:$0xff]  ;;  %v852_v17 = vld [vmem:[%s982_s25 + $0x18] sm:$0xff]  ;;  %v851_v21 = vld [vmem:[%s982_s25 + $0x10] sm:$0xff] }
  0x1b   : > { %538 = vmatpush.bf16.msra.mxu0 %v855_v5  ;;  %v861_v14 = vld [vmem:[%s982_s25 + $0x60] sm:$0xff]  ;;  %v860_v18 = vld [vmem:[%s982_s25 + $0x58] sm:$0xff]  ;;  %v859_v22 = vld [vmem:[%s982_s25 + $0x50] sm:$0xff] }
  0x1c   : > { %551 = vmatpush.bf16.msra.mxu1 %v863_v6  ;;  %v869_v15 = vld [vmem:[%s982_s25 + $0xa0] sm:$0xff]  ;;  %v868_v19 = vld [vmem:[%s982_s25 + $0x98] sm:$0xff]  ;;  %v867_v23 = vld [vmem:[%s982_s25 + $0x90] sm:$0xff] }
  0x1d   : > { %564 = vmatpush.bf16.msra.mxu2 %v871_v7  ;;  %v877_v16 = vld [vmem:[%s982_s25 + $0xe0] sm:$0xff]  ;;  %v876_v20 = vld [vmem:[%s982_s25 + $0xd8] sm:$0xff]  ;;  %v875_v24 = vld [vmem:[%s982_s25 + $0xd0] sm:$0xff] }
  0x1e   : > { %577 = vmatpush.bf16.msra.mxu3 %v879_v8  ;;  %v850_v25 = vld [vmem:[%s982_s25 + $0x8] sm:$0xff]  ;;  %v265_v27 = vld [vmem:[%s977_s21] sm:$0xff] }
  0x1f   : > { %539 = vmatpush.bf16.msra.mxu0 %v854_v9  ;;  %v858_v26 = vld [vmem:[%s982_s25 + $0x48] sm:$0xff]  ;;  %v333_v31 = vunpack.c.l.b16 %v265_v27  ;;  %v334_v32 = vunpack.c.h.b16 %v265_v27  ;;  %v849_v33 = vld [vmem:[%s982_s25] sm:$0xff] }
  0x20   : > { %552 = vmatpush.bf16.msra.mxu1 %v862_v10  ;;  %v866_v28 = vld [vmem:[%s982_s25 + $0x88] sm:$0xff]  ;;  %v857_v34 = vld [vmem:[%s982_s25 + $0x40] sm:$0xff] }
  0x21   : > { %565 = vmatpush.bf16.msra.mxu2 %v870_v11  ;;  %v874_v29 = vld [vmem:[%s982_s25 + $0xc8] sm:$0xff]  ;;  %v865_v37 = vld [vmem:[%s982_s25 + $0x80] sm:$0xff]  ;;  %v337_v39 = vpack.c.b16 %v333_v31, %v333_v31  ;;  %v338_v40 = vpack.c.b16 %v334_v32, %v334_v32 }
  0x22   : > { %578 = vmatpush.bf16.msra.mxu3 %v878_v12  ;;  %v266_v30 = vld [vmem:[%s977_s21 + $0x8] sm:$0xff]  ;;  %v873_v38 = vld [vmem:[%s982_s25 + $0xc0] sm:$0xff] }
  0x23   : > { %540 = vmatpush.bf16.msra.mxu0 %v853_v13  ;;  %v335_v35 = vunpack.c.l.b16 %v266_v30  ;;  %v336_v36 = vunpack.c.h.b16 %v266_v30  ;;  %v264_v51 = vld [vmem:[#allocation2] sm:$0xff] }
  0x24   : > { %553 = vmatpush.bf16.msra.mxu1 %v861_v14 }
  0x25   : > { %566 = vmatpush.bf16.msra.mxu2 %v869_v15  ;;  %v339_v41 = vpack.c.b16 %v335_v35, %v335_v35  ;;  %v340_v42 = vpack.c.b16 %v336_v36, %v336_v36 }
  0x26   : > { %579 = vmatpush.bf16.msra.mxu3 %v877_v16 }
  0x27   : > { %541 = vmatpush.bf16.msra.mxu0 %v852_v17 }
  0x28   : > { %554 = vmatpush.bf16.msra.mxu1 %v860_v18 }
  0x29   : > { %567 = vmatpush.bf16.msra.mxu2 %v868_v19 }
  0x2a   : > { %580 = vmatpush.bf16.msra.mxu3 %v876_v20 }
  0x2b   : > { %542 = vmatpush.bf16.msra.mxu0 %v851_v21 }
  0x2c   : > { %555 = vmatpush.bf16.msra.mxu1 %v859_v22 }
  0x2d   : > { %568 = vmatpush.bf16.msra.mxu2 %v867_v23 }
  0x2e   : > { %581 = vmatpush.bf16.msra.mxu3 %v875_v24 }
  0x2f   : > { %543 = vmatpush.bf16.msra.mxu0 %v850_v25 }
  0x30   : > { %556 = vmatpush.bf16.msra.mxu1 %v858_v26 }
  0x31   : > { %569 = vmatpush.bf16.msra.mxu2 %v866_v28 }
  0x32   : > { %582 = vmatpush.bf16.msra.mxu3 %v874_v29 }
  0x33   : > { %544 = vmatpush.bf16.msra.mxu0 %v849_v33 }
  0x34   : > { %557 = vmatpush.bf16.msra.mxu1 %v857_v34 }
  0x35   : > { %570 = vmatpush.bf16.msra.mxu2 %v865_v37 }
  0x36   : > { %583 = vmatpush.bf16.msra.mxu3 %v873_v38  ;;  %545 = vmatmul.bf16.vlgmr.msra.gmra.mxu0 %v337_v39 }
  0x37   : > { %558 = vmatmul.bf16.vlgmr.msra.gmra.mxu1 %v338_v40 }
  0x38   : > { %571 = vmatmul.bf16.vlgmr.msra.gmra.mxu2 %v339_v41 }
  0x39   : > { %584 = vmatmul.bf16.vlgmr.msra.gmra.mxu3 %v340_v42 }
  0xb3   : > { %v546_v43 = vpop.f32.mrf.mxu0 }
  0xb4   : > { %v559_v44 = vpop.f32.mrf.mxu1 }
  0xb5   : > { %v560_v45 = vadd.f32 %v559_v44, %v546_v43 }
  0xbb   : > { %v572_v46 = vpop.f32.mrf.mxu2  ;;  %v548_v49 = vpop.f32.mrf.mxu0 }
  0xbc   : > { %v585_v47 = vpop.f32.mrf.mxu3  ;;  %v573_v48 = vadd.f32 %v572_v46, %v560_v45  ;;  %v561_v50 = vpop.f32.mrf.mxu1 }
  0xbe   : > { %v586_v52 = vadd.f32 %v585_v47, %v573_v48 }
  0xc0   : > { %v589_v53 = vadd.f32 %v586_v52, %v264_v51  ;;  %594 = sbr.rel (%p845_p7) target bundleno = 205 (0xcd), region = 40 }
  0xc2   : > { %590 = vst [vmem:[#allocation2] sm:$0xff] %v589_v53 }
  0xc3   : > { %v574_v54 = vpop.f32.mrf.mxu2 }
  0xc4   : > { %v587_v55 = vpop.f32.mrf.mxu3 }
  0xc5   : > { %v906_v57 = vld [vmem:[%s1037_s2] ss:$0 sm:$0xff] }
  0xc9   : > { %v595_v56 = vld [vmem:[#allocation2] sm:$0xff] }
  0xca   : > { %v600_v58 = vadd.f32 %v906_v57, %v595_v56 }
  0xcc   : > { %601 = vst [vmem:[%s1038_s3] sm:$0xff] %v600_v58 }
  0xcd PF: > { %s13_s14 = sadd.s32 1, %s929_s14   ;;  %s1039_s12 = smov %s925_s13 }
  0xce   : > { %p10_p8 = scmp.ge.s32.totalorder %s13_s14, 6   ;;  %s1040_s13 = smov %s1042_s15 }
  0xd0   :  { %12 = sbr.rel (!%p10_p8) target bundleno = 2 (0x2), region = 76 }

</bundles_post_ra>
